<compile_context>
chip_gen: v7x
topology: tpu7x:2x2x1
jax: 0.10.0
libtpu: 0.0.40
codegen_flags: <defaults>
</compile_context>

<pallas_src>
import numpy as np
import jax
import jax.numpy as jnp
from jax import lax
from jax.experimental import pallas as pl
from jax.experimental.pallas import tpu as pltpu

# VGG-19 config 'E', channel widths / 8, truncated before the final 'M' (that last pool
# is the module's explicit self.max_pool).
CFG = [8, 8, 'M', 16, 16, 'M', 32, 32, 32, 32, 'M', 64, 64, 64, 64, 'M',
       64, 64, 64, 64]
FC_HIDDEN = 128
NUM_CLASSES = 10
IMG = 32
IN_CH = 3
IN_CH_PAD = 8          # first conv's Cin zero-padded 3 -> 8 (sublane-aligned tap stacking)


# ---------------------------------------------------------------------------
# Static network plan
# ---------------------------------------------------------------------------
def _plan():
    ops = []
    h, c = IMG, IN_CH_PAD
    for v in CFG:
        if v == 'M':
            ops.append(('pool', h, h, c))
            h //= 2
        else:
            ops.append(('conv', h, h, c, v))
            c = v
    ops.append(('pool', h, h, c))            # module's explicit final self.max_pool
    return ops, c


OPS, FEAT_CH = _plan()
STAGE_SIZES = [op[1] for op in OPS if op[0] == 'pool']       # [32, 16, 8, 4, 2]
N_STAGE = len(STAGE_SIZES)


def _fuse_plan():
    """Entries: (h, w, cin, cout, fuse_pool, stage).  Every pool in VGG follows a conv,
    so the 2x2 max-pool is fused into that conv's f32 epilogue."""
    fused, stage, i = [], 0, 0
    while i < len(OPS):
        op = OPS[i]
        assert op[0] == 'conv'
        fuse = (i + 1 < len(OPS)) and OPS[i + 1][0] == 'pool'
        fused.append((op[1], op[2], op[3], op[4], fuse, stage))
        if fuse:
            i += 2
            stage += 1
        else:
            i += 1
    return fused


FUSED_CONVS = _fuse_plan()
N_CONV = len(FUSED_CONVS)                                    # 16


# ---------------------------------------------------------------------------
# Tiny precomputed layout constants
# ---------------------------------------------------------------------------
def init_consts():
    """Per stage: f32 gap-column mask (1, L) and bf16 column-select (W-1, W/2+2)."""
    masks, colsels = [], []
    for h in STAGE_SIZES:
        w = h
        wp = w + 2
        L = (h - 1) * wp + w
        cols = np.arange(L) % wp
        masks.append(jnp.asarray((cols < w).astype(np.float32)[None, :]))   # cols < W (bugfix)
        wo = w // 2
        sel = np.zeros((w - 1, wo + 2), np.float32)
        for c in range(wo):
            sel[2 * c, c] = 1.0          # even anchor 2c -> output column c (gaps stay 0)
        colsels.append(jnp.asarray(sel, jnp.bfloat16))
    return {"masks": masks, "colsels": colsels}


# ---------------------------------------------------------------------------
# In-kernel building block: 3x3 conv (+ ReLU) with optional fused 2x2/2 max-pool
# ---------------------------------------------------------------------------
def _conv_block(x, w_ref, b_ref, mask_ref, colsel_ref, h, w, cin, cout, fuse_pool):
    """x: (cin, L) bf16 offset-flat (row stride W+2, 2 zero gap lanes per row, no border
    rows).  Returns bf16 offset-flat output of the conv (or of the fused pool)."""
    wp = w + 2
    L = (h - 1) * wp + w
    dt = x.dtype

    # Implicit im2col: stack the 9 tap views on the sublane axis -> (9*cin, L).
    # Out-of-range tap positions are the image border (zero); gap lanes are already zero.
    taps = []
    for dh in range(3):
        for dw in range(3):
            o = (dh - 1) * wp + (dw - 1)
            if o == 0:
                t = x
            elif o > 0:
                t = jnp.concatenate([x[:, o:], jnp.zeros((cin, o), dt)], axis=1)
            else:
                t = jnp.concatenate([jnp.zeros((cin, -o), dt), x[:, :o]], axis=1)
            taps.append(t)
    rhs = jnp.concatenate(taps, axis=0)                               # (9*cin, L) bf16

    acc = jnp.dot(w_ref[...], rhs, preferred_element_type=jnp.float32)   # ONE MXU dot
    acc = jnp.maximum(acc + b_ref[...], 0.0)                          # bias + ReLU (f32)

    if not fuse_pool:
        # Zero the gap lanes (they must read as padding in the next conv's taps).
        return (acc * mask_ref[...]).astype(jnp.bfloat16)

    # Fused 2x2 stride-2 max-pool, computed on the f32 accumulator.
    n = (h - 2) * wp + w - 1
    z = jnp.maximum(jnp.maximum(acc[:, 0:n], acc[:, 1:1 + n]),
                    jnp.maximum(acc[:, wp:wp + n], acc[:, wp + 1:wp + 1 + n]))
    ho, wo = h // 2, w // 2
    if ho == 1 and wo == 1:                                           # final 2x2 -> 1x1 pool
        return z.astype(jnp.bfloat16)                                 # (cout, 1)

    # Per output row: pick even anchors and re-embed into next offset-flat row (W/2+2).
    zb = z.astype(jnp.bfloat16)
    csel = colsel_ref[...]                                            # (w-1, wo+2) bf16
    wpo = wo + 2
    rows = [jnp.dot(zb[:, 2 * r * wp:2 * r * wp + (w - 1)], csel,
                    preferred_element_type=jnp.float32) for r in range(ho)]
    out = jnp.concatenate(rows, axis=1)[:, :(ho - 1) * wpo + wo]
    return out.astype(jnp.bfloat16)


# ---------------------------------------------------------------------------
# The single fused kernel
# ---------------------------------------------------------------------------
def _vgg_kernel(*refs):
    idx = 0

    def take(n):
        nonlocal idx
        out = refs[idx:idx + n]
        idx += n
        return out

    (x_ref,) = take(1)
    mask_refs = take(N_STAGE)
    sel_refs = take(N_STAGE)
    conv_refs = take(2 * N_CONV)
    (w1, b1, w2, b2, w3, b3) = take(6)
    (o_ref,) = take(1)

    x = x_ref[...]                                            # (8, 1086) bf16 offset-flat
    for ci, (h, w, cin, cout, fuse_pool, stage) in enumerate(FUSED_CONVS):
        x = _conv_block(x, conv_refs[2 * ci], conv_refs[2 * ci + 1],
                        mask_refs[stage], sel_refs[stage], h, w, cin, cout, fuse_pool)

    # x.view((1, -1)): final spatial is 1x1, so x is the (FEAT_CH, 1) feature column.
    # Row-form (lane-dense) classifier: contract the channel axis directly (dim 0 of x
    # against dim 0 of the (Cin, Cout) weight) -> activations are (1, 128) / (1, 10).
    h1 = lax.dot_general(x, w1[...], (((0,), (0,)), ((), ())),
                         preferred_element_type=jnp.float32) + b1[...]
    h1 = jnp.maximum(h1, 0.0).astype(jnp.bfloat16)
    # TODO(synk): nn.Dropout treated as identity (inference semantics; no RNG state).
    h2 = jnp.maximum(jnp.dot(h1, w2[...], preferred_element_type=jnp.float32)
                     + b2[...], 0.0).astype(jnp.bfloat16)
    o_ref[...] = jnp.dot(h2, w3[...], preferred_element_type=jnp.float32) + b3[...]


# ---------------------------------------------------------------------------
# Parameters (deterministic, in-script) and forward pass
# ---------------------------------------------------------------------------
def init_params(key):
    convs = []
    cin, cin_k = IN_CH, IN_CH_PAD
    for v in CFG:
        if v == 'M':
            continue
        key, kw, kb = jax.random.split(key, 3)
        w = jax.random.normal(kw, (3, 3, cin, v), jnp.float32) * np.sqrt(2.0 / (9 * cin))
        if cin_k != cin:                                      # zero-pad first conv's Cin 3 -> 8
            w = jnp.pad(w, ((0, 0), (0, 0), (0, cin_k - cin), (0, 0)))
        # (kh, kw, Cin, Cout) -> (Cout, 9*Cin); column index = (kh*3+kw)*Cin + cin, matching
        # the in-kernel sublane-stacked tap order.
        w = jnp.transpose(w, (3, 0, 1, 2)).reshape(v, 9 * cin_k).astype(jnp.bfloat16)
        b = jax.random.normal(kb, (v, 1), jnp.float32) * 0.01
        convs.append((w, b))
        cin = cin_k = v
    fcs = []
    for fi, fo in [(FEAT_CH, FC_HIDDEN), (FC_HIDDEN, FC_HIDDEN), (FC_HIDDEN, NUM_CLASSES)]:
        key, kw, kb = jax.random.split(key, 3)
        w = (jax.random.normal(kw, (fi, fo), jnp.float32) * np.sqrt(2.0 / fi)).astype(jnp.bfloat16)
        b = jax.random.normal(kb, (1, fo), jnp.float32) * 0.01
        fcs.append((w, b))
    return {"convs": convs, "fc": fcs}


def vgg_forward(params, consts, x_nchw):
    """x_nchw: (1, 3, 32, 32) f32 NCHW (PyTorch layout) -> (1, NUM_CLASSES) f32."""
    assert x_nchw.shape == (1, IN_CH, IMG, IMG), "forward assumes batch=1 (x.view((1, -1)))"
    wp0 = IMG + 2
    L0 = (IMG - 1) * wp0 + IMG
    # One-time layout plumbing on the 12 KB input: CHW -> offset-flat (row stride W+2,
    # 2 zero gap lanes after each row, no border rows); channels zero-padded 3 -> 8.
    x = x_nchw[0].astype(jnp.float32)
    x = jnp.pad(x, ((0, IN_CH_PAD - IN_CH), (0, 0), (0, 2)))          # (8, 32, 34)
    x = x.reshape(IN_CH_PAD, IMG * wp0)[:, :L0].astype(jnp.bfloat16)  # (8, 1086)

    inputs = [x] + list(consts["masks"]) + list(consts["colsels"])
    for wgt, bias in params["convs"]:
        inputs += [wgt, bias]
    for wgt, bias in params["fc"]:
        inputs += [wgt, bias]

    vmem_spec = pl.BlockSpec(memory_space=pltpu.MemorySpace.VMEM)      # whole array in VMEM
    out = pl.pallas_call(
        _vgg_kernel,
        out_shape=jax.ShapeDtypeStruct((1, NUM_CLASSES), jnp.float32),
        in_specs=[vmem_spec] * len(inputs),
        out_specs=vmem_spec,
    )(*inputs)
    return out                                                        # (1, NUM_CLASSES)


if __name__ == "__main__":
    key = jax.random.PRNGKey(0)
    k_x, k_p = jax.random.split(key)
    x = jax.random.normal(k_x, (1, IN_CH, IMG, IMG), jnp.float32)     # NCHW, batch=1
    params = init_params(k_p)
    consts = init_consts()

    fwd = jax.jit(vgg_forward)
    out = jax.block_until_ready(fwd(params, consts, x))
    assert out.shape == (1, NUM_CLASSES), out.shape
    assert bool(jnp.all(jnp.isfinite(out)))
    print("KERNEL_OK")
</pallas_src>

<mosaic_0001>
module attributes {stable_mosaic.version = 11 : i64} {
  func.func @_vgg_kernel(%arg0: memref<8x1086xbf16, #tpu.memory_space<vmem>>, %arg1: memref<1x1086xf32, #tpu.memory_space<vmem>>, %arg2: memref<1x286xf32, #tpu.memory_space<vmem>>, %arg3: memref<1x78xf32, #tpu.memory_space<vmem>>, %arg4: memref<1x22xf32, #tpu.memory_space<vmem>>, %arg5: memref<1x6xf32, #tpu.memory_space<vmem>>, %arg6: memref<31x18xbf16, #tpu.memory_space<vmem>>, %arg7: memref<15x10xbf16, #tpu.memory_space<vmem>>, %arg8: memref<7x6xbf16, #tpu.memory_space<vmem>>, %arg9: memref<3x4xbf16, #tpu.memory_space<vmem>>, %arg10: memref<1x3xbf16, #tpu.memory_space<vmem>>, %arg11: memref<8x72xbf16, #tpu.memory_space<vmem>>, %arg12: memref<8x1xf32, #tpu.memory_space<vmem>>, %arg13: memref<8x72xbf16, #tpu.memory_space<vmem>>, %arg14: memref<8x1xf32, #tpu.memory_space<vmem>>, %arg15: memref<16x72xbf16, #tpu.memory_space<vmem>>, %arg16: memref<16x1xf32, #tpu.memory_space<vmem>>, %arg17: memref<16x144xbf16, #tpu.memory_space<vmem>>, %arg18: memref<16x1xf32, #tpu.memory_space<vmem>>, %arg19: memref<32x144xbf16, #tpu.memory_space<vmem>>, %arg20: memref<32x1xf32, #tpu.memory_space<vmem>>, %arg21: memref<32x288xbf16, #tpu.memory_space<vmem>>, %arg22: memref<32x1xf32, #tpu.memory_space<vmem>>, %arg23: memref<32x288xbf16, #tpu.memory_space<vmem>>, %arg24: memref<32x1xf32, #tpu.memory_space<vmem>>, %arg25: memref<32x288xbf16, #tpu.memory_space<vmem>>, %arg26: memref<32x1xf32, #tpu.memory_space<vmem>>, %arg27: memref<64x288xbf16, #tpu.memory_space<vmem>>, %arg28: memref<64x1xf32, #tpu.memory_space<vmem>>, %arg29: memref<64x576xbf16, #tpu.memory_space<vmem>>, %arg30: memref<64x1xf32, #tpu.memory_space<vmem>>, %arg31: memref<64x576xbf16, #tpu.memory_space<vmem>>, %arg32: memref<64x1xf32, #tpu.memory_space<vmem>>, %arg33: memref<64x576xbf16, #tpu.memory_space<vmem>>, %arg34: memref<64x1xf32, #tpu.memory_space<vmem>>, %arg35: memref<64x576xbf16, #tpu.memory_space<vmem>>, %arg36: memref<64x1xf32, #tpu.memory_space<vmem>>, %arg37: memref<64x576xbf16, #tpu.memory_space<vmem>>, %arg38: memref<64x1xf32, #tpu.memory_space<vmem>>, %arg39: memref<64x576xbf16, #tpu.memory_space<vmem>>, %arg40: memref<64x1xf32, #tpu.memory_space<vmem>>, %arg41: memref<64x576xbf16, #tpu.memory_space<vmem>>, %arg42: memref<64x1xf32, #tpu.memory_space<vmem>>, %arg43: memref<64x128xbf16, #tpu.memory_space<vmem>>, %arg44: memref<1x128xf32, #tpu.memory_space<vmem>>, %arg45: memref<128x128xbf16, #tpu.memory_space<vmem>>, %arg46: memref<1x128xf32, #tpu.memory_space<vmem>>, %arg47: memref<128x10xbf16, #tpu.memory_space<vmem>>, %arg48: memref<1x10xf32, #tpu.memory_space<vmem>>, %arg49: memref<1x10xf32, #tpu.memory_space<vmem>>) attributes {dimension_semantics = [], scalar_prefetch = 0 : i64, scratch_operands = 0 : i64, tpu.core_type = #tpu.core_type<tc>} {
    %c0 = arith.constant 0 : index
    %c0_0 = arith.constant 0 : index
    %0 = vector.load %arg0[%c0, %c0_0] : memref<8x1086xbf16, #tpu.memory_space<vmem>>, vector<8x1086xbf16>
    %cst = arith.constant 0.000000e+00 : bf16
    %1 = vector.broadcast %cst : bf16 to vector<8x35xbf16>
    %2 = vector.extract_strided_slice %0 {offsets = [0, 0], sizes = [8, 1051], strides = [1, 1]} : vector<8x1086xbf16> to vector<8x1051xbf16>
    %3 = tpu.concatenate %1, %2 in 1 : vector<8x35xbf16>, vector<8x1051xbf16> -> vector<8x1086xbf16>
    %cst_1 = arith.constant 0.000000e+00 : bf16
    %4 = vector.broadcast %cst_1 : bf16 to vector<8x34xbf16>
    %5 = vector.extract_strided_slice %0 {offsets = [0, 0], sizes = [8, 1052], strides = [1, 1]} : vector<8x1086xbf16> to vector<8x1052xbf16>
    %6 = tpu.concatenate %4, %5 in 1 : vector<8x34xbf16>, vector<8x1052xbf16> -> vector<8x1086xbf16>
    %cst_2 = arith.constant 0.000000e+00 : bf16
    %7 = vector.broadcast %cst_2 : bf16 to vector<8x33xbf16>
    %8 = vector.extract_strided_slice %0 {offsets = [0, 0], sizes = [8, 1053], strides = [1, 1]} : vector<8x1086xbf16> to vector<8x1053xbf16>
    %9 = tpu.concatenate %7, %8 in 1 : vector<8x33xbf16>, vector<8x1053xbf16> -> vector<8x1086xbf16>
    %cst_3 = arith.constant 0.000000e+00 : bf16
    %10 = vector.broadcast %cst_3 : bf16 to vector<8x1xbf16>
    %11 = vector.extract_strided_slice %0 {offsets = [0, 0], sizes = [8, 1085], strides = [1, 1]} : vector<8x1086xbf16> to vector<8x1085xbf16>
    %12 = tpu.concatenate %10, %11 in 1 : vector<8x1xbf16>, vector<8x1085xbf16> -> vector<8x1086xbf16>
    %13 = vector.extract_strided_slice %0 {offsets = [0, 1], sizes = [8, 1085], strides = [1, 1]} : vector<8x1086xbf16> to vector<8x1085xbf16>
    %cst_4 = arith.constant 0.000000e+00 : bf16
    %14 = vector.broadcast %cst_4 : bf16 to vector<8x1xbf16>
    %15 = tpu.concatenate %13, %14 in 1 : vector<8x1085xbf16>, vector<8x1xbf16> -> vector<8x1086xbf16>
    %16 = vector.extract_strided_slice %0 {offsets = [0, 33], sizes = [8, 1053], strides = [1, 1]} : vector<8x1086xbf16> to vector<8x1053xbf16>
    %cst_5 = arith.constant 0.000000e+00 : bf16
    %17 = vector.broadcast %cst_5 : bf16 to vector<8x33xbf16>
    %18 = tpu.concatenate %16, %17 in 1 : vector<8x1053xbf16>, vector<8x33xbf16> -> vector<8x1086xbf16>
    %19 = vector.extract_strided_slice %0 {offsets = [0, 34], sizes = [8, 1052], strides = [1, 1]} : vector<8x1086xbf16> to vector<8x1052xbf16>
    %cst_6 = arith.constant 0.000000e+00 : bf16
    %20 = vector.broadcast %cst_6 : bf16 to vector<8x34xbf16>
    %21 = tpu.concatenate %19, %20 in 1 : vector<8x1052xbf16>, vector<8x34xbf16> -> vector<8x1086xbf16>
    %22 = vector.extract_strided_slice %0 {offsets = [0, 35], sizes = [8, 1051], strides = [1, 1]} : vector<8x1086xbf16> to vector<8x1051xbf16>
    %cst_7 = arith.constant 0.000000e+00 : bf16
    %23 = vector.broadcast %cst_7 : bf16 to vector<8x35xbf16>
    %24 = tpu.concatenate %22, %23 in 1 : vector<8x1051xbf16>, vector<8x35xbf16> -> vector<8x1086xbf16>
    %25 = tpu.concatenate %3, %6, %9, %12, %0, %15, %18, %21, %24 in 0 : vector<8x1086xbf16>, vector<8x1086xbf16>, vector<8x1086xbf16>, vector<8x1086xbf16>, vector<8x1086xbf16>, vector<8x1086xbf16>, vector<8x1086xbf16>, vector<8x1086xbf16>, vector<8x1086xbf16> -> vector<72x1086xbf16>
    %c0_8 = arith.constant 0 : index
    %c0_9 = arith.constant 0 : index
    %26 = vector.load %arg11[%c0_8, %c0_9] : memref<8x72xbf16, #tpu.memory_space<vmem>>, vector<8x72xbf16>
    %cst_10 = arith.constant dense<0.000000e+00> : vector<8x1086xf32>
    %27 = tpu.matmul %26, %25, %cst_10 {dimension_numbers = #tpu.dot_dimension_numbers<[1], [0], [0], [1], [0, 0, 1, 1], [], []>} : vector<8x72xbf16>, vector<72x1086xbf16>, vector<8x1086xf32> -> vector<8x1086xf32>
    %c0_11 = arith.constant 0 : index
    %c0_12 = arith.constant 0 : index
    %28 = vector.load %arg12[%c0_11, %c0_12] : memref<8x1xf32, #tpu.memory_space<vmem>>, vector<8x1xf32>
    %29 = vector.broadcast %28 : vector<8x1xf32> to vector<8x1086xf32>
    %30 = arith.addf %27, %29 : vector<8x1086xf32>
    %cst_13 = arith.constant 0.000000e+00 : f32
    %31 = vector.broadcast %cst_13 : f32 to vector<8x1086xf32>
    %32 = arith.maximumf %30, %31 : vector<8x1086xf32>
    %c0_14 = arith.constant 0 : index
    %c0_15 = arith.constant 0 : index
    %33 = vector.load %arg1[%c0_14, %c0_15] : memref<1x1086xf32, #tpu.memory_space<vmem>>, vector<1x1086xf32>
    %34 = vector.broadcast %33 : vector<1x1086xf32> to vector<8x1086xf32>
    %35 = arith.mulf %32, %34 : vector<8x1086xf32>
    %36 = arith.truncf %35 : vector<8x1086xf32> to vector<8x1086xbf16>
    %cst_16 = arith.constant 0.000000e+00 : bf16
    %37 = vector.broadcast %cst_16 : bf16 to vector<8x35xbf16>
    %38 = vector.extract_strided_slice %36 {offsets = [0, 0], sizes = [8, 1051], strides = [1, 1]} : vector<8x1086xbf16> to vector<8x1051xbf16>
    %39 = tpu.concatenate %37, %38 in 1 : vector<8x35xbf16>, vector<8x1051xbf16> -> vector<8x1086xbf16>
    %cst_17 = arith.constant 0.000000e+00 : bf16
    %40 = vector.broadcast %cst_17 : bf16 to vector<8x34xbf16>
    %41 = vector.extract_strided_slice %36 {offsets = [0, 0], sizes = [8, 1052], strides = [1, 1]} : vector<8x1086xbf16> to vector<8x1052xbf16>
    %42 = tpu.concatenate %40, %41 in 1 : vector<8x34xbf16>, vector<8x1052xbf16> -> vector<8x1086xbf16>
    %cst_18 = arith.constant 0.000000e+00 : bf16
    %43 = vector.broadcast %cst_18 : bf16 to vector<8x33xbf16>
    %44 = vector.extract_strided_slice %36 {offsets = [0, 0], sizes = [8, 1053], strides = [1, 1]} : vector<8x1086xbf16> to vector<8x1053xbf16>
    %45 = tpu.concatenate %43, %44 in 1 : vector<8x33xbf16>, vector<8x1053xbf16> -> vector<8x1086xbf16>
    %cst_19 = arith.constant 0.000000e+00 : bf16
    %46 = vector.broadcast %cst_19 : bf16 to vector<8x1xbf16>
    %47 = vector.extract_strided_slice %36 {offsets = [0, 0], sizes = [8, 1085], strides = [1, 1]} : vector<8x1086xbf16> to vector<8x1085xbf16>
    %48 = tpu.concatenate %46, %47 in 1 : vector<8x1xbf16>, vector<8x1085xbf16> -> vector<8x1086xbf16>
    %49 = vector.extract_strided_slice %36 {offsets = [0, 1], sizes = [8, 1085], strides = [1, 1]} : vector<8x1086xbf16> to vector<8x1085xbf16>
    %cst_20 = arith.constant 0.000000e+00 : bf16
    %50 = vector.broadcast %cst_20 : bf16 to vector<8x1xbf16>
    %51 = tpu.concatenate %49, %50 in 1 : vector<8x1085xbf16>, vector<8x1xbf16> -> vector<8x1086xbf16>
    %52 = vector.extract_strided_slice %36 {offsets = [0, 33], sizes = [8, 1053], strides = [1, 1]} : vector<8x1086xbf16> to vector<8x1053xbf16>
    %cst_21 = arith.constant 0.000000e+00 : bf16
    %53 = vector.broadcast %cst_21 : bf16 to vector<8x33xbf16>
    %54 = tpu.concatenate %52, %53 in 1 : vector<8x1053xbf16>, vector<8x33xbf16> -> vector<8x1086xbf16>
    %55 = vector.extract_strided_slice %36 {offsets = [0, 34], sizes = [8, 1052], strides = [1, 1]} : vector<8x1086xbf16> to vector<8x1052xbf16>
    %cst_22 = arith.constant 0.000000e+00 : bf16
    %56 = vector.broadcast %cst_22 : bf16 to vector<8x34xbf16>
    %57 = tpu.concatenate %55, %56 in 1 : vector<8x1052xbf16>, vector<8x34xbf16> -> vector<8x1086xbf16>
    %58 = vector.extract_strided_slice %36 {offsets = [0, 35], sizes = [8, 1051], strides = [1, 1]} : vector<8x1086xbf16> to vector<8x1051xbf16>
    %cst_23 = arith.constant 0.000000e+00 : bf16
    %59 = vector.broadcast %cst_23 : bf16 to vector<8x35xbf16>
    %60 = tpu.concatenate %58, %59 in 1 : vector<8x1051xbf16>, vector<8x35xbf16> -> vector<8x1086xbf16>
    %61 = tpu.concatenate %39, %42, %45, %48, %36, %51, %54, %57, %60 in 0 : vector<8x1086xbf16>, vector<8x1086xbf16>, vector<8x1086xbf16>, vector<8x1086xbf16>, vector<8x1086xbf16>, vector<8x1086xbf16>, vector<8x1086xbf16>, vector<8x1086xbf16>, vector<8x1086xbf16> -> vector<72x1086xbf16>
    %c0_24 = arith.constant 0 : index
    %c0_25 = arith.constant 0 : index
    %62 = vector.load %arg13[%c0_24, %c0_25] : memref<8x72xbf16, #tpu.memory_space<vmem>>, vector<8x72xbf16>
    %cst_26 = arith.constant dense<0.000000e+00> : vector<8x1086xf32>
    %63 = tpu.matmul %62, %61, %cst_26 {dimension_numbers = #tpu.dot_dimension_numbers<[1], [0], [0], [1], [0, 0, 1, 1], [], []>} : vector<8x72xbf16>, vector<72x1086xbf16>, vector<8x1086xf32> -> vector<8x1086xf32>
    %c0_27 = arith.constant 0 : index
    %c0_28 = arith.constant 0 : index
    %64 = vector.load %arg14[%c0_27, %c0_28] : memref<8x1xf32, #tpu.memory_space<vmem>>, vector<8x1xf32>
    %65 = vector.broadcast %64 : vector<8x1xf32> to vector<8x1086xf32>
    %66 = arith.addf %63, %65 : vector<8x1086xf32>
    %cst_29 = arith.constant 0.000000e+00 : f32
    %67 = vector.broadcast %cst_29 : f32 to vector<8x1086xf32>
    %68 = arith.maximumf %66, %67 : vector<8x1086xf32>
    %69 = vector.extract_strided_slice %68 {offsets = [0, 0], sizes = [8, 1051], strides = [1, 1]} : vector<8x1086xf32> to vector<8x1051xf32>
    %70 = vector.extract_strided_slice %68 {offsets = [0, 1], sizes = [8, 1051], strides = [1, 1]} : vector<8x1086xf32> to vector<8x1051xf32>
    %71 = arith.maximumf %69, %70 : vector<8x1051xf32>
    %72 = vector.extract_strided_slice %68 {offsets = [0, 34], sizes = [8, 1051], strides = [1, 1]} : vector<8x1086xf32> to vector<8x1051xf32>
    %73 = vector.extract_strided_slice %68 {offsets = [0, 35], sizes = [8, 1051], strides = [1, 1]} : vector<8x1086xf32> to vector<8x1051xf32>
    %74 = arith.maximumf %72, %73 : vector<8x1051xf32>
    %75 = arith.maximumf %71, %74 : vector<8x1051xf32>
    %76 = arith.truncf %75 : vector<8x1051xf32> to vector<8x1051xbf16>
    %c0_30 = arith.constant 0 : index
    %c0_31 = arith.constant 0 : index
    %77 = vector.load %arg6[%c0_30, %c0_31] : memref<31x18xbf16, #tpu.memory_space<vmem>>, vector<31x18xbf16>
    %78 = vector.extract_strided_slice %76 {offsets = [0, 0], sizes = [8, 31], strides = [1, 1]} : vector<8x1051xbf16> to vector<8x31xbf16>
    %cst_32 = arith.constant dense<0.000000e+00> : vector<8x18xf32>
    %79 = tpu.matmul %78, %77, %cst_32 {dimension_numbers = #tpu.dot_dimension_numbers<[1], [0], [0], [1], [0, 0, 1, 1], [], []>} : vector<8x31xbf16>, vector<31x18xbf16>, vector<8x18xf32> -> vector<8x18xf32>
    %80 = vector.extract_strided_slice %76 {offsets = [0, 68], sizes = [8, 31], strides = [1, 1]} : vector<8x1051xbf16> to vector<8x31xbf16>
    %cst_33 = arith.constant dense<0.000000e+00> : vector<8x18xf32>
    %81 = tpu.matmul %80, %77, %cst_33 {dimension_numbers = #tpu.dot_dimension_numbers<[1], [0], [0], [1], [0, 0, 1, 1], [], []>} : vector<8x31xbf16>, vector<31x18xbf16>, vector<8x18xf32> -> vector<8x18xf32>
    %82 = vector.extract_strided_slice %76 {offsets = [0, 136], sizes = [8, 31], strides = [1, 1]} : vector<8x1051xbf16> to vector<8x31xbf16>
    %cst_34 = arith.constant dense<0.000000e+00> : vector<8x18xf32>
    %83 = tpu.matmul %82, %77, %cst_34 {dimension_numbers = #tpu.dot_dimension_numbers<[1], [0], [0], [1], [0, 0, 1, 1], [], []>} : vector<8x31xbf16>, vector<31x18xbf16>, vector<8x18xf32> -> vector<8x18xf32>
    %84 = vector.extract_strided_slice %76 {offsets = [0, 204], sizes = [8, 31], strides = [1, 1]} : vector<8x1051xbf16> to vector<8x31xbf16>
    %cst_35 = arith.constant dense<0.000000e+00> : vector<8x18xf32>
    %85 = tpu.matmul %84, %77, %cst_35 {dimension_numbers = #tpu.dot_dimension_numbers<[1], [0], [0], [1], [0, 0, 1, 1], [], []>} : vector<8x31xbf16>, vector<31x18xbf16>, vector<8x18xf32> -> vector<8x18xf32>
    %86 = vector.extract_strided_slice %76 {offsets = [0, 272], sizes = [8, 31], strides = [1, 1]} : vector<8x1051xbf16> to vector<8x31xbf16>
    %cst_36 = arith.constant dense<0.000000e+00> : vector<8x18xf32>
    %87 = tpu.matmul %86, %77, %cst_36 {dimension_numbers = #tpu.dot_dimension_numbers<[1], [0], [0], [1], [0, 0, 1, 1], [], []>} : vector<8x31xbf16>, vector<31x18xbf16>, vector<8x18xf32> -> vector<8x18xf32>
    %88 = vector.extract_strided_slice %76 {offsets = [0, 340], sizes = [8, 31], strides = [1, 1]} : vector<8x1051xbf16> to vector<8x31xbf16>
    %cst_37 = arith.constant dense<0.000000e+00> : vector<8x18xf32>
    %89 = tpu.matmul %88, %77, %cst_37 {dimension_numbers = #tpu.dot_dimension_numbers<[1], [0], [0], [1], [0, 0, 1, 1], [], []>} : vector<8x31xbf16>, vector<31x18xbf16>, vector<8x18xf32> -> vector<8x18xf32>
    %90 = vector.extract_strided_slice %76 {offsets = [0, 408], sizes = [8, 31], strides = [1, 1]} : vector<8x1051xbf16> to vector<8x31xbf16>
    %cst_38 = arith.constant dense<0.000000e+00> : vector<8x18xf32>
    %91 = tpu.matmul %90, %77, %cst_38 {dimension_numbers = #tpu.dot_dimension_numbers<[1], [0], [0], [1], [0, 0, 1, 1], [], []>} : vector<8x31xbf16>, vector<31x18xbf16>, vector<8x18xf32> -> vector<8x18xf32>
    %92 = vector.extract_strided_slice %76 {offsets = [0, 476], sizes = [8, 31], strides = [1, 1]} : vector<8x1051xbf16> to vector<8x31xbf16>
    %cst_39 = arith.constant dense<0.000000e+00> : vector<8x18xf32>
    %93 = tpu.matmul %92, %77, %cst_39 {dimension_numbers = #tpu.dot_dimension_numbers<[1], [0], [0], [1], [0, 0, 1, 1], [], []>} : vector<8x31xbf16>, vector<31x18xbf16>, vector<8x18xf32> -> vector<8x18xf32>
    %94 = vector.extract_strided_slice %76 {offsets = [0, 544], sizes = [8, 31], strides = [1, 1]} : vector<8x1051xbf16> to vector<8x31xbf16>
    %cst_40 = arith.constant dense<0.000000e+00> : vector<8x18xf32>
    %95 = tpu.matmul %94, %77, %cst_40 {dimension_numbers = #tpu.dot_dimension_numbers<[1], [0], [0], [1], [0, 0, 1, 1], [], []>} : vector<8x31xbf16>, vector<31x18xbf16>, vector<8x18xf32> -> vector<8x18xf32>
    %96 = vector.extract_strided_slice %76 {offsets = [0, 612], sizes = [8, 31], strides = [1, 1]} : vector<8x1051xbf16> to vector<8x31xbf16>
    %cst_41 = arith.constant dense<0.000000e+00> : vector<8x18xf32>
    %97 = tpu.matmul %96, %77, %cst_41 {dimension_numbers = #tpu.dot_dimension_numbers<[1], [0], [0], [1], [0, 0, 1, 1], [], []>} : vector<8x31xbf16>, vector<31x18xbf16>, vector<8x18xf32> -> vector<8x18xf32>
    %98 = vector.extract_strided_slice %76 {offsets = [0, 680], sizes = [8, 31], strides = [1, 1]} : vector<8x1051xbf16> to vector<8x31xbf16>
    %cst_42 = arith.constant dense<0.000000e+00> : vector<8x18xf32>
    %99 = tpu.matmul %98, %77, %cst_42 {dimension_numbers = #tpu.dot_dimension_numbers<[1], [0], [0], [1], [0, 0, 1, 1], [], []>} : vector<8x31xbf16>, vector<31x18xbf16>, vector<8x18xf32> -> vector<8x18xf32>
    %100 = vector.extract_strided_slice %76 {offsets = [0, 748], sizes = [8, 31], strides = [1, 1]} : vector<8x1051xbf16> to vector<8x31xbf16>
    %cst_43 = arith.constant dense<0.000000e+00> : vector<8x18xf32>
    %101 = tpu.matmul %100, %77, %cst_43 {dimension_numbers = #tpu.dot_dimension_numbers<[1], [0], [0], [1], [0, 0, 1, 1], [], []>} : vector<8x31xbf16>, vector<31x18xbf16>, vector<8x18xf32> -> vector<8x18xf32>
    %102 = vector.extract_strided_slice %76 {offsets = [0, 816], sizes = [8, 31], strides = [1, 1]} : vector<8x1051xbf16> to vector<8x31xbf16>
    %cst_44 = arith.constant dense<0.000000e+00> : vector<8x18xf32>
    %103 = tpu.matmul %102, %77, %cst_44 {dimension_numbers = #tpu.dot_dimension_numbers<[1], [0], [0], [1], [0, 0, 1, 1], [], []>} : vector<8x31xbf16>, vector<31x18xbf16>, vector<8x18xf32> -> vector<8x18xf32>
    %104 = vector.extract_strided_slice %76 {offsets = [0, 884], sizes = [8, 31], strides = [1, 1]} : vector<8x1051xbf16> to vector<8x31xbf16>
    %cst_45 = arith.constant dense<0.000000e+00> : vector<8x18xf32>
    %105 = tpu.matmul %104, %77, %cst_45 {dimension_numbers = #tpu.dot_dimension_numbers<[1], [0], [0], [1], [0, 0, 1, 1], [], []>} : vector<8x31xbf16>, vector<31x18xbf16>, vector<8x18xf32> -> vector<8x18xf32>
    %106 = vector.extract_strided_slice %76 {offsets = [0, 952], sizes = [8, 31], strides = [1, 1]} : vector<8x1051xbf16> to vector<8x31xbf16>
    %cst_46 = arith.constant dense<0.000000e+00> : vector<8x18xf32>
    %107 = tpu.matmul %106, %77, %cst_46 {dimension_numbers = #tpu.dot_dimension_numbers<[1], [0], [0], [1], [0, 0, 1, 1], [], []>} : vector<8x31xbf16>, vector<31x18xbf16>, vector<8x18xf32> -> vector<8x18xf32>
    %108 = vector.extract_strided_slice %76 {offsets = [0, 1020], sizes = [8, 31], strides = [1, 1]} : vector<8x1051xbf16> to vector<8x31xbf16>
    %cst_47 = arith.constant dense<0.000000e+00> : vector<8x18xf32>
    %109 = tpu.matmul %108, %77, %cst_47 {dimension_numbers = #tpu.dot_dimension_numbers<[1], [0], [0], [1], [0, 0, 1, 1], [], []>} : vector<8x31xbf16>, vector<31x18xbf16>, vector<8x18xf32> -> vector<8x18xf32>
    %110 = tpu.concatenate %79, %81, %83, %85, %87, %89, %91, %93, %95, %97, %99, %101, %103, %105, %107, %109 in 1 : vector<8x18xf32>, vector<8x18xf32>, vector<8x18xf32>, vector<8x18xf32>, vector<8x18xf32>, vector<8x18xf32>, vector<8x18xf32>, vector<8x18xf32>, vector<8x18xf32>, vector<8x18xf32>, vector<8x18xf32>, vector<8x18xf32>, vector<8x18xf32>, vector<8x18xf32>, vector<8x18xf32>, vector<8x18xf32> -> vector<8x288xf32>
    %111 = vector.extract_strided_slice %110 {offsets = [0, 0], sizes = [8, 286], strides = [1, 1]} : vector<8x288xf32> to vector<8x286xf32>
    %112 = arith.truncf %111 : vector<8x286xf32> to vector<8x286xbf16>
    %cst_48 = arith.constant 0.000000e+00 : bf16
    %113 = vector.broadcast %cst_48 : bf16 to vector<8x19xbf16>
    %114 = vector.extract_strided_slice %112 {offsets = [0, 0], sizes = [8, 267], strides = [1, 1]} : vector<8x286xbf16> to vector<8x267xbf16>
    %115 = tpu.concatenate %113, %114 in 1 : vector<8x19xbf16>, vector<8x267xbf16> -> vector<8x286xbf16>
    %cst_49 = arith.constant 0.000000e+00 : bf16
    %116 = vector.broadcast %cst_49 : bf16 to vector<8x18xbf16>
    %117 = vector.extract_strided_slice %112 {offsets = [0, 0], sizes = [8, 268], strides = [1, 1]} : vector<8x286xbf16> to vector<8x268xbf16>
    %118 = tpu.concatenate %116, %117 in 1 : vector<8x18xbf16>, vector<8x268xbf16> -> vector<8x286xbf16>
    %cst_50 = arith.constant 0.000000e+00 : bf16
    %119 = vector.broadcast %cst_50 : bf16 to vector<8x17xbf16>
    %120 = vector.extract_strided_slice %112 {offsets = [0, 0], sizes = [8, 269], strides = [1, 1]} : vector<8x286xbf16> to vector<8x269xbf16>
    %121 = tpu.concatenate %119, %120 in 1 : vector<8x17xbf16>, vector<8x269xbf16> -> vector<8x286xbf16>
    %cst_51 = arith.constant 0.000000e+00 : bf16
    %122 = vector.broadcast %cst_51 : bf16 to vector<8x1xbf16>
    %123 = vector.extract_strided_slice %112 {offsets = [0, 0], sizes = [8, 285], strides = [1, 1]} : vector<8x286xbf16> to vector<8x285xbf16>
    %124 = tpu.concatenate %122, %123 in 1 : vector<8x1xbf16>, vector<8x285xbf16> -> vector<8x286xbf16>
    %125 = vector.extract_strided_slice %112 {offsets = [0, 1], sizes = [8, 285], strides = [1, 1]} : vector<8x286xbf16> to vector<8x285xbf16>
    %cst_52 = arith.constant 0.000000e+00 : bf16
    %126 = vector.broadcast %cst_52 : bf16 to vector<8x1xbf16>
    %127 = tpu.concatenate %125, %126 in 1 : vector<8x285xbf16>, vector<8x1xbf16> -> vector<8x286xbf16>
    %128 = vector.extract_strided_slice %112 {offsets = [0, 17], sizes = [8, 269], strides = [1, 1]} : vector<8x286xbf16> to vector<8x269xbf16>
    %cst_53 = arith.constant 0.000000e+00 : bf16
    %129 = vector.broadcast %cst_53 : bf16 to vector<8x17xbf16>
    %130 = tpu.concatenate %128, %129 in 1 : vector<8x269xbf16>, vector<8x17xbf16> -> vector<8x286xbf16>
    %131 = vector.extract_strided_slice %112 {offsets = [0, 18], sizes = [8, 268], strides = [1, 1]} : vector<8x286xbf16> to vector<8x268xbf16>
    %cst_54 = arith.constant 0.000000e+00 : bf16
    %132 = vector.broadcast %cst_54 : bf16 to vector<8x18xbf16>
    %133 = tpu.concatenate %131, %132 in 1 : vector<8x268xbf16>, vector<8x18xbf16> -> vector<8x286xbf16>
    %134 = vector.extract_strided_slice %112 {offsets = [0, 19], sizes = [8, 267], strides = [1, 1]} : vector<8x286xbf16> to vector<8x267xbf16>
    %cst_55 = arith.constant 0.000000e+00 : bf16
    %135 = vector.broadcast %cst_55 : bf16 to vector<8x19xbf16>
    %136 = tpu.concatenate %134, %135 in 1 : vector<8x267xbf16>, vector<8x19xbf16> -> vector<8x286xbf16>
    %137 = tpu.concatenate %115, %118, %121, %124, %112, %127, %130, %133, %136 in 0 : vector<8x286xbf16>, vector<8x286xbf16>, vector<8x286xbf16>, vector<8x286xbf16>, vector<8x286xbf16>, vector<8x286xbf16>, vector<8x286xbf16>, vector<8x286xbf16>, vector<8x286xbf16> -> vector<72x286xbf16>
    %c0_56 = arith.constant 0 : index
    %c0_57 = arith.constant 0 : index
    %138 = vector.load %arg15[%c0_56, %c0_57] : memref<16x72xbf16, #tpu.memory_space<vmem>>, vector<16x72xbf16>
    %cst_58 = arith.constant dense<0.000000e+00> : vector<16x286xf32>
    %139 = tpu.matmul %138, %137, %cst_58 {dimension_numbers = #tpu.dot_dimension_numbers<[1], [0], [0], [1], [0, 0, 1, 1], [], []>} : vector<16x72xbf16>, vector<72x286xbf16>, vector<16x286xf32> -> vector<16x286xf32>
    %c0_59 = arith.constant 0 : index
    %c0_60 = arith.constant 0 : index
    %140 = vector.load %arg16[%c0_59, %c0_60] : memref<16x1xf32, #tpu.memory_space<vmem>>, vector<16x1xf32>
    %141 = vector.broadcast %140 : vector<16x1xf32> to vector<16x286xf32>
    %142 = arith.addf %139, %141 : vector<16x286xf32>
    %cst_61 = arith.constant 0.000000e+00 : f32
    %143 = vector.broadcast %cst_61 : f32 to vector<16x286xf32>
    %144 = arith.maximumf %142, %143 : vector<16x286xf32>
    %c0_62 = arith.constant 0 : index
    %c0_63 = arith.constant 0 : index
    %145 = vector.load %arg2[%c0_62, %c0_63] : memref<1x286xf32, #tpu.memory_space<vmem>>, vector<1x286xf32>
    %146 = vector.broadcast %145 : vector<1x286xf32> to vector<16x286xf32>
    %147 = arith.mulf %144, %146 : vector<16x286xf32>
    %148 = arith.truncf %147 : vector<16x286xf32> to vector<16x286xbf16>
    %cst_64 = arith.constant 0.000000e+00 : bf16
    %149 = vector.broadcast %cst_64 : bf16 to vector<16x19xbf16>
    %150 = vector.extract_strided_slice %148 {offsets = [0, 0], sizes = [16, 267], strides = [1, 1]} : vector<16x286xbf16> to vector<16x267xbf16>
    %151 = tpu.concatenate %149, %150 in 1 : vector<16x19xbf16>, vector<16x267xbf16> -> vector<16x286xbf16>
    %cst_65 = arith.constant 0.000000e+00 : bf16
    %152 = vector.broadcast %cst_65 : bf16 to vector<16x18xbf16>
    %153 = vector.extract_strided_slice %148 {offsets = [0, 0], sizes = [16, 268], strides = [1, 1]} : vector<16x286xbf16> to vector<16x268xbf16>
    %154 = tpu.concatenate %152, %153 in 1 : vector<16x18xbf16>, vector<16x268xbf16> -> vector<16x286xbf16>
    %cst_66 = arith.constant 0.000000e+00 : bf16
    %155 = vector.broadcast %cst_66 : bf16 to vector<16x17xbf16>
    %156 = vector.extract_strided_slice %148 {offsets = [0, 0], sizes = [16, 269], strides = [1, 1]} : vector<16x286xbf16> to vector<16x269xbf16>
    %157 = tpu.concatenate %155, %156 in 1 : vector<16x17xbf16>, vector<16x269xbf16> -> vector<16x286xbf16>
    %cst_67 = arith.constant 0.000000e+00 : bf16
    %158 = vector.broadcast %cst_67 : bf16 to vector<16x1xbf16>
    %159 = vector.extract_strided_slice %148 {offsets = [0, 0], sizes = [16, 285], strides = [1, 1]} : vector<16x286xbf16> to vector<16x285xbf16>
    %160 = tpu.concatenate %158, %159 in 1 : vector<16x1xbf16>, vector<16x285xbf16> -> vector<16x286xbf16>
    %161 = vector.extract_strided_slice %148 {offsets = [0, 1], sizes = [16, 285], strides = [1, 1]} : vector<16x286xbf16> to vector<16x285xbf16>
    %cst_68 = arith.constant 0.000000e+00 : bf16
    %162 = vector.broadcast %cst_68 : bf16 to vector<16x1xbf16>
    %163 = tpu.concatenate %161, %162 in 1 : vector<16x285xbf16>, vector<16x1xbf16> -> vector<16x286xbf16>
    %164 = vector.extract_strided_slice %148 {offsets = [0, 17], sizes = [16, 269], strides = [1, 1]} : vector<16x286xbf16> to vector<16x269xbf16>
    %cst_69 = arith.constant 0.000000e+00 : bf16
    %165 = vector.broadcast %cst_69 : bf16 to vector<16x17xbf16>
    %166 = tpu.concatenate %164, %165 in 1 : vector<16x269xbf16>, vector<16x17xbf16> -> vector<16x286xbf16>
    %167 = vector.extract_strided_slice %148 {offsets = [0, 18], sizes = [16, 268], strides = [1, 1]} : vector<16x286xbf16> to vector<16x268xbf16>
    %cst_70 = arith.constant 0.000000e+00 : bf16
    %168 = vector.broadcast %cst_70 : bf16 to vector<16x18xbf16>
    %169 = tpu.concatenate %167, %168 in 1 : vector<16x268xbf16>, vector<16x18xbf16> -> vector<16x286xbf16>
    %170 = vector.extract_strided_slice %148 {offsets = [0, 19], sizes = [16, 267], strides = [1, 1]} : vector<16x286xbf16> to vector<16x267xbf16>
    %cst_71 = arith.constant 0.000000e+00 : bf16
    %171 = vector.broadcast %cst_71 : bf16 to vector<16x19xbf16>
    %172 = tpu.concatenate %170, %171 in 1 : vector<16x267xbf16>, vector<16x19xbf16> -> vector<16x286xbf16>
    %173 = tpu.concatenate %151, %154, %157, %160, %148, %163, %166, %169, %172 in 0 : vector<16x286xbf16>, vector<16x286xbf16>, vector<16x286xbf16>, vector<16x286xbf16>, vector<16x286xbf16>, vector<16x286xbf16>, vector<16x286xbf16>, vector<16x286xbf16>, vector<16x286xbf16> -> vector<144x286xbf16>
    %c0_72 = arith.constant 0 : index
    %c0_73 = arith.constant 0 : index
    %174 = vector.load %arg17[%c0_72, %c0_73] : memref<16x144xbf16, #tpu.memory_space<vmem>>, vector<16x144xbf16>
    %cst_74 = arith.constant dense<0.000000e+00> : vector<16x286xf32>
    %175 = tpu.matmul %174, %173, %cst_74 {dimension_numbers = #tpu.dot_dimension_numbers<[1], [0], [0], [1], [0, 0, 1, 1], [], []>} : vector<16x144xbf16>, vector<144x286xbf16>, vector<16x286xf32> -> vector<16x286xf32>
    %c0_75 = arith.constant 0 : index
    %c0_76 = arith.constant 0 : index
    %176 = vector.load %arg18[%c0_75, %c0_76] : memref<16x1xf32, #tpu.memory_space<vmem>>, vector<16x1xf32>
    %177 = vector.broadcast %176 : vector<16x1xf32> to vector<16x286xf32>
    %178 = arith.addf %175, %177 : vector<16x286xf32>
    %cst_77 = arith.constant 0.000000e+00 : f32
    %179 = vector.broadcast %cst_77 : f32 to vector<16x286xf32>
    %180 = arith.maximumf %178, %179 : vector<16x286xf32>
    %181 = vector.extract_strided_slice %180 {offsets = [0, 0], sizes = [16, 267], strides = [1, 1]} : vector<16x286xf32> to vector<16x267xf32>
    %182 = vector.extract_strided_slice %180 {offsets = [0, 1], sizes = [16, 267], strides = [1, 1]} : vector<16x286xf32> to vector<16x267xf32>
    %183 = arith.maximumf %181, %182 : vector<16x267xf32>
    %184 = vector.extract_strided_slice %180 {offsets = [0, 18], sizes = [16, 267], strides = [1, 1]} : vector<16x286xf32> to vector<16x267xf32>
    %185 = vector.extract_strided_slice %180 {offsets = [0, 19], sizes = [16, 267], strides = [1, 1]} : vector<16x286xf32> to vector<16x267xf32>
    %186 = arith.maximumf %184, %185 : vector<16x267xf32>
    %187 = arith.maximumf %183, %186 : vector<16x267xf32>
    %188 = arith.truncf %187 : vector<16x267xf32> to vector<16x267xbf16>
    %c0_78 = arith.constant 0 : index
    %c0_79 = arith.constant 0 : index
    %189 = vector.load %arg7[%c0_78, %c0_79] : memref<15x10xbf16, #tpu.memory_space<vmem>>, vector<15x10xbf16>
    %190 = vector.extract_strided_slice %188 {offsets = [0, 0], sizes = [16, 15], strides = [1, 1]} : vector<16x267xbf16> to vector<16x15xbf16>
    %cst_80 = arith.constant dense<0.000000e+00> : vector<16x10xf32>
    %191 = tpu.matmul %190, %189, %cst_80 {dimension_numbers = #tpu.dot_dimension_numbers<[1], [0], [0], [1], [0, 0, 1, 1], [], []>} : vector<16x15xbf16>, vector<15x10xbf16>, vector<16x10xf32> -> vector<16x10xf32>
    %192 = vector.extract_strided_slice %188 {offsets = [0, 36], sizes = [16, 15], strides = [1, 1]} : vector<16x267xbf16> to vector<16x15xbf16>
    %cst_81 = arith.constant dense<0.000000e+00> : vector<16x10xf32>
    %193 = tpu.matmul %192, %189, %cst_81 {dimension_numbers = #tpu.dot_dimension_numbers<[1], [0], [0], [1], [0, 0, 1, 1], [], []>} : vector<16x15xbf16>, vector<15x10xbf16>, vector<16x10xf32> -> vector<16x10xf32>
    %194 = vector.extract_strided_slice %188 {offsets = [0, 72], sizes = [16, 15], strides = [1, 1]} : vector<16x267xbf16> to vector<16x15xbf16>
    %cst_82 = arith.constant dense<0.000000e+00> : vector<16x10xf32>
    %195 = tpu.matmul %194, %189, %cst_82 {dimension_numbers = #tpu.dot_dimension_numbers<[1], [0], [0], [1], [0, 0, 1, 1], [], []>} : vector<16x15xbf16>, vector<15x10xbf16>, vector<16x10xf32> -> vector<16x10xf32>
    %196 = vector.extract_strided_slice %188 {offsets = [0, 108], sizes = [16, 15], strides = [1, 1]} : vector<16x267xbf16> to vector<16x15xbf16>
    %cst_83 = arith.constant dense<0.000000e+00> : vector<16x10xf32>
    %197 = tpu.matmul %196, %189, %cst_83 {dimension_numbers = #tpu.dot_dimension_numbers<[1], [0], [0], [1], [0, 0, 1, 1], [], []>} : vector<16x15xbf16>, vector<15x10xbf16>, vector<16x10xf32> -> vector<16x10xf32>
    %198 = vector.extract_strided_slice %188 {offsets = [0, 144], sizes = [16, 15], strides = [1, 1]} : vector<16x267xbf16> to vector<16x15xbf16>
    %cst_84 = arith.constant dense<0.000000e+00> : vector<16x10xf32>
    %199 = tpu.matmul %198, %189, %cst_84 {dimension_numbers = #tpu.dot_dimension_numbers<[1], [0], [0], [1], [0, 0, 1, 1], [], []>} : vector<16x15xbf16>, vector<15x10xbf16>, vector<16x10xf32> -> vector<16x10xf32>
    %200 = vector.extract_strided_slice %188 {offsets = [0, 180], sizes = [16, 15], strides = [1, 1]} : vector<16x267xbf16> to vector<16x15xbf16>
    %cst_85 = arith.constant dense<0.000000e+00> : vector<16x10xf32>
    %201 = tpu.matmul %200, %189, %cst_85 {dimension_numbers = #tpu.dot_dimension_numbers<[1], [0], [0], [1], [0, 0, 1, 1], [], []>} : vector<16x15xbf16>, vector<15x10xbf16>, vector<16x10xf32> -> vector<16x10xf32>
    %202 = vector.extract_strided_slice %188 {offsets = [0, 216], sizes = [16, 15], strides = [1, 1]} : vector<16x267xbf16> to vector<16x15xbf16>
    %cst_86 = arith.constant dense<0.000000e+00> : vector<16x10xf32>
    %203 = tpu.matmul %202, %189, %cst_86 {dimension_numbers = #tpu.dot_dimension_numbers<[1], [0], [0], [1], [0, 0, 1, 1], [], []>} : vector<16x15xbf16>, vector<15x10xbf16>, vector<16x10xf32> -> vector<16x10xf32>
    %204 = vector.extract_strided_slice %188 {offsets = [0, 252], sizes = [16, 15], strides = [1, 1]} : vector<16x267xbf16> to vector<16x15xbf16>
    %cst_87 = arith.constant dense<0.000000e+00> : vector<16x10xf32>
    %205 = tpu.matmul %204, %189, %cst_87 {dimension_numbers = #tpu.dot_dimension_numbers<[1], [0], [0], [1], [0, 0, 1, 1], [], []>} : vector<16x15xbf16>, vector<15x10xbf16>, vector<16x10xf32> -> vector<16x10xf32>
    %206 = tpu.concatenate %191, %193, %195, %197, %199, %201, %203, %205 in 1 : vector<16x10xf32>, vector<16x10xf32>, vector<16x10xf32>, vector<16x10xf32>, vector<16x10xf32>, vector<16x10xf32>, vector<16x10xf32>, vector<16x10xf32> -> vector<16x80xf32>
    %207 = vector.extract_strided_slice %206 {offsets = [0, 0], sizes = [16, 78], strides = [1, 1]} : vector<16x80xf32> to vector<16x78xf32>
    %208 = arith.truncf %207 : vector<16x78xf32> to vector<16x78xbf16>
    %cst_88 = arith.constant 0.000000e+00 : bf16
    %209 = vector.broadcast %cst_88 : bf16 to vector<16x11xbf16>
    %210 = vector.extract_strided_slice %208 {offsets = [0, 0], sizes = [16, 67], strides = [1, 1]} : vector<16x78xbf16> to vector<16x67xbf16>
    %211 = tpu.concatenate %209, %210 in 1 : vector<16x11xbf16>, vector<16x67xbf16> -> vector<16x78xbf16>
    %cst_89 = arith.constant 0.000000e+00 : bf16
    %212 = vector.broadcast %cst_89 : bf16 to vector<16x10xbf16>
    %213 = vector.extract_strided_slice %208 {offsets = [0, 0], sizes = [16, 68], strides = [1, 1]} : vector<16x78xbf16> to vector<16x68xbf16>
    %214 = tpu.concatenate %212, %213 in 1 : vector<16x10xbf16>, vector<16x68xbf16> -> vector<16x78xbf16>
    %cst_90 = arith.constant 0.000000e+00 : bf16
    %215 = vector.broadcast %cst_90 : bf16 to vector<16x9xbf16>
    %216 = vector.extract_strided_slice %208 {offsets = [0, 0], sizes = [16, 69], strides = [1, 1]} : vector<16x78xbf16> to vector<16x69xbf16>
    %217 = tpu.concatenate %215, %216 in 1 : vector<16x9xbf16>, vector<16x69xbf16> -> vector<16x78xbf16>
    %cst_91 = arith.constant 0.000000e+00 : bf16
    %218 = vector.broadcast %cst_91 : bf16 to vector<16x1xbf16>
    %219 = vector.extract_strided_slice %208 {offsets = [0, 0], sizes = [16, 77], strides = [1, 1]} : vector<16x78xbf16> to vector<16x77xbf16>
    %220 = tpu.concatenate %218, %219 in 1 : vector<16x1xbf16>, vector<16x77xbf16> -> vector<16x78xbf16>
    %221 = vector.extract_strided_slice %208 {offsets = [0, 1], sizes = [16, 77], strides = [1, 1]} : vector<16x78xbf16> to vector<16x77xbf16>
    %cst_92 = arith.constant 0.000000e+00 : bf16
    %222 = vector.broadcast %cst_92 : bf16 to vector<16x1xbf16>
    %223 = tpu.concatenate %221, %222 in 1 : vector<16x77xbf16>, vector<16x1xbf16> -> vector<16x78xbf16>
    %224 = vector.extract_strided_slice %208 {offsets = [0, 9], sizes = [16, 69], strides = [1, 1]} : vector<16x78xbf16> to vector<16x69xbf16>
    %cst_93 = arith.constant 0.000000e+00 : bf16
    %225 = vector.broadcast %cst_93 : bf16 to vector<16x9xbf16>
    %226 = tpu.concatenate %224, %225 in 1 : vector<16x69xbf16>, vector<16x9xbf16> -> vector<16x78xbf16>
    %227 = vector.extract_strided_slice %208 {offsets = [0, 10], sizes = [16, 68], strides = [1, 1]} : vector<16x78xbf16> to vector<16x68xbf16>
    %cst_94 = arith.constant 0.000000e+00 : bf16
    %228 = vector.broadcast %cst_94 : bf16 to vector<16x10xbf16>
    %229 = tpu.concatenate %227, %228 in 1 : vector<16x68xbf16>, vector<16x10xbf16> -> vector<16x78xbf16>
    %230 = vector.extract_strided_slice %208 {offsets = [0, 11], sizes = [16, 67], strides = [1, 1]} : vector<16x78xbf16> to vector<16x67xbf16>
    %cst_95 = arith.constant 0.000000e+00 : bf16
    %231 = vector.broadcast %cst_95 : bf16 to vector<16x11xbf16>
    %232 = tpu.concatenate %230, %231 in 1 : vector<16x67xbf16>, vector<16x11xbf16> -> vector<16x78xbf16>
    %233 = tpu.concatenate %211, %214, %217, %220, %208, %223, %226, %229, %232 in 0 : vector<16x78xbf16>, vector<16x78xbf16>, vector<16x78xbf16>, vector<16x78xbf16>, vector<16x78xbf16>, vector<16x78xbf16>, vector<16x78xbf16>, vector<16x78xbf16>, vector<16x78xbf16> -> vector<144x78xbf16>
    %c0_96 = arith.constant 0 : index
    %c0_97 = arith.constant 0 : index
    %234 = vector.load %arg19[%c0_96, %c0_97] : memref<32x144xbf16, #tpu.memory_space<vmem>>, vector<32x144xbf16>
    %cst_98 = arith.constant dense<0.000000e+00> : vector<32x78xf32>
    %235 = tpu.matmul %234, %233, %cst_98 {dimension_numbers = #tpu.dot_dimension_numbers<[1], [0], [0], [1], [0, 0, 1, 1], [], []>} : vector<32x144xbf16>, vector<144x78xbf16>, vector<32x78xf32> -> vector<32x78xf32>
    %c0_99 = arith.constant 0 : index
    %c0_100 = arith.constant 0 : index
    %236 = vector.load %arg20[%c0_99, %c0_100] : memref<32x1xf32, #tpu.memory_space<vmem>>, vector<32x1xf32>
    %237 = vector.broadcast %236 : vector<32x1xf32> to vector<32x78xf32>
    %238 = arith.addf %235, %237 : vector<32x78xf32>
    %cst_101 = arith.constant 0.000000e+00 : f32
    %239 = vector.broadcast %cst_101 : f32 to vector<32x78xf32>
    %240 = arith.maximumf %238, %239 : vector<32x78xf32>
    %c0_102 = arith.constant 0 : index
    %c0_103 = arith.constant 0 : index
    %241 = vector.load %arg3[%c0_102, %c0_103] : memref<1x78xf32, #tpu.memory_space<vmem>>, vector<1x78xf32>
    %242 = vector.broadcast %241 : vector<1x78xf32> to vector<32x78xf32>
    %243 = arith.mulf %240, %242 : vector<32x78xf32>
    %244 = arith.truncf %243 : vector<32x78xf32> to vector<32x78xbf16>
    %cst_104 = arith.constant 0.000000e+00 : bf16
    %245 = vector.broadcast %cst_104 : bf16 to vector<32x11xbf16>
    %246 = vector.extract_strided_slice %244 {offsets = [0, 0], sizes = [32, 67], strides = [1, 1]} : vector<32x78xbf16> to vector<32x67xbf16>
    %247 = tpu.concatenate %245, %246 in 1 : vector<32x11xbf16>, vector<32x67xbf16> -> vector<32x78xbf16>
    %cst_105 = arith.constant 0.000000e+00 : bf16
    %248 = vector.broadcast %cst_105 : bf16 to vector<32x10xbf16>
    %249 = vector.extract_strided_slice %244 {offsets = [0, 0], sizes = [32, 68], strides = [1, 1]} : vector<32x78xbf16> to vector<32x68xbf16>
    %250 = tpu.concatenate %248, %249 in 1 : vector<32x10xbf16>, vector<32x68xbf16> -> vector<32x78xbf16>
    %cst_106 = arith.constant 0.000000e+00 : bf16
    %251 = vector.broadcast %cst_106 : bf16 to vector<32x9xbf16>
    %252 = vector.extract_strided_slice %244 {offsets = [0, 0], sizes = [32, 69], strides = [1, 1]} : vector<32x78xbf16> to vector<32x69xbf16>
    %253 = tpu.concatenate %251, %252 in 1 : vector<32x9xbf16>, vector<32x69xbf16> -> vector<32x78xbf16>
    %cst_107 = arith.constant 0.000000e+00 : bf16
    %254 = vector.broadcast %cst_107 : bf16 to vector<32x1xbf16>
    %255 = vector.extract_strided_slice %244 {offsets = [0, 0], sizes = [32, 77], strides = [1, 1]} : vector<32x78xbf16> to vector<32x77xbf16>
    %256 = tpu.concatenate %254, %255 in 1 : vector<32x1xbf16>, vector<32x77xbf16> -> vector<32x78xbf16>
    %257 = vector.extract_strided_slice %244 {offsets = [0, 1], sizes = [32, 77], strides = [1, 1]} : vector<32x78xbf16> to vector<32x77xbf16>
    %cst_108 = arith.constant 0.000000e+00 : bf16
    %258 = vector.broadcast %cst_108 : bf16 to vector<32x1xbf16>
    %259 = tpu.concatenate %257, %258 in 1 : vector<32x77xbf16>, vector<32x1xbf16> -> vector<32x78xbf16>
    %260 = vector.extract_strided_slice %244 {offsets = [0, 9], sizes = [32, 69], strides = [1, 1]} : vector<32x78xbf16> to vector<32x69xbf16>
    %cst_109 = arith.constant 0.000000e+00 : bf16
    %261 = vector.broadcast %cst_109 : bf16 to vector<32x9xbf16>
    %262 = tpu.concatenate %260, %261 in 1 : vector<32x69xbf16>, vector<32x9xbf16> -> vector<32x78xbf16>
    %263 = vector.extract_strided_slice %244 {offsets = [0, 10], sizes = [32, 68], strides = [1, 1]} : vector<32x78xbf16> to vector<32x68xbf16>
    %cst_110 = arith.constant 0.000000e+00 : bf16
    %264 = vector.broadcast %cst_110 : bf16 to vector<32x10xbf16>
    %265 = tpu.concatenate %263, %264 in 1 : vector<32x68xbf16>, vector<32x10xbf16> -> vector<32x78xbf16>
    %266 = vector.extract_strided_slice %244 {offsets = [0, 11], sizes = [32, 67], strides = [1, 1]} : vector<32x78xbf16> to vector<32x67xbf16>
    %cst_111 = arith.constant 0.000000e+00 : bf16
    %267 = vector.broadcast %cst_111 : bf16 to vector<32x11xbf16>
    %268 = tpu.concatenate %266, %267 in 1 : vector<32x67xbf16>, vector<32x11xbf16> -> vector<32x78xbf16>
    %269 = tpu.concatenate %247, %250, %253, %256, %244, %259, %262, %265, %268 in 0 : vector<32x78xbf16>, vector<32x78xbf16>, vector<32x78xbf16>, vector<32x78xbf16>, vector<32x78xbf16>, vector<32x78xbf16>, vector<32x78xbf16>, vector<32x78xbf16>, vector<32x78xbf16> -> vector<288x78xbf16>
    %c0_112 = arith.constant 0 : index
    %c0_113 = arith.constant 0 : index
    %270 = vector.load %arg21[%c0_112, %c0_113] : memref<32x288xbf16, #tpu.memory_space<vmem>>, vector<32x288xbf16>
    %cst_114 = arith.constant dense<0.000000e+00> : vector<32x78xf32>
    %271 = tpu.matmul %270, %269, %cst_114 {dimension_numbers = #tpu.dot_dimension_numbers<[1], [0], [0], [1], [0, 0, 1, 1], [], []>} : vector<32x288xbf16>, vector<288x78xbf16>, vector<32x78xf32> -> vector<32x78xf32>
    %c0_115 = arith.constant 0 : index
    %c0_116 = arith.constant 0 : index
    %272 = vector.load %arg22[%c0_115, %c0_116] : memref<32x1xf32, #tpu.memory_space<vmem>>, vector<32x1xf32>
    %273 = vector.broadcast %272 : vector<32x1xf32> to vector<32x78xf32>
    %274 = arith.addf %271, %273 : vector<32x78xf32>
    %cst_117 = arith.constant 0.000000e+00 : f32
    %275 = vector.broadcast %cst_117 : f32 to vector<32x78xf32>
    %276 = arith.maximumf %274, %275 : vector<32x78xf32>
    %c0_118 = arith.constant 0 : index
    %c0_119 = arith.constant 0 : index
    %277 = vector.load %arg3[%c0_118, %c0_119] : memref<1x78xf32, #tpu.memory_space<vmem>>, vector<1x78xf32>
    %278 = vector.broadcast %277 : vector<1x78xf32> to vector<32x78xf32>
    %279 = arith.mulf %276, %278 : vector<32x78xf32>
    %280 = arith.truncf %279 : vector<32x78xf32> to vector<32x78xbf16>
    %cst_120 = arith.constant 0.000000e+00 : bf16
    %281 = vector.broadcast %cst_120 : bf16 to vector<32x11xbf16>
    %282 = vector.extract_strided_slice %280 {offsets = [0, 0], sizes = [32, 67], strides = [1, 1]} : vector<32x78xbf16> to vector<32x67xbf16>
    %283 = tpu.concatenate %281, %282 in 1 : vector<32x11xbf16>, vector<32x67xbf16> -> vector<32x78xbf16>
    %cst_121 = arith.constant 0.000000e+00 : bf16
    %284 = vector.broadcast %cst_121 : bf16 to vector<32x10xbf16>
    %285 = vector.extract_strided_slice %280 {offsets = [0, 0], sizes = [32, 68], strides = [1, 1]} : vector<32x78xbf16> to vector<32x68xbf16>
    %286 = tpu.concatenate %284, %285 in 1 : vector<32x10xbf16>, vector<32x68xbf16> -> vector<32x78xbf16>
    %cst_122 = arith.constant 0.000000e+00 : bf16
    %287 = vector.broadcast %cst_122 : bf16 to vector<32x9xbf16>
    %288 = vector.extract_strided_slice %280 {offsets = [0, 0], sizes = [32, 69], strides = [1, 1]} : vector<32x78xbf16> to vector<32x69xbf16>
    %289 = tpu.concatenate %287, %288 in 1 : vector<32x9xbf16>, vector<32x69xbf16> -> vector<32x78xbf16>
    %cst_123 = arith.constant 0.000000e+00 : bf16
    %290 = vector.broadcast %cst_123 : bf16 to vector<32x1xbf16>
    %291 = vector.extract_strided_slice %280 {offsets = [0, 0], sizes = [32, 77], strides = [1, 1]} : vector<32x78xbf16> to vector<32x77xbf16>
    %292 = tpu.concatenate %290, %291 in 1 : vector<32x1xbf16>, vector<32x77xbf16> -> vector<32x78xbf16>
    %293 = vector.extract_strided_slice %280 {offsets = [0, 1], sizes = [32, 77], strides = [1, 1]} : vector<32x78xbf16> to vector<32x77xbf16>
    %cst_124 = arith.constant 0.000000e+00 : bf16
    %294 = vector.broadcast %cst_124 : bf16 to vector<32x1xbf16>
    %295 = tpu.concatenate %293, %294 in 1 : vector<32x77xbf16>, vector<32x1xbf16> -> vector<32x78xbf16>
    %296 = vector.extract_strided_slice %280 {offsets = [0, 9], sizes = [32, 69], strides = [1, 1]} : vector<32x78xbf16> to vector<32x69xbf16>
    %cst_125 = arith.constant 0.000000e+00 : bf16
    %297 = vector.broadcast %cst_125 : bf16 to vector<32x9xbf16>
    %298 = tpu.concatenate %296, %297 in 1 : vector<32x69xbf16>, vector<32x9xbf16> -> vector<32x78xbf16>
    %299 = vector.extract_strided_slice %280 {offsets = [0, 10], sizes = [32, 68], strides = [1, 1]} : vector<32x78xbf16> to vector<32x68xbf16>
    %cst_126 = arith.constant 0.000000e+00 : bf16
    %300 = vector.broadcast %cst_126 : bf16 to vector<32x10xbf16>
    %301 = tpu.concatenate %299, %300 in 1 : vector<32x68xbf16>, vector<32x10xbf16> -> vector<32x78xbf16>
    %302 = vector.extract_strided_slice %280 {offsets = [0, 11], sizes = [32, 67], strides = [1, 1]} : vector<32x78xbf16> to vector<32x67xbf16>
    %cst_127 = arith.constant 0.000000e+00 : bf16
    %303 = vector.broadcast %cst_127 : bf16 to vector<32x11xbf16>
    %304 = tpu.concatenate %302, %303 in 1 : vector<32x67xbf16>, vector<32x11xbf16> -> vector<32x78xbf16>
    %305 = tpu.concatenate %283, %286, %289, %292, %280, %295, %298, %301, %304 in 0 : vector<32x78xbf16>, vector<32x78xbf16>, vector<32x78xbf16>, vector<32x78xbf16>, vector<32x78xbf16>, vector<32x78xbf16>, vector<32x78xbf16>, vector<32x78xbf16>, vector<32x78xbf16> -> vector<288x78xbf16>
    %c0_128 = arith.constant 0 : index
    %c0_129 = arith.constant 0 : index
    %306 = vector.load %arg23[%c0_128, %c0_129] : memref<32x288xbf16, #tpu.memory_space<vmem>>, vector<32x288xbf16>
    %cst_130 = arith.constant dense<0.000000e+00> : vector<32x78xf32>
    %307 = tpu.matmul %306, %305, %cst_130 {dimension_numbers = #tpu.dot_dimension_numbers<[1], [0], [0], [1], [0, 0, 1, 1], [], []>} : vector<32x288xbf16>, vector<288x78xbf16>, vector<32x78xf32> -> vector<32x78xf32>
    %c0_131 = arith.constant 0 : index
    %c0_132 = arith.constant 0 : index
    %308 = vector.load %arg24[%c0_131, %c0_132] : memref<32x1xf32, #tpu.memory_space<vmem>>, vector<32x1xf32>
    %309 = vector.broadcast %308 : vector<32x1xf32> to vector<32x78xf32>
    %310 = arith.addf %307, %309 : vector<32x78xf32>
    %cst_133 = arith.constant 0.000000e+00 : f32
    %311 = vector.broadcast %cst_133 : f32 to vector<32x78xf32>
    %312 = arith.maximumf %310, %311 : vector<32x78xf32>
    %c0_134 = arith.constant 0 : index
    %c0_135 = arith.constant 0 : index
    %313 = vector.load %arg3[%c0_134, %c0_135] : memref<1x78xf32, #tpu.memory_space<vmem>>, vector<1x78xf32>
    %314 = vector.broadcast %313 : vector<1x78xf32> to vector<32x78xf32>
    %315 = arith.mulf %312, %314 : vector<32x78xf32>
    %316 = arith.truncf %315 : vector<32x78xf32> to vector<32x78xbf16>
    %cst_136 = arith.constant 0.000000e+00 : bf16
    %317 = vector.broadcast %cst_136 : bf16 to vector<32x11xbf16>
    %318 = vector.extract_strided_slice %316 {offsets = [0, 0], sizes = [32, 67], strides = [1, 1]} : vector<32x78xbf16> to vector<32x67xbf16>
    %319 = tpu.concatenate %317, %318 in 1 : vector<32x11xbf16>, vector<32x67xbf16> -> vector<32x78xbf16>
    %cst_137 = arith.constant 0.000000e+00 : bf16
    %320 = vector.broadcast %cst_137 : bf16 to vector<32x10xbf16>
    %321 = vector.extract_strided_slice %316 {offsets = [0, 0], sizes = [32, 68], strides = [1, 1]} : vector<32x78xbf16> to vector<32x68xbf16>
    %322 = tpu.concatenate %320, %321 in 1 : vector<32x10xbf16>, vector<32x68xbf16> -> vector<32x78xbf16>
    %cst_138 = arith.constant 0.000000e+00 : bf16
    %323 = vector.broadcast %cst_138 : bf16 to vector<32x9xbf16>
    %324 = vector.extract_strided_slice %316 {offsets = [0, 0], sizes = [32, 69], strides = [1, 1]} : vector<32x78xbf16> to vector<32x69xbf16>
    %325 = tpu.concatenate %323, %324 in 1 : vector<32x9xbf16>, vector<32x69xbf16> -> vector<32x78xbf16>
    %cst_139 = arith.constant 0.000000e+00 : bf16
    %326 = vector.broadcast %cst_139 : bf16 to vector<32x1xbf16>
    %327 = vector.extract_strided_slice %316 {offsets = [0, 0], sizes = [32, 77], strides = [1, 1]} : vector<32x78xbf16> to vector<32x77xbf16>
    %328 = tpu.concatenate %326, %327 in 1 : vector<32x1xbf16>, vector<32x77xbf16> -> vector<32x78xbf16>
    %329 = vector.extract_strided_slice %316 {offsets = [0, 1], sizes = [32, 77], strides = [1, 1]} : vector<32x78xbf16> to vector<32x77xbf16>
    %cst_140 = arith.constant 0.000000e+00 : bf16
    %330 = vector.broadcast %cst_140 : bf16 to vector<32x1xbf16>
    %331 = tpu.concatenate %329, %330 in 1 : vector<32x77xbf16>, vector<32x1xbf16> -> vector<32x78xbf16>
    %332 = vector.extract_strided_slice %316 {offsets = [0, 9], sizes = [32, 69], strides = [1, 1]} : vector<32x78xbf16> to vector<32x69xbf16>
    %cst_141 = arith.constant 0.000000e+00 : bf16
    %333 = vector.broadcast %cst_141 : bf16 to vector<32x9xbf16>
    %334 = tpu.concatenate %332, %333 in 1 : vector<32x69xbf16>, vector<32x9xbf16> -> vector<32x78xbf16>
    %335 = vector.extract_strided_slice %316 {offsets = [0, 10], sizes = [32, 68], strides = [1, 1]} : vector<32x78xbf16> to vector<32x68xbf16>
    %cst_142 = arith.constant 0.000000e+00 : bf16
    %336 = vector.broadcast %cst_142 : bf16 to vector<32x10xbf16>
    %337 = tpu.concatenate %335, %336 in 1 : vector<32x68xbf16>, vector<32x10xbf16> -> vector<32x78xbf16>
    %338 = vector.extract_strided_slice %316 {offsets = [0, 11], sizes = [32, 67], strides = [1, 1]} : vector<32x78xbf16> to vector<32x67xbf16>
    %cst_143 = arith.constant 0.000000e+00 : bf16
    %339 = vector.broadcast %cst_143 : bf16 to vector<32x11xbf16>
    %340 = tpu.concatenate %338, %339 in 1 : vector<32x67xbf16>, vector<32x11xbf16> -> vector<32x78xbf16>
    %341 = tpu.concatenate %319, %322, %325, %328, %316, %331, %334, %337, %340 in 0 : vector<32x78xbf16>, vector<32x78xbf16>, vector<32x78xbf16>, vector<32x78xbf16>, vector<32x78xbf16>, vector<32x78xbf16>, vector<32x78xbf16>, vector<32x78xbf16>, vector<32x78xbf16> -> vector<288x78xbf16>
    %c0_144 = arith.constant 0 : index
    %c0_145 = arith.constant 0 : index
    %342 = vector.load %arg25[%c0_144, %c0_145] : memref<32x288xbf16, #tpu.memory_space<vmem>>, vector<32x288xbf16>
    %cst_146 = arith.constant dense<0.000000e+00> : vector<32x78xf32>
    %343 = tpu.matmul %342, %341, %cst_146 {dimension_numbers = #tpu.dot_dimension_numbers<[1], [0], [0], [1], [0, 0, 1, 1], [], []>} : vector<32x288xbf16>, vector<288x78xbf16>, vector<32x78xf32> -> vector<32x78xf32>
    %c0_147 = arith.constant 0 : index
    %c0_148 = arith.constant 0 : index
    %344 = vector.load %arg26[%c0_147, %c0_148] : memref<32x1xf32, #tpu.memory_space<vmem>>, vector<32x1xf32>
    %345 = vector.broadcast %344 : vector<32x1xf32> to vector<32x78xf32>
    %346 = arith.addf %343, %345 : vector<32x78xf32>
    %cst_149 = arith.constant 0.000000e+00 : f32
    %347 = vector.broadcast %cst_149 : f32 to vector<32x78xf32>
    %348 = arith.maximumf %346, %347 : vector<32x78xf32>
    %349 = vector.extract_strided_slice %348 {offsets = [0, 0], sizes = [32, 67], strides = [1, 1]} : vector<32x78xf32> to vector<32x67xf32>
    %350 = vector.extract_strided_slice %348 {offsets = [0, 1], sizes = [32, 67], strides = [1, 1]} : vector<32x78xf32> to vector<32x67xf32>
    %351 = arith.maximumf %349, %350 : vector<32x67xf32>
    %352 = vector.extract_strided_slice %348 {offsets = [0, 10], sizes = [32, 67], strides = [1, 1]} : vector<32x78xf32> to vector<32x67xf32>
    %353 = vector.extract_strided_slice %348 {offsets = [0, 11], sizes = [32, 67], strides = [1, 1]} : vector<32x78xf32> to vector<32x67xf32>
    %354 = arith.maximumf %352, %353 : vector<32x67xf32>
    %355 = arith.maximumf %351, %354 : vector<32x67xf32>
    %356 = arith.truncf %355 : vector<32x67xf32> to vector<32x67xbf16>
    %c0_150 = arith.constant 0 : index
    %c0_151 = arith.constant 0 : index
    %357 = vector.load %arg8[%c0_150, %c0_151] : memref<7x6xbf16, #tpu.memory_space<vmem>>, vector<7x6xbf16>
    %358 = vector.extract_strided_slice %356 {offsets = [0, 0], sizes = [32, 7], strides = [1, 1]} : vector<32x67xbf16> to vector<32x7xbf16>
    %cst_152 = arith.constant dense<0.000000e+00> : vector<32x6xf32>
    %359 = tpu.matmul %358, %357, %cst_152 {dimension_numbers = #tpu.dot_dimension_numbers<[1], [0], [0], [1], [0, 0, 1, 1], [], []>} : vector<32x7xbf16>, vector<7x6xbf16>, vector<32x6xf32> -> vector<32x6xf32>
    %360 = vector.extract_strided_slice %356 {offsets = [0, 20], sizes = [32, 7], strides = [1, 1]} : vector<32x67xbf16> to vector<32x7xbf16>
    %cst_153 = arith.constant dense<0.000000e+00> : vector<32x6xf32>
    %361 = tpu.matmul %360, %357, %cst_153 {dimension_numbers = #tpu.dot_dimension_numbers<[1], [0], [0], [1], [0, 0, 1, 1], [], []>} : vector<32x7xbf16>, vector<7x6xbf16>, vector<32x6xf32> -> vector<32x6xf32>
    %362 = vector.extract_strided_slice %356 {offsets = [0, 40], sizes = [32, 7], strides = [1, 1]} : vector<32x67xbf16> to vector<32x7xbf16>
    %cst_154 = arith.constant dense<0.000000e+00> : vector<32x6xf32>
    %363 = tpu.matmul %362, %357, %cst_154 {dimension_numbers = #tpu.dot_dimension_numbers<[1], [0], [0], [1], [0, 0, 1, 1], [], []>} : vector<32x7xbf16>, vector<7x6xbf16>, vector<32x6xf32> -> vector<32x6xf32>
    %364 = vector.extract_strided_slice %356 {offsets = [0, 60], sizes = [32, 7], strides = [1, 1]} : vector<32x67xbf16> to vector<32x7xbf16>
    %cst_155 = arith.constant dense<0.000000e+00> : vector<32x6xf32>
    %365 = tpu.matmul %364, %357, %cst_155 {dimension_numbers = #tpu.dot_dimension_numbers<[1], [0], [0], [1], [0, 0, 1, 1], [], []>} : vector<32x7xbf16>, vector<7x6xbf16>, vector<32x6xf32> -> vector<32x6xf32>
    %366 = tpu.concatenate %359, %361, %363, %365 in 1 : vector<32x6xf32>, vector<32x6xf32>, vector<32x6xf32>, vector<32x6xf32> -> vector<32x24xf32>
    %367 = vector.extract_strided_slice %366 {offsets = [0, 0], sizes = [32, 22], strides = [1, 1]} : vector<32x24xf32> to vector<32x22xf32>
    %368 = arith.truncf %367 : vector<32x22xf32> to vector<32x22xbf16>
    %cst_156 = arith.constant 0.000000e+00 : bf16
    %369 = vector.broadcast %cst_156 : bf16 to vector<32x7xbf16>
    %370 = vector.extract_strided_slice %368 {offsets = [0, 0], sizes = [32, 15], strides = [1, 1]} : vector<32x22xbf16> to vector<32x15xbf16>
    %371 = tpu.concatenate %369, %370 in 1 : vector<32x7xbf16>, vector<32x15xbf16> -> vector<32x22xbf16>
    %cst_157 = arith.constant 0.000000e+00 : bf16
    %372 = vector.broadcast %cst_157 : bf16 to vector<32x6xbf16>
    %373 = vector.extract_strided_slice %368 {offsets = [0, 0], sizes = [32, 16], strides = [1, 1]} : vector<32x22xbf16> to vector<32x16xbf16>
    %374 = tpu.concatenate %372, %373 in 1 : vector<32x6xbf16>, vector<32x16xbf16> -> vector<32x22xbf16>
    %cst_158 = arith.constant 0.000000e+00 : bf16
    %375 = vector.broadcast %cst_158 : bf16 to vector<32x5xbf16>
    %376 = vector.extract_strided_slice %368 {offsets = [0, 0], sizes = [32, 17], strides = [1, 1]} : vector<32x22xbf16> to vector<32x17xbf16>
    %377 = tpu.concatenate %375, %376 in 1 : vector<32x5xbf16>, vector<32x17xbf16> -> vector<32x22xbf16>
    %cst_159 = arith.constant 0.000000e+00 : bf16
    %378 = vector.broadcast %cst_159 : bf16 to vector<32x1xbf16>
    %379 = vector.extract_strided_slice %368 {offsets = [0, 0], sizes = [32, 21], strides = [1, 1]} : vector<32x22xbf16> to vector<32x21xbf16>
    %380 = tpu.concatenate %378, %379 in 1 : vector<32x1xbf16>, vector<32x21xbf16> -> vector<32x22xbf16>
    %381 = vector.extract_strided_slice %368 {offsets = [0, 1], sizes = [32, 21], strides = [1, 1]} : vector<32x22xbf16> to vector<32x21xbf16>
    %cst_160 = arith.constant 0.000000e+00 : bf16
    %382 = vector.broadcast %cst_160 : bf16 to vector<32x1xbf16>
    %383 = tpu.concatenate %381, %382 in 1 : vector<32x21xbf16>, vector<32x1xbf16> -> vector<32x22xbf16>
    %384 = vector.extract_strided_slice %368 {offsets = [0, 5], sizes = [32, 17], strides = [1, 1]} : vector<32x22xbf16> to vector<32x17xbf16>
    %cst_161 = arith.constant 0.000000e+00 : bf16
    %385 = vector.broadcast %cst_161 : bf16 to vector<32x5xbf16>
    %386 = tpu.concatenate %384, %385 in 1 : vector<32x17xbf16>, vector<32x5xbf16> -> vector<32x22xbf16>
    %387 = vector.extract_strided_slice %368 {offsets = [0, 6], sizes = [32, 16], strides = [1, 1]} : vector<32x22xbf16> to vector<32x16xbf16>
    %cst_162 = arith.constant 0.000000e+00 : bf16
    %388 = vector.broadcast %cst_162 : bf16 to vector<32x6xbf16>
    %389 = tpu.concatenate %387, %388 in 1 : vector<32x16xbf16>, vector<32x6xbf16> -> vector<32x22xbf16>
    %390 = vector.extract_strided_slice %368 {offsets = [0, 7], sizes = [32, 15], strides = [1, 1]} : vector<32x22xbf16> to vector<32x15xbf16>
    %cst_163 = arith.constant 0.000000e+00 : bf16
    %391 = vector.broadcast %cst_163 : bf16 to vector<32x7xbf16>
    %392 = tpu.concatenate %390, %391 in 1 : vector<32x15xbf16>, vector<32x7xbf16> -> vector<32x22xbf16>
    %393 = tpu.concatenate %371, %374, %377, %380, %368, %383, %386, %389, %392 in 0 : vector<32x22xbf16>, vector<32x22xbf16>, vector<32x22xbf16>, vector<32x22xbf16>, vector<32x22xbf16>, vector<32x22xbf16>, vector<32x22xbf16>, vector<32x22xbf16>, vector<32x22xbf16> -> vector<288x22xbf16>
    %c0_164 = arith.constant 0 : index
    %c0_165 = arith.constant 0 : index
    %394 = vector.load %arg27[%c0_164, %c0_165] : memref<64x288xbf16, #tpu.memory_space<vmem>>, vector<64x288xbf16>
    %cst_166 = arith.constant dense<0.000000e+00> : vector<64x22xf32>
    %395 = tpu.matmul %394, %393, %cst_166 {dimension_numbers = #tpu.dot_dimension_numbers<[1], [0], [0], [1], [0, 0, 1, 1], [], []>} : vector<64x288xbf16>, vector<288x22xbf16>, vector<64x22xf32> -> vector<64x22xf32>
    %c0_167 = arith.constant 0 : index
    %c0_168 = arith.constant 0 : index
    %396 = vector.load %arg28[%c0_167, %c0_168] : memref<64x1xf32, #tpu.memory_space<vmem>>, vector<64x1xf32>
    %397 = vector.broadcast %396 : vector<64x1xf32> to vector<64x22xf32>
    %398 = arith.addf %395, %397 : vector<64x22xf32>
    %cst_169 = arith.constant 0.000000e+00 : f32
    %399 = vector.broadcast %cst_169 : f32 to vector<64x22xf32>
    %400 = arith.maximumf %398, %399 : vector<64x22xf32>
    %c0_170 = arith.constant 0 : index
    %c0_171 = arith.constant 0 : index
    %401 = vector.load %arg4[%c0_170, %c0_171] : memref<1x22xf32, #tpu.memory_space<vmem>>, vector<1x22xf32>
    %402 = vector.broadcast %401 : vector<1x22xf32> to vector<64x22xf32>
    %403 = arith.mulf %400, %402 : vector<64x22xf32>
    %404 = arith.truncf %403 : vector<64x22xf32> to vector<64x22xbf16>
    %cst_172 = arith.constant 0.000000e+00 : bf16
    %405 = vector.broadcast %cst_172 : bf16 to vector<64x7xbf16>
    %406 = vector.extract_strided_slice %404 {offsets = [0, 0], sizes = [64, 15], strides = [1, 1]} : vector<64x22xbf16> to vector<64x15xbf16>
    %407 = tpu.concatenate %405, %406 in 1 : vector<64x7xbf16>, vector<64x15xbf16> -> vector<64x22xbf16>
    %cst_173 = arith.constant 0.000000e+00 : bf16
    %408 = vector.broadcast %cst_173 : bf16 to vector<64x6xbf16>
    %409 = vector.extract_strided_slice %404 {offsets = [0, 0], sizes = [64, 16], strides = [1, 1]} : vector<64x22xbf16> to vector<64x16xbf16>
    %410 = tpu.concatenate %408, %409 in 1 : vector<64x6xbf16>, vector<64x16xbf16> -> vector<64x22xbf16>
    %cst_174 = arith.constant 0.000000e+00 : bf16
    %411 = vector.broadcast %cst_174 : bf16 to vector<64x5xbf16>
    %412 = vector.extract_strided_slice %404 {offsets = [0, 0], sizes = [64, 17], strides = [1, 1]} : vector<64x22xbf16> to vector<64x17xbf16>
    %413 = tpu.concatenate %411, %412 in 1 : vector<64x5xbf16>, vector<64x17xbf16> -> vector<64x22xbf16>
    %cst_175 = arith.constant 0.000000e+00 : bf16
    %414 = vector.broadcast %cst_175 : bf16 to vector<64x1xbf16>
    %415 = vector.extract_strided_slice %404 {offsets = [0, 0], sizes = [64, 21], strides = [1, 1]} : vector<64x22xbf16> to vector<64x21xbf16>
    %416 = tpu.concatenate %414, %415 in 1 : vector<64x1xbf16>, vector<64x21xbf16> -> vector<64x22xbf16>
    %417 = vector.extract_strided_slice %404 {offsets = [0, 1], sizes = [64, 21], strides = [1, 1]} : vector<64x22xbf16> to vector<64x21xbf16>
    %cst_176 = arith.constant 0.000000e+00 : bf16
    %418 = vector.broadcast %cst_176 : bf16 to vector<64x1xbf16>
    %419 = tpu.concatenate %417, %418 in 1 : vector<64x21xbf16>, vector<64x1xbf16> -> vector<64x22xbf16>
    %420 = vector.extract_strided_slice %404 {offsets = [0, 5], sizes = [64, 17], strides = [1, 1]} : vector<64x22xbf16> to vector<64x17xbf16>
    %cst_177 = arith.constant 0.000000e+00 : bf16
    %421 = vector.broadcast %cst_177 : bf16 to vector<64x5xbf16>
    %422 = tpu.concatenate %420, %421 in 1 : vector<64x17xbf16>, vector<64x5xbf16> -> vector<64x22xbf16>
    %423 = vector.extract_strided_slice %404 {offsets = [0, 6], sizes = [64, 16], strides = [1, 1]} : vector<64x22xbf16> to vector<64x16xbf16>
    %cst_178 = arith.constant 0.000000e+00 : bf16
    %424 = vector.broadcast %cst_178 : bf16 to vector<64x6xbf16>
    %425 = tpu.concatenate %423, %424 in 1 : vector<64x16xbf16>, vector<64x6xbf16> -> vector<64x22xbf16>
    %426 = vector.extract_strided_slice %404 {offsets = [0, 7], sizes = [64, 15], strides = [1, 1]} : vector<64x22xbf16> to vector<64x15xbf16>
    %cst_179 = arith.constant 0.000000e+00 : bf16
    %427 = vector.broadcast %cst_179 : bf16 to vector<64x7xbf16>
    %428 = tpu.concatenate %426, %427 in 1 : vector<64x15xbf16>, vector<64x7xbf16> -> vector<64x22xbf16>
    %429 = tpu.concatenate %407, %410, %413, %416, %404, %419, %422, %425, %428 in 0 : vector<64x22xbf16>, vector<64x22xbf16>, vector<64x22xbf16>, vector<64x22xbf16>, vector<64x22xbf16>, vector<64x22xbf16>, vector<64x22xbf16>, vector<64x22xbf16>, vector<64x22xbf16> -> vector<576x22xbf16>
    %c0_180 = arith.constant 0 : index
    %c0_181 = arith.constant 0 : index
    %430 = vector.load %arg29[%c0_180, %c0_181] : memref<64x576xbf16, #tpu.memory_space<vmem>>, vector<64x576xbf16>
    %cst_182 = arith.constant dense<0.000000e+00> : vector<64x22xf32>
    %431 = tpu.matmul %430, %429, %cst_182 {dimension_numbers = #tpu.dot_dimension_numbers<[1], [0], [0], [1], [0, 0, 1, 1], [], []>} : vector<64x576xbf16>, vector<576x22xbf16>, vector<64x22xf32> -> vector<64x22xf32>
    %c0_183 = arith.constant 0 : index
    %c0_184 = arith.constant 0 : index
    %432 = vector.load %arg30[%c0_183, %c0_184] : memref<64x1xf32, #tpu.memory_space<vmem>>, vector<64x1xf32>
    %433 = vector.broadcast %432 : vector<64x1xf32> to vector<64x22xf32>
    %434 = arith.addf %431, %433 : vector<64x22xf32>
    %cst_185 = arith.constant 0.000000e+00 : f32
    %435 = vector.broadcast %cst_185 : f32 to vector<64x22xf32>
    %436 = arith.maximumf %434, %435 : vector<64x22xf32>
    %c0_186 = arith.constant 0 : index
    %c0_187 = arith.constant 0 : index
    %437 = vector.load %arg4[%c0_186, %c0_187] : memref<1x22xf32, #tpu.memory_space<vmem>>, vector<1x22xf32>
    %438 = vector.broadcast %437 : vector<1x22xf32> to vector<64x22xf32>
    %439 = arith.mulf %436, %438 : vector<64x22xf32>
    %440 = arith.truncf %439 : vector<64x22xf32> to vector<64x22xbf16>
    %cst_188 = arith.constant 0.000000e+00 : bf16
    %441 = vector.broadcast %cst_188 : bf16 to vector<64x7xbf16>
    %442 = vector.extract_strided_slice %440 {offsets = [0, 0], sizes = [64, 15], strides = [1, 1]} : vector<64x22xbf16> to vector<64x15xbf16>
    %443 = tpu.concatenate %441, %442 in 1 : vector<64x7xbf16>, vector<64x15xbf16> -> vector<64x22xbf16>
    %cst_189 = arith.constant 0.000000e+00 : bf16
    %444 = vector.broadcast %cst_189 : bf16 to vector<64x6xbf16>
    %445 = vector.extract_strided_slice %440 {offsets = [0, 0], sizes = [64, 16], strides = [1, 1]} : vector<64x22xbf16> to vector<64x16xbf16>
    %446 = tpu.concatenate %444, %445 in 1 : vector<64x6xbf16>, vector<64x16xbf16> -> vector<64x22xbf16>
    %cst_190 = arith.constant 0.000000e+00 : bf16
    %447 = vector.broadcast %cst_190 : bf16 to vector<64x5xbf16>
    %448 = vector.extract_strided_slice %440 {offsets = [0, 0], sizes = [64, 17], strides = [1, 1]} : vector<64x22xbf16> to vector<64x17xbf16>
    %449 = tpu.concatenate %447, %448 in 1 : vector<64x5xbf16>, vector<64x17xbf16> -> vector<64x22xbf16>
    %cst_191 = arith.constant 0.000000e+00 : bf16
    %450 = vector.broadcast %cst_191 : bf16 to vector<64x1xbf16>
    %451 = vector.extract_strided_slice %440 {offsets = [0, 0], sizes = [64, 21], strides = [1, 1]} : vector<64x22xbf16> to vector<64x21xbf16>
    %452 = tpu.concatenate %450, %451 in 1 : vector<64x1xbf16>, vector<64x21xbf16> -> vector<64x22xbf16>
    %453 = vector.extract_strided_slice %440 {offsets = [0, 1], sizes = [64, 21], strides = [1, 1]} : vector<64x22xbf16> to vector<64x21xbf16>
    %cst_192 = arith.constant 0.000000e+00 : bf16
    %454 = vector.broadcast %cst_192 : bf16 to vector<64x1xbf16>
    %455 = tpu.concatenate %453, %454 in 1 : vector<64x21xbf16>, vector<64x1xbf16> -> vector<64x22xbf16>
    %456 = vector.extract_strided_slice %440 {offsets = [0, 5], sizes = [64, 17], strides = [1, 1]} : vector<64x22xbf16> to vector<64x17xbf16>
    %cst_193 = arith.constant 0.000000e+00 : bf16
    %457 = vector.broadcast %cst_193 : bf16 to vector<64x5xbf16>
    %458 = tpu.concatenate %456, %457 in 1 : vector<64x17xbf16>, vector<64x5xbf16> -> vector<64x22xbf16>
    %459 = vector.extract_strided_slice %440 {offsets = [0, 6], sizes = [64, 16], strides = [1, 1]} : vector<64x22xbf16> to vector<64x16xbf16>
    %cst_194 = arith.constant 0.000000e+00 : bf16
    %460 = vector.broadcast %cst_194 : bf16 to vector<64x6xbf16>
    %461 = tpu.concatenate %459, %460 in 1 : vector<64x16xbf16>, vector<64x6xbf16> -> vector<64x22xbf16>
    %462 = vector.extract_strided_slice %440 {offsets = [0, 7], sizes = [64, 15], strides = [1, 1]} : vector<64x22xbf16> to vector<64x15xbf16>
    %cst_195 = arith.constant 0.000000e+00 : bf16
    %463 = vector.broadcast %cst_195 : bf16 to vector<64x7xbf16>
    %464 = tpu.concatenate %462, %463 in 1 : vector<64x15xbf16>, vector<64x7xbf16> -> vector<64x22xbf16>
    %465 = tpu.concatenate %443, %446, %449, %452, %440, %455, %458, %461, %464 in 0 : vector<64x22xbf16>, vector<64x22xbf16>, vector<64x22xbf16>, vector<64x22xbf16>, vector<64x22xbf16>, vector<64x22xbf16>, vector<64x22xbf16>, vector<64x22xbf16>, vector<64x22xbf16> -> vector<576x22xbf16>
    %c0_196 = arith.constant 0 : index
    %c0_197 = arith.constant 0 : index
    %466 = vector.load %arg31[%c0_196, %c0_197] : memref<64x576xbf16, #tpu.memory_space<vmem>>, vector<64x576xbf16>
    %cst_198 = arith.constant dense<0.000000e+00> : vector<64x22xf32>
    %467 = tpu.matmul %466, %465, %cst_198 {dimension_numbers = #tpu.dot_dimension_numbers<[1], [0], [0], [1], [0, 0, 1, 1], [], []>} : vector<64x576xbf16>, vector<576x22xbf16>, vector<64x22xf32> -> vector<64x22xf32>
    %c0_199 = arith.constant 0 : index
    %c0_200 = arith.constant 0 : index
    %468 = vector.load %arg32[%c0_199, %c0_200] : memref<64x1xf32, #tpu.memory_space<vmem>>, vector<64x1xf32>
    %469 = vector.broadcast %468 : vector<64x1xf32> to vector<64x22xf32>
    %470 = arith.addf %467, %469 : vector<64x22xf32>
    %cst_201 = arith.constant 0.000000e+00 : f32
    %471 = vector.broadcast %cst_201 : f32 to vector<64x22xf32>
    %472 = arith.maximumf %470, %471 : vector<64x22xf32>
    %c0_202 = arith.constant 0 : index
    %c0_203 = arith.constant 0 : index
    %473 = vector.load %arg4[%c0_202, %c0_203] : memref<1x22xf32, #tpu.memory_space<vmem>>, vector<1x22xf32>
    %474 = vector.broadcast %473 : vector<1x22xf32> to vector<64x22xf32>
    %475 = arith.mulf %472, %474 : vector<64x22xf32>
    %476 = arith.truncf %475 : vector<64x22xf32> to vector<64x22xbf16>
    %cst_204 = arith.constant 0.000000e+00 : bf16
    %477 = vector.broadcast %cst_204 : bf16 to vector<64x7xbf16>
    %478 = vector.extract_strided_slice %476 {offsets = [0, 0], sizes = [64, 15], strides = [1, 1]} : vector<64x22xbf16> to vector<64x15xbf16>
    %479 = tpu.concatenate %477, %478 in 1 : vector<64x7xbf16>, vector<64x15xbf16> -> vector<64x22xbf16>
    %cst_205 = arith.constant 0.000000e+00 : bf16
    %480 = vector.broadcast %cst_205 : bf16 to vector<64x6xbf16>
    %481 = vector.extract_strided_slice %476 {offsets = [0, 0], sizes = [64, 16], strides = [1, 1]} : vector<64x22xbf16> to vector<64x16xbf16>
    %482 = tpu.concatenate %480, %481 in 1 : vector<64x6xbf16>, vector<64x16xbf16> -> vector<64x22xbf16>
    %cst_206 = arith.constant 0.000000e+00 : bf16
    %483 = vector.broadcast %cst_206 : bf16 to vector<64x5xbf16>
    %484 = vector.extract_strided_slice %476 {offsets = [0, 0], sizes = [64, 17], strides = [1, 1]} : vector<64x22xbf16> to vector<64x17xbf16>
    %485 = tpu.concatenate %483, %484 in 1 : vector<64x5xbf16>, vector<64x17xbf16> -> vector<64x22xbf16>
    %cst_207 = arith.constant 0.000000e+00 : bf16
    %486 = vector.broadcast %cst_207 : bf16 to vector<64x1xbf16>
    %487 = vector.extract_strided_slice %476 {offsets = [0, 0], sizes = [64, 21], strides = [1, 1]} : vector<64x22xbf16> to vector<64x21xbf16>
    %488 = tpu.concatenate %486, %487 in 1 : vector<64x1xbf16>, vector<64x21xbf16> -> vector<64x22xbf16>
    %489 = vector.extract_strided_slice %476 {offsets = [0, 1], sizes = [64, 21], strides = [1, 1]} : vector<64x22xbf16> to vector<64x21xbf16>
    %cst_208 = arith.constant 0.000000e+00 : bf16
    %490 = vector.broadcast %cst_208 : bf16 to vector<64x1xbf16>
    %491 = tpu.concatenate %489, %490 in 1 : vector<64x21xbf16>, vector<64x1xbf16> -> vector<64x22xbf16>
    %492 = vector.extract_strided_slice %476 {offsets = [0, 5], sizes = [64, 17], strides = [1, 1]} : vector<64x22xbf16> to vector<64x17xbf16>
    %cst_209 = arith.constant 0.000000e+00 : bf16
    %493 = vector.broadcast %cst_209 : bf16 to vector<64x5xbf16>
    %494 = tpu.concatenate %492, %493 in 1 : vector<64x17xbf16>, vector<64x5xbf16> -> vector<64x22xbf16>
    %495 = vector.extract_strided_slice %476 {offsets = [0, 6], sizes = [64, 16], strides = [1, 1]} : vector<64x22xbf16> to vector<64x16xbf16>
    %cst_210 = arith.constant 0.000000e+00 : bf16
    %496 = vector.broadcast %cst_210 : bf16 to vector<64x6xbf16>
    %497 = tpu.concatenate %495, %496 in 1 : vector<64x16xbf16>, vector<64x6xbf16> -> vector<64x22xbf16>
    %498 = vector.extract_strided_slice %476 {offsets = [0, 7], sizes = [64, 15], strides = [1, 1]} : vector<64x22xbf16> to vector<64x15xbf16>
    %cst_211 = arith.constant 0.000000e+00 : bf16
    %499 = vector.broadcast %cst_211 : bf16 to vector<64x7xbf16>
    %500 = tpu.concatenate %498, %499 in 1 : vector<64x15xbf16>, vector<64x7xbf16> -> vector<64x22xbf16>
    %501 = tpu.concatenate %479, %482, %485, %488, %476, %491, %494, %497, %500 in 0 : vector<64x22xbf16>, vector<64x22xbf16>, vector<64x22xbf16>, vector<64x22xbf16>, vector<64x22xbf16>, vector<64x22xbf16>, vector<64x22xbf16>, vector<64x22xbf16>, vector<64x22xbf16> -> vector<576x22xbf16>
    %c0_212 = arith.constant 0 : index
    %c0_213 = arith.constant 0 : index
    %502 = vector.load %arg33[%c0_212, %c0_213] : memref<64x576xbf16, #tpu.memory_space<vmem>>, vector<64x576xbf16>
    %cst_214 = arith.constant dense<0.000000e+00> : vector<64x22xf32>
    %503 = tpu.matmul %502, %501, %cst_214 {dimension_numbers = #tpu.dot_dimension_numbers<[1], [0], [0], [1], [0, 0, 1, 1], [], []>} : vector<64x576xbf16>, vector<576x22xbf16>, vector<64x22xf32> -> vector<64x22xf32>
    %c0_215 = arith.constant 0 : index
    %c0_216 = arith.constant 0 : index
    %504 = vector.load %arg34[%c0_215, %c0_216] : memref<64x1xf32, #tpu.memory_space<vmem>>, vector<64x1xf32>
    %505 = vector.broadcast %504 : vector<64x1xf32> to vector<64x22xf32>
    %506 = arith.addf %503, %505 : vector<64x22xf32>
    %cst_217 = arith.constant 0.000000e+00 : f32
    %507 = vector.broadcast %cst_217 : f32 to vector<64x22xf32>
    %508 = arith.maximumf %506, %507 : vector<64x22xf32>
    %509 = vector.extract_strided_slice %508 {offsets = [0, 0], sizes = [64, 15], strides = [1, 1]} : vector<64x22xf32> to vector<64x15xf32>
    %510 = vector.extract_strided_slice %508 {offsets = [0, 1], sizes = [64, 15], strides = [1, 1]} : vector<64x22xf32> to vector<64x15xf32>
    %511 = arith.maximumf %509, %510 : vector<64x15xf32>
    %512 = vector.extract_strided_slice %508 {offsets = [0, 6], sizes = [64, 15], strides = [1, 1]} : vector<64x22xf32> to vector<64x15xf32>
    %513 = vector.extract_strided_slice %508 {offsets = [0, 7], sizes = [64, 15], strides = [1, 1]} : vector<64x22xf32> to vector<64x15xf32>
    %514 = arith.maximumf %512, %513 : vector<64x15xf32>
    %515 = arith.maximumf %511, %514 : vector<64x15xf32>
    %516 = arith.truncf %515 : vector<64x15xf32> to vector<64x15xbf16>
    %c0_218 = arith.constant 0 : index
    %c0_219 = arith.constant 0 : index
    %517 = vector.load %arg9[%c0_218, %c0_219] : memref<3x4xbf16, #tpu.memory_space<vmem>>, vector<3x4xbf16>
    %518 = vector.extract_strided_slice %516 {offsets = [0, 0], sizes = [64, 3], strides = [1, 1]} : vector<64x15xbf16> to vector<64x3xbf16>
    %cst_220 = arith.constant dense<0.000000e+00> : vector<64x4xf32>
    %519 = tpu.matmul %518, %517, %cst_220 {dimension_numbers = #tpu.dot_dimension_numbers<[1], [0], [0], [1], [0, 0, 1, 1], [], []>} : vector<64x3xbf16>, vector<3x4xbf16>, vector<64x4xf32> -> vector<64x4xf32>
    %520 = vector.extract_strided_slice %516 {offsets = [0, 12], sizes = [64, 3], strides = [1, 1]} : vector<64x15xbf16> to vector<64x3xbf16>
    %cst_221 = arith.constant dense<0.000000e+00> : vector<64x4xf32>
    %521 = tpu.matmul %520, %517, %cst_221 {dimension_numbers = #tpu.dot_dimension_numbers<[1], [0], [0], [1], [0, 0, 1, 1], [], []>} : vector<64x3xbf16>, vector<3x4xbf16>, vector<64x4xf32> -> vector<64x4xf32>
    %522 = tpu.concatenate %519, %521 in 1 : vector<64x4xf32>, vector<64x4xf32> -> vector<64x8xf32>
    %523 = vector.extract_strided_slice %522 {offsets = [0, 0], sizes = [64, 6], strides = [1, 1]} : vector<64x8xf32> to vector<64x6xf32>
    %524 = arith.truncf %523 : vector<64x6xf32> to vector<64x6xbf16>
    %cst_222 = arith.constant 0.000000e+00 : bf16
    %525 = vector.broadcast %cst_222 : bf16 to vector<64x5xbf16>
    %526 = vector.extract_strided_slice %524 {offsets = [0, 0], sizes = [64, 1], strides = [1, 1]} : vector<64x6xbf16> to vector<64x1xbf16>
    %527 = tpu.concatenate %525, %526 in 1 : vector<64x5xbf16>, vector<64x1xbf16> -> vector<64x6xbf16>
    %cst_223 = arith.constant 0.000000e+00 : bf16
    %528 = vector.broadcast %cst_223 : bf16 to vector<64x4xbf16>
    %529 = vector.extract_strided_slice %524 {offsets = [0, 0], sizes = [64, 2], strides = [1, 1]} : vector<64x6xbf16> to vector<64x2xbf16>
    %530 = tpu.concatenate %528, %529 in 1 : vector<64x4xbf16>, vector<64x2xbf16> -> vector<64x6xbf16>
    %cst_224 = arith.constant 0.000000e+00 : bf16
    %531 = vector.broadcast %cst_224 : bf16 to vector<64x3xbf16>
    %532 = vector.extract_strided_slice %524 {offsets = [0, 0], sizes = [64, 3], strides = [1, 1]} : vector<64x6xbf16> to vector<64x3xbf16>
    %533 = tpu.concatenate %531, %532 in 1 : vector<64x3xbf16>, vector<64x3xbf16> -> vector<64x6xbf16>
    %cst_225 = arith.constant 0.000000e+00 : bf16
    %534 = vector.broadcast %cst_225 : bf16 to vector<64x1xbf16>
    %535 = vector.extract_strided_slice %524 {offsets = [0, 0], sizes = [64, 5], strides = [1, 1]} : vector<64x6xbf16> to vector<64x5xbf16>
    %536 = tpu.concatenate %534, %535 in 1 : vector<64x1xbf16>, vector<64x5xbf16> -> vector<64x6xbf16>
    %537 = vector.extract_strided_slice %524 {offsets = [0, 1], sizes = [64, 5], strides = [1, 1]} : vector<64x6xbf16> to vector<64x5xbf16>
    %cst_226 = arith.constant 0.000000e+00 : bf16
    %538 = vector.broadcast %cst_226 : bf16 to vector<64x1xbf16>
    %539 = tpu.concatenate %537, %538 in 1 : vector<64x5xbf16>, vector<64x1xbf16> -> vector<64x6xbf16>
    %540 = vector.extract_strided_slice %524 {offsets = [0, 3], sizes = [64, 3], strides = [1, 1]} : vector<64x6xbf16> to vector<64x3xbf16>
    %cst_227 = arith.constant 0.000000e+00 : bf16
    %541 = vector.broadcast %cst_227 : bf16 to vector<64x3xbf16>
    %542 = tpu.concatenate %540, %541 in 1 : vector<64x3xbf16>, vector<64x3xbf16> -> vector<64x6xbf16>
    %543 = vector.extract_strided_slice %524 {offsets = [0, 4], sizes = [64, 2], strides = [1, 1]} : vector<64x6xbf16> to vector<64x2xbf16>
    %cst_228 = arith.constant 0.000000e+00 : bf16
    %544 = vector.broadcast %cst_228 : bf16 to vector<64x4xbf16>
    %545 = tpu.concatenate %543, %544 in 1 : vector<64x2xbf16>, vector<64x4xbf16> -> vector<64x6xbf16>
    %546 = vector.extract_strided_slice %524 {offsets = [0, 5], sizes = [64, 1], strides = [1, 1]} : vector<64x6xbf16> to vector<64x1xbf16>
    %cst_229 = arith.constant 0.000000e+00 : bf16
    %547 = vector.broadcast %cst_229 : bf16 to vector<64x5xbf16>
    %548 = tpu.concatenate %546, %547 in 1 : vector<64x1xbf16>, vector<64x5xbf16> -> vector<64x6xbf16>
    %549 = tpu.concatenate %527, %530, %533, %536, %524, %539, %542, %545, %548 in 0 : vector<64x6xbf16>, vector<64x6xbf16>, vector<64x6xbf16>, vector<64x6xbf16>, vector<64x6xbf16>, vector<64x6xbf16>, vector<64x6xbf16>, vector<64x6xbf16>, vector<64x6xbf16> -> vector<576x6xbf16>
    %c0_230 = arith.constant 0 : index
    %c0_231 = arith.constant 0 : index
    %550 = vector.load %arg35[%c0_230, %c0_231] : memref<64x576xbf16, #tpu.memory_space<vmem>>, vector<64x576xbf16>
    %cst_232 = arith.constant dense<0.000000e+00> : vector<64x6xf32>
    %551 = tpu.matmul %550, %549, %cst_232 {dimension_numbers = #tpu.dot_dimension_numbers<[1], [0], [0], [1], [0, 0, 1, 1], [], []>} : vector<64x576xbf16>, vector<576x6xbf16>, vector<64x6xf32> -> vector<64x6xf32>
    %c0_233 = arith.constant 0 : index
    %c0_234 = arith.constant 0 : index
    %552 = vector.load %arg36[%c0_233, %c0_234] : memref<64x1xf32, #tpu.memory_space<vmem>>, vector<64x1xf32>
    %553 = vector.broadcast %552 : vector<64x1xf32> to vector<64x6xf32>
    %554 = arith.addf %551, %553 : vector<64x6xf32>
    %cst_235 = arith.constant 0.000000e+00 : f32
    %555 = vector.broadcast %cst_235 : f32 to vector<64x6xf32>
    %556 = arith.maximumf %554, %555 : vector<64x6xf32>
    %c0_236 = arith.constant 0 : index
    %c0_237 = arith.constant 0 : index
    %557 = vector.load %arg5[%c0_236, %c0_237] : memref<1x6xf32, #tpu.memory_space<vmem>>, vector<1x6xf32>
    %558 = vector.broadcast %557 : vector<1x6xf32> to vector<64x6xf32>
    %559 = arith.mulf %556, %558 : vector<64x6xf32>
    %560 = arith.truncf %559 : vector<64x6xf32> to vector<64x6xbf16>
    %cst_238 = arith.constant 0.000000e+00 : bf16
    %561 = vector.broadcast %cst_238 : bf16 to vector<64x5xbf16>
    %562 = vector.extract_strided_slice %560 {offsets = [0, 0], sizes = [64, 1], strides = [1, 1]} : vector<64x6xbf16> to vector<64x1xbf16>
    %563 = tpu.concatenate %561, %562 in 1 : vector<64x5xbf16>, vector<64x1xbf16> -> vector<64x6xbf16>
    %cst_239 = arith.constant 0.000000e+00 : bf16
    %564 = vector.broadcast %cst_239 : bf16 to vector<64x4xbf16>
    %565 = vector.extract_strided_slice %560 {offsets = [0, 0], sizes = [64, 2], strides = [1, 1]} : vector<64x6xbf16> to vector<64x2xbf16>
    %566 = tpu.concatenate %564, %565 in 1 : vector<64x4xbf16>, vector<64x2xbf16> -> vector<64x6xbf16>
    %cst_240 = arith.constant 0.000000e+00 : bf16
    %567 = vector.broadcast %cst_240 : bf16 to vector<64x3xbf16>
    %568 = vector.extract_strided_slice %560 {offsets = [0, 0], sizes = [64, 3], strides = [1, 1]} : vector<64x6xbf16> to vector<64x3xbf16>
    %569 = tpu.concatenate %567, %568 in 1 : vector<64x3xbf16>, vector<64x3xbf16> -> vector<64x6xbf16>
    %cst_241 = arith.constant 0.000000e+00 : bf16
    %570 = vector.broadcast %cst_241 : bf16 to vector<64x1xbf16>
    %571 = vector.extract_strided_slice %560 {offsets = [0, 0], sizes = [64, 5], strides = [1, 1]} : vector<64x6xbf16> to vector<64x5xbf16>
    %572 = tpu.concatenate %570, %571 in 1 : vector<64x1xbf16>, vector<64x5xbf16> -> vector<64x6xbf16>
    %573 = vector.extract_strided_slice %560 {offsets = [0, 1], sizes = [64, 5], strides = [1, 1]} : vector<64x6xbf16> to vector<64x5xbf16>
    %cst_242 = arith.constant 0.000000e+00 : bf16
    %574 = vector.broadcast %cst_242 : bf16 to vector<64x1xbf16>
    %575 = tpu.concatenate %573, %574 in 1 : vector<64x5xbf16>, vector<64x1xbf16> -> vector<64x6xbf16>
    %576 = vector.extract_strided_slice %560 {offsets = [0, 3], sizes = [64, 3], strides = [1, 1]} : vector<64x6xbf16> to vector<64x3xbf16>
    %cst_243 = arith.constant 0.000000e+00 : bf16
    %577 = vector.broadcast %cst_243 : bf16 to vector<64x3xbf16>
    %578 = tpu.concatenate %576, %577 in 1 : vector<64x3xbf16>, vector<64x3xbf16> -> vector<64x6xbf16>
    %579 = vector.extract_strided_slice %560 {offsets = [0, 4], sizes = [64, 2], strides = [1, 1]} : vector<64x6xbf16> to vector<64x2xbf16>
    %cst_244 = arith.constant 0.000000e+00 : bf16
    %580 = vector.broadcast %cst_244 : bf16 to vector<64x4xbf16>
    %581 = tpu.concatenate %579, %580 in 1 : vector<64x2xbf16>, vector<64x4xbf16> -> vector<64x6xbf16>
    %582 = vector.extract_strided_slice %560 {offsets = [0, 5], sizes = [64, 1], strides = [1, 1]} : vector<64x6xbf16> to vector<64x1xbf16>
    %cst_245 = arith.constant 0.000000e+00 : bf16
    %583 = vector.broadcast %cst_245 : bf16 to vector<64x5xbf16>
    %584 = tpu.concatenate %582, %583 in 1 : vector<64x1xbf16>, vector<64x5xbf16> -> vector<64x6xbf16>
    %585 = tpu.concatenate %563, %566, %569, %572, %560, %575, %578, %581, %584 in 0 : vector<64x6xbf16>, vector<64x6xbf16>, vector<64x6xbf16>, vector<64x6xbf16>, vector<64x6xbf16>, vector<64x6xbf16>, vector<64x6xbf16>, vector<64x6xbf16>, vector<64x6xbf16> -> vector<576x6xbf16>
    %c0_246 = arith.constant 0 : index
    %c0_247 = arith.constant 0 : index
    %586 = vector.load %arg37[%c0_246, %c0_247] : memref<64x576xbf16, #tpu.memory_space<vmem>>, vector<64x576xbf16>
    %cst_248 = arith.constant dense<0.000000e+00> : vector<64x6xf32>
    %587 = tpu.matmul %586, %585, %cst_248 {dimension_numbers = #tpu.dot_dimension_numbers<[1], [0], [0], [1], [0, 0, 1, 1], [], []>} : vector<64x576xbf16>, vector<576x6xbf16>, vector<64x6xf32> -> vector<64x6xf32>
    %c0_249 = arith.constant 0 : index
    %c0_250 = arith.constant 0 : index
    %588 = vector.load %arg38[%c0_249, %c0_250] : memref<64x1xf32, #tpu.memory_space<vmem>>, vector<64x1xf32>
    %589 = vector.broadcast %588 : vector<64x1xf32> to vector<64x6xf32>
    %590 = arith.addf %587, %589 : vector<64x6xf32>
    %cst_251 = arith.constant 0.000000e+00 : f32
    %591 = vector.broadcast %cst_251 : f32 to vector<64x6xf32>
    %592 = arith.maximumf %590, %591 : vector<64x6xf32>
    %c0_252 = arith.constant 0 : index
    %c0_253 = arith.constant 0 : index
    %593 = vector.load %arg5[%c0_252, %c0_253] : memref<1x6xf32, #tpu.memory_space<vmem>>, vector<1x6xf32>
    %594 = vector.broadcast %593 : vector<1x6xf32> to vector<64x6xf32>
    %595 = arith.mulf %592, %594 : vector<64x6xf32>
    %596 = arith.truncf %595 : vector<64x6xf32> to vector<64x6xbf16>
    %cst_254 = arith.constant 0.000000e+00 : bf16
    %597 = vector.broadcast %cst_254 : bf16 to vector<64x5xbf16>
    %598 = vector.extract_strided_slice %596 {offsets = [0, 0], sizes = [64, 1], strides = [1, 1]} : vector<64x6xbf16> to vector<64x1xbf16>
    %599 = tpu.concatenate %597, %598 in 1 : vector<64x5xbf16>, vector<64x1xbf16> -> vector<64x6xbf16>
    %cst_255 = arith.constant 0.000000e+00 : bf16
    %600 = vector.broadcast %cst_255 : bf16 to vector<64x4xbf16>
    %601 = vector.extract_strided_slice %596 {offsets = [0, 0], sizes = [64, 2], strides = [1, 1]} : vector<64x6xbf16> to vector<64x2xbf16>
    %602 = tpu.concatenate %600, %601 in 1 : vector<64x4xbf16>, vector<64x2xbf16> -> vector<64x6xbf16>
    %cst_256 = arith.constant 0.000000e+00 : bf16
    %603 = vector.broadcast %cst_256 : bf16 to vector<64x3xbf16>
    %604 = vector.extract_strided_slice %596 {offsets = [0, 0], sizes = [64, 3], strides = [1, 1]} : vector<64x6xbf16> to vector<64x3xbf16>
    %605 = tpu.concatenate %603, %604 in 1 : vector<64x3xbf16>, vector<64x3xbf16> -> vector<64x6xbf16>
    %cst_257 = arith.constant 0.000000e+00 : bf16
    %606 = vector.broadcast %cst_257 : bf16 to vector<64x1xbf16>
    %607 = vector.extract_strided_slice %596 {offsets = [0, 0], sizes = [64, 5], strides = [1, 1]} : vector<64x6xbf16> to vector<64x5xbf16>
    %608 = tpu.concatenate %606, %607 in 1 : vector<64x1xbf16>, vector<64x5xbf16> -> vector<64x6xbf16>
    %609 = vector.extract_strided_slice %596 {offsets = [0, 1], sizes = [64, 5], strides = [1, 1]} : vector<64x6xbf16> to vector<64x5xbf16>
    %cst_258 = arith.constant 0.000000e+00 : bf16
    %610 = vector.broadcast %cst_258 : bf16 to vector<64x1xbf16>
    %611 = tpu.concatenate %609, %610 in 1 : vector<64x5xbf16>, vector<64x1xbf16> -> vector<64x6xbf16>
    %612 = vector.extract_strided_slice %596 {offsets = [0, 3], sizes = [64, 3], strides = [1, 1]} : vector<64x6xbf16> to vector<64x3xbf16>
    %cst_259 = arith.constant 0.000000e+00 : bf16
    %613 = vector.broadcast %cst_259 : bf16 to vector<64x3xbf16>
    %614 = tpu.concatenate %612, %613 in 1 : vector<64x3xbf16>, vector<64x3xbf16> -> vector<64x6xbf16>
    %615 = vector.extract_strided_slice %596 {offsets = [0, 4], sizes = [64, 2], strides = [1, 1]} : vector<64x6xbf16> to vector<64x2xbf16>
    %cst_260 = arith.constant 0.000000e+00 : bf16
    %616 = vector.broadcast %cst_260 : bf16 to vector<64x4xbf16>
    %617 = tpu.concatenate %615, %616 in 1 : vector<64x2xbf16>, vector<64x4xbf16> -> vector<64x6xbf16>
    %618 = vector.extract_strided_slice %596 {offsets = [0, 5], sizes = [64, 1], strides = [1, 1]} : vector<64x6xbf16> to vector<64x1xbf16>
    %cst_261 = arith.constant 0.000000e+00 : bf16
    %619 = vector.broadcast %cst_261 : bf16 to vector<64x5xbf16>
    %620 = tpu.concatenate %618, %619 in 1 : vector<64x1xbf16>, vector<64x5xbf16> -> vector<64x6xbf16>
    %621 = tpu.concatenate %599, %602, %605, %608, %596, %611, %614, %617, %620 in 0 : vector<64x6xbf16>, vector<64x6xbf16>, vector<64x6xbf16>, vector<64x6xbf16>, vector<64x6xbf16>, vector<64x6xbf16>, vector<64x6xbf16>, vector<64x6xbf16>, vector<64x6xbf16> -> vector<576x6xbf16>
    %c0_262 = arith.constant 0 : index
    %c0_263 = arith.constant 0 : index
    %622 = vector.load %arg39[%c0_262, %c0_263] : memref<64x576xbf16, #tpu.memory_space<vmem>>, vector<64x576xbf16>
    %cst_264 = arith.constant dense<0.000000e+00> : vector<64x6xf32>
    %623 = tpu.matmul %622, %621, %cst_264 {dimension_numbers = #tpu.dot_dimension_numbers<[1], [0], [0], [1], [0, 0, 1, 1], [], []>} : vector<64x576xbf16>, vector<576x6xbf16>, vector<64x6xf32> -> vector<64x6xf32>
    %c0_265 = arith.constant 0 : index
    %c0_266 = arith.constant 0 : index
    %624 = vector.load %arg40[%c0_265, %c0_266] : memref<64x1xf32, #tpu.memory_space<vmem>>, vector<64x1xf32>
    %625 = vector.broadcast %624 : vector<64x1xf32> to vector<64x6xf32>
    %626 = arith.addf %623, %625 : vector<64x6xf32>
    %cst_267 = arith.constant 0.000000e+00 : f32
    %627 = vector.broadcast %cst_267 : f32 to vector<64x6xf32>
    %628 = arith.maximumf %626, %627 : vector<64x6xf32>
    %c0_268 = arith.constant 0 : index
    %c0_269 = arith.constant 0 : index
    %629 = vector.load %arg5[%c0_268, %c0_269] : memref<1x6xf32, #tpu.memory_space<vmem>>, vector<1x6xf32>
    %630 = vector.broadcast %629 : vector<1x6xf32> to vector<64x6xf32>
    %631 = arith.mulf %628, %630 : vector<64x6xf32>
    %632 = arith.truncf %631 : vector<64x6xf32> to vector<64x6xbf16>
    %cst_270 = arith.constant 0.000000e+00 : bf16
    %633 = vector.broadcast %cst_270 : bf16 to vector<64x5xbf16>
    %634 = vector.extract_strided_slice %632 {offsets = [0, 0], sizes = [64, 1], strides = [1, 1]} : vector<64x6xbf16> to vector<64x1xbf16>
    %635 = tpu.concatenate %633, %634 in 1 : vector<64x5xbf16>, vector<64x1xbf16> -> vector<64x6xbf16>
    %cst_271 = arith.constant 0.000000e+00 : bf16
    %636 = vector.broadcast %cst_271 : bf16 to vector<64x4xbf16>
    %637 = vector.extract_strided_slice %632 {offsets = [0, 0], sizes = [64, 2], strides = [1, 1]} : vector<64x6xbf16> to vector<64x2xbf16>
    %638 = tpu.concatenate %636, %637 in 1 : vector<64x4xbf16>, vector<64x2xbf16> -> vector<64x6xbf16>
    %cst_272 = arith.constant 0.000000e+00 : bf16
    %639 = vector.broadcast %cst_272 : bf16 to vector<64x3xbf16>
    %640 = vector.extract_strided_slice %632 {offsets = [0, 0], sizes = [64, 3], strides = [1, 1]} : vector<64x6xbf16> to vector<64x3xbf16>
    %641 = tpu.concatenate %639, %640 in 1 : vector<64x3xbf16>, vector<64x3xbf16> -> vector<64x6xbf16>
    %cst_273 = arith.constant 0.000000e+00 : bf16
    %642 = vector.broadcast %cst_273 : bf16 to vector<64x1xbf16>
    %643 = vector.extract_strided_slice %632 {offsets = [0, 0], sizes = [64, 5], strides = [1, 1]} : vector<64x6xbf16> to vector<64x5xbf16>
    %644 = tpu.concatenate %642, %643 in 1 : vector<64x1xbf16>, vector<64x5xbf16> -> vector<64x6xbf16>
    %645 = vector.extract_strided_slice %632 {offsets = [0, 1], sizes = [64, 5], strides = [1, 1]} : vector<64x6xbf16> to vector<64x5xbf16>
    %cst_274 = arith.constant 0.000000e+00 : bf16
    %646 = vector.broadcast %cst_274 : bf16 to vector<64x1xbf16>
    %647 = tpu.concatenate %645, %646 in 1 : vector<64x5xbf16>, vector<64x1xbf16> -> vector<64x6xbf16>
    %648 = vector.extract_strided_slice %632 {offsets = [0, 3], sizes = [64, 3], strides = [1, 1]} : vector<64x6xbf16> to vector<64x3xbf16>
    %cst_275 = arith.constant 0.000000e+00 : bf16
    %649 = vector.broadcast %cst_275 : bf16 to vector<64x3xbf16>
    %650 = tpu.concatenate %648, %649 in 1 : vector<64x3xbf16>, vector<64x3xbf16> -> vector<64x6xbf16>
    %651 = vector.extract_strided_slice %632 {offsets = [0, 4], sizes = [64, 2], strides = [1, 1]} : vector<64x6xbf16> to vector<64x2xbf16>
    %cst_276 = arith.constant 0.000000e+00 : bf16
    %652 = vector.broadcast %cst_276 : bf16 to vector<64x4xbf16>
    %653 = tpu.concatenate %651, %652 in 1 : vector<64x2xbf16>, vector<64x4xbf16> -> vector<64x6xbf16>
    %654 = vector.extract_strided_slice %632 {offsets = [0, 5], sizes = [64, 1], strides = [1, 1]} : vector<64x6xbf16> to vector<64x1xbf16>
    %cst_277 = arith.constant 0.000000e+00 : bf16
    %655 = vector.broadcast %cst_277 : bf16 to vector<64x5xbf16>
    %656 = tpu.concatenate %654, %655 in 1 : vector<64x1xbf16>, vector<64x5xbf16> -> vector<64x6xbf16>
    %657 = tpu.concatenate %635, %638, %641, %644, %632, %647, %650, %653, %656 in 0 : vector<64x6xbf16>, vector<64x6xbf16>, vector<64x6xbf16>, vector<64x6xbf16>, vector<64x6xbf16>, vector<64x6xbf16>, vector<64x6xbf16>, vector<64x6xbf16>, vector<64x6xbf16> -> vector<576x6xbf16>
    %c0_278 = arith.constant 0 : index
    %c0_279 = arith.constant 0 : index
    %658 = vector.load %arg41[%c0_278, %c0_279] : memref<64x576xbf16, #tpu.memory_space<vmem>>, vector<64x576xbf16>
    %cst_280 = arith.constant dense<0.000000e+00> : vector<64x6xf32>
    %659 = tpu.matmul %658, %657, %cst_280 {dimension_numbers = #tpu.dot_dimension_numbers<[1], [0], [0], [1], [0, 0, 1, 1], [], []>} : vector<64x576xbf16>, vector<576x6xbf16>, vector<64x6xf32> -> vector<64x6xf32>
    %c0_281 = arith.constant 0 : index
    %c0_282 = arith.constant 0 : index
    %660 = vector.load %arg42[%c0_281, %c0_282] : memref<64x1xf32, #tpu.memory_space<vmem>>, vector<64x1xf32>
    %661 = vector.broadcast %660 : vector<64x1xf32> to vector<64x6xf32>
    %662 = arith.addf %659, %661 : vector<64x6xf32>
    %cst_283 = arith.constant 0.000000e+00 : f32
    %663 = vector.broadcast %cst_283 : f32 to vector<64x6xf32>
    %664 = arith.maximumf %662, %663 : vector<64x6xf32>
    %665 = vector.extract_strided_slice %664 {offsets = [0, 0], sizes = [64, 1], strides = [1, 1]} : vector<64x6xf32> to vector<64x1xf32>
    %666 = vector.extract_strided_slice %664 {offsets = [0, 1], sizes = [64, 1], strides = [1, 1]} : vector<64x6xf32> to vector<64x1xf32>
    %667 = arith.maximumf %665, %666 : vector<64x1xf32>
    %668 = vector.extract_strided_slice %664 {offsets = [0, 4], sizes = [64, 1], strides = [1, 1]} : vector<64x6xf32> to vector<64x1xf32>
    %669 = vector.extract_strided_slice %664 {offsets = [0, 5], sizes = [64, 1], strides = [1, 1]} : vector<64x6xf32> to vector<64x1xf32>
    %670 = arith.maximumf %668, %669 : vector<64x1xf32>
    %671 = arith.maximumf %667, %670 : vector<64x1xf32>
    %672 = arith.truncf %671 : vector<64x1xf32> to vector<64x1xbf16>
    %c0_284 = arith.constant 0 : index
    %c0_285 = arith.constant 0 : index
    %673 = vector.load %arg43[%c0_284, %c0_285] : memref<64x128xbf16, #tpu.memory_space<vmem>>, vector<64x128xbf16>
    %cst_286 = arith.constant dense<0.000000e+00> : vector<1x128xf32>
    %674 = tpu.matmul %672, %673, %cst_286 {dimension_numbers = #tpu.dot_dimension_numbers<[0], [0], [1], [1], [0, 1, 1, 1], [], []>} : vector<64x1xbf16>, vector<64x128xbf16>, vector<1x128xf32> -> vector<1x128xf32>
    %c0_287 = arith.constant 0 : index
    %c0_288 = arith.constant 0 : index
    %675 = vector.load %arg44[%c0_287, %c0_288] : memref<1x128xf32, #tpu.memory_space<vmem>>, vector<1x128xf32>
    %676 = arith.addf %674, %675 : vector<1x128xf32>
    %cst_289 = arith.constant 0.000000e+00 : f32
    %677 = vector.broadcast %cst_289 : f32 to vector<1x128xf32>
    %678 = arith.maximumf %676, %677 : vector<1x128xf32>
    %679 = arith.truncf %678 : vector<1x128xf32> to vector<1x128xbf16>
    %c0_290 = arith.constant 0 : index
    %c0_291 = arith.constant 0 : index
    %680 = vector.load %arg45[%c0_290, %c0_291] : memref<128x128xbf16, #tpu.memory_space<vmem>>, vector<128x128xbf16>
    %cst_292 = arith.constant dense<0.000000e+00> : vector<1x128xf32>
    %681 = tpu.matmul %679, %680, %cst_292 {dimension_numbers = #tpu.dot_dimension_numbers<[1], [0], [0], [1], [0, 0, 1, 1], [], []>} : vector<1x128xbf16>, vector<128x128xbf16>, vector<1x128xf32> -> vector<1x128xf32>
    %c0_293 = arith.constant 0 : index
    %c0_294 = arith.constant 0 : index
    %682 = vector.load %arg46[%c0_293, %c0_294] : memref<1x128xf32, #tpu.memory_space<vmem>>, vector<1x128xf32>
    %683 = arith.addf %681, %682 : vector<1x128xf32>
    %cst_295 = arith.constant 0.000000e+00 : f32
    %684 = vector.broadcast %cst_295 : f32 to vector<1x128xf32>
    %685 = arith.maximumf %683, %684 : vector<1x128xf32>
    %686 = arith.truncf %685 : vector<1x128xf32> to vector<1x128xbf16>
    %c0_296 = arith.constant 0 : index
    %c0_297 = arith.constant 0 : index
    %687 = vector.load %arg47[%c0_296, %c0_297] : memref<128x10xbf16, #tpu.memory_space<vmem>>, vector<128x10xbf16>
    %cst_298 = arith.constant dense<0.000000e+00> : vector<1x10xf32>
    %688 = tpu.matmul %686, %687, %cst_298 {dimension_numbers = #tpu.dot_dimension_numbers<[1], [0], [0], [1], [0, 0, 1, 1], [], []>} : vector<1x128xbf16>, vector<128x10xbf16>, vector<1x10xf32> -> vector<1x10xf32>
    %c0_299 = arith.constant 0 : index
    %c0_300 = arith.constant 0 : index
    %689 = vector.load %arg48[%c0_299, %c0_300] : memref<1x10xf32, #tpu.memory_space<vmem>>, vector<1x10xf32>
    %690 = arith.addf %688, %689 : vector<1x10xf32>
    %c0_301 = arith.constant 0 : index
    %c0_302 = arith.constant 0 : index
    %691 = vector.load %arg49[%c0_301, %c0_302] : memref<1x10xf32, #tpu.memory_space<vmem>>, vector<1x10xf32>
    tpu.vector_store %arg49[%c0_301, %c0_302], %690 {strides = array<i32>} : memref<1x10xf32, #tpu.memory_space<vmem>>, vector<1x10xf32>,
    return
  }
}

</mosaic_0001>

<bundles_post_ra>
// kernel: vgg_forward.1
= control target key start
LH: loop header
LB: loop body
LE: loop exit
PB: predicated region body
PF: predicated region fallthrough
CT: control target
= control target key end

     0   :  { %s13220_s6 = smov 1   ;;  %s13221_s10 = smov 2   ;;  %s16641_s0 = inlined_call_operand.smem [shape: u32[50], index: -1, kind: input, shape index: {}] }
   0x1   :  { %s13358_s5 = sld [smem:[%s16641_s0]]   ;;  %s13222_s14 = smov 3  }
   0x2   :  { %s13363_s9 = sld [smem:[%s16641_s0 + %s13220_s6]]   ;;  %s13223_s18 = smov 4  }
   0x3   :  { %s13368_s13 = sld [smem:[%s16641_s0 + %s13221_s10]]   ;;  %s13224_s22 = smov 5  }
   0x4   :  { %s13373_s17 = sld [smem:[%s16641_s0 + %s13222_s14]]   ;;  %s13225_s26 = smov 6  }
   0x5   :  { %s13378_s21 = sld [smem:[%s16641_s0 + %s13223_s18]]   ;;  %s13226_s30 = smov 7  }
   0x6   :  { %s13383_s25 = sld [smem:[%s16641_s0 + %s13224_s22]]   ;;  %s13227_s4 = smov 8  }
   0x7   :  { %s13388_s29 = sld [smem:[%s16641_s0 + %s13225_s26]]   ;;  %s13228_s10 = smov 9  }
   0x8   :  { %16672 = sst [smem:[#allocation32_spill]] %s13363_s9  ;;  %s13229_s15 = smov 11  }
   0x9   :  { %16673 = sst [smem:[#allocation33_spill]] %s13368_s13  ;;  %s13230_s20 = smov 12  }
   0xa   :  { %s13393_s3 = sld [smem:[%s16641_s0 + %s13226_s30]]   ;;  %s13231_s26 = smov 13  }
   0xb   :  { %s13398_s8 = sld [smem:[%s16641_s0 + %s13227_s4]]   ;;  %s13232_s1 = smov 14  }
   0xc   :  { %s13403_s14 = sld [smem:[%s16641_s0 + %s13228_s10]]   ;;  %s13233_s7 = smov 15  }
   0xd   :  { %16674 = sst [smem:[#allocation34_spill]] %s13388_s29  ;;  %s13235_s22 = smov 17  }
   0xe   :  { %s13408_s19 = sld [smem:[%s16641_s0 + %s13229_s15]]   ;;  %s13234_s15 = smov 16  }
   0xf   :  { %s13413_s24 = sld [smem:[%s16641_s0 + %s13230_s20]]   ;;  %s13236_s28 = smov 18  }
  0x10   :  { %16675 = sst [smem:[#allocation35_spill]] %s13393_s3 }
  0x11   :  { %16676 = sst [smem:[#allocation36_spill]] %s13398_s8 }
  0x12   :  { %16677 = sst [smem:[#allocation37_spill]] %s13403_s14 }
  0x13   :  { %s13418_s30 = sld [smem:[%s16641_s0 + %s13231_s26]]  }
  0x14   :  { %s13423_s6 = sld [smem:[%s16641_s0 + %s13232_s1]]  }
  0x15   :  { %s13428_s12 = sld [smem:[%s16641_s0 + %s13233_s7]]   ;;  %s13237_s7 = smov 19  }
  0x16   :  { %s13433_s20 = sld [smem:[%s16641_s0 + %s13234_s15]]   ;;  %s13238_s15 = smov 20  }
  0x17   :  { %s13438_s27 = sld [smem:[%s16641_s0 + %s13235_s22]]   ;;  %s13239_s22 = smov 21  }
  0x18   :  { %s13443_s4 = sld [smem:[%s16641_s0 + %s13236_s28]]   ;;  %s13240_s28 = smov 22  }
  0x19   :  { %s13448_s14 = sld [smem:[%s16641_s0 + %s13237_s7]]   ;;  %s13241_s7 = smov 23  }
  0x1a   :  { %16678 = sst [smem:[#allocation38_spill]] %s13423_s6 }
  0x1b   :  { %s13453_s8 = sld [smem:[%s16641_s0 + %s13238_s15]]   ;;  %s13242_s15 = smov 24  }
  0x1c   :  { %16679 = sst [smem:[#allocation39_spill]] %s13433_s20 }
  0x1d   :  { %s13458_s3 = sld [smem:[%s16641_s0 + %s13239_s22]]   ;;  %s13243_s22 = smov 25  }
  0x1e   :  { %16680 = sst [smem:[#allocation40_spill]] %s13443_s4 }
  0x1f   :  { %16681 = sst [smem:[#allocation41_spill]] %s13448_s14 }
  0x20   :  { %s13463_s4 = sld [smem:[%s16641_s0 + %s13240_s28]]   ;;  %s13244_s28 = smov 26  }
  0x21   :  { %16682 = sst [smem:[#allocation42_spill]] %s13453_s8 }
  0x22   :  { %s13468_s14 = sld [smem:[%s16641_s0 + %s13241_s7]]   ;;  %s13245_s7 = smov 27  }
  0x23   :  { %s13473_s8 = sld [smem:[%s16641_s0 + %s13242_s15]]   ;;  %s13246_s15 = smov 28  }
  0x24   :  { %s13478_s13 = sld [smem:[%s16641_s0 + %s13243_s22]]   ;;  %s13247_s22 = smov 29  }
  0x25   :  { %s13488_s20 = sld [smem:[%s16641_s0 + %s13245_s7]]   ;;  %s13249_s7 = smov 31  }
  0x26   :  { %16683 = sst [smem:[#allocation43_spill]] %s13463_s4 }
  0x27   :  { %s13483_s4 = sld [smem:[%s16641_s0 + %s13244_s28]]   ;;  %s13248_s28 = smov 30  }
  0x28   :  { %s13498_s29 = sld [smem:[%s16641_s0 + %s13247_s22]]   ;;  %s13251_s22 = smov 33  }
  0x29   :  { %16684 = sst [smem:[#allocation44_spill]] %s13473_s8 }
  0x2a   :  { %s13493_s8 = sld [smem:[%s16641_s0 + %s13246_s15]]   ;;  %s13250_s15 = smov 32  }
  0x2b   :  { %16686 = sst [smem:[#allocation46_spill]] %s13488_s20 }
  0x2c   :  { %s13508_s20 = sld [smem:[%s16641_s0 + %s13249_s7]]   ;;  %s13253_s7 = smov 35  }
  0x2d   :  { %16685 = sst [smem:[#allocation45_spill]] %s13483_s4 }
  0x2e   :  { %16688 = sst [smem:[#allocation48_spill]] %s13498_s29 }
  0x2f   :  { %s13503_s4 = sld [smem:[%s16641_s0 + %s13248_s28]]   ;;  %s13252_s28 = smov 34  }
  0x30   :  { %16687 = sst [smem:[#allocation47_spill]] %s13493_s8 }
  0x31   :  { %s13513_s8 = sld [smem:[%s16641_s0 + %s13250_s15]]   ;;  %s13254_s15 = smov 36  }
  0x32   :  { %16690 = sst [smem:[#allocation50_spill]] %s13508_s20 }
  0x33   :  { %s13518_s29 = sld [smem:[%s16641_s0 + %s13251_s22]]   ;;  %s13255_s22 = smov 37  }
  0x34   :  { %s13528_s20 = sld [smem:[%s16641_s0 + %s13253_s7]]   ;;  %s13257_s7 = smov 39  }
  0x35   :  { %16689 = sst [smem:[#allocation49_spill]] %s13503_s4 }
  0x36   :  { %s13523_s4 = sld [smem:[%s16641_s0 + %s13252_s28]]   ;;  %s13256_s28 = smov 38  }
  0x37   :  { %16691 = sst [smem:[#allocation51_spill]] %s13513_s8 }
  0x38   :  { %s13533_s8 = sld [smem:[%s16641_s0 + %s13254_s15]]   ;;  %s13258_s15 = smov 40  }
  0x39   :  { %16692 = sst [smem:[#allocation52_spill]] %s13518_s29 }
  0x3a   :  { %16694 = sst [smem:[#allocation54_spill]] %s13528_s20 }
  0x3b   :  { %s13538_s29 = sld [smem:[%s16641_s0 + %s13255_s22]]   ;;  %s13259_s22 = smov 41  }
  0x3c   :  { %16693 = sst [smem:[#allocation53_spill]] %s13523_s4 }
  0x3d   :  { %s13543_s4 = sld [smem:[%s16641_s0 + %s13256_s28]]   ;;  %s13260_s28 = smov 42  }
  0x3e   :  { %16695 = sst [smem:[#allocation55_spill]] %s13533_s8 }
  0x3f   :  { %s13548_s20 = sld [smem:[%s16641_s0 + %s13257_s7]]   ;;  %s13261_s7 = smov 43  }
  0x40   :  { %s13553_s8 = sld [smem:[%s16641_s0 + %s13258_s15]]   ;;  %s13262_s15 = smov 44  }
  0x41   :  { %16696 = sst [smem:[#allocation56_spill]] %s13538_s29 }
  0x42   :  { %s13558_s29 = sld [smem:[%s16641_s0 + %s13259_s22]]   ;;  %s13263_s22 = smov 45  }
  0x43   :  { %16697 = sst [smem:[#allocation57_spill]] %s13543_s4 }
  0x44   :  { %s13563_s4 = sld [smem:[%s16641_s0 + %s13260_s28]]   ;;  %s13264_s28 = smov 46  }
  0x45   :  { %16698 = sst [smem:[#allocation58_spill]] %s13548_s20 }
  0x46   :  { %16699 = sst [smem:[#allocation59_spill]] %s13553_s8 }
  0x47   :  { %s13568_s20 = sld [smem:[%s16641_s0 + %s13261_s7]]   ;;  %s13265_s7 = smov 47  }
  0x48   :  { %16700 = sst [smem:[#allocation60_spill]] %s13558_s29 }
  0x49   :  { %s13573_s8 = sld [smem:[%s16641_s0 + %s13262_s15]]   ;;  %s13266_s15 = smov 48  }
  0x4a   :  { %16701 = sst [smem:[#allocation61_spill]] %s13563_s4 }
  0x4b   :  { %s13578_s29 = sld [smem:[%s16641_s0 + %s13263_s22]]   ;;  %s13267_s22 = smov 49  }
  0x4c   :  { %s13583_s4 = sld [smem:[%s16641_s0 + %s13264_s28]]  }
  0x4d   :  { %s13588_s6 = sld [smem:[%s16641_s0 + %s13265_s7]]  }
  0x4e   :  { %s13593_s9 = sld [smem:[%s16641_s0 + %s13266_s15]]  }
  0x51   :  { %16702 = sst [smem:[#allocation62_spill]] %s13578_s29 }
  0x52   :  { %s13598_s29 = sld [smem:[%s16641_s0 + %s13267_s22]]  }
  0x53   :  { %104 = vsyncpa [#allocation3], 0 }
  0x54   :  { %105 = vsyncpa [#allocation6], 0 }
  0x55   :  { %106 = vsyncpa [#allocation9], 0 }
  0x56   :  { %107 = vsyncpa [#allocation12], 0 }
  0x57   :  { %108 = vsyncpa [#allocation15], 0 }
  0x58   :  { %109 = vsyncpa [#allocation18], 0 }
  0x59   :  { %110 = vsyncpa [#allocation21], 0 }
  0x5a   :  { %111 = vsyncpa [#allocation4], 0  ;;  %s13268_s28 = smov [#allocation5]   ;;  %s13269_s2 = smov [#allocation8]  }
  0x5b   :  { %s134_s1 = sshll.u32 %s13268_s28, 4  ;;  %s168_s7 = sshll.u32 %s13269_s2, 4  ;;  %s135_s1 = int_to_ptr.vmem [resolvable:$true] %s134_s1  ;;  %s169_s7 = int_to_ptr.vmem [resolvable:$true] %s168_s7 }
  0x5c   :  { %s12896_s10 = scalar_lea.hbm %s13378_s21, 16 }
  0x5d   :  { %p12897_p0 = scmp.ne.s32.totalorder %s13378_s21, %s12896_s10  ;;  %p12900_p1 = scmp.lt.u32.totalorder %s12896_s10, %s13378_s21 }
  0x5f   :  { %p12902_p2 = pnand %p12900_p1, %p12897_p0 }
  0x61   :  { %12905 = shalt.err (!%p12902_p2)
}
  0x62   :  { %s12906_s0 = scalar_lea.vmem %s135_s1, 16  ;;  %s12910_s11 = scalar_lea.vmem %s135_s1, 32 }
  0x63   :  { %p12907_p3 = scmp.ne.s32.totalorder %s135_s1, %s12906_s0  ;;  %p12911_p4 = scmp.lt.s32.totalorder %s135_s1, %s135_s1 }
  0x64   :  { %p12912_p5 = scmp.lt.s32.totalorder %s12910_s11, %s12906_s0 }
  0x66   :  { %p12913_p6 = por %p12912_p5, %p12911_p4 }
  0x68   :  { %p12914_p7 = pnand %p12913_p6, %p12907_p3 }
  0x6a   :  { %12917 = shalt.err (!%p12914_p7)
}
  0x6b   :  { %137 = dma.hbm_to_vmem [thread:$0]  %s13378_s21, 16, %s135_s1, [#allocation6]  }
  0x6c   :  { %s12918_s15 = scalar_lea.hbm %s13418_s30, 64 }
  0x6d   :  { %p12919_p8 = scmp.ne.s32.totalorder %s13418_s30, %s12918_s15  ;;  %p12922_p9 = scmp.lt.u32.totalorder %s12918_s15, %s13418_s30 }
  0x6f   :  { %p12924_p10 = pnand %p12922_p9, %p12919_p8 }
  0x71   :  { %12927 = shalt.err (!%p12924_p10)
}
  0x72   :  { %s12928_s16 = scalar_lea.vmem %s169_s7, 64  ;;  %p12933_p12 = scmp.lt.s32.totalorder %s169_s7, %s169_s7 }
  0x73   :  { %p12929_p11 = scmp.ne.s32.totalorder %s169_s7, %s12928_s16  ;;  %p12934_p13 = scmp.lt.s32.totalorder %s12928_s16, %s12928_s16 }
  0x75   :  { %p12935_p0 = por %p12934_p13, %p12933_p12 }
  0x77   :  { %p12936_p1 = pnand %p12935_p0, %p12929_p11 }
  0x79   :  { %12939 = shalt.err (!%p12936_p1)
}
  0x7a   :  { %171 = dma.hbm_to_vmem [thread:$0]  %s13418_s30, 64, %s169_s7, [#allocation9]  }
  0x7b   :  { %s13270_s18 = smov [#allocation11]   ;;  %s12940_s21 = scalar_lea.hbm %s13438_s27, 256 }
  0x7c   :  { %s193_s22 = sshll.u32 %s13270_s18, 4  ;;  %p12941_p2 = scmp.ne.s32.totalorder %s13438_s27, %s12940_s21  ;;  %s194_s22 = int_to_ptr.vmem [resolvable:$true] %s193_s22 }
  0x7d   :  { %p12944_p3 = scmp.lt.u32.totalorder %s12940_s21, %s13438_s27 }
  0x7f   :  { %p12946_p4 = pnand %p12944_p3, %p12941_p2 }
  0x81   :  { %12949 = shalt.err (!%p12946_p4)
}
  0x82   :  { %s12950_s23 = scalar_lea.vmem %s194_s22, 256  ;;  %p12955_p6 = scmp.lt.s32.totalorder %s194_s22, %s194_s22 }
  0x83   :  { %p12951_p5 = scmp.ne.s32.totalorder %s194_s22, %s12950_s23  ;;  %p12956_p7 = scmp.lt.s32.totalorder %s12950_s23, %s12950_s23 }
  0x85   :  { %p12957_p8 = por %p12956_p7, %p12955_p6 }
  0x87   :  { %p12958_p9 = pnand %p12957_p8, %p12951_p5 }
  0x89   :  { %12961 = shalt.err (!%p12958_p9)
}
  0x8a   :  { %s13271_s26 = smov 128   ;;  %s13272_s30 = smov 8  }
  0x8b   :  { %199 = dma.hbm_to_vmem [thread:$0]  %s13438_s27, 256, %s194_s22, [#allocation12], %s13271_s26, %s13271_s26, %s13272_s30  }
  0x8c   :  { %s13273_s28 = smov [#allocation14]   ;;  %s12962_s2 = scalar_lea.hbm %s13468_s14, 768 }
  0x8d   :  { %s225_s1 = sshll.u32 %s13273_s28, 4  ;;  %p12963_p10 = scmp.ne.s32.totalorder %s13468_s14, %s12962_s2  ;;  %s226_s1 = int_to_ptr.vmem [resolvable:$true] %s225_s1 }
  0x8e   :  { %p12966_p11 = scmp.lt.u32.totalorder %s12962_s2, %s13468_s14 }
  0x90   :  { %p12968_p12 = pnand %p12966_p11, %p12963_p10 }
  0x92   :  { %12971 = shalt.err (!%p12968_p12)
}
  0x93   :  { %s12972_s7 = scalar_lea.vmem %s226_s1, 768  ;;  %p12977_p0 = scmp.lt.s32.totalorder %s226_s1, %s226_s1 }
  0x94   :  { %p12973_p13 = scmp.ne.s32.totalorder %s226_s1, %s12972_s7  ;;  %p12978_p1 = scmp.lt.s32.totalorder %s12972_s7, %s12972_s7 }
  0x96   :  { %p12979_p2 = por %p12978_p1, %p12977_p0 }
  0x98   :  { %p12980_p3 = pnand %p12979_p2, %p12973_p13 }
  0x9a   :  { %12983 = shalt.err (!%p12980_p3)
}
  0x9b   :  { %s13274_s10 = smov 192   ;;  %s13275_s27 = smov 12  }
  0x9c   :  { %231 = dma.hbm_to_vmem [thread:$0]  %s13468_s14, 768, %s226_s1, [#allocation15], %s13274_s10, %s13274_s10, %s13275_s27  }
  0x9d   :  { %s13276_s0 = smov [#allocation17]   ;;  %s13277_s15 = smov [#allocation20]  }
  0x9e   :  { %s285_s11 = sshll.u32 %s13276_s0, 4  ;;  %s310_s16 = sshll.u32 %s13277_s15, 4  ;;  %s286_s11 = int_to_ptr.vmem [resolvable:$true] %s285_s11  ;;  %s13619_s16 = int_to_ptr.vmem [resolvable:$true] %s310_s16 }
  0x9f   :  { %s12984_s18 = scalar_lea.hbm %s13568_s20, 512 }
  0xa0   :  { %p12985_p4 = scmp.ne.s32.totalorder %s13568_s20, %s12984_s18  ;;  %p12988_p5 = scmp.lt.u32.totalorder %s12984_s18, %s13568_s20 }
  0xa2   :  { %p12990_p6 = pnand %p12988_p5, %p12985_p4 }
  0xa4   :  { %12993 = shalt.err (!%p12990_p6)
}
  0xa5   :  { %s12994_s22 = scalar_lea.vmem %s286_s11, 512  ;;  %p12999_p8 = scmp.lt.s32.totalorder %s286_s11, %s286_s11 }
  0xa6   :  { %p12995_p7 = scmp.ne.s32.totalorder %s286_s11, %s12994_s22  ;;  %p13000_p9 = scmp.lt.s32.totalorder %s12994_s22, %s12994_s22 }
  0xa8   :  { %p13001_p10 = por %p13000_p9, %p12999_p8 }
  0xaa   :  { %p13002_p11 = pnand %p13001_p10, %p12995_p7 }
  0xac   :  { %13005 = shalt.err (!%p13002_p11)
}
  0xad   :  { %s13278_s14 = smov 64   ;;  %s13279_s21 = smov 4  }
  0xae   :  { %291 = dma.hbm_to_vmem [thread:$0]  %s13568_s20, 512, %s286_s11, [#allocation18], %s13278_s14, %s13278_s14, %s13279_s21  }
  0xaf   :  { %s13006_s23 = scalar_lea.hbm %s13583_s4, 16 }
  0xb0   :  { %p13007_p12 = scmp.ne.s32.totalorder %s13583_s4, %s13006_s23  ;;  %p13010_p13 = scmp.lt.u32.totalorder %s13006_s23, %s13583_s4 }
  0xb2   :  { %p13012_p0 = pnand %p13010_p13, %p13007_p12 }
  0xb4   :  { %13015 = shalt.err (!%p13012_p0)
}
  0xb5   :  { %s13016_s26 = scalar_lea.vmem %s13619_s16, 16  ;;  %s13020_s30 = scalar_lea.vmem %s13619_s16, 32 }
  0xb6   :  { %p13017_p1 = scmp.ne.s32.totalorder %s13619_s16, %s13016_s26  ;;  %p13021_p2 = scmp.lt.s32.totalorder %s13619_s16, %s13619_s16 }
  0xb7   :  { %p13022_p3 = scmp.lt.s32.totalorder %s13020_s30, %s13016_s26 }
  0xb9   :  { %p13023_p4 = por %p13022_p3, %p13021_p2 }
  0xbb   :  { %p13024_p5 = pnand %p13023_p4, %p13017_p1 }
  0xbd   :  { %13027 = shalt.err (!%p13024_p5)
}
  0xbe   :  { %313 = dma.hbm_to_vmem [thread:$0]  %s13583_s4, 16, %s13619_s16, [#allocation21]  }
  0xbf   :  { %s13280_s20 = smov [#allocation2]   ;;  %s13281_s1 = smov [#allocation7]  }
  0xc0   :  { %s124_s28 = sshll.u32 %s13280_s20, 4  ;;  %s144_s2 = sshll.u32 %s13281_s1, 4  ;;  %s125_s28 = int_to_ptr.vmem [resolvable:$true] %s124_s28  ;;  %s145_s2 = int_to_ptr.vmem [resolvable:$true] %s144_s2 }
  0xc1   :  { %s13028_s7 = scalar_lea.hbm %s13373_s17, 16 }
  0xc2   :  { %p13029_p6 = scmp.ne.s32.totalorder %s13373_s17, %s13028_s7  ;;  %p13032_p7 = scmp.lt.u32.totalorder %s13028_s7, %s13373_s17 }
  0xc4   :  { %p13034_p8 = pnand %p13032_p7, %p13029_p6 }
  0xc6   :  { %13037 = shalt.err (!%p13034_p8)
}
  0xc7   :  { %s13038_s0 = scalar_lea.vmem %s125_s28, 16  ;;  %s13042_s11 = scalar_lea.vmem %s125_s28, 32 }
  0xc8   :  { %p13039_p9 = scmp.ne.s32.totalorder %s125_s28, %s13038_s0  ;;  %p13043_p10 = scmp.lt.s32.totalorder %s125_s28, %s125_s28 }
  0xc9   :  { %p13044_p11 = scmp.lt.s32.totalorder %s13042_s11, %s13038_s0 }
  0xcb   :  { %p13045_p12 = por %p13044_p11, %p13043_p10 }
  0xcd   :  { %p13046_p13 = pnand %p13045_p12, %p13039_p9 }
  0xcf   :  { %13049 = shalt.err (!%p13046_p13)
}
  0xd0   :  { %127 = dma.hbm_to_vmem [thread:$0]  %s13373_s17, 16, %s125_s28, [#allocation3]  }
  0xd1   :  { %s13050_s4 = scalar_lea.hbm %s13383_s25, 16 }
  0xd2   :  { %p13051_p0 = scmp.ne.s32.totalorder %s13383_s25, %s13050_s4  ;;  %p13054_p1 = scmp.lt.u32.totalorder %s13050_s4, %s13383_s25 }
  0xd4   :  { %p13056_p2 = pnand %p13054_p1, %p13051_p0 }
  0xd6   :  { %13059 = shalt.err (!%p13056_p2)
}
  0xd7   :  { %s13060_s15 = scalar_lea.vmem %s145_s2, 16  ;;  %s13064_s16 = scalar_lea.vmem %s145_s2, 32 }
  0xd8   :  { %p13061_p3 = scmp.ne.s32.totalorder %s145_s2, %s13060_s15  ;;  %p13065_p4 = scmp.lt.s32.totalorder %s145_s2, %s145_s2 }
  0xd9   :  { %p13066_p5 = scmp.lt.s32.totalorder %s13064_s16, %s13060_s15 }
  0xdb   :  { %p13067_p6 = por %p13066_p5, %p13065_p4 }
  0xdd   :  { %p13068_p7 = pnand %p13067_p6, %p13061_p3 }
  0xdf   :  { %13071 = shalt.err (!%p13068_p7)
}
  0xe0   :  { %147 = dma.hbm_to_vmem [thread:$0]  %s13383_s25, 16, %s145_s2, [#allocation6]  }
  0xe1   :  { %s13282_s18 = smov [#allocation10]   ;;  %s13283_s22 = smov [#allocation13]  }
  0xe2   :  { %s179_s17 = sshll.u32 %s13282_s18, 4  ;;  %s211_s23 = sshll.u32 %s13283_s22, 4  ;;  %s180_s17 = int_to_ptr.vmem [resolvable:$true] %s179_s17  ;;  %s13646_s23 = int_to_ptr.vmem [resolvable:$true] %s211_s23 }
  0xe3   :  { %s13072_s26 = scalar_lea.hbm %s13428_s12, 128 }
  0xe4   :  { %p13073_p8 = scmp.ne.s32.totalorder %s13428_s12, %s13072_s26  ;;  %p13076_p9 = scmp.lt.u32.totalorder %s13072_s26, %s13428_s12 }
  0xe6   :  { %p13078_p10 = pnand %p13076_p9, %p13073_p8 }
  0xe8   :  { %13081 = shalt.err (!%p13078_p10)
}
  0xe9   :  { %s13082_s30 = scalar_lea.vmem %s180_s17, 128  ;;  %p13087_p12 = scmp.lt.s32.totalorder %s180_s17, %s180_s17 }
  0xea   :  { %p13083_p11 = scmp.ne.s32.totalorder %s180_s17, %s13082_s30  ;;  %p13088_p13 = scmp.lt.s32.totalorder %s13082_s30, %s13082_s30 }
  0xec   :  { %p13089_p0 = por %p13088_p13, %p13087_p12 }
  0xee   :  { %p13090_p1 = pnand %p13089_p0, %p13083_p11 }
  0xf0   :  { %13093 = shalt.err (!%p13090_p1)
}
  0xf1   :  { %185 = dma.hbm_to_vmem [thread:$0]  %s13428_s12, 128, %s180_s17, [#allocation9], %s13278_s14, %s13278_s14, %s13279_s21  }
  0xf2   :  { %s13094_s25 = scalar_lea.hbm %s13458_s3, 768 }
  0xf3   :  { %p13095_p2 = scmp.ne.s32.totalorder %s13458_s3, %s13094_s25  ;;  %p13098_p3 = scmp.lt.u32.totalorder %s13094_s25, %s13458_s3 }
  0xf5   :  { %p13100_p4 = pnand %p13098_p3, %p13095_p2 }
  0xf7   :  { %13103 = shalt.err (!%p13100_p4)
}
  0xf8   :  { %s13104_s20 = scalar_lea.vmem %s13646_s23, 768  ;;  %p13109_p6 = scmp.lt.s32.totalorder %s13646_s23, %s13646_s23 }
  0xf9   :  { %p13105_p5 = scmp.ne.s32.totalorder %s13646_s23, %s13104_s20  ;;  %p13110_p7 = scmp.lt.s32.totalorder %s13104_s20, %s13104_s20 }
  0xfb   :  { %p13111_p8 = por %p13110_p7, %p13109_p6 }
  0xfd   :  { %p13112_p9 = pnand %p13111_p8, %p13105_p5 }
  0xff   :  { %13115 = shalt.err (!%p13112_p9)
}
 0x100   :  { %217 = dma.hbm_to_vmem [thread:$0]  %s13458_s3, 768, %s13646_s23, [#allocation12], %s13274_s10, %s13274_s10, %s13275_s27  }
 0x101   :  { %s13284_s12 = smov [#allocation16]   ;;  %s13285_s28 = smov [#allocation19]  }
 0x102   :  { %s239_s14 = sshll.u32 %s13284_s12, 4  ;;  %s298_s1 = sshll.u32 %s13285_s28, 4  ;;  %s240_s14 = int_to_ptr.vmem [resolvable:$true] %s239_s14  ;;  %s299_s1 = int_to_ptr.vmem [resolvable:$true] %s298_s1 }
 0x103   :  { %s13116_s2 = scalar_lea.hbm %s13478_s13, 768 }
 0x104   :  { %p13117_p10 = scmp.ne.s32.totalorder %s13478_s13, %s13116_s2  ;;  %p13120_p11 = scmp.lt.u32.totalorder %s13116_s2, %s13478_s13 }
 0x106   :  { %p13122_p12 = pnand %p13120_p11, %p13117_p10 }
 0x108   :  { %13125 = shalt.err (!%p13122_p12)
}
 0x109   :  { %s13126_s7 = scalar_lea.vmem %s240_s14, 768  ;;  %p13131_p0 = scmp.lt.s32.totalorder %s240_s14, %s240_s14 }
 0x10a   :  { %p13127_p13 = scmp.ne.s32.totalorder %s240_s14, %s13126_s7  ;;  %p13132_p1 = scmp.lt.s32.totalorder %s13126_s7, %s13126_s7 }
 0x10c   :  { %p13133_p2 = por %p13132_p1, %p13131_p0 }
 0x10e   :  { %p13134_p3 = pnand %p13133_p2, %p13127_p13 }
 0x110   :  { %13137 = shalt.err (!%p13134_p3)
}
 0x111   :  { %245 = dma.hbm_to_vmem [thread:$0]  %s13478_s13, 768, %s240_s14, [#allocation15], %s13274_s10, %s13274_s10, %s13275_s27  }
 0x112   :  { %s13138_s3 = scalar_lea.hbm %s13573_s8, 16 }
 0x113   :  { %p13139_p4 = scmp.ne.s32.totalorder %s13573_s8, %s13138_s3  ;;  %p13142_p5 = scmp.lt.u32.totalorder %s13138_s3, %s13573_s8 }
 0x115   :  { %p13144_p6 = pnand %p13142_p5, %p13139_p4 }
 0x117   :  { %13147 = shalt.err (!%p13144_p6)
}
 0x118   :  { %s13148_s0 = scalar_lea.vmem %s299_s1, 16  ;;  %s13152_s11 = scalar_lea.vmem %s299_s1, 32 }
 0x119   :  { %p13149_p7 = scmp.ne.s32.totalorder %s299_s1, %s13148_s0  ;;  %p13153_p8 = scmp.lt.s32.totalorder %s299_s1, %s299_s1 }
 0x11a   :  { %p13154_p9 = scmp.lt.s32.totalorder %s13152_s11, %s13148_s0 }
 0x11c   :  { %p13155_p10 = por %p13154_p9, %p13153_p8 }
 0x11e   :  { %p13156_p11 = pnand %p13155_p10, %p13149_p7 }
 0x120   :  { %13159 = shalt.err (!%p13156_p11)
}
 0x121   :  { %301 = dma.hbm_to_vmem [thread:$0]  %s13573_s8, 16, %s299_s1, [#allocation18]  }
 0x122   :  { %s13286_s4 = smov [#allocation22]   ;;  %s13160_s10 = scalar_lea.hbm %s13593_s9, 16 }
 0x123   :  { %s322_s13 = sshll.u32 %s13286_s4, 4  ;;  %p13161_p12 = scmp.ne.s32.totalorder %s13593_s9, %s13160_s10  ;;  %s323_s13 = int_to_ptr.vmem [resolvable:$true] %s322_s13 }
 0x124   :  { %p13164_p13 = scmp.lt.u32.totalorder %s13160_s10, %s13593_s9 }
 0x126   :  { %p13166_p0 = pnand %p13164_p13, %p13161_p12 }
 0x128   :  { %13169 = shalt.err (!%p13166_p0)
}
 0x129   :  { %s13170_s15 = scalar_lea.vmem %s323_s13, 16  ;;  %s13174_s16 = scalar_lea.vmem %s323_s13, 32 }
 0x12a   :  { %p13171_p1 = scmp.ne.s32.totalorder %s323_s13, %s13170_s15  ;;  %p13175_p2 = scmp.lt.s32.totalorder %s323_s13, %s323_s13 }
 0x12b   :  { %p13176_p3 = scmp.lt.s32.totalorder %s13174_s16, %s13170_s15 }
 0x12d   :  { %p13177_p4 = por %p13176_p3, %p13175_p2 }
 0x12f   :  { %p13178_p5 = pnand %p13177_p4, %p13171_p1 }
 0x131   :  { %13181 = shalt.err (!%p13178_p5)
}
 0x132   :  { %325 = dma.hbm_to_vmem [thread:$0]  %s13593_s9, 16, %s323_s13, [#allocation21]  }
 0x133   :  { %13204 = dma.done.wait [#allocation3], 16  }
 0x134   :  { %13205 = vsyncadd [#allocation3], 4294967280 }
 0x135   :  { %13206 = dma.done.wait [#allocation6], 32  }
 0x136   :  { %13207 = vsyncadd [#allocation6], 4294967264 }
 0x137   :  { %13208 = dma.done.wait [#allocation9], 192  }
 0x138   :  { %13209 = vsyncadd [#allocation9], 4294967104 }
 0x139   :  { %13210 = dma.done.wait [#allocation12], 1024  }
 0x13a   :  { %13211 = vsyncadd [#allocation12], 4294966272 }
 0x13b   :  { %13212 = dma.done.wait [#allocation15], 1536  }
 0x13c   :  { %13213 = vsyncadd [#allocation15], 4294965760 }
 0x13d   :  { %13214 = dma.done.wait [#allocation18], 528  }
 0x13e   :  { %13215 = vsyncadd [#allocation18], 4294966768 }
 0x13f   :  { %13216 = dma.done.wait [#allocation21], 32  }
 0x140   :  { %13217 = vsyncadd [#allocation21], 4294967264  ;;  %v366_v0 = vld [vmem:[%s13358_s5] sm:$0xff]  ;;  %s13287_s9 = smov 35   ;;  %s13288_s8 = smov 34   ;;  %v367_v3 = vld [vmem:[%s13358_s5 + $0x8] sm:$0xff] }
 0x141   :  { %v13683_v1 = vcombine.low %v366_v0, %v366_v0  ;;  %v13689_v2 = vcombine.high %v366_v0, %v366_v0  ;;  %s13289_s18 = smov 1   ;;  %s13290_s17 = smov 33   ;;  %v13704_v4 = vcombine.low %v367_v3, %v367_v3  ;;  %v13714_v5 = vcombine.high %v367_v3, %v367_v3  ;;  %v368_v6 = vld [vmem:[%s13358_s5 + $0x10] sm:$0xff]  ;;  %v369_v10 = vld [vmem:[%s13358_s5 + $0x18] sm:$0xff]  ;;  %v13827_v15 = vld [vmem:[%s13358_s5 + $0x20] ss:$0 sps:$4 sm:$0xff]  }
 0x142   :  { %s13291_s22 = smov 127   ;;  %s13292_s23 = smov 94   ;;  %v13745_v7 = vcombine.low %v368_v6, %v368_v6  ;;  %v13295_v8 = vmov 0   ;;  %v13759_v9 = vcombine.high %v368_v6, %v368_v6  ;;  %v13786_v11 = vcombine.low %v369_v10, %v369_v10  ;;  %v818_v58 = vld [vmem:[%s13413_s24] sm:$0xff] }
 0x143   :  { %394 = vrot.lane.b32.xlu1 %v13683_v1, %s13287_s9  ;;  %425 = vrot.lane.b32.xlu0 %v13683_v1, %s13288_s8  ;;  %s13293_s26 = smov 95   ;;  %s13294_s30 = smov 93   ;;  %v13796_v12 = vcombine.high %v369_v10, %v369_v10  ;;  %vm443_vm0 = vcmask 277504   ;;  %vm503_vm1 = vcmask 7168   ;;  %vm412_vm2 = vcmask 285696  }
 0x144   :  { %886 = vmatprep.mubr.bf16.mxu0 %v13295_v8  ;;  %927 = vmatprep.mubr.bf16.mxu1 %v13295_v8  ;;  %vm16671_vm3 = vcmask 1043456   ;;  %vm473_vm4 = vcmask 269312   ;;  %vm533_vm5 = vcmask 1039360   ;;  %vm593_vm6 = vcmask 769024   ;;  %s16703_s5 = sld [smem:[#allocation32_spill]]  ;;  %s16705_s24 = sld [smem:[#allocation34_spill]] }
 0x145   :  { %12389 = vset.pattern.permute.xlu0 %v13295_v8  ;;  %12400 = vset.pattern.permute.xlu1 %v13295_v8  ;;  %vm563_vm7 = vcmask 777216   ;;  %vm623_vm8 = vcmask 760832   ;;  %vm824_vm9 = vcmask 588800   ;;  %vm13297_vm10 = vmmov 0   ;;  %s13299_s25 = smov 120   ;;  %s13300_s20 = smov 60  }
 0x146   :  { %vm542_vm11 = vcmask 498688   ;;  %vm602_vm12 = vcmask 228352   ;;  %vm572_vm13 = vcmask 236544   ;;  %vm632_vm14 = vcmask 220160   ;;  %s13301_s12 = smov 52   ;;  %s13302_s14 = smov 112  }
 0x147   :  { %396 = vrot.lane.b32.xlu1 %v13689_v2, %s13287_s9  ;;  %427 = vrot.lane.b32.xlu0 %v13689_v2, %s13288_s8  ;;  %vm1933_vm15 = vcmask 1046528   ;;  %s13303_s28 = smov 44   ;;  %s13304_s1 = smov 104  }
 0x148   :  { %s13305_s2 = smov 36   ;;  %s13306_s7 = smov 96  }
 0x149   :  { %s13307_s3 = smov 28   ;;  %s13308_s0 = smov 88  }
 0x14a   :  { %s13309_s11 = smov 20   ;;  %s13310_s4 = smov 80  }
 0x14b   :  { %487 = vrot.lane.b32.xlu1 %v13689_v2, %s13289_s18  ;;  %485 = vrot.lane.b32.xlu0 %v13683_v1, %s13289_s18  ;;  %s13311_s13 = smov 72   ;;  %s13312_s10 = smov 18  }
 0x14c   :  { %s13313_s15 = smov 54   ;;  %s13314_s16 = smov 90  }
 0x14f   :  { %457 = vrot.lane.b32.xlu1 %v13689_v2, %s13290_s17  ;;  %455 = vrot.lane.b32.xlu0 %v13683_v1, %s13290_s17 }
 0x153   :  { %519 = vrot.lane.b32.xlu1 %v13704_v4, %s13291_s22  ;;  %517 = vrot.lane.b32.xlu0 %v13689_v2, %s13291_s22 }
 0x157   :  { %429 = vrot.lane.b32.xlu1 %v13704_v4, %s13288_s8  ;;  %515 = vrot.lane.b32.xlu0 %v13683_v1, %s13291_s22 }
 0x15b   :  { %577 = vrot.lane.b32.xlu1 %v13689_v2, %s13292_s23  ;;  %431 = vrot.lane.b32.xlu0 %v13714_v5, %s13288_s8 }
 0x15f   :  { %398 = vrot.lane.b32.xlu1 %v13704_v4, %s13287_s9  ;;  %579 = vrot.lane.b32.xlu0 %v13704_v4, %s13292_s23 }
 0x163   :  { %575 = vrot.lane.b32.xlu1 %v13683_v1, %s13292_s23  ;;  %400 = vrot.lane.b32.xlu0 %v13714_v5, %s13287_s9 }
 0x167   :  { %549 = vrot.lane.b32.xlu1 %v13704_v4, %s13293_s26  ;;  %547 = vrot.lane.b32.xlu0 %v13689_v2, %s13293_s26 }
 0x16b   :  { %491 = vrot.lane.b32.xlu1 %v13714_v5, %s13289_s18  ;;  %489 = vrot.lane.b32.xlu0 %v13704_v4, %s13289_s18 }
 0x16f   :  { %459 = vrot.lane.b32.xlu1 %v13704_v4, %s13290_s17  ;;  %545 = vrot.lane.b32.xlu0 %v13683_v1, %s13293_s26 }
 0x173   :  { %521 = vrot.lane.b32.xlu1 %v13714_v5, %s13291_s22  ;;  %461 = vrot.lane.b32.xlu0 %v13714_v5, %s13290_s17 }
 0x177   :  { %605 = vrot.lane.b32.xlu1 %v13683_v1, %s13294_s30  ;;  %523 = vrot.lane.b32.xlu0 %v13745_v7, %s13291_s22 }
 0x17b   :  { %609 = vrot.lane.b32.xlu1 %v13704_v4, %s13294_s30  ;;  %607 = vrot.lane.b32.xlu0 %v13689_v2, %s13294_s30 }
 0x17f   :  { %435 = vrot.lane.b32.xlu1 %v13759_v9, %s13288_s8  ;;  %433 = vrot.lane.b32.xlu0 %v13745_v7, %s13288_s8 }
 0x183   :  { %404 = vrot.lane.b32.xlu1 %v13759_v9, %s13287_s9  ;;  %402 = vrot.lane.b32.xlu0 %v13745_v7, %s13287_s9 }
 0x187   :  { %583 = vrot.lane.b32.xlu1 %v13745_v7, %s13292_s23  ;;  %581 = vrot.lane.b32.xlu0 %v13714_v5, %s13292_s23 }
 0x18b   :  { %495 = vrot.lane.b32.xlu1 %v13759_v9, %s13289_s18  ;;  %493 = vrot.lane.b32.xlu0 %v13745_v7, %s13289_s18 }
 0x18f   :  { %553 = vrot.lane.b32.xlu1 %v13745_v7, %s13293_s26  ;;  %551 = vrot.lane.b32.xlu0 %v13714_v5, %s13293_s26 }
 0x193   :  { %465 = vrot.lane.b32.xlu1 %v13759_v9, %s13290_s17  ;;  %463 = vrot.lane.b32.xlu0 %v13745_v7, %s13290_s17 }
 0x197   :  { %527 = vrot.lane.b32.xlu1 %v13786_v11, %s13291_s22  ;;  %525 = vrot.lane.b32.xlu0 %v13759_v9, %s13291_s22 }
 0x19b   :  { %613 = vrot.lane.b32.xlu1 %v13745_v7, %s13294_s30  ;;  %611 = vrot.lane.b32.xlu0 %v13714_v5, %s13294_s30 }
 0x19f   :  { %439 = vrot.lane.b32.xlu1 %v13796_v12, %s13288_s8  ;;  %437 = vrot.lane.b32.xlu0 %v13786_v11, %s13288_s8 }
 0x1a3   :  { %587 = vrot.lane.b32.xlu1 %v13786_v11, %s13292_s23  ;;  %585 = vrot.lane.b32.xlu0 %v13759_v9, %s13292_s23 }
 0x1a7   :  { %408 = vrot.lane.b32.xlu1 %v13796_v12, %s13287_s9  ;;  %406 = vrot.lane.b32.xlu0 %v13786_v11, %s13287_s9 }
 0x1ab   :  { %557 = vrot.lane.b32.xlu1 %v13786_v11, %s13293_s26  ;;  %555 = vrot.lane.b32.xlu0 %v13759_v9, %s13293_s26 }
 0x1af   :  { %499 = vrot.lane.b32.xlu1 %v13796_v12, %s13289_s18  ;;  %497 = vrot.lane.b32.xlu0 %v13786_v11, %s13289_s18 }
 0x1b3   :  { %469 = vrot.lane.b32.xlu1 %v13796_v12, %s13290_s17  ;;  %467 = vrot.lane.b32.xlu0 %v13786_v11, %s13290_s17 }
 0x1b5   :  { %v395_v13 = vpop.permute.xlu1 %394  ;;  %v426_v14 = vpop.permute.xlu0 %425 }
 0x1b6   :  { %v454_v16 = vsel %vm443_vm0, 0, %v426_v14  ;;  %v424_v28 = vsel %vm412_vm2, 0, %v395_v13 }
 0x1b7   :  { %617 = vrot.lane.b32.xlu1 %v13786_v11, %s13294_s30  ;;  %615 = vrot.lane.b32.xlu0 %v13759_v9, %s13294_s30  ;;  %v636_v20 = vrot.slane %v454_v16, 4 }
 0x1b9   :  { %v13830_v17 = vpop.permute.xlu1 %396  ;;  %v428_v18 = vpop.permute.xlu0 %427  ;;  %v677_v29 = vsel %vm16671_vm3, %v424_v28, %v636_v20 }
 0x1ba   :  { %v444_v19 = vsel %vm443_vm0, %v426_v14, %v428_v18  ;;  %v413_v22 = vsel %vm412_vm2, %v395_v13, %v13830_v17 }
 0x1bb   :  { %v637_v21 = vrot.slane %v444_v19, 4  ;;  %531 = vrot.lane.b32.xlu1 %v13827_v15, %s13291_s22  ;;  %529 = vrot.lane.b32.xlu0 %v13796_v12, %s13291_s22 }
 0x1bd   :  { %v13839_v23 = vpop.permute.xlu1 %487  ;;  %v486_v24 = vpop.permute.xlu0 %485  ;;  %v681_v25 = vsel %vm16671_vm3, %v413_v22, %v637_v21 }
 0x1be   :  { %v504_v26 = vsel %vm503_vm1, %v486_v24, %v13839_v23  ;;  %v514_v27 = vsel %vm503_vm1, 0, %v486_v24  ;;  %854 = vmatprep.subr.bf16.mxu0 %v681_v25 }
 0x1bf   :  { %591 = vrot.lane.b32.xlu1 %v13827_v15, %s13292_s23  ;;  %589 = vrot.lane.b32.xlu0 %v13796_v12, %s13292_s23  ;;  %v646_v30 = vrot.slane %v514_v27, 4  ;;  %v647_v31 = vrot.slane %v504_v26, 4 }
 0x1c0   :  { %855 = vmatpush1.bf16.msra.mxu0 %v677_v29 }
 0x1c1   :  { %v13851_v32 = vpop.permute.xlu1 %457  ;;  %v456_v33 = vpop.permute.xlu0 %455 }
 0x1c2   :  { %v474_v34 = vsel %vm473_vm4, %v456_v33, %v13851_v32  ;;  %v484_v35 = vsel %vm473_vm4, 0, %v456_v33 }
 0x1c3   :  { %561 = vrot.lane.b32.xlu1 %v13827_v15, %s13293_s26  ;;  %559 = vrot.lane.b32.xlu0 %v13796_v12, %s13293_s26  ;;  %v716_v36 = vsel %vm16671_vm3, %v474_v34, %v647_v31  ;;  %v712_v37 = vsel %vm16671_vm3, %v484_v35, %v646_v30 }
 0x1c4   :  { %856 = vmatprep.subr.bf16.mxu0 %v716_v36 }
 0x1c5   :  { %v13862_v38 = vpop.permute.xlu1 %519  ;;  %857 = vmatpush1.bf16.msra.mxu0 %v712_v37  ;;  %v518_v39 = vpop.permute.xlu0 %517 }
 0x1c6   :  { %v535_v40 = vsel %vm533_vm5, %v518_v39, %v13862_v38 }
 0x1c7   :  { %v657_v41 = vrot.slane %v535_v40, 4  ;;  %410 = vrot.lane.b32.xlu1 %v13827_v15, %s13287_s9  ;;  %441 = vrot.lane.b32.xlu0 %v13827_v15, %s13288_s8 }
 0x1c9   :  { %v430_v42 = vpop.permute.xlu1 %429  ;;  %v516_v43 = vpop.permute.xlu0 %515  ;;  %v752_v44 = vsel %vm16671_vm3, %v13689_v2, %v657_v41 }
 0x1ca   :  { %v534_v45 = vsel %vm533_vm5, %v516_v43, %v518_v39  ;;  %858 = vmatprep.subr.bf16.mxu0 %v752_v44  ;;  %v445_v53 = vsel %vm443_vm0, %v428_v18, %v430_v42  ;;  %v13941_v44 = vld [vmem:[%s13408_s19] sm:$0xf]  ;;  %s16704_s19 = sld [smem:[#allocation38_spill]] }
 0x1cb   :  { %v656_v46 = vrot.slane %v534_v45, 4  ;;  %621 = vrot.lane.b32.xlu1 %v13827_v15, %s13294_s30  ;;  %619 = vrot.lane.b32.xlu0 %v13796_v12, %s13294_s30  ;;  %v638_v59 = vrot.slane %v445_v53, 4 }
 0x1cd   :  { %v578_v47 = vpop.permute.xlu1 %577  ;;  %v13877_v48 = vpop.permute.xlu0 %431  ;;  %v748_v49 = vsel %vm16671_vm3, %v13683_v1, %v656_v46 }
 0x1ce   :  { %859 = vmatpush1.bf16.msra.mxu0 %v748_v49  ;;  %v446_v52 = vsel %vm443_vm0, %v430_v42, %v13877_v48 }
 0x1cf   :  { %471 = vrot.lane.b32.xlu1 %v13827_v15, %s13290_s17  ;;  %501 = vrot.lane.b32.xlu0 %v13827_v15, %s13289_s18  ;;  %v639_v54 = vrot.slane %v446_v52, 4 }
 0x1d1   :  { %v399_v50 = vpop.permute.xlu1 %398  ;;  %v13885_v51 = vpop.permute.xlu0 %579 }
 0x1d2   :  { %v414_v57 = vsel %vm412_vm2, %v13830_v17, %v399_v50  ;;  %v595_v60 = vsel %vm593_vm6, %v578_v47, %v13885_v51 }
 0x1d3   :  { %821 = vperm.xlu0 %12389, %v818_v58   ;;  %v685_v63 = vsel %vm16671_vm3, %v414_v57, %v638_v59  ;;  %v667_v0 = vrot.slane %v595_v60, 4 }
 0x1d5   :  { %v576_v55 = vpop.permute.xlu1 %575  ;;  %v13890_v56 = vpop.permute.xlu0 %400 }
 0x1d6   :  { %v415_v61 = vsel %vm412_vm2, %v399_v50, %v13890_v56  ;;  %v594_v14 = vsel %vm593_vm6, %v576_v55, %v578_v47 }
 0x1d7   :  { %v689_v62 = vsel %vm16671_vm3, %v415_v61, %v639_v54  ;;  %v666_v16 = vrot.slane %v594_v14, 4 }
 0x1d8   :  { %895 = vmatprep.subr.bf16.mxu1 %v689_v62 }
 0x1d9   :  { %v13901_v1 = vpop.permute.xlu1 %549  ;;  %896 = vmatpush1.bf16.msra.mxu1 %v685_v63  ;;  %v548_v2 = vpop.permute.xlu0 %547 }
 0x1da   :  { %v565_v3 = vsel %vm563_vm7, %v548_v2, %v13901_v1 }
 0x1db   :  { %v788_v6 = vsel %vm16671_vm3, %v565_v3, %v667_v0 }
 0x1dc   :  { %860 = vmatprep.subr.bf16.mxu0 %v788_v6 }
 0x1dd   :  { %v13906_v10 = vpop.permute.xlu1 %491  ;;  %v490_v13 = vpop.permute.xlu0 %489 }
 0x1de   :  { %v506_v19 = vsel %vm503_vm1, %v490_v13, %v13906_v10  ;;  %v505_v21 = vsel %vm503_vm1, %v13839_v23, %v490_v13 }
 0x1df   :  { %v649_v24 = vrot.slane %v506_v19, 4  ;;  %v648_v28 = vrot.slane %v505_v21, 4 }
 0x1e1   :  { %v460_v17 = vpop.permute.xlu1 %459  ;;  %v546_v18 = vpop.permute.xlu0 %545 }
 0x1e2   :  { %v564_v20 = vsel %vm563_vm7, %v546_v18, %v548_v2  ;;  %v475_v25 = vsel %vm473_vm4, %v13851_v32, %v460_v17 }
 0x1e3   :  { %v784_v22 = vsel %vm16671_vm3, %v564_v20, %v666_v16  ;;  %v720_v23 = vsel %vm16671_vm3, %v475_v25, %v648_v28 }
 0x1e4   :  { %861 = vmatpush1.bf16.msra.mxu0 %v784_v22 }
 0x1e5   :  { %v522_v26 = vpop.permute.xlu1 %521  ;;  %v13917_v27 = vpop.permute.xlu0 %461 }
 0x1e6   :  { %v476_v29 = vsel %vm473_vm4, %v460_v17, %v13917_v27  ;;  %v536_v30 = vsel %vm533_vm5, %v13862_v38, %v522_v26 }
 0x1e7   :  { %v724_v31 = vsel %vm16671_vm3, %v476_v29, %v649_v24  ;;  %v658_v32 = vrot.slane %v536_v30, 4 }
 0x1e8   :  { %897 = vmatprep.subr.bf16.mxu1 %v724_v31 }
 0x1e9   :  { %v606_v33 = vpop.permute.xlu1 %605  ;;  %898 = vmatpush1.bf16.msra.mxu1 %v720_v23  ;;  %v13925_v34 = vpop.permute.xlu0 %523  ;;  %v756_v41 = vsel %vm16671_vm3, %v13704_v4, %v658_v32 }
 0x1ea   :  { %v537_v35 = vsel %vm533_vm5, %v522_v26, %v13925_v34 }
 0x1eb   :  { %v659_v36 = vrot.slane %v537_v35, 4 }
 0x1ed   :  { %v13929_v37 = vpop.permute.xlu1 %609  ;;  %v608_v39 = vpop.permute.xlu0 %607  ;;  %v760_v38 = vsel %vm16671_vm3, %v13714_v5, %v659_v36 }
 0x1ee   :  { %899 = vmatprep.subr.bf16.mxu1 %v760_v38  ;;  %v625_v40 = vsel %vm623_vm8, %v608_v39, %v13929_v37  ;;  %v624_v42 = vsel %vm623_vm8, %v606_v33, %v608_v39 }
 0x1ef   :  { %10184 = vmatprep.subr.msk.bf16.mxu0 %vm16671_vm3, %v625_v40  ;;  %900 = vmatpush1.bf16.msra.mxu1 %v756_v41  ;;  %v829_v43 = vsel %vm16671_vm3, %v624_v42, 0 }
 0x1f0   :  { %863 = vmatpush1.bf16.msra.mxu0 %v829_v43 }
 0x1f1   :  { %v13943_v45 = vpop.permute.xlu1 %435  ;;  %v434_v5 = vpop.permute.xlu0 %433 }
 0x1f2   :  { %v447_v46 = vsel %vm443_vm0, %v13877_v48, %v434_v5  ;;  %v448_v4 = vsel %vm443_vm0, %v434_v5, %v13943_v45 }
 0x1f3   :  { %10185 = vmatmul.mubr.msk.bf16.vlgmr.msra.gmra.mrb[0].mxu0 %vm824_vm9, %v13941_v44  ;;  %v640_v47 = vrot.slane %v447_v46, 4  ;;  %v641_v49 = vrot.slane %v448_v4, 4 }
 0x1f4   :  { %968 = vmatprep.mubr.bf16.mxu0 %v13295_v8 }
 0x1f5   :  { %v13952_v50 = vpop.permute.xlu1 %404  ;;  %v403_v52 = vpop.permute.xlu0 %402 }
 0x1f6   :  { %v416_v53 = vsel %vm412_vm2, %v13890_v56, %v403_v52  ;;  %v417_v54 = vsel %vm412_vm2, %v403_v52, %v13952_v50 }
 0x1f7   :  { %v697_v48 = vsel %vm16671_vm3, %v417_v54, %v641_v49  ;;  %v693_v55 = vsel %vm16671_vm3, %v416_v53, %v640_v47 }
 0x1f8   :  { %936 = vmatprep.subr.bf16.mxu0 %v697_v48 }
 0x1f9   :  { %v584_v57 = vpop.permute.xlu1 %583  ;;  %937 = vmatpush1.bf16.msra.mxu0 %v693_v55  ;;  %v582_v58 = vpop.permute.xlu0 %581 }
 0x1fa   :  { %v596_v61 = vsel %vm593_vm6, %v13885_v51, %v582_v58  ;;  %v597_v62 = vsel %vm593_vm6, %v582_v58, %v584_v57 }
 0x1fb   :  { %v668_v56 = vrot.slane %v596_v61, 4  ;;  %v669_v63 = vrot.slane %v597_v62, 4 }
 0x1fd   :  { %v13960_v59 = vpop.permute.xlu1 %495  ;;  %v494_v60 = vpop.permute.xlu0 %493 }
 0x1fe   :  { %v507_v3 = vsel %vm503_vm1, %v13906_v10, %v494_v60  ;;  %v508_v6 = vsel %vm503_vm1, %v494_v60, %v13960_v59 }
 0x1ff   :  { %v650_v17 = vrot.slane %v507_v3, 4  ;;  %v651_v18 = vrot.slane %v508_v6, 4 }
 0x201   :  { %v554_v0 = vpop.permute.xlu1 %553  ;;  %v552_v2 = vpop.permute.xlu0 %551 }
 0x202   :  { %v566_v13 = vsel %vm563_vm7, %v13901_v1, %v552_v2  ;;  %v567_v14 = vsel %vm563_vm7, %v552_v2, %v554_v0 }
 0x203   :  { %v796_v16 = vsel %vm16671_vm3, %v567_v14, %v669_v63  ;;  %v792_v51 = vsel %vm16671_vm3, %v566_v13, %v668_v56 }
 0x204   :  { %901 = vmatprep.subr.bf16.mxu1 %v796_v16 }
 0x205   :  { %v13974_v19 = vpop.permute.xlu1 %465  ;;  %902 = vmatpush1.bf16.msra.mxu1 %v792_v51  ;;  %v464_v20 = vpop.permute.xlu0 %463 }
 0x206   :  { %v477_v10 = vsel %vm473_vm4, %v13917_v27, %v464_v20  ;;  %v478_v21 = vsel %vm473_vm4, %v464_v20, %v13974_v19 }
 0x207   :  { %v732_v1 = vsel %vm16671_vm3, %v478_v21, %v651_v18  ;;  %v728_v22 = vsel %vm16671_vm3, %v477_v10, %v650_v17  ;;  %v13296_v21 = vmov 0.0  }
 0x208   :  { %938 = vmatprep.subr.bf16.mxu0 %v732_v1 }
 0x209   :  { %v13982_v24 = vpop.permute.xlu1 %527  ;;  %939 = vmatpush1.bf16.msra.mxu0 %v728_v22  ;;  %v526_v25 = vpop.permute.xlu0 %525 }
 0x20a   :  { %v538_v26 = vsel %vm533_vm5, %v13925_v34, %v526_v25  ;;  %v539_v28 = vsel %vm533_vm5, %v526_v25, %v13982_v24 }
 0x20b   :  { %v660_v29 = vrot.slane %v538_v26, 4  ;;  %v661_v27 = vrot.slane %v539_v28, 4 }
 0x20d   :  { %v614_v30 = vpop.permute.xlu1 %613  ;;  %v612_v31 = vpop.permute.xlu0 %611  ;;  %v768_v23 = vsel %vm16671_vm3, %v13759_v9, %v661_v27  ;;  %v764_v33 = vsel %vm16671_vm3, %v13745_v7, %v660_v29 }
 0x20e   :  { %940 = vmatprep.subr.bf16.mxu0 %v768_v23  ;;  %v627_v32 = vsel %vm623_vm8, %v612_v31, %v614_v30  ;;  %v626_v35 = vsel %vm623_vm8, %v13929_v37, %v612_v31 }
 0x20f   :  { %10186 = vmatprep.subr.msk.bf16.mxu1 %vm16671_vm3, %v627_v32  ;;  %941 = vmatpush1.bf16.msra.mxu0 %v764_v33  ;;  %v835_v34 = vsel %vm16671_vm3, %v626_v35, 0 }
 0x210   :  { %904 = vmatpush1.bf16.msra.mxu1 %v835_v34 }
 0x211   :  { %v13997_v36 = vpop.permute.xlu1 %439  ;;  %v438_v39 = vpop.permute.xlu0 %437 }
 0x212   :  { %v450_v7 = vsel %vm443_vm0, %v438_v39, %v13997_v36  ;;  %v449_v37 = vsel %vm443_vm0, %v13943_v45, %v438_v39 }
 0x213   :  { %10187 = vmatmul.mubr.msk.bf16.vlgmr.msra.gmra.mrb[0].mxu1 %vm824_vm9, %v13941_v44  ;;  %v643_v40 = vrot.slane %v450_v7, 4  ;;  %v642_v42 = vrot.slane %v449_v37, 4 }
 0x214   :  { %1009 = vmatprep.mubr.bf16.mxu1 %v13295_v8 }
 0x215   :  { %v588_v9 = vpop.permute.xlu1 %587  ;;  %v586_v38 = vpop.permute.xlu0 %585 }
 0x216   :  { %v599_v41 = vsel %vm593_vm6, %v586_v38, %v588_v9  ;;  %v598_v46 = vsel %vm593_vm6, %v584_v57, %v586_v38 }
 0x217   :  { %v671_v49 = vrot.slane %v599_v41, 4  ;;  %v670_v53 = vrot.slane %v598_v46, 4 }
 0x219   :  { %v14007_v43 = vpop.permute.xlu1 %408  ;;  %v407_v5 = vpop.permute.xlu0 %406 }
 0x21a   :  { %v418_v4 = vsel %vm412_vm2, %v13952_v50, %v407_v5  ;;  %v419_v47 = vsel %vm412_vm2, %v407_v5, %v14007_v43 }
 0x21b   :  { %v705_v52 = vsel %vm16671_vm3, %v419_v47, %v643_v40  ;;  %v701_v45 = vsel %vm16671_vm3, %v418_v4, %v642_v42 }
 0x21c   :  { %977 = vmatprep.subr.bf16.mxu1 %v705_v52 }
 0x21d   :  { %v558_v54 = vpop.permute.xlu1 %557  ;;  %978 = vmatpush1.bf16.msra.mxu1 %v701_v45  ;;  %v556_v48 = vpop.permute.xlu0 %555 }
 0x21e   :  { %v568_v55 = vsel %vm563_vm7, %v554_v0, %v556_v48  ;;  %v569_v57 = vsel %vm563_vm7, %v556_v48, %v558_v54 }
 0x21f   :  { %v804_v58 = vsel %vm16671_vm3, %v569_v57, %v671_v49  ;;  %v800_v50 = vsel %vm16671_vm3, %v568_v55, %v670_v53 }
 0x220   :  { %942 = vmatprep.subr.bf16.mxu0 %v804_v58 }
 0x221   :  { %v14020_v60 = vpop.permute.xlu1 %499  ;;  %943 = vmatpush1.bf16.msra.mxu0 %v800_v50  ;;  %v498_v61 = vpop.permute.xlu0 %497 }
 0x222   :  { %v509_v62 = vsel %vm503_vm1, %v13960_v59, %v498_v61  ;;  %v510_v56 = vsel %vm503_vm1, %v498_v61, %v14020_v60 }
 0x223   :  { %v653_v63 = vrot.slane %v510_v56, 4  ;;  %v652_v2 = vrot.slane %v509_v62, 4 }
 0x225   :  { %v14026_v0 = vpop.permute.xlu1 %469  ;;  %v468_v3 = vpop.permute.xlu0 %467 }
 0x226   :  { %v479_v6 = vsel %vm473_vm4, %v13974_v19, %v468_v3  ;;  %v480_v13 = vsel %vm473_vm4, %v468_v3, %v14026_v0 }
 0x227   :  { %v740_v14 = vsel %vm16671_vm3, %v480_v13, %v653_v63  ;;  %v736_v16 = vsel %vm16671_vm3, %v479_v6, %v652_v2 }
 0x228   :  { %979 = vmatprep.subr.bf16.mxu1 %v740_v14 }
 0x229   :  { %v618_v59 = vpop.permute.xlu1 %617  ;;  %980 = vmatpush1.bf16.msra.mxu1 %v736_v16  ;;  %v616_v51 = vpop.permute.xlu0 %615 }
 0x22a   :  { %v628_v17 = vsel %vm623_vm8, %v614_v30, %v616_v51  ;;  %v629_v18 = vsel %vm623_vm8, %v616_v51, %v618_v59 }
 0x22b   :  { %10188 = vmatprep.subr.msk.bf16.mxu0 %vm16671_vm3, %v629_v18  ;;  %v841_v20 = vsel %vm16671_vm3, %v628_v17, 0 }
 0x22c   :  { %945 = vmatpush1.bf16.msra.mxu0 %v841_v20 }
 0x22d   :  { %v532_v19 = vpop.permute.xlu1 %531  ;;  %v530_v10 = vpop.permute.xlu0 %529  ;;  %11681 = vmatprep.subr.bf16.mxu0 %v13296_v21 }
 0x22e   :  { %v540_v1 = vsel %vm533_vm5, %v13982_v24, %v530_v10  ;;  %v541_v22 = vsel %vm533_vm5, %v530_v10, %v532_v19 }
 0x22f   :  { %v662_v25 = vrot.slane %v540_v1, 4  ;;  %v663_v26 = vrot.slane %v541_v22, 4  ;;  %10189 = vmatmul.mubr.msk.bf16.vlgmr.msra.gmra.mrb[4].mxu0 %vm824_vm9, %v13941_v44 }
 0x230   :  { %11691 = vmatprep.mubr.msk.bf16.mxu0 %vm13297_vm10, %v13296_v21 }
 0x231   :  { %v592_v28 = vpop.permute.xlu1 %591  ;;  %v590_v29 = vpop.permute.xlu0 %589  ;;  %v776_v27 = vsel %vm16671_vm3, %v13796_v12, %v663_v26  ;;  %v772_v30 = vsel %vm16671_vm3, %v13786_v11, %v662_v25 }
 0x232   :  { %v600_v24 = vsel %vm593_vm6, %v588_v9, %v590_v29  ;;  %v601_v31 = vsel %vm593_vm6, %v590_v29, %v592_v28  ;;  %981 = vmatprep.subr.bf16.mxu1 %v776_v27 }
 0x233   :  { %v673_v23 = vrot.slane %v601_v31, 4  ;;  %982 = vmatpush1.bf16.msra.mxu1 %v772_v30  ;;  %v672_v33 = vrot.slane %v600_v24, 4 }
 0x235   :  { %v562_v32 = vpop.permute.xlu1 %561  ;;  %v560_v35 = vpop.permute.xlu0 %559 }
 0x236   :  { %v570_v34 = vsel %vm563_vm7, %v558_v54, %v560_v35  ;;  %v571_v39 = vsel %vm563_vm7, %v560_v35, %v562_v32  ;;  %v604_v54 = vsel %vm602_vm12, %v592_v28, 0  ;;  %v574_v50 = vsel %vm572_vm13, %v562_v32, 0 }
 0x237   :  { %v812_v7 = vsel %vm16671_vm3, %v571_v39, %v673_v23  ;;  %v808_v12 = vsel %vm16671_vm3, %v570_v34, %v672_v33  ;;  %v674_v57 = vrot.slane %v604_v54, 4 }
 0x238   :  { %983 = vmatprep.subr.bf16.mxu1 %v812_v7 }
 0x239   :  { %v411_v11 = vpop.permute.xlu1 %410  ;;  %984 = vmatpush1.bf16.msra.mxu1 %v808_v12  ;;  %v442_v9 = vpop.permute.xlu0 %441 }
 0x23a   :  { %v451_v38 = vsel %vm443_vm0, %v13997_v36, %v442_v9  ;;  %v420_v40 = vsel %vm412_vm2, %v14007_v43, %v411_v11  ;;  %v544_v36 = vsel %vm542_vm11, %v532_v19, 0 }
 0x23b   :  { %v644_v37 = vrot.slane %v451_v38, 4  ;;  %v664_v45 = vrot.slane %v544_v36, 4 }
 0x23d   :  { %v622_v41 = vpop.permute.xlu1 %621  ;;  %v620_v42 = vpop.permute.xlu0 %619  ;;  %v709_v5 = vsel %vm16671_vm3, %v420_v40, %v644_v37  ;;  %v780_v58 = vsel %vm16671_vm3, %v13827_v15, %v664_v45  ;;  %v1071_v15 = vlaneseq }
 0x23e   :  { %v630_v46 = vsel %vm623_vm8, %v618_v59, %v620_v42  ;;  %11682 = vmatpush3.bf16.msra.mxu0 %v709_v5  ;;  %v631_v4 = vsel %vm623_vm8, %v620_v42, %v622_v41  ;;  %v634_v61 = vsel %vm632_vm14, %v622_v41, 0 }
 0x23f   :  { %10190 = vmatprep.subr.msk.bf16.mxu1 %vm16671_vm3, %v631_v4  ;;  %v847_v47 = vsel %vm16671_vm3, %v630_v46, 0  ;;  %11683 = vmatprep.subr.bf16.mxu0 %v13296_v21  ;;  %v852_v62 = vsel %vm16671_vm3, %v634_v61, 0  ;;  %v14088_v56 = vshrl.u32 %v1071_v15, 7 }
 0x240   :  { %986 = vmatpush1.bf16.msra.mxu1 %v847_v47 }
 0x241   :  { %v472_v43 = vpop.permute.xlu1 %471  ;;  %v502_v49 = vpop.permute.xlu0 %501  ;;  %v1073_v63 = vsub.s32 0, %v14088_v56  ;;  %v1081_v18 = vsub.s32 2, %v14088_v56  ;;  %v1077_v30 = vsub.s32 1, %v14088_v56  ;;  %v1085_v33 = vsub.s32 3, %v14088_v56 }
 0x242   :  { %v511_v52 = vsel %vm503_vm1, %v14020_v60, %v502_v49  ;;  %v481_v48 = vsel %vm473_vm4, %v14026_v0, %v472_v43  ;;  %v815_v60 = vsel %vm16671_vm3, %v574_v50, %v674_v57  ;;  %v14094_v0 = vld [vmem:[%s16703_s5] sm:$0xff]  ;;  %v1089_v41 = vsub.s32 4, %v14088_v56 }
 0x243   :  { %v654_v53 = vrot.slane %v511_v52, 4  ;;  %10191 = vmatmul.mubr.msk.bf16.vlgmr.msra.gmra.mrb[4].mxu1 %vm824_vm9, %v13941_v44  ;;  %v1074_v14 = vrot.slane %v14094_v0, %v1073_v63  ;;  %v1082_v10 = vrot.slane %v14094_v0, %v1081_v18  ;;  %v1078_v31 = vrot.slane %v14094_v0, %v1077_v30 }
 0x244   :  { %1616 = vmatprep.mubr.bf16.mxu1 %v13295_v8  ;;  %v1086_v34 = vrot.slane %v14094_v0, %v1085_v33  ;;  %v1090_v47 = vrot.slane %v14094_v0, %v1089_v41 }
 0x245   :  { %v744_v55 = vsel %vm16671_vm3, %v481_v48, %v654_v53  ;;  %v1097_v53 = vsub.s32 6, %v14088_v56 }
 0x246   :  { %11684 = vmatpush3.bf16.msra.mxu0 %v744_v55 }
 0x247   :  { %11685 = vmatprep.subr.bf16.mxu0 %v13296_v21 }
 0x24a   :  { %11686 = vmatpush3.bf16.msra.mxu0 %v780_v58  ;;  %v1098_v58 = vrot.slane %v14094_v0, %v1097_v53 }
 0x24b   :  { %11687 = vmatprep.subr.bf16.mxu0 %v13296_v21 }
 0x24e   :  { %11688 = vmatpush3.bf16.msra.mxu0 %v815_v60 }
 0x24f   :  { %11689 = vmatprep.subr.bf16.mxu0 %v13296_v21 }
 0x252   :  { %11690 = vmatpush3.bf16.msra.mxu0 %v852_v62  ;;  %v14091_v2 = vpop.permute.xlu0 %821  ;;  %v1093_v62 = vsub.s32 5, %v14088_v56 }
 0x255   :  { %11692 = vmatmul.mubr.msk.bf16.vlgmr.msra.gmra.mrb[8].mxu0 %vm824_vm9, %v13941_v44 }
 0x256   :  { %1657 = vmatprep.mubr.bf16.mxu0 %v13295_v8 }
 0x2c6   :  { %v888_v3 = vpop.f32.mrb[0].mxu0 }
 0x2c7   :  { %v889_v6 = vadd.f32 %v888_v3, %v14091_v2  ;;  %v890_v13 = vpop.f32.mrb[1].mxu0  ;;  %v1094_v3 = vrot.slane %v14094_v0, %v1093_v62 }
 0x2c8   :  { %v892_v44 = vpop.f32.mrb[2].mxu0  ;;  %v891_v27 = vadd.f32 %v890_v13, %v14091_v2 }
 0x2c9   :  { %v1058_v16 = vmax.f32 %v889_v6, 0.0  ;;  %v893_v59 = vpop.f32.mrb[3].mxu0  ;;  %v1101_v44 = vsub.s32 7, %v14088_v56  ;;  %v12628_v56 = vld [vmem:[#allocation11 + $0x4] ss:$8 sps:$4 sm:$0xff]  }
 0x2ca   :  { %v1059_v24 = vmax.f32 %v891_v27, 0.0 }
 0x2cb   :  { %v1116_v51 = vmul.f32 %v1074_v14, %v1058_v16  ;;  %v1102_v59 = vrot.slane %v14094_v0, %v1101_v44 }
 0x2cc   :  { %v1117_v32 = vmul.f32 %v1078_v31, %v1059_v24 }
 0x2cd   :  { %v14100_v17 = vpack.c.bf16 %v1116_v51, %v1116_v51 }
 0x2ce   :  { %v14145_v39 = vpack.c.bf16 %v1117_v32, %v1117_v32 }
 0x2cf   :  { %1143 = vrot.lane.b32.xlu0 %v14100_v17, %s13287_s9  ;;  %1171 = vrot.lane.b32.xlu1 %v14100_v17, %s13288_s8 }
 0x2d3   :  { %1227 = vrot.lane.b32.xlu0 %v14100_v17, %s13289_s18 }
 0x2d7   :  { %1199 = vrot.lane.b32.xlu0 %v14100_v17, %s13290_s17 }
 0x2e6   :  { %v929_v20 = vpop.f32.mrb[0].mxu1 }
 0x2e7   :  { %v930_v19 = vadd.f32 %v929_v20, %v14091_v2  ;;  %v931_v1 = vpop.f32.mrb[1].mxu1 }
 0x2e8   :  { %v933_v22 = vpop.f32.mrb[2].mxu1  ;;  %v932_v23 = vadd.f32 %v931_v1, %v14091_v2 }
 0x2e9   :  { %v1060_v25 = vmax.f32 %v930_v19, 0.0  ;;  %v934_v26 = vpop.f32.mrb[3].mxu1  ;;  %v10193_v22 = vld [vmem:[%s16703_s5 + $0x8] ss:$0 sm:$0xff]  ;;  %s13321_s5 = smov 14  }
 0x2ea   :  { %v1061_v35 = vmax.f32 %v932_v23, 0.0 }
 0x2eb   :  { %v1118_v28 = vmul.f32 %v1082_v10, %v1060_v25 }
 0x2ec   :  { %v1119_v7 = vmul.f32 %v1086_v34, %v1061_v35  ;;  %v1549_v35 = vld [vmem:[%s16704_s19] sm:$0xff]  ;;  %s13322_s19 = smov 19  }
 0x2ed   :  { %v14115_v29 = vpack.c.bf16 %v1118_v28, %v1118_v28 }
 0x2ee   :  { %v14151_v38 = vpack.c.bf16 %v1119_v7, %v1119_v7 }
 0x2ef   :  { %1175 = vrot.lane.b32.xlu0 %v14115_v29, %s13288_s8  ;;  %1259 = vrot.lane.b32.xlu1 %v14115_v29, %s13291_s22 }
 0x2f3   :  { %1255 = vrot.lane.b32.xlu0 %v14100_v17, %s13291_s22  ;;  %1147 = vrot.lane.b32.xlu1 %v14115_v29, %s13287_s9 }
 0x2f7   :  { %1315 = vrot.lane.b32.xlu0 %v14115_v29, %s13292_s23  ;;  %1231 = vrot.lane.b32.xlu1 %v14115_v29, %s13289_s18 }
 0x2fb   :  { %1203 = vrot.lane.b32.xlu0 %v14115_v29, %s13290_s17  ;;  %1311 = vrot.lane.b32.xlu1 %v14100_v17, %s13292_s23 }
 0x2ff   :  { %1283 = vrot.lane.b32.xlu0 %v14100_v17, %s13293_s26  ;;  %1287 = vrot.lane.b32.xlu1 %v14115_v29, %s13293_s26 }
 0x302   :  { %v970_v12 = vpop.f32.mrb[4].mxu0 }
 0x303   :  { %v972_v11 = vpop.f32.mrb[5].mxu0  ;;  %1257 = vrot.lane.b32.xlu0 %v14145_v39, %s13291_s22  ;;  %1339 = vrot.lane.b32.xlu1 %v14100_v17, %s13294_s30  ;;  %v971_v40 = vadd.f32 %v970_v12, %v14091_v2 }
 0x304   :  { %v974_v9 = vpop.f32.mrb[6].mxu0  ;;  %v973_v61 = vadd.f32 %v972_v11, %v14091_v2 }
 0x305   :  { %v975_v37 = vpop.f32.mrb[7].mxu0  ;;  %v1062_v4 = vmax.f32 %v971_v40, 0.0 }
 0x306   :  { %v1063_v15 = vmax.f32 %v973_v61, 0.0 }
 0x307   :  { %1149 = vrot.lane.b32.xlu0 %v14151_v38, %s13287_s9  ;;  %1343 = vrot.lane.b32.xlu1 %v14115_v29, %s13294_s30  ;;  %v1120_v43 = vmul.f32 %v1090_v47, %v1062_v4 }
 0x308   :  { %v1121_v6 = vmul.f32 %v1094_v3, %v1063_v15 }
 0x309   :  { %v14184_v49 = vpack.c.bf16 %v1120_v43, %v1120_v43 }
 0x30a   :  { %v14230_v13 = vpack.c.bf16 %v1121_v6, %v1121_v6 }
 0x30b   :  { %1233 = vrot.lane.b32.xlu0 %v14151_v38, %s13289_s18  ;;  %1173 = vrot.lane.b32.xlu1 %v14145_v39, %s13288_s8 }
 0x30f   :  { %1285 = vrot.lane.b32.xlu0 %v14145_v39, %s13293_s26  ;;  %1145 = vrot.lane.b32.xlu1 %v14145_v39, %s13287_s9 }
 0x313   :  { %1341 = vrot.lane.b32.xlu0 %v14145_v39, %s13294_s30  ;;  %1229 = vrot.lane.b32.xlu1 %v14145_v39, %s13289_s18 }
 0x316   :  { %v1011_v42 = vpop.f32.mrb[4].mxu1 }
 0x317   :  { %v1013_v5 = vpop.f32.mrb[5].mxu1  ;;  %1317 = vrot.lane.b32.xlu0 %v14151_v38, %s13292_s23  ;;  %1201 = vrot.lane.b32.xlu1 %v14145_v39, %s13290_s17  ;;  %v1012_v45 = vadd.f32 %v1011_v42, %v14091_v2 }
 0x318   :  { %v1015_v46 = vpop.f32.mrb[6].mxu1  ;;  %v1014_v14 = vadd.f32 %v1013_v5, %v14091_v2 }
 0x319   :  { %v1016_v36 = vpop.f32.mrb[7].mxu1  ;;  %v1064_v57 = vmax.f32 %v1012_v45, 0.0 }
 0x31a   :  { %v1065_v16 = vmax.f32 %v1014_v14, 0.0 }
 0x31b   :  { %1289 = vrot.lane.b32.xlu0 %v14151_v38, %s13293_s26  ;;  %1177 = vrot.lane.b32.xlu1 %v14151_v38, %s13288_s8  ;;  %v1122_v50 = vmul.f32 %v1098_v58, %v1064_v57 }
 0x31c   :  { %v1123_v20 = vmul.f32 %v1102_v59, %v1065_v16 }
 0x31d   :  { %v14209_v60 = vpack.c.bf16 %v1122_v50, %v1122_v50 }
 0x31e   :  { %v14252_v10 = vpack.c.bf16 %v1123_v20, %v1123_v20 }
 0x31f   :  { %1345 = vrot.lane.b32.xlu0 %v14151_v38, %s13294_s30  ;;  %1313 = vrot.lane.b32.xlu1 %v14145_v39, %s13292_s23 }
 0x323   :  { %1263 = vrot.lane.b32.xlu0 %v14184_v49, %s13291_s22  ;;  %1205 = vrot.lane.b32.xlu1 %v14151_v38, %s13290_s17 }
 0x327   :  { %1179 = vrot.lane.b32.xlu0 %v14184_v49, %s13288_s8  ;;  %1261 = vrot.lane.b32.xlu1 %v14151_v38, %s13291_s22 }
 0x328   :  { %v1052_v52 = vpop.f32.mrb[8].mxu0 }
 0x329   :  { %v11693_v54 = vpop.f32.mrb[9].mxu0  ;;  %v1053_v19 = vadd.f32 %v1052_v52, %v14091_v2 }
 0x32a   :  { %v1055_v48 = vpop.f32.mrb[10].mxu0 }
 0x32b   :  { %1151 = vrot.lane.b32.xlu0 %v14184_v49, %s13287_s9  ;;  %1319 = vrot.lane.b32.xlu1 %v14184_v49, %s13292_s23  ;;  %v11694_v55 = vpop.f32.mrb[11].mxu0  ;;  %v1066_v1 = vmax.f32 %v1053_v19, 0.0 }
 0x32d   :  { %v1124_v25 = vmul.f32 %v10193_v22, %v1066_v1 }
 0x32f   :  { %1235 = vrot.lane.b32.xlu0 %v14184_v49, %s13289_s18  ;;  %1291 = vrot.lane.b32.xlu1 %v14184_v49, %s13293_s26  ;;  %v14263_v26 = vpack.c.bf16 %v1124_v25, %v1124_v25 }
 0x333   :  { %1207 = vrot.lane.b32.xlu0 %v14184_v49, %s13290_s17  ;;  %1347 = vrot.lane.b32.xlu1 %v14184_v49, %s13294_s30 }
 0x337   :  { %1183 = vrot.lane.b32.xlu0 %v14209_v60, %s13288_s8  ;;  %1267 = vrot.lane.b32.xlu1 %v14209_v60, %s13291_s22 }
 0x33b   :  { %1155 = vrot.lane.b32.xlu0 %v14209_v60, %s13287_s9  ;;  %1323 = vrot.lane.b32.xlu1 %v14209_v60, %s13292_s23 }
 0x33f   :  { %1239 = vrot.lane.b32.xlu0 %v14209_v60, %s13289_s18  ;;  %1295 = vrot.lane.b32.xlu1 %v14209_v60, %s13293_s26 }
 0x341   :  { %v1144_v51 = vpop.permute.xlu0 %1143  ;;  %v1172_v28 = vpop.permute.xlu1 %1171 }
 0x342   :  { %v1198_v42 = vsel %vm443_vm0, 0, %v1172_v28  ;;  %v1170_v36 = vsel %vm412_vm2, 0, %v1144_v51 }
 0x343   :  { %1211 = vrot.lane.b32.xlu0 %v14209_v60, %s13290_s17  ;;  %1351 = vrot.lane.b32.xlu1 %v14209_v60, %s13294_s30  ;;  %v1368_v47 = vrot.slane %v1198_v42, 4 }
 0x345   :  { %v1228_v0 = vpop.permute.xlu0 %1227  ;;  %v1408_v48 = vsel %vm16671_vm3, %v1170_v36, %v1368_v47 }
 0x346   :  { %v1254_v55 = vsel %vm503_vm1, 0, %v1228_v0 }
 0x347   :  { %1265 = vrot.lane.b32.xlu0 %v14230_v13, %s13291_s22  ;;  %1181 = vrot.lane.b32.xlu1 %v14230_v13, %s13288_s8  ;;  %v1378_v62 = vrot.slane %v1254_v55, 4 }
 0x349   :  { %v1200_v2 = vpop.permute.xlu0 %1199 }
 0x34a   :  { %v1226_v15 = vsel %vm473_vm4, 0, %v1200_v2 }
 0x34b   :  { %1321 = vrot.lane.b32.xlu0 %v14230_v13, %s13292_s23  ;;  %1153 = vrot.lane.b32.xlu1 %v14230_v13, %s13287_s9  ;;  %v1443_v19 = vsel %vm16671_vm3, %v1226_v15, %v1378_v62 }
 0x34f   :  { %1293 = vrot.lane.b32.xlu0 %v14230_v13, %s13293_s26  ;;  %1237 = vrot.lane.b32.xlu1 %v14230_v13, %s13289_s18 }
 0x353   :  { %1349 = vrot.lane.b32.xlu0 %v14230_v13, %s13294_s30  ;;  %1209 = vrot.lane.b32.xlu1 %v14230_v13, %s13290_s17 }
 0x357   :  { %1269 = vrot.lane.b32.xlu0 %v14252_v10, %s13291_s22  ;;  %1185 = vrot.lane.b32.xlu1 %v14252_v10, %s13288_s8 }
 0x35b   :  { %1297 = vrot.lane.b32.xlu0 %v14252_v10, %s13293_s26  ;;  %1157 = vrot.lane.b32.xlu1 %v14252_v10, %s13287_s9 }
 0x35f   :  { %1187 = vrot.lane.b32.xlu0 %v14263_v26, %s13288_s8  ;;  %1241 = vrot.lane.b32.xlu1 %v14252_v10, %s13289_s18 }
 0x361   :  { %v14269_v27 = vpop.permute.xlu0 %1175  ;;  %v14271_v24 = vpop.permute.xlu1 %1259 }
 0x363   :  { %1327 = vrot.lane.b32.xlu0 %v14263_v26, %s13292_s23  ;;  %1213 = vrot.lane.b32.xlu1 %v14252_v10, %s13290_s17 }
 0x365   :  { %v1256_v31 = vpop.permute.xlu0 %1255  ;;  %v1148_v23 = vpop.permute.xlu1 %1147 }
 0x367   :  { %1243 = vrot.lane.b32.xlu0 %v14263_v26, %s13289_s18  ;;  %1325 = vrot.lane.b32.xlu1 %v14252_v10, %s13292_s23 }
 0x369   :  { %v14281_v33 = vpop.permute.xlu0 %1315  ;;  %v14283_v32 = vpop.permute.xlu1 %1231 }
 0x36b   :  { %1353 = vrot.lane.b32.xlu0 %v14252_v10, %s13294_s30  ;;  %1271 = vrot.lane.b32.xlu1 %v14263_v26, %s13291_s22 }
 0x36d   :  { %v14290_v34 = vpop.permute.xlu0 %1203  ;;  %v1312_v7 = vpop.permute.xlu1 %1311 }
 0x36f   :  { %1552 = vperm.xlu0 %12389, %v1549_v35   ;;  %1159 = vrot.lane.b32.xlu1 %v14263_v26, %s13287_s9  ;;  %s13315_s9 = smov 126  }
 0x371   :  { %v14294_v12 = vpop.permute.xlu0 %1283  ;;  %v14296_v11 = vpop.permute.xlu1 %1287 }
 0x373   :  { %1299 = vrot.lane.b32.xlu1 %v14263_v26, %s13293_s26  ;;  %s13318_s26 = smov 70  }
 0x375   :  { %v1258_v9 = vpop.permute.xlu0 %1257  ;;  %v14300_v37 = vpop.permute.xlu1 %1339 }
 0x376   :  { %v1274_v50 = vsel %vm533_vm5, %v1258_v9, %v14271_v24  ;;  %v1273_v3 = vsel %vm533_vm5, %v1256_v31, %v1258_v9 }
 0x377   :  { %1215 = vrot.lane.b32.xlu1 %v14263_v26, %s13290_s17  ;;  %v1389_v6 = vrot.slane %v1274_v50, 4  ;;  %v1388_v20 = vrot.slane %v1273_v3, 4  ;;  %s13316_s17 = smov 108  }
 0x379   :  { %v14304_v40 = vpop.permute.xlu0 %1149  ;;  %v14306_v41 = vpop.permute.xlu1 %1343  ;;  %v1483_v25 = vsel %vm16671_vm3, %v14145_v39, %v1389_v6  ;;  %v1479_v42 = vsel %vm16671_vm3, %v14100_v17, %v1388_v20 }
 0x37a   :  { %v1163_v35 = vsel %vm412_vm2, %v1148_v23, %v14304_v40 }
 0x37b   :  { %1355 = vrot.lane.b32.xlu1 %v14263_v26, %s13294_s30  ;;  %s13320_s30 = smov 124  }
 0x37d   :  { %v14311_v5 = vpop.permute.xlu0 %1233  ;;  %v1174_v46 = vpop.permute.xlu1 %1173 }
 0x37e   :  { %v1189_v4 = vsel %vm443_vm0, %v1172_v28, %v1174_v46  ;;  %v1190_v1 = vsel %vm443_vm0, %v1174_v46, %v14269_v27 }
 0x37f   :  { %v1369_v43 = vrot.slane %v1189_v4, 4  ;;  %v1370_v9 = vrot.slane %v1190_v1, 4 }
 0x381   :  { %v1286_v52 = vpop.permute.xlu0 %1285  ;;  %v1146_v45 = vpop.permute.xlu1 %1145 }
 0x382   :  { %v1161_v53 = vsel %vm412_vm2, %v1144_v51, %v1146_v45  ;;  %v1162_v28 = vsel %vm412_vm2, %v1146_v45, %v1148_v23 }
 0x383   :  { %v1412_v54 = vsel %vm16671_vm3, %v1161_v53, %v1369_v43  ;;  %v1416_v23 = vsel %vm16671_vm3, %v1162_v28, %v1370_v9  ;;  %v1301_v53 = vsel %vm563_vm7, %v14294_v12, %v1286_v52 }
 0x384   :  { %1584 = vmatprep.subr.bf16.mxu1 %v1412_v54  ;;  %v1302_v54 = vsel %vm563_vm7, %v1286_v52, %v14296_v11 }
 0x385   :  { %v1342_v57 = vpop.permute.xlu0 %1341  ;;  %1585 = vmatpush1.bf16.msra.mxu1 %v1408_v48  ;;  %v1230_v58 = vpop.permute.xlu1 %1229 }
 0x386   :  { %v1245_v61 = vsel %vm503_vm1, %v1228_v0, %v1230_v58  ;;  %v1246_v17 = vsel %vm503_vm1, %v1230_v58, %v14283_v32  ;;  %v1357_v52 = vsel %vm623_vm8, %v14300_v37, %v1342_v57  ;;  %v1358_v62 = vsel %vm623_vm8, %v1342_v57, %v14306_v41 }
 0x387   :  { %v1379_v14 = vrot.slane %v1245_v61, 4  ;;  %v1380_v58 = vrot.slane %v1246_v17, 4 }
 0x389   :  { %v14324_v44 = vpop.permute.xlu0 %1317  ;;  %v1202_v16 = vpop.permute.xlu1 %1201 }
 0x38a   :  { %v1217_v59 = vsel %vm473_vm4, %v1200_v2, %v1202_v16 }
 0x38b   :  { %v1447_v51 = vsel %vm16671_vm3, %v1217_v59, %v1379_v14 }
 0x38c   :  { %1586 = vmatprep.subr.bf16.mxu1 %v1447_v51  ;;  %v14384_v51 = vld [vmem:[#allocation8] sm:$0xf] }
 0x38d   :  { %v14331_v0 = vpop.permute.xlu0 %1289  ;;  %1587 = vmatpush1.bf16.msra.mxu1 %v1443_v19  ;;  %v14333_v22 = vpop.permute.xlu1 %1177 }
 0x38e   :  { %v1191_v2 = vsel %vm443_vm0, %v14269_v27, %v14333_v22  ;;  %1588 = vmatprep.subr.bf16.mxu1 %v1483_v25  ;;  %v1247_v27 = vsel %vm503_vm1, %v14283_v32, %v14311_v5 }
 0x38f   :  { %v1371_v31 = vrot.slane %v1191_v2, 4  ;;  %v1381_v48 = vrot.slane %v1247_v27, 4  ;;  %v1331_v2 = vsel %vm593_vm6, %v14281_v33, %v14324_v44 }
 0x391   :  { %v14345_v46 = vpop.permute.xlu0 %1345  ;;  %1589 = vmatpush1.bf16.msra.mxu1 %v1479_v42  ;;  %v1314_v4 = vpop.permute.xlu1 %1313  ;;  %v1420_v39 = vsel %vm16671_vm3, %v1163_v35, %v1371_v31  ;;  %v1400_v35 = vrot.slane %v1331_v2, 4 }
 0x392   :  { %v1329_v47 = vsel %vm593_vm6, %v1312_v7, %v1314_v4  ;;  %v1330_v36 = vsel %vm593_vm6, %v1314_v4, %v14281_v33  ;;  %1625 = vmatprep.subr.bf16.mxu0 %v1420_v39  ;;  %v1218_v7 = vsel %vm473_vm4, %v1202_v16, %v14290_v34  ;;  %v1559_v16 = vsel %vm16671_vm3, %v1357_v52, 0 }
 0x393   :  { %v1398_v43 = vrot.slane %v1329_v47, 4  ;;  %v1399_v45 = vrot.slane %v1330_v36, 4  ;;  %1626 = vmatpush1.bf16.msra.mxu0 %v1416_v23  ;;  %v1451_v3 = vsel %vm16671_vm3, %v1218_v7, %v1380_v58 }
 0x395   :  { %v14363_v55 = vpop.permute.xlu0 %1263  ;;  %v14365_v50 = vpop.permute.xlu1 %1205  ;;  %v1519_v61 = vsel %vm16671_vm3, %v1302_v54, %v1399_v45  ;;  %v1515_v32 = vsel %vm16671_vm3, %v1301_v53, %v1398_v43 }
 0x396   :  { %v1219_v12 = vsel %vm473_vm4, %v14290_v34, %v14365_v50  ;;  %1590 = vmatprep.subr.bf16.mxu1 %v1519_v61 }
 0x397   :  { %1591 = vmatpush1.bf16.msra.mxu1 %v1515_v32  ;;  %v1455_v15 = vsel %vm16671_vm3, %v1219_v12, %v1381_v48 }
 0x398   :  { %10194 = vmatprep.subr.msk.bf16.mxu1 %vm16671_vm3, %v1358_v62  ;;  %1627 = vmatprep.subr.bf16.mxu0 %v1455_v15 }
 0x399   :  { %v1180_v6 = vpop.permute.xlu0 %1179  ;;  %1628 = vmatpush1.bf16.msra.mxu0 %v1451_v3  ;;  %v1262_v14 = vpop.permute.xlu1 %1261 }
 0x39a   :  { %v1275_v34 = vsel %vm533_vm5, %v14271_v24, %v1262_v14  ;;  %v1276_v37 = vsel %vm533_vm5, %v1262_v14, %v14363_v55  ;;  %v1192_v48 = vsel %vm443_vm0, %v14333_v22, %v1180_v6 }
 0x39b   :  { %v1390_v59 = vrot.slane %v1275_v34, 4  ;;  %v1391_v57 = vrot.slane %v1276_v37, 4  ;;  %1593 = vmatpush1.bf16.msra.mxu1 %v1559_v16  ;;  %v1372_v12 = vrot.slane %v1192_v48, 4 }
 0x39d   :  { %v1152_v20 = vpop.permute.xlu0 %1151  ;;  %v14386_v19 = vpop.permute.xlu1 %1319  ;;  %v1491_v1 = vsel %vm16671_vm3, %v14151_v38, %v1391_v57  ;;  %v1487_v25 = vsel %vm16671_vm3, %v14115_v29, %v1390_v59  ;;  %v1303_v38 = vsel %vm563_vm7, %v14296_v11, %v14331_v0 }
 0x39e   :  { %v1332_v24 = vsel %vm593_vm6, %v14324_v44, %v14386_v19  ;;  %10195 = vmatmul.mubr.msk.bf16.vlgmr.msra.gmra.mrb[8].mxu1 %vm824_vm9, %v14384_v51  ;;  %1629 = vmatprep.subr.bf16.mxu0 %v1491_v1  ;;  %v1523_v33 = vsel %vm16671_vm3, %v1303_v38, %v1400_v35  ;;  %v1359_v44 = vsel %vm623_vm8, %v14306_v41, %v14345_v46 }
 0x39f   :  { %1630 = vmatpush1.bf16.msra.mxu0 %v1487_v25  ;;  %1698 = vmatprep.mubr.bf16.mxu1 %v13295_v8  ;;  %v1401_v29 = vrot.slane %v1332_v24, 4  ;;  %v1164_v7 = vsel %vm412_vm2, %v14304_v40, %v1152_v20 }
 0x3a0   :  { %v1424_v15 = vsel %vm16671_vm3, %v1164_v7, %v1372_v12 }
 0x3a1   :  { %v1236_v28 = vpop.permute.xlu0 %1235  ;;  %v14404_v31 = vpop.permute.xlu1 %1291 }
 0x3a2   :  { %v1304_v9 = vsel %vm563_vm7, %v14331_v0, %v14404_v31  ;;  %v1565_v0 = vsel %vm16671_vm3, %v1359_v44, 0  ;;  %v1248_v40 = vsel %vm503_vm1, %v14311_v5, %v1236_v28 }
 0x3a3   :  { %v1527_v42 = vsel %vm16671_vm3, %v1304_v9, %v1401_v29  ;;  %v1382_v1 = vrot.slane %v1248_v40, 4 }
 0x3a4   :  { %1631 = vmatprep.subr.bf16.mxu0 %v1527_v42 }
 0x3a5   :  { %v1208_v4 = vpop.permute.xlu0 %1207  ;;  %1632 = vmatpush1.bf16.msra.mxu0 %v1523_v33  ;;  %v14414_v11 = vpop.permute.xlu1 %1347 }
 0x3a6   :  { %v1360_v39 = vsel %vm623_vm8, %v14345_v46, %v14414_v11  ;;  %v1220_v34 = vsel %vm473_vm4, %v14365_v50, %v1208_v4 }
 0x3a7   :  { %10196 = vmatprep.subr.msk.bf16.mxu0 %vm16671_vm3, %v1360_v39  ;;  %v1459_v5 = vsel %vm16671_vm3, %v1220_v34, %v1382_v1 }
 0x3a9   :  { %v1184_v27 = vpop.permute.xlu0 %1183  ;;  %1634 = vmatpush1.bf16.msra.mxu0 %v1565_v0  ;;  %v14421_v47 = vpop.permute.xlu1 %1267 }
 0x3ac   :  { %10197 = vmatmul.mubr.msk.bf16.vlgmr.msra.gmra.mrb[12].mxu0 %vm824_vm9, %v14384_v51 }
 0x3ad   :  { %v1156_v41 = vpop.permute.xlu0 %1155  ;;  %v14425_v36 = vpop.permute.xlu1 %1323  ;;  %1739 = vmatprep.mubr.bf16.mxu0 %v13295_v8 }
 0x3b1   :  { %v14428_v23 = vpop.permute.xlu0 %1239  ;;  %v14430_v17 = vpop.permute.xlu1 %1295 }
 0x3b5   :  { %v14432_v46 = vpop.permute.xlu0 %1211  ;;  %v14434_v43 = vpop.permute.xlu1 %1351 }
 0x3b9   :  { %v1266_v45 = vpop.permute.xlu0 %1265  ;;  %v1182_v53 = vpop.permute.xlu1 %1181 }
 0x3ba   :  { %v1193_v54 = vsel %vm443_vm0, %v1180_v6, %v1182_v53  ;;  %v1278_v22 = vsel %vm533_vm5, %v1266_v45, %v14421_v47  ;;  %v1277_v37 = vsel %vm533_vm5, %v14363_v55, %v1266_v45  ;;  %v1194_v35 = vsel %vm443_vm0, %v1182_v53, %v1184_v27 }
 0x3bb   :  { %v1373_v61 = vrot.slane %v1193_v54, 4  ;;  %v1393_v16 = vrot.slane %v1278_v22, 4  ;;  %v1392_v2 = vrot.slane %v1277_v37, 4  ;;  %v1374_v54 = vrot.slane %v1194_v35, 4 }
 0x3bd   :  { %v1322_v32 = vpop.permute.xlu0 %1321  ;;  %v1154_v58 = vpop.permute.xlu1 %1153  ;;  %v1499_v55 = vsel %vm16671_vm3, %v14230_v13, %v1393_v16  ;;  %v1495_v44 = vsel %vm16671_vm3, %v14184_v49, %v1392_v2 }
 0x3be   :  { %v1165_v52 = vsel %vm412_vm2, %v1152_v20, %v1154_v58  ;;  %v1334_v38 = vsel %vm593_vm6, %v1322_v32, %v14425_v36  ;;  %v1333_v9 = vsel %vm593_vm6, %v14386_v19, %v1322_v32 }
 0x3bf   :  { %v1428_v62 = vsel %vm16671_vm3, %v1165_v52, %v1373_v61  ;;  %v1403_v42 = vrot.slane %v1334_v38, 4 }
 0x3c0   :  { %1666 = vmatprep.subr.bf16.mxu1 %v1428_v62 }
 0x3c1   :  { %v1294_v3 = vpop.permute.xlu0 %1293  ;;  %1667 = vmatpush1.bf16.msra.mxu1 %v1424_v15  ;;  %v1238_v14 = vpop.permute.xlu1 %1237 }
 0x3c2   :  { %v1249_v6 = vsel %vm503_vm1, %v1236_v28, %v1238_v14  ;;  %v1306_v29 = vsel %vm563_vm7, %v1294_v3, %v14430_v17  ;;  %v1305_v13 = vsel %vm563_vm7, %v14404_v31, %v1294_v3 }
 0x3c3   :  { %v1383_v59 = vrot.slane %v1249_v6, 4  ;;  %v1535_v45 = vsel %vm16671_vm3, %v1306_v29, %v1403_v42 }
 0x3c5   :  { %v1350_v57 = vpop.permute.xlu0 %1349  ;;  %v1210_v20 = vpop.permute.xlu1 %1209 }
 0x3c6   :  { %v1221_v25 = vsel %vm473_vm4, %v1208_v4, %v1210_v20  ;;  %v1166_v4 = vsel %vm412_vm2, %v1154_v58, %v1156_v41  ;;  %v1361_v31 = vsel %vm623_vm8, %v14414_v11, %v1350_v57  ;;  %v1362_v32 = vsel %vm623_vm8, %v1350_v57, %v14434_v43 }
 0x3c7   :  { %v1463_v24 = vsel %vm16671_vm3, %v1221_v25, %v1383_v59  ;;  %v1432_v48 = vsel %vm16671_vm3, %v1166_v4, %v1374_v54  ;;  %v1250_v58 = vsel %vm503_vm1, %v1238_v14, %v14428_v23  ;;  %v1571_v12 = vsel %vm16671_vm3, %v1361_v31, 0 }
 0x3c8   :  { %1668 = vmatprep.subr.bf16.mxu1 %v1463_v24  ;;  %v1222_v11 = vsel %vm473_vm4, %v1210_v20, %v14432_v46  ;;  %v1384_v15 = vrot.slane %v1250_v58, 4 }
 0x3c9   :  { %1669 = vmatpush1.bf16.msra.mxu1 %v1459_v5  ;;  %v1186_v50 = vpop.permute.xlu1 %1185  ;;  %v1270_v33 = vpop.permute.xlu0 %1269 }
 0x3ca   :  { %v1195_v28 = vsel %vm443_vm0, %v1184_v27, %v1186_v50  ;;  %1670 = vmatprep.subr.bf16.mxu1 %v1499_v55  ;;  %v1402_v27 = vrot.slane %v1333_v9, 4  ;;  %v1279_v40 = vsel %vm533_vm5, %v14421_v47, %v1270_v33 }
 0x3cb   :  { %v1375_v39 = vrot.slane %v1195_v28, 4  ;;  %v1394_v37 = vrot.slane %v1279_v40, 4 }
 0x3cc   :  { %v1531_v49 = vsel %vm16671_vm3, %v1305_v13, %v1402_v27 }
 0x3cd   :  { %1671 = vmatpush1.bf16.msra.mxu1 %v1495_v44  ;;  %v1158_v0 = vpop.permute.xlu1 %1157  ;;  %v1298_v7 = vpop.permute.xlu0 %1297  ;;  %v1503_v38 = vsel %vm16671_vm3, %v14209_v60, %v1394_v37 }
 0x3ce   :  { %v1167_v53 = vsel %vm412_vm2, %v1156_v41, %v1158_v0  ;;  %1672 = vmatprep.subr.bf16.mxu1 %v1535_v45  ;;  %v1307_v35 = vsel %vm563_vm7, %v14430_v17, %v1298_v7 }
 0x3cf   :  { %v1436_v19 = vsel %vm16671_vm3, %v1167_v53, %v1375_v39 }
 0x3d0   :  { %1707 = vmatprep.subr.bf16.mxu0 %v1436_v19 }
 0x3d1   :  { %1673 = vmatpush1.bf16.msra.mxu1 %v1531_v49  ;;  %1708 = vmatpush1.bf16.msra.mxu0 %v1432_v48  ;;  %v1242_v61 = vpop.permute.xlu1 %1241  ;;  %v1188_v22 = vpop.permute.xlu0 %1187 }
 0x3d2   :  { %v1251_v41 = vsel %vm503_vm1, %v14428_v23, %v1242_v61  ;;  %10198 = vmatprep.subr.msk.bf16.mxu1 %vm16671_vm3, %v1362_v32  ;;  %v1467_v23 = vsel %vm16671_vm3, %v1222_v11, %v1384_v15  ;;  %v1196_v16 = vsel %vm443_vm0, %v1186_v50, %v1188_v22 }
 0x3d3   :  { %v1385_v52 = vrot.slane %v1251_v41, 4  ;;  %v1376_v20 = vrot.slane %v1196_v16, 4 }
 0x3d5   :  { %1675 = vmatpush1.bf16.msra.mxu1 %v1571_v12  ;;  %v1214_v62 = vpop.permute.xlu1 %1213 }
 0x3d6   :  { %v1223_v3 = vsel %vm473_vm4, %v14432_v46, %v1214_v62  ;;  %11695 = vmatprep.subr.bf16.mxu1 %v13296_v21  ;;  %v1328_v46 = vpop.permute.xlu0 %1327 }
 0x3d7   :  { %v1471_v6 = vsel %vm16671_vm3, %v1223_v3, %v1385_v52  ;;  %v1338_v54 = vsel %vm602_vm12, %v1328_v46, 0 }
 0x3d8   :  { %10199 = vmatmul.mubr.msk.bf16.vlgmr.msra.gmra.mrb[12].mxu1 %vm824_vm9, %v14384_v51  ;;  %1709 = vmatprep.subr.bf16.mxu0 %v1471_v6 }
 0x3d9   :  { %1710 = vmatpush1.bf16.msra.mxu0 %v1467_v23  ;;  %v1326_v14 = vpop.permute.xlu1 %1325  ;;  %11705 = vmatprep.mubr.msk.bf16.mxu1 %vm13297_vm10, %v13296_v21 }
 0x3da   :  { %v1335_v1 = vsel %vm593_vm6, %v14425_v36, %v1326_v14  ;;  %v1336_v2 = vsel %vm593_vm6, %v1326_v14, %v1328_v46  ;;  %v1244_v5 = vpop.permute.xlu0 %1243 }
 0x3db   :  { %v1404_v55 = vrot.slane %v1335_v1, 4  ;;  %v1405_v29 = vrot.slane %v1336_v2, 4 }
 0x3dd   :  { %v1272_v34 = vpop.permute.xlu1 %1271  ;;  %v1539_v42 = vsel %vm16671_vm3, %v1307_v35, %v1404_v55 }
 0x3de   :  { %v1280_v59 = vsel %vm533_vm5, %v1270_v33, %v1272_v34  ;;  %v1282_v60 = vsel %vm542_vm11, %v1272_v34, 0  ;;  %v1354_v44 = vpop.permute.xlu0 %1353  ;;  %vm2740_vm11 = vcmask 146432  }
 0x3df   :  { %v1395_v57 = vrot.slane %v1280_v59, 4  ;;  %v1396_v39 = vrot.slane %v1282_v60, 4  ;;  %v1363_v45 = vsel %vm623_vm8, %v14434_v43, %v1354_v44  ;;  %v1406_v43 = vrot.slane %v1338_v54, 4 }
 0x3e0   :  { %v1577_v53 = vsel %vm16671_vm3, %v1363_v45, 0 }
 0x3e1   :  { %v1160_v25 = vpop.permute.xlu1 %1159  ;;  %v1507_v24 = vsel %vm16671_vm3, %v14252_v10, %v1395_v57  ;;  %v1252_v10 = vsel %vm503_vm1, %v1242_v61, %v1244_v5  ;;  %v1511_v19 = vsel %vm16671_vm3, %v14263_v26, %v1396_v39 }
 0x3e2   :  { %v1168_v47 = vsel %vm412_vm2, %v1158_v0, %v1160_v25  ;;  %1711 = vmatprep.subr.bf16.mxu0 %v1507_v24  ;;  %v1386_v33 = vrot.slane %v1252_v10, 4  ;;  %vm1934_vm2 = vcmask 1047552  }
 0x3e3   :  { %1712 = vmatpush1.bf16.msra.mxu0 %v1503_v38  ;;  %v1440_v50 = vsel %vm16671_vm3, %v1168_v47, %v1376_v20 }
 0x3e4   :  { %11696 = vmatpush3.bf16.msra.mxu1 %v1440_v50 }
 0x3e5   :  { %v1300_v36 = vpop.permute.xlu1 %1299  ;;  %11697 = vmatprep.subr.bf16.mxu1 %v13296_v21 }
 0x3e6   :  { %v1308_v28 = vsel %vm563_vm7, %v1298_v7, %v1300_v36  ;;  %v1310_v49 = vsel %vm572_vm13, %v1300_v36, 0  ;;  %vm2540_vm7 = vcmask 97280  }
 0x3e7   :  { %v1543_v9 = vsel %vm16671_vm3, %v1308_v28, %v1405_v29  ;;  %v1546_v48 = vsel %vm16671_vm3, %v1310_v49, %v1406_v43 }
 0x3e8   :  { %1713 = vmatprep.subr.bf16.mxu0 %v1543_v9 }
 0x3e9   :  { %1714 = vmatpush1.bf16.msra.mxu0 %v1539_v42  ;;  %v1216_v4 = vpop.permute.xlu1 %1215 }
 0x3ea   :  { %v1224_v13 = vsel %vm473_vm4, %v1214_v62, %v1216_v4  ;;  %v13298_v4 = vmov 65535   ;;  %vm1929_vm4 = vcmask 252928  }
 0x3eb   :  { %v1475_v0 = vsel %vm16671_vm3, %v1224_v13, %v1386_v33  ;;  %v14578_v33 = vld [vmem:[%s16705_s24] sm:$0xff]   ;;  %v1935_v13 = vsel %vm1933_vm15, 4294967295, %v13298_v4  ;;  %vm2747_vm15 = vcmask 736256  }
 0x3ec   :  { %11698 = vmatpush3.bf16.msra.mxu1 %v1475_v0  ;;  %v14585_v45 = vsel %vm1934_vm2, %v1935_v13, 0  ;;  %vm2749_vm2 = vcmask 883712  }
 0x3ed   :  { %v1356_v17 = vpop.permute.xlu1 %1355  ;;  %11699 = vmatprep.subr.bf16.mxu1 %v13296_v21 }
 0x3ee   :  { %v1364_v27 = vsel %vm623_vm8, %v1354_v44, %v1356_v17  ;;  %v1366_v31 = vsel %vm632_vm14, %v1356_v17, 0  ;;  %v1553_v7 = vpop.permute.xlu0 %1552  ;;  %v12626_v44 = vld [vmem:[%s16705_s24 + $0x8] sm:$0xff]   ;;  %vm16669_vm8 = vcmask 31744   ;;  %vm2744_vm14 = vcmask 441344   ;;  %s13323_s24 = smov 17  }
 0x3ef   :  { %10200 = vmatprep.subr.msk.bf16.mxu0 %vm16671_vm3, %v1364_v27  ;;  %v1582_v26 = vsel %vm16671_vm3, %v1366_v31, 0  ;;  %v14589_v17 = vand.u32 %v12626_v44, %v14585_v45 }
 0x3f0   :  { %1716 = vmatpush1.bf16.msra.mxu0 %v1577_v53  ;;  %11700 = vmatpush3.bf16.msra.mxu1 %v1511_v19 }
 0x3f1   :  { %11701 = vmatprep.subr.bf16.mxu1 %v13296_v21  ;;  %11709 = vmatprep.subr.bf16.mxu0 %v13296_v21 }
 0x3f3   :  { %10201 = vmatmul.mubr.msk.bf16.vlgmr.msra.gmra.mrb[16].mxu0 %vm824_vm9, %v14384_v51 }
 0x3f4   :  { %11702 = vmatpush3.bf16.msra.mxu1 %v1546_v48  ;;  %11713 = vmatprep.mubr.msk.bf16.mxu0 %vm13297_vm10, %v13296_v21 }
 0x3f5   :  { %11703 = vmatprep.subr.bf16.mxu1 %v13296_v21  ;;  %11710 = vmatpush3.bf16.msra.mxu0 %v14578_v33 }
 0x3f6   :  { %11711 = vmatprep.subr.bf16.mxu0 %v13296_v21 }
 0x3f8   :  { %11704 = vmatpush3.bf16.msra.mxu1 %v1582_v26 }
 0x3f9   :  { %11717 = vmatprep.subr.bf16.mxu1 %v13296_v21  ;;  %11712 = vmatpush3.bf16.msra.mxu0 %v14589_v17 }
 0x3fa   :  { %11725 = vmatprep.subr.bf16.mxu0 %v13296_v21 }
 0x3fb   :  { %11706 = vmatmul.mubr.msk.bf16.vlgmr.msra.gmra.mrb[16].mxu1 %vm824_vm9, %v14384_v51 }
 0x3fc   :  { %11721 = vmatprep.mubr.msk.bf16.mxu1 %vm13297_vm10, %v13296_v21  ;;  %11718 = vmatpush3.bf16.msra.mxu1 %v14578_v33 }
 0x3fd   :  { %11719 = vmatprep.subr.bf16.mxu1 %v13296_v21 }
 0x400   :  { %11720 = vmatpush3.bf16.msra.mxu1 %v14589_v17 }
 0x401   :  { %11733 = vmatprep.subr.bf16.mxu1 %v13296_v21 }
 0x471   :  { %v1618_v61 = vpop.f32.mrb[8].mxu1 }
 0x472   :  { %v14545_v32 = vadd.f32 %v1618_v61, %v1553_v7  ;;  %v1620_v41 = vpop.f32.mrb[9].mxu1 }
 0x473   :  { %v14547_v58 = vadd.f32 %v1620_v41, %v1553_v7  ;;  %v1622_v12 = vpop.f32.mrb[10].mxu1 }
 0x474   :  { %v1788_v11 = vmax.f32 %v14545_v32, 0.0  ;;  %v1623_v52 = vpop.f32.mrb[11].mxu1 }
 0x475   :  { %v1789_v62 = vmax.f32 %v14547_v58, 0.0 }
 0x477   :  { %v12390_v51 = vpack.i.bf16 %v1789_v62, %v1788_v11 }
 0x479   :  { %12391 = vrot.lane.b32.xlu1 %v12390_v51, %s13291_s22 }
 0x47f   :  { %v1659_v15 = vpop.f32.mrb[12].mxu0 }
 0x480   :  { %v14556_v3 = vadd.f32 %v1659_v15, %v1553_v7  ;;  %v1661_v22 = vpop.f32.mrb[13].mxu0 }
 0x481   :  { %v14558_v6 = vadd.f32 %v1661_v22, %v1553_v7  ;;  %v1663_v23 = vpop.f32.mrb[14].mxu0 }
 0x482   :  { %v1790_v14 = vmax.f32 %v14556_v3, 0.0  ;;  %v1664_v40 = vpop.f32.mrb[15].mxu0 }
 0x483   :  { %v1791_v46 = vmax.f32 %v14558_v6, 0.0 }
 0x484   :  { %1810 = vrot.lane.b32.xlu0 %v1790_v14, %s13291_s22 }
 0x485   :  { %1812 = vrot.lane.b32.xlu1 %v1791_v46, %s13291_s22 }
 0x4ab   :  { %v1700_v34 = vpop.f32.mrb[12].mxu1 }
 0x4ac   :  { %v1701_v37 = vadd.f32 %v1700_v34, %v1553_v7  ;;  %v1702_v16 = vpop.f32.mrb[13].mxu1 }
 0x4ad   :  { %v14566_v59 = vadd.f32 %v1702_v16, %v1553_v7  ;;  %v1704_v57 = vpop.f32.mrb[14].mxu1 }
 0x4ae   :  { %v1792_v20 = vmax.f32 %v1701_v37, 0.0  ;;  %v1705_v1 = vpop.f32.mrb[15].mxu1 }
 0x4af   :  { %v1793_v25 = vmax.f32 %v14566_v59, 0.0 }
 0x4b0   :  { %1814 = vrot.lane.b32.xlu0 %v1792_v20, %s13291_s22 }
 0x4b1   :  { %1816 = vrot.lane.b32.xlu1 %v1793_v25, %s13291_s22 }
 0x4c6   :  { %v1741_v24 = vpop.f32.mrb[16].mxu0 }
 0x4c7   :  { %v1742_v2 = vadd.f32 %v1741_v24, %v1553_v7  ;;  %v1743_v47 = vpop.f32.mrb[17].mxu0 }
 0x4c8   :  { %v14571_v38 = vadd.f32 %v1743_v47, %v1553_v7  ;;  %v1745_v5 = vpop.f32.mrb[18].mxu0 }
 0x4c9   :  { %v1794_v50 = vmax.f32 %v1742_v2, 0.0  ;;  %v1746_v55 = vpop.f32.mrb[19].mxu0 }
 0x4ca   :  { %v1795_v29 = vmax.f32 %v14571_v38, 0.0 }
 0x4cb   :  { %1818 = vrot.lane.b32.xlu0 %v1794_v50, %s13291_s22 }
 0x4cc   :  { %1820 = vrot.lane.b32.xlu1 %v1795_v29, %s13291_s22 }
 0x4ce   :  { %v1782_v36 = vpop.f32.mrb[16].mxu1 }
 0x4cf   :  { %v1783_v10 = vadd.f32 %v1782_v36, %v1553_v7  ;;  %v11707_v28 = vpop.f32.mrb[17].mxu1 }
 0x4d0   :  { %v1785_v35 = vpop.f32.mrb[18].mxu1 }
 0x4d1   :  { %v1796_v9 = vmax.f32 %v1783_v10, 0.0  ;;  %v11708_v60 = vpop.f32.mrb[19].mxu1 }
 0x4d3   :  { %1822 = vrot.lane.b32.xlu0 %v1796_v9, %s13291_s22 }
 0x4eb   :  { %v12392_v42 = vpop.permute.xlu1 %12391 }
 0x4ec   :  { %v12394_v39 = vunpack.i.h.bf16 %v12392_v42  ;;  %v12393_v0 = vunpack.i.l.bf16 %v12392_v42 }
 0x4ee   :  { %v1825_v54 = vsel %vm533_vm5, %v12393_v0, %v12394_v39 }
 0x4ef   :  { %v1842_v49 = vmax.f32 %v1788_v11, %v1825_v54 }
 0x4f6   :  { %v1811_v27 = vpop.permute.xlu0 %1810 }
 0x4f7   :  { %v1826_v53 = vsel %vm533_vm5, %v12394_v39, %v1811_v27  ;;  %v1813_v19 = vpop.permute.xlu1 %1812 }
 0x4f8   :  { %v1843_v43 = vmax.f32 %v1789_v62, %v1826_v53  ;;  %v1827_v48 = vsel %vm533_vm5, %v1811_v27, %v1813_v19 }
 0x4f9   :  { %v1844_v31 = vmax.f32 %v1790_v14, %v1827_v48 }
 0x4fa   :  { %v12395_v26 = vpack.i.bf16 %v1843_v43, %v1842_v49 }
 0x4fb   :  { %1864 = vrot.lane.b32.xlu0 %v1844_v31, %s13292_s23 }
 0x4fc   :  { %12396 = vrot.lane.b32.xlu1 %v12395_v26, %s13292_s23 }
 0x522   :  { %v1815_v7 = vpop.permute.xlu0 %1814 }
 0x523   :  { %v1828_v61 = vsel %vm533_vm5, %v1813_v19, %v1815_v7  ;;  %v1817_v41 = vpop.permute.xlu1 %1816 }
 0x524   :  { %v1845_v12 = vmax.f32 %v1791_v46, %v1828_v61  ;;  %v1829_v32 = vsel %vm533_vm5, %v1815_v7, %v1817_v41 }
 0x525   :  { %v1846_v11 = vmax.f32 %v1792_v20, %v1829_v32 }
 0x526   :  { %1866 = vrot.lane.b32.xlu1 %v1845_v12, %s13292_s23 }
 0x527   :  { %1868 = vrot.lane.b32.xlu0 %v1846_v11, %s13292_s23 }
 0x53d   :  { %v1819_v58 = vpop.permute.xlu0 %1818 }
 0x53e   :  { %v1830_v52 = vsel %vm533_vm5, %v1817_v41, %v1819_v58  ;;  %v1821_v62 = vpop.permute.xlu1 %1820 }
 0x53f   :  { %v1847_v51 = vmax.f32 %v1793_v25, %v1830_v52  ;;  %v1831_v15 = vsel %vm533_vm5, %v1819_v58, %v1821_v62 }
 0x540   :  { %v14612_v3 = vmax.f32 %v1794_v50, %v1831_v15 }
 0x541   :  { %1870 = vrot.lane.b32.xlu1 %v1847_v51, %s13292_s23 }
 0x542   :  { %1872 = vrot.lane.b32.xlu0 %v14612_v3, %s13292_s23 }
 0x545   :  { %v1823_v22 = vpop.permute.xlu0 %1822 }
 0x546   :  { %v1832_v6 = vsel %vm533_vm5, %v1821_v62, %v1823_v22  ;;  %v14618_v23 = vmax.f32 %v1796_v9, %v1823_v22 }
 0x547   :  { %v14620_v14 = vmax.f32 %v1795_v29, %v1832_v6 }
 0x548   :  { %1876 = vrot.lane.b32.xlu0 %v14618_v23, %s13292_s23 }
 0x549   :  { %1874 = vrot.lane.b32.xlu1 %v14620_v14, %s13292_s23  ;;  %s13317_s23 = smov 16  }
 0x56d   :  { %v1865_v37 = vpop.permute.xlu0 %1864 }
 0x56e   :  { %v12397_v40 = vpop.permute.xlu1 %12396 }
 0x56f   :  { %v12399_v46 = vunpack.i.h.bf16 %v12397_v40  ;;  %v12398_v34 = vunpack.i.l.bf16 %v12397_v40 }
 0x571   :  { %v1880_v16 = vsel %vm593_vm6, %v12399_v46, %v1865_v37  ;;  %v1879_v59 = vsel %vm593_vm6, %v12398_v34, %v12399_v46 }
 0x572   :  { %v1897_v57 = vmax.f32 %v1843_v43, %v1880_v16  ;;  %v1896_v20 = vmax.f32 %v1842_v49, %v1879_v59 }
 0x574   :  { %v1906_v1 = vpack.c.bf16 %v1897_v57, %v1897_v57  ;;  %v1905_v25 = vpack.c.bf16 %v1896_v20, %v1896_v20 }
 0x576   :  { %2027 = vrot.lane.b32.xlu0 %v1906_v1, %s13299_s25  ;;  %1981 = vrot.lane.b32.xlu1 %v1905_v25, %s13300_s20  ;;  %s13324_s25 = smov 111  }
 0x577   :  { %11714 = vmatmul.mubr.msk.bf16.vlgmr.msra.gmra.mrb[20].mxu0 %vm1929_vm4, %v1905_v25 }
 0x578   :  { %11726 = vmatpush3.bf16.msra.mxu0 %v14578_v33  ;;  %11729 = vmatprep.mubr.msk.bf16.mxu0 %vm13297_vm10, %v13296_v21 }
 0x579   :  { %11727 = vmatprep.subr.bf16.mxu0 %v13296_v21 }
 0x57a   :  { %2072 = vrot.lane.b32.xlu1 %v1906_v1, %s13301_s12 }
 0x57c   :  { %11728 = vmatpush3.bf16.msra.mxu0 %v14589_v17 }
 0x57d   :  { %11741 = vmatprep.subr.bf16.mxu0 %v13296_v21 }
 0x598   :  { %v1867_v24 = vpop.permute.xlu1 %1866 }
 0x599   :  { %v1881_v2 = vsel %vm593_vm6, %v1865_v37, %v1867_v24  ;;  %v1869_v47 = vpop.permute.xlu0 %1868 }
 0x59a   :  { %v1898_v38 = vmax.f32 %v1844_v31, %v1881_v2  ;;  %v1882_v5 = vsel %vm593_vm6, %v1867_v24, %v1869_v47 }
 0x59b   :  { %v1899_v55 = vmax.f32 %v1845_v12, %v1882_v5 }
 0x59c   :  { %v1907_v50 = vpack.c.bf16 %v1898_v38, %v1898_v38 }
 0x59d   :  { %v1908_v29 = vpack.c.bf16 %v1899_v55, %v1899_v55 }
 0x59e   :  { %2118 = vrot.lane.b32.xlu0 %v1907_v50, %s13302_s14  ;;  %2163 = vrot.lane.b32.xlu1 %v1907_v50, %s13303_s28  ;;  %s13325_s28 = smov 110  }
 0x5a2   :  { %2209 = vrot.lane.b32.xlu0 %v1908_v29, %s13304_s1  ;;  %2254 = vrot.lane.b32.xlu1 %v1908_v29, %s13305_s2  ;;  %s13326_s1 = smov 109  }
 0x5b3   :  { %v1871_v36 = vpop.permute.xlu1 %1870 }
 0x5b4   :  { %v1883_v10 = vsel %vm593_vm6, %v1869_v47, %v1871_v36  ;;  %v1873_v28 = vpop.permute.xlu0 %1872 }
 0x5b5   :  { %v1900_v35 = vmax.f32 %v1846_v11, %v1883_v10  ;;  %v1884_v9 = vsel %vm593_vm6, %v1871_v36, %v1873_v28 }
 0x5b6   :  { %v1901_v42 = vmax.f32 %v1847_v51, %v1884_v9 }
 0x5b7   :  { %v1909_v60 = vpack.c.bf16 %v1900_v35, %v1900_v35 }
 0x5b8   :  { %v1910_v44 = vpack.c.bf16 %v1901_v42, %v1901_v42 }
 0x5b9   :  { %2300 = vrot.lane.b32.xlu0 %v1909_v60, %s13306_s7  ;;  %2346 = vrot.lane.b32.xlu1 %v1909_v60, %s13307_s3  ;;  %s16708_s7 = sld [smem:[#allocation40_spill]] }
 0x5ba   :  { %v1877_v0 = vpop.permute.xlu0 %1876 }
 0x5bb   :  { %v1875_v13 = vpop.permute.xlu1 %1874  ;;  %v1904_v49 = vmax.f32 %v14618_v23, %v1877_v0 }
 0x5bc   :  { %v1885_v39 = vsel %vm593_vm6, %v1873_v28, %v1875_v13  ;;  %v1886_v53 = vsel %vm593_vm6, %v1875_v13, %v1877_v0  ;;  %vm16668_vm6 = vcmask 162816  }
 0x5bd   :  { %v1902_v54 = vmax.f32 %v14612_v3, %v1885_v39  ;;  %2348 = vrot.lane.b32.xlu0 %v1910_v44, %s13307_s3  ;;  %2395 = vrot.lane.b32.xlu1 %v1910_v44, %s13308_s0  ;;  %v1903_v19 = vmax.f32 %v14620_v14, %v1886_v53  ;;  %v1913_v48 = vpack.c.bf16 %v1904_v49, %v1904_v49  ;;  %s16711_s3 = sld [smem:[#allocation35_spill]] }
 0x5bf   :  { %v1911_v27 = vpack.c.bf16 %v1902_v54, %v1902_v54  ;;  %v1912_v43 = vpack.c.bf16 %v1903_v19, %v1903_v19 }
 0x5c1   :  { %2441 = vrot.lane.b32.xlu0 %v1910_v44, %s13309_s11  ;;  %2443 = vrot.lane.b32.xlu1 %v1911_v27, %s13309_s11 }
 0x5c5   :  { %2490 = vrot.lane.b32.xlu0 %v1911_v27, %s13310_s4  ;;  %2536 = vrot.lane.b32.xlu1 %v1911_v27, %s13275_s27  ;;  %s13327_s4 = smov 56  }
 0x5c9   :  { %2538 = vrot.lane.b32.xlu0 %v1912_v43, %s13275_s27  ;;  %2585 = vrot.lane.b32.xlu1 %v1912_v43, %s13311_s13 }
 0x5cd   :  { %2631 = vrot.lane.b32.xlu0 %v1912_v43, %s13279_s21  ;;  %2633 = vrot.lane.b32.xlu1 %v1913_v48, %s13279_s21 }
 0x5e8   :  { %v2028_v31 = vpop.permute.xlu0 %2027  ;;  %v1982_v26 = vpop.permute.xlu1 %1981 }
 0x5e9   :  { %11722 = vmatmul.mubr.msk.bf16.vlgmr.msra.gmra.mrb[20].mxu1 %vm1929_vm4, %v1982_v26  ;;  %11730 = vmatmul.mubr.msk.bf16.vlgmr.msra.gmra.mrb[24].mxu0 %vm1929_vm4, %v2028_v31 }
 0x5ea   :  { %11734 = vmatpush3.bf16.msra.mxu1 %v14578_v33  ;;  %11737 = vmatprep.mubr.msk.bf16.mxu1 %vm13297_vm10, %v13296_v21 }
 0x5eb   :  { %11735 = vmatprep.subr.bf16.mxu1 %v13296_v21  ;;  %11742 = vmatpush3.bf16.msra.mxu0 %v14578_v33 }
 0x5ec   :  { %11743 = vmatprep.subr.bf16.mxu0 %v13296_v21  ;;  %11745 = vmatprep.mubr.msk.bf16.mxu0 %vm13297_vm10, %v13296_v21  ;;  %v2073_v7 = vpop.permute.xlu1 %2072 }
 0x5ee   :  { %11736 = vmatpush3.bf16.msra.mxu1 %v14589_v17 }
 0x5ef   :  { %11749 = vmatprep.subr.bf16.mxu1 %v13296_v21  ;;  %11744 = vmatpush3.bf16.msra.mxu0 %v14589_v17 }
 0x5f0   :  { %11757 = vmatprep.subr.bf16.mxu0 %v13296_v21 }
 0x5f1   :  { %11738 = vmatmul.mubr.msk.bf16.vlgmr.msra.gmra.mrb[24].mxu1 %vm1929_vm4, %v2073_v7 }
 0x5f2   :  { %11750 = vmatpush3.bf16.msra.mxu1 %v14578_v33  ;;  %11753 = vmatprep.mubr.msk.bf16.mxu1 %vm13297_vm10, %v13296_v21 }
 0x5f3   :  { %11751 = vmatprep.subr.bf16.mxu1 %v13296_v21 }
 0x5f6   :  { %11752 = vmatpush3.bf16.msra.mxu1 %v14589_v17 }
 0x5f7   :  { %11765 = vmatprep.subr.bf16.mxu1 %v13296_v21 }
 0x610   :  { %v2119_v61 = vpop.permute.xlu0 %2118  ;;  %v2164_v41 = vpop.permute.xlu1 %2163 }
 0x611   :  { %11746 = vmatmul.mubr.msk.bf16.vlgmr.msra.gmra.mrb[28].mxu0 %vm1929_vm4, %v2119_v61  ;;  %11754 = vmatmul.mubr.msk.bf16.vlgmr.msra.gmra.mrb[28].mxu1 %vm1929_vm4, %v2164_v41 }
 0x612   :  { %11758 = vmatpush3.bf16.msra.mxu0 %v14578_v33  ;;  %11766 = vmatpush3.bf16.msra.mxu1 %v14578_v33 }
 0x613   :  { %11759 = vmatprep.subr.bf16.mxu0 %v13296_v21  ;;  %11767 = vmatprep.subr.bf16.mxu1 %v13296_v21 }
 0x614   :  { %11761 = vmatprep.mubr.msk.bf16.mxu0 %vm13297_vm10, %v13296_v21  ;;  %11769 = vmatprep.mubr.msk.bf16.mxu1 %vm13297_vm10, %v13296_v21  ;;  %v2210_v12 = vpop.permute.xlu0 %2209  ;;  %v2255_v32 = vpop.permute.xlu1 %2254 }
 0x616   :  { %11760 = vmatpush3.bf16.msra.mxu0 %v14589_v17  ;;  %11768 = vmatpush3.bf16.msra.mxu1 %v14589_v17 }
 0x617   :  { %11773 = vmatprep.subr.bf16.mxu0 %v13296_v21  ;;  %11781 = vmatprep.subr.bf16.mxu1 %v13296_v21 }
 0x619   :  { %11762 = vmatmul.mubr.msk.bf16.vlgmr.msra.gmra.mrb[32].mxu0 %vm1929_vm4, %v2210_v12  ;;  %11770 = vmatmul.mubr.msk.bf16.vlgmr.msra.gmra.mrb[32].mxu1 %vm1929_vm4, %v2255_v32 }
 0x61a   :  { %11774 = vmatpush3.bf16.msra.mxu0 %v14578_v33  ;;  %11782 = vmatpush3.bf16.msra.mxu1 %v14578_v33 }
 0x61b   :  { %11775 = vmatprep.subr.bf16.mxu0 %v13296_v21  ;;  %11777 = vmatprep.mubr.msk.bf16.mxu0 %vm13297_vm10, %v13296_v21 }
 0x61c   :  { %11783 = vmatprep.subr.bf16.mxu1 %v13296_v21  ;;  %11785 = vmatprep.mubr.msk.bf16.mxu1 %vm13297_vm10, %v13296_v21 }
 0x61e   :  { %11776 = vmatpush3.bf16.msra.mxu0 %v14589_v17  ;;  %11784 = vmatpush3.bf16.msra.mxu1 %v14589_v17 }
 0x61f   :  { %11789 = vmatprep.subr.bf16.mxu0 %v13296_v21  ;;  %11797 = vmatprep.subr.bf16.mxu1 %v13296_v21 }
 0x62b   :  { %v2301_v11 = vpop.permute.xlu0 %2300  ;;  %v2347_v58 = vpop.permute.xlu1 %2346 }
 0x62c   :  { %11778 = vmatmul.mubr.msk.bf16.vlgmr.msra.gmra.mrb[36].mxu0 %vm1929_vm4, %v2301_v11 }
 0x62d   :  { %11790 = vmatpush3.bf16.msra.mxu0 %v14578_v33  ;;  %11793 = vmatprep.mubr.msk.bf16.mxu0 %vm13297_vm10, %v13296_v21 }
 0x62e   :  { %11791 = vmatprep.subr.bf16.mxu0 %v13296_v21 }
 0x62f   :  { %v2349_v52 = vpop.permute.xlu0 %2348  ;;  %v2396_v62 = vpop.permute.xlu1 %2395 }
 0x630   :  { %v2351_v51 = vsel %vm602_vm12, %v2347_v58, %v2349_v52  ;;  %vm2742_vm12 = vcmask 293888  }
 0x631   :  { %11786 = vmatmul.mubr.msk.bf16.vlgmr.msra.gmra.mrb[36].mxu1 %vm1929_vm4, %v2351_v51  ;;  %11792 = vmatpush3.bf16.msra.mxu0 %v14589_v17 }
 0x632   :  { %11798 = vmatpush3.bf16.msra.mxu1 %v14578_v33  ;;  %11805 = vmatprep.subr.bf16.mxu0 %v13296_v21 }
 0x633   :  { %v2442_v15 = vpop.permute.xlu0 %2441  ;;  %v2444_v3 = vpop.permute.xlu1 %2443  ;;  %11799 = vmatprep.subr.bf16.mxu1 %v13296_v21  ;;  %11801 = vmatprep.mubr.msk.bf16.mxu1 %vm13297_vm10, %v13296_v21 }
 0x634   :  { %11794 = vmatmul.mubr.msk.bf16.vlgmr.msra.gmra.mrb[40].mxu0 %vm1929_vm4, %v2396_v62  ;;  %v2446_v6 = vsel %vm16668_vm6, %v2442_v15, %v2444_v3  ;;  %vm2764_vm6 = vcmask 1014784  }
 0x635   :  { %11806 = vmatpush3.bf16.msra.mxu0 %v14578_v33  ;;  %11809 = vmatprep.mubr.msk.bf16.mxu0 %vm13297_vm10, %v13296_v21 }
 0x636   :  { %11800 = vmatpush3.bf16.msra.mxu1 %v14589_v17  ;;  %11807 = vmatprep.subr.bf16.mxu0 %v13296_v21 }
 0x637   :  { %v2491_v22 = vpop.permute.xlu0 %2490  ;;  %11813 = vmatprep.subr.bf16.mxu1 %v13296_v21  ;;  %v2537_v23 = vpop.permute.xlu1 %2536 }
 0x639   :  { %11802 = vmatmul.mubr.msk.bf16.vlgmr.msra.gmra.mrb[40].mxu1 %vm1929_vm4, %v2446_v6  ;;  %11808 = vmatpush3.bf16.msra.mxu0 %v14589_v17 }
 0x63a   :  { %11814 = vmatpush3.bf16.msra.mxu1 %v14578_v33  ;;  %11821 = vmatprep.subr.bf16.mxu0 %v13296_v21 }
 0x63b   :  { %11815 = vmatprep.subr.bf16.mxu1 %v13296_v21  ;;  %11817 = vmatprep.mubr.msk.bf16.mxu1 %vm13297_vm10, %v13296_v21  ;;  %v2539_v14 = vpop.permute.xlu0 %2538  ;;  %v2586_v40 = vpop.permute.xlu1 %2585 }
 0x63c   :  { %11810 = vmatmul.mubr.msk.bf16.vlgmr.msra.gmra.mrb[44].mxu0 %vm1929_vm4, %v2491_v22  ;;  %v2541_v46 = vsel %vm2540_vm7, %v2537_v23, %v2539_v14 }
 0x63d   :  { %11822 = vmatpush3.bf16.msra.mxu0 %v14578_v33  ;;  %11825 = vmatprep.mubr.msk.bf16.mxu0 %vm13297_vm10, %v13296_v21 }
 0x63e   :  { %11816 = vmatpush3.bf16.msra.mxu1 %v14589_v17  ;;  %11823 = vmatprep.subr.bf16.mxu0 %v13296_v21 }
 0x63f   :  { %11829 = vmatprep.subr.bf16.mxu1 %v13296_v21  ;;  %v2632_v34 = vpop.permute.xlu0 %2631  ;;  %v2634_v37 = vpop.permute.xlu1 %2633 }
 0x640   :  { %v2636_v16 = vsel %vm16669_vm8, %v2632_v34, %v2634_v37  ;;  %vm2766_vm8 = vcmask 113664  }
 0x641   :  { %11818 = vmatmul.mubr.msk.bf16.vlgmr.msra.gmra.mrb[44].mxu1 %vm1929_vm4, %v2541_v46  ;;  %11824 = vmatpush3.bf16.msra.mxu0 %v14589_v17 }
 0x642   :  { %11830 = vmatpush3.bf16.msra.mxu1 %v14578_v33  ;;  %11833 = vmatprep.mubr.msk.bf16.mxu1 %vm13297_vm10, %v13296_v21 }
 0x643   :  { %11831 = vmatprep.subr.bf16.mxu1 %v13296_v21 }
 0x644   :  { %11826 = vmatmul.mubr.msk.bf16.vlgmr.msra.gmra.mrb[48].mxu0 %vm1929_vm4, %v2586_v40 }
 0x645   :  { %2988 = vmatprep.mubr.bf16.mxu0 %v13295_v8 }
 0x646   :  { %11832 = vmatpush3.bf16.msra.mxu1 %v14589_v17 }
 0x647   :  { %11837 = vmatprep.subr.bf16.mxu1 %v13296_v21 }
 0x649   :  { %11834 = vmatmul.mubr.msk.bf16.vlgmr.msra.gmra.mrb[48].mxu1 %vm1929_vm4, %v2636_v16  ;;  %vm2751_vm4 = vcmask 1031168  }
 0x64a   :  { %v14753_v33 = vpop.f32.mrb[20].mxu0  ;;  %11847 = vmatprep.mubr.msk.bf16.mxu1 %vm13297_vm10, %v13296_v21 }
 0x64b   :  { %v11715_v59 = vpop.f32.mrb[21].mxu0 }
 0x64c   :  { %v1977_v57 = vpop.f32.mrb[22].mxu0 }
 0x64d   :  { %v11716_v20 = vpop.f32.mrb[23].mxu0 }
 0x6bc   :  { %v2020_v1 = vpop.f32.mrb[20].mxu1  ;;  %v2066_v25 = vpop.f32.mrb[24].mxu0 }
 0x6bd   :  { %2681 = vrot.lane.b32.xlu0 %v2020_v1, %s13312_s10  ;;  %v11723_v17 = vpop.f32.mrb[21].mxu1  ;;  %2685 = vrot.lane.b32.xlu1 %v2066_v25, %s13305_s2  ;;  %v11731_v24 = vpop.f32.mrb[25].mxu0  ;;  %s16707_s2 = sld [smem:[#allocation33_spill]] }
 0x6be   :  { %v2023_v2 = vpop.f32.mrb[22].mxu1  ;;  %v2069_v47 = vpop.f32.mrb[26].mxu0 }
 0x6bf   :  { %v11724_v38 = vpop.f32.mrb[23].mxu1  ;;  %v11732_v5 = vpop.f32.mrb[27].mxu0 }
 0x6c4   :  { %v2111_v50 = vpop.f32.mrb[24].mxu1 }
 0x6c5   :  { %v11739_v55 = vpop.f32.mrb[25].mxu1  ;;  %2689 = vrot.lane.b32.xlu1 %v2111_v50, %s13313_s15  ;;  %s13329_s15 = smov 40  }
 0x6c6   :  { %v2114_v29 = vpop.f32.mrb[26].mxu1 }
 0x6c7   :  { %v11740_v36 = vpop.f32.mrb[27].mxu1 }
 0x6e4   :  { %v2157_v10 = vpop.f32.mrb[28].mxu0  ;;  %v2202_v28 = vpop.f32.mrb[28].mxu1 }
 0x6e5   :  { %v11755_v35 = vpop.f32.mrb[29].mxu1  ;;  %2693 = vrot.lane.b32.xlu1 %v2157_v10, %s13311_s13  ;;  %v11747_v9 = vpop.f32.mrb[29].mxu0  ;;  %s13328_s13 = smov 92  }
 0x6e6   :  { %v2160_v60 = vpop.f32.mrb[30].mxu0  ;;  %v2205_v42 = vpop.f32.mrb[30].mxu1 }
 0x6e7   :  { %v11748_v44 = vpop.f32.mrb[31].mxu0  ;;  %v11756_v13 = vpop.f32.mrb[31].mxu1 }
 0x6e9   :  { %2697 = vrot.lane.b32.xlu1 %v2202_v28, %s13314_s16  ;;  %s13330_s16 = smov 76  }
 0x6ec   :  { %v2248_v39 = vpop.f32.mrb[32].mxu0  ;;  %v2293_v0 = vpop.f32.mrb[32].mxu1 }
 0x6ed   :  { %v11771_v54 = vpop.f32.mrb[33].mxu1  ;;  %2705 = vrot.lane.b32.xlu1 %v2293_v0, %s13315_s9  ;;  %v11763_v27 = vpop.f32.mrb[33].mxu0  ;;  %s13332_s9 = smov 30  }
 0x6ee   :  { %v2251_v53 = vpop.f32.mrb[34].mxu0  ;;  %v2296_v19 = vpop.f32.mrb[34].mxu1 }
 0x6ef   :  { %v11764_v49 = vpop.f32.mrb[35].mxu0  ;;  %v11772_v43 = vpop.f32.mrb[35].mxu1 }
 0x6f1   :  { %2701 = vrot.lane.b32.xlu1 %v2248_v39, %s13316_s17 }
 0x6ff   :  { %v2339_v48 = vpop.f32.mrb[36].mxu0 }
 0x700   :  { %2709 = vrot.lane.b32.xlu0 %v2339_v48, %s13317_s23  ;;  %v11779_v31 = vpop.f32.mrb[37].mxu0  ;;  %s13334_s23 = smov 11  }
 0x701   :  { %v2342_v26 = vpop.f32.mrb[38].mxu0 }
 0x702   :  { %v11780_v7 = vpop.f32.mrb[39].mxu0 }
 0x704   :  { %v2389_v61 = vpop.f32.mrb[36].mxu1 }
 0x705   :  { %v11787_v41 = vpop.f32.mrb[37].mxu1  ;;  %2713 = vrot.lane.b32.xlu0 %v2389_v61, %s13288_s8  ;;  %s13319_s8 = smov 106  }
 0x706   :  { %v2392_v12 = vpop.f32.mrb[38].mxu1 }
 0x707   :  { %v11788_v32 = vpop.f32.mrb[39].mxu1  ;;  %v2434_v11 = vpop.f32.mrb[40].mxu0 }
 0x708   :  { %v11795_v58 = vpop.f32.mrb[41].mxu0 }
 0x709   :  { %2717 = vrot.lane.b32.xlu0 %v2434_v11, %s13301_s12  ;;  %v2437_v52 = vpop.f32.mrb[42].mxu0  ;;  %s16706_s12 = sld [smem:[#allocation39_spill]] }
 0x70a   :  { %v11796_v62 = vpop.f32.mrb[43].mxu0 }
 0x70c   :  { %v2484_v51 = vpop.f32.mrb[40].mxu1 }
 0x70d   :  { %v11803_v15 = vpop.f32.mrb[41].mxu1  ;;  %2721 = vrot.lane.b32.xlu0 %v2484_v51, %s13318_s26 }
 0x70e   :  { %v2487_v3 = vpop.f32.mrb[42].mxu1 }
 0x70f   :  { %v11804_v22 = vpop.f32.mrb[43].mxu1  ;;  %v2529_v6 = vpop.f32.mrb[44].mxu0  ;;  %v2929_v58 = vld [vmem:[%s16706_s12 + $0x8] sm:$0xff]  ;;  %v2928_v52 = vld [vmem:[%s16706_s12] sm:$0xff]  ;;  %s16726_s12 = sld [smem:[#allocation44_spill]] }
 0x710   :  { %v11811_v23 = vpop.f32.mrb[45].mxu0 }
 0x711   :  { %2725 = vrot.lane.b32.xlu0 %v2529_v6, %s13308_s0  ;;  %v2532_v14 = vpop.f32.mrb[46].mxu0 }
 0x712   :  { %v11812_v40 = vpop.f32.mrb[47].mxu0 }
 0x714   :  { %v2579_v46 = vpop.f32.mrb[44].mxu1 }
 0x715   :  { %v11819_v34 = vpop.f32.mrb[45].mxu1  ;;  %2729 = vrot.lane.b32.xlu0 %v2579_v46, %s13319_s8  ;;  %s13335_s8 = smov 9  }
 0x716   :  { %v2582_v37 = vpop.f32.mrb[46].mxu1 }
 0x717   :  { %v11820_v16 = vpop.f32.mrb[47].mxu1  ;;  %v2624_v59 = vpop.f32.mrb[48].mxu0 }
 0x718   :  { %2733 = vrot.lane.b32.xlu1 %v2624_v59, %s13320_s30  ;;  %v11827_v57 = vpop.f32.mrb[49].mxu0 }
 0x719   :  { %v2627_v20 = vpop.f32.mrb[50].mxu0 }
 0x71a   :  { %v11828_v1 = vpop.f32.mrb[51].mxu0 }
 0x71c   :  { %v2674_v25 = vpop.f32.mrb[48].mxu1 }
 0x71d   :  { %v11835_v17 = vpop.f32.mrb[49].mxu1  ;;  %2737 = vrot.lane.b32.xlu0 %v2674_v25, %s13321_s5  ;;  %s13336_s5 = smov 119  }
 0x71e   :  { %v2677_v24 = vpop.f32.mrb[50].mxu1 }
 0x71f   :  { %v11836_v2 = vpop.f32.mrb[51].mxu1 }
 0x72f   :  { %v2686_v47 = vpop.permute.xlu1 %2685  ;;  %v2682_v50 = vpop.permute.xlu0 %2681 }
 0x730   :  { %v2741_v29 = vsel %vm2740_vm11, %v14753_v33, %v2682_v50 }
 0x731   :  { %v2743_v10 = vsel %vm2742_vm12, %v2741_v29, %v2686_v47  ;;  %vm2753_vm12 = vcmask 130048  }
 0x737   :  { %v2690_v38 = vpop.permute.xlu1 %2689 }
 0x738   :  { %v2745_v28 = vsel %vm2744_vm14, %v2743_v10, %v2690_v38  ;;  %vm2756_vm14 = vcmask 424960  }
 0x757   :  { %v2694_v5 = vpop.permute.xlu1 %2693 }
 0x758   :  { %v2746_v35 = vsel %vm824_vm9, %v2745_v28, %v2694_v5 }
 0x75b   :  { %v2698_v55 = vpop.permute.xlu1 %2697 }
 0x75c   :  { %v2748_v9 = vsel %vm2747_vm15, %v2746_v35, %v2698_v55  ;;  %vm16670_vm15 = vcmask 572416  }
 0x75f   :  { %v2706_v36 = vpop.permute.xlu1 %2705 }
 0x763   :  { %v2702_v60 = vpop.permute.xlu1 %2701 }
 0x764   :  { %v2750_v42 = vsel %vm2749_vm2, %v2748_v9, %v2702_v60  ;;  %vm2760_vm2 = vcmask 719872  }
 0x765   :  { %v2752_v44 = vsel %vm2751_vm4, %v2750_v42, %v2706_v36  ;;  %vm2762_vm4 = vcmask 867328  }
 0x766   :  { %v14769_v13 = vpack.c.bf16 %v2752_v44, %v2752_v44 }
 0x768   :  { %2809 = vrot.lane.b32.xlu0 %v14769_v13, %s13289_s18  ;;  %2786 = vrot.lane.b32.xlu1 %v14769_v13, %s13312_s10 }
 0x76c   :  { %2819 = vrot.lane.b32.xlu0 %v14769_v13, %s13291_s22  ;;  %2774 = vrot.lane.b32.xlu1 %v14769_v13, %s13322_s19 }
 0x770   :  { %2797 = vrot.lane.b32.xlu1 %v14769_v13, %s13323_s24 }
 0x772   :  { %v2710_v33 = vpop.permute.xlu0 %2709 }
 0x773   :  { %v2754_v53 = vsel %vm2753_vm12, %v2706_v36, %v2710_v33 }
 0x777   :  { %v2714_v39 = vpop.permute.xlu0 %2713 }
 0x778   :  { %v2755_v19 = vsel %vm443_vm0, %v2754_v53, %v2714_v39  ;;  %vm2780_vm0 = vcmask 154624  }
 0x77b   :  { %v2718_v0 = vpop.permute.xlu0 %2717 }
 0x77c   :  { %v2757_v49 = vsel %vm2756_vm14, %v2755_v19, %v2718_v0  ;;  %vm2835_vm14 = vcmask 908288  }
 0x77f   :  { %v2722_v54 = vpop.permute.xlu0 %2721 }
 0x780   :  { %v2759_v48 = vsel %vm16670_vm15, %v2757_v49, %v2722_v54  ;;  %vm2862_vm15 = vcmask 89088  }
 0x783   :  { %v2726_v27 = vpop.permute.xlu0 %2725 }
 0x784   :  { %v2761_v31 = vsel %vm2760_vm2, %v2759_v48, %v2726_v27  ;;  %vm2838_vm2 = vcmask 105472  }
 0x787   :  { %v2730_v43 = vpop.permute.xlu0 %2729 }
 0x788   :  { %v2763_v26 = vsel %vm2762_vm4, %v2761_v31, %v2730_v43  ;;  %vm2859_vm4 = vcmask 891904  }
 0x78a   :  { %v2734_v7 = vpop.permute.xlu1 %2733 }
 0x78b   :  { %v2765_v61 = vsel %vm2764_vm6, %v2763_v26, %v2734_v7  ;;  %vm2803_vm6 = vcmask 138240  }
 0x78c   :  { %v14784_v41 = vpack.c.bf16 %v2765_v61, %v2765_v61 }
 0x78e   :  { %2811 = vrot.lane.b32.xlu1 %v14784_v41, %s13289_s18  ;;  %2788 = vrot.lane.b32.xlu0 %v14784_v41, %s13312_s10 }
 0x78f   :  { %v2738_v12 = vpop.permute.xlu0 %2737 }
 0x790   :  { %v2767_v32 = vsel %vm2766_vm8, %v2734_v7, %v2738_v12  ;;  %vm2847_vm8 = vcmask 900096  }
 0x791   :  { %v14790_v11 = vpack.c.bf16 %v2767_v32, %v2767_v32 }
 0x792   :  { %2776 = vrot.lane.b32.xlu0 %v14784_v41, %s13322_s19 }
 0x793   :  { %2790 = vrot.lane.b32.xlu1 %v14790_v11, %s13312_s10 }
 0x796   :  { %2799 = vrot.lane.b32.xlu0 %v14784_v41, %s13323_s24 }
 0x797   :  { %2831 = vrot.lane.b32.xlu1 %v14784_v41, %s13324_s25 }
 0x79a   :  { %2821 = vrot.lane.b32.xlu0 %v14784_v41, %s13291_s22 }
 0x79b   :  { %2813 = vrot.lane.b32.xlu1 %v14790_v11, %s13289_s18 }
 0x79e   :  { %2843 = vrot.lane.b32.xlu0 %v14784_v41, %s13325_s28 }
 0x79f   :  { %2823 = vrot.lane.b32.xlu1 %v14790_v11, %s13291_s22 }
 0x7a2   :  { %2778 = vrot.lane.b32.xlu0 %v14790_v11, %s13322_s19 }
 0x7a3   :  { %2801 = vrot.lane.b32.xlu1 %v14790_v11, %s13323_s24 }
 0x7a6   :  { %2841 = vrot.lane.b32.xlu0 %v14769_v13, %s13325_s28 }
 0x7a7   :  { %2845 = vrot.lane.b32.xlu1 %v14790_v11, %s13325_s28 }
 0x7aa   :  { %2833 = vrot.lane.b32.xlu0 %v14790_v11, %s13324_s25 }
 0x7ab   :  { %2829 = vrot.lane.b32.xlu1 %v14769_v13, %s13324_s25 }
 0x7ae   :  { %2853 = vrot.lane.b32.xlu0 %v14769_v13, %s13326_s1 }
 0x7af   :  { %2855 = vrot.lane.b32.xlu1 %v14784_v41, %s13326_s1 }
 0x7b2   :  { %2857 = vrot.lane.b32.xlu0 %v14790_v11, %s13326_s1 }
 0x7b3   :  { %2932 = vperm.xlu1 %12400, %v2928_v52  }
 0x7b6   :  { %2937 = vperm.xlu0 %12389, %v2929_v58  }
 0x7da   :  { %v2787_v62 = vpop.permute.xlu1 %2786  ;;  %v2810_v51 = vpop.permute.xlu0 %2809 }
 0x7db   :  { %v2796_v40 = vsel %vm2740_vm11, 0, %v2787_v62  ;;  %v2818_v1 = vsel %vm503_vm1, 0, %v2810_v51 }
 0x7dc   :  { %v2866_v16 = vrot.slane %v2796_v40, 4  ;;  %v2870_v38 = vrot.slane %v2818_v1, 4 }
 0x7de   :  { %v2775_v15 = vpop.permute.xlu1 %2774  ;;  %v2820_v3 = vpop.permute.xlu0 %2819 }
 0x7df   :  { %v2785_v46 = vsel %vm2780_vm0, 0, %v2775_v15 }
 0x7e0   :  { %v2882_v17 = vsel %vm16671_vm3, %v2785_v46, %v2866_v16 }
 0x7e2   :  { %v2798_v22 = vpop.permute.xlu1 %2797 }
 0x7e3   :  { %v2808_v24 = vsel %vm2803_vm6, 0, %v2798_v22 }
 0x7e4   :  { %v2893_v29 = vsel %vm16671_vm3, %v2808_v24, %v2870_v38 }
 0x800   :  { %v2789_v6 = vpop.permute.xlu0 %2788  ;;  %v2812_v23 = vpop.permute.xlu1 %2811 }
 0x801   :  { %v2793_v14 = vsel %vm2740_vm11, %v2787_v62, %v2789_v6  ;;  %v2815_v59 = vsel %vm503_vm1, %v2810_v51, %v2812_v23 }
 0x802   :  { %v2867_v34 = vrot.slane %v2793_v14, 4  ;;  %v2871_v2 = vrot.slane %v2815_v59, 4 }
 0x804   :  { %v2777_v37 = vpop.permute.xlu0 %2776 }
 0x805   :  { %v2781_v57 = vsel %vm2780_vm0, %v2775_v15, %v2777_v37  ;;  %v2791_v20 = vpop.permute.xlu1 %2790 }
 0x806   :  { %v2886_v25 = vsel %vm16671_vm3, %v2781_v57, %v2867_v34  ;;  %v2794_v9 = vsel %vm2740_vm11, %v2789_v6, %v2791_v20 }
 0x807   :  { %2956 = vmatprep.subr.bf16.mxu0 %v2886_v25  ;;  %v2868_v39 = vrot.slane %v2794_v9, 4 }
 0x808   :  { %v2800_v47 = vpop.permute.xlu0 %2799  ;;  %2957 = vmatpush1.bf16.msra.mxu0 %v2882_v17  ;;  %v12627_v17 = vld [vmem:[#allocation10] sm:$0xff]  }
 0x809   :  { %v2804_v5 = vsel %vm2803_vm6, %v2798_v22, %v2800_v47  ;;  %v2832_v50 = vpop.permute.xlu1 %2831 }
 0x80a   :  { %v2897_v55 = vsel %vm16671_vm3, %v2804_v5, %v2871_v2 }
 0x80b   :  { %2958 = vmatprep.subr.bf16.mxu0 %v2897_v55 }
 0x80c   :  { %v2822_v36 = vpop.permute.xlu0 %2821  ;;  %2959 = vmatpush1.bf16.msra.mxu0 %v2893_v29 }
 0x80d   :  { %v2814_v10 = vpop.permute.xlu1 %2813  ;;  %v2825_v28 = vsel %vm533_vm5, %v2820_v3, %v2822_v36 }
 0x80e   :  { %v2874_v42 = vrot.slane %v2825_v28, 4  ;;  %v2816_v54 = vsel %vm503_vm1, %v2812_v23, %v2814_v10 }
 0x80f   :  { %v2872_v26 = vrot.slane %v2816_v54, 4 }
 0x810   :  { %v2844_v35 = vpop.permute.xlu0 %2843  ;;  %v2905_v49 = vsel %vm16671_vm3, %v14769_v13, %v2874_v42 }
 0x811   :  { %v2824_v60 = vpop.permute.xlu1 %2823 }
 0x812   :  { %v2826_v44 = vsel %vm533_vm5, %v2822_v36, %v2824_v60  ;;  %v2828_v48 = vsel %vm572_vm13, %v2824_v60, 0 }
 0x813   :  { %v2875_v33 = vrot.slane %v2826_v44, 4 }
 0x814   :  { %v2779_v0 = vpop.permute.xlu0 %2778 }
 0x815   :  { %v2782_v27 = vsel %vm2780_vm0, %v2777_v37, %v2779_v0  ;;  %v2802_v53 = vpop.permute.xlu1 %2801  ;;  %v2909_v19 = vsel %vm16671_vm3, %v14784_v41, %v2875_v33  ;;  %v2876_v41 = vrot.slane %v2828_v48, 4 }
 0x816   :  { %2960 = vmatprep.subr.bf16.mxu0 %v2909_v19  ;;  %v2890_v43 = vsel %vm16671_vm3, %v2782_v27, %v2868_v39  ;;  %v2805_v31 = vsel %vm2803_vm6, %v2800_v47, %v2802_v53  ;;  %v3046_v47 = vld [vmem:[%s16707_s2] sm:$0x7]  ;;  %s13339_s2 = smov 68  }
 0x817   :  { %2961 = vmatpush1.bf16.msra.mxu0 %v2905_v49  ;;  %11838 = vmatpush3.bf16.msra.mxu1 %v2890_v43  ;;  %v2901_v32 = vsel %vm16671_vm3, %v2805_v31, %v2872_v26  ;;  %v2913_v14 = vsel %vm16671_vm3, %v14790_v11, %v2876_v41  ;;  %v3059_v10 = vrot.slane %v3046_v47, %v1081_v18 }
 0x818   :  { %v2842_v7 = vpop.permute.xlu0 %2841  ;;  %11839 = vmatprep.subr.bf16.mxu1 %v13296_v21  ;;  %v3051_v28 = vrot.slane %v3046_v47, %v1073_v63  ;;  %v3055_v53 = vrot.slane %v3046_v47, %v1077_v30  ;;  %v3182_v30 = vld [vmem:[%s16708_s7 + $0x8] sm:$0xff] }
 0x819   :  { %v2846_v61 = vpop.permute.xlu1 %2845  ;;  %v2848_v12 = vsel %vm2847_vm8, %v2842_v7, %v2844_v35 }
 0x81a   :  { %v2849_v13 = vsel %vm2847_vm8, %v2844_v35, %v2846_v61  ;;  %v2852_v58 = vsel %vm2540_vm7, %v2846_v61, 0  ;;  %v2878_v51 = vrot.slane %v2848_v12, 4 }
 0x81b   :  { %v2879_v52 = vrot.slane %v2849_v13, 4  ;;  %11840 = vmatpush3.bf16.msra.mxu1 %v2901_v32  ;;  %v2880_v22 = vrot.slane %v2852_v58, 4  ;;  %v3181_v32 = vld [vmem:[%s16708_s7] sm:$0xff]  ;;  %s16731_s7 = sld [smem:[#allocation47_spill]] }
 0x81c   :  { %v2834_v62 = vpop.permute.xlu0 %2833  ;;  %11841 = vmatprep.subr.bf16.mxu1 %v13296_v21 }
 0x81d   :  { %v2837_v15 = vsel %vm2835_vm14, %v2832_v50, %v2834_v62  ;;  %v2830_v3 = vpop.permute.xlu1 %2829  ;;  %v2840_v40 = vsel %vm2838_vm2, %v2834_v62, 0 }
 0x81e   :  { %v2836_v6 = vsel %vm2835_vm14, %v2830_v3, %v2832_v50  ;;  %v2921_v23 = vsel %vm16671_vm3, %v2837_v15, %v2879_v52  ;;  %v2924_v16 = vsel %vm16671_vm3, %v2840_v40, %v2880_v22 }
 0x81f   :  { %2962 = vmatprep.subr.bf16.mxu0 %v2921_v23  ;;  %11842 = vmatpush3.bf16.msra.mxu1 %v2913_v14  ;;  %v2917_v46 = vsel %vm16671_vm3, %v2836_v6, %v2878_v51 }
 0x820   :  { %v2854_v34 = vpop.permute.xlu0 %2853  ;;  %2963 = vmatpush1.bf16.msra.mxu0 %v2917_v46  ;;  %11843 = vmatprep.subr.bf16.mxu1 %v13296_v21 }
 0x821   :  { %v2856_v37 = vpop.permute.xlu1 %2855 }
 0x822   :  { %v2860_v59 = vsel %vm2859_vm4, %v2854_v34, %v2856_v37 }
 0x823   :  { %11844 = vmatpush3.bf16.msra.mxu1 %v2924_v16  ;;  %v2949_v1 = vsel %vm16671_vm3, %v2860_v59, 0 }
 0x824   :  { %v2858_v11 = vpop.permute.xlu0 %2857  ;;  %11845 = vmatprep.subr.bf16.mxu1 %v13296_v21 }
 0x825   :  { %v2864_v57 = vsel %vm2862_vm15, %v2858_v11, 0  ;;  %v2861_v20 = vsel %vm2859_vm4, %v2856_v37, %v2858_v11 }
 0x826   :  { %10222 = vmatprep.subr.msk.bf16.mxu0 %vm16671_vm3, %v2861_v20  ;;  %v2954_v25 = vsel %vm16671_vm3, %v2864_v57, 0  ;;  %vm10229_vm3 = vmneg %vm2740_vm11 }
 0x827   :  { %2965 = vmatpush1.bf16.msra.mxu0 %v2949_v1  ;;  %11846 = vmatpush3.bf16.msra.mxu1 %v2954_v25 }
 0x828   :  { %3248 = vmatprep.subr.bf16.mxu1 %v13295_v8 }
 0x82a   :  { %10223 = vmatmul.mubr.msk.bf16.vlgmr.msra.gmra.mrb[52].mxu0 %vm824_vm9, %v12627_v17  ;;  %11848 = vmatmul.mubr.msk.bf16.vlgmr.msra.gmra.mrb[52].mxu1 %vm824_vm9, %v12627_v17  ;;  %vm10227_vm9 = vmneg %vm2780_vm0 }
 0x82b   :  { %10236 = vmatprep.mubr.msk.bf16.mxu1 %vm2753_vm12, %v12628_v56  ;;  %10235 = vmatprep.mubr.msk.bf16.mxu0 %vm2753_vm12, %v12628_v56 }
 0x832   :  { %v2933_v24 = vpop.permute.xlu1 %2932 }
 0x835   :  { %v2938_v2 = vpop.permute.xlu0 %2937 }
 0x8fd   :  { %v3033_v38 = vpop.f32.mrb[52].mxu1  ;;  %v2990_v5 = vpop.f32.mrb[52].mxu0 }
 0x8fe   :  { %v3034_v50 = vadd.f32 %v3033_v38, %v2933_v24  ;;  %v2991_v55 = vadd.f32 %v2990_v5, %v2933_v24  ;;  %v2992_v29 = vpop.f32.mrb[53].mxu0  ;;  %v11849_v36 = vpop.f32.mrb[53].mxu1 }
 0x8ff   :  { %v2993_v35 = vadd.f32 %v2992_v29, %v2933_v24  ;;  %v2994_v9 = vpop.f32.mrb[54].mxu0  ;;  %v3036_v60 = vpop.f32.mrb[54].mxu1 }
 0x900   :  { %v3042_v42 = vmax.f32 %v3034_v50, 0.0  ;;  %v3040_v44 = vmax.f32 %v2991_v55, 0.0  ;;  %v2995_v33 = vadd.f32 %v2994_v9, %v2938_v2  ;;  %v3037_v39 = vadd.f32 %v3036_v60, %v2938_v2  ;;  %v2996_v0 = vpop.f32.mrb[55].mxu0  ;;  %v11850_v54 = vpop.f32.mrb[55].mxu1 }
 0x901   :  { %v3041_v27 = vmax.f32 %v2993_v35, 0.0  ;;  %v2997_v19 = vadd.f32 %v2996_v0, %v2938_v2 }
 0x902   :  { %v3043_v49 = vmax.f32 %v2995_v33, 0.0  ;;  %v3045_v43 = vmax.f32 %v3037_v39, 0.0  ;;  %v3065_v18 = vmul.f32 %v3059_v10, %v3042_v42  ;;  %v3063_v31 = vmul.f32 %v3051_v28, %v3040_v44 }
 0x903   :  { %v3044_v48 = vmax.f32 %v2997_v19, 0.0  ;;  %v3064_v7 = vmul.f32 %v3055_v53, %v3041_v27 }
 0x904   :  { %v3066_v63 = vmul.f32 %v3051_v28, %v3043_v49  ;;  %v3068_v26 = vmul.f32 %v3059_v10, %v3045_v43  ;;  %v12630_v49 = vld [vmem:[#allocation11] ss:$8 sps:$4 sm:$0xff]  }
 0x905   :  { %v3067_v61 = vmul.f32 %v3055_v53, %v3044_v48 }
 0x906   :  { %v14884_v41 = vpack.c.bf16 %v3066_v63, %v3063_v31  ;;  %v14886_v12 = vpack.c.bf16 %v3068_v26, %v3065_v18 }
 0x907   :  { %v14888_v13 = vpack.c.bf16 %v3067_v61, %v3064_v7 }
 0x908   :  { %3088 = vrot.lane.b32.xlu0 %v14884_v41, %s13312_s10  ;;  %3075 = vrot.lane.b32.xlu1 %v14884_v41, %s13322_s19 }
 0x90c   :  { %3114 = vrot.lane.b32.xlu0 %v14884_v41, %s13289_s18  ;;  %3101 = vrot.lane.b32.xlu1 %v14884_v41, %s13323_s24 }
 0x910   :  { %3077 = vrot.lane.b32.xlu0 %v14888_v13, %s13322_s19  ;;  %3090 = vrot.lane.b32.xlu1 %v14888_v13, %s13312_s10 }
 0x914   :  { %3103 = vrot.lane.b32.xlu0 %v14888_v13, %s13323_s24  ;;  %3079 = vrot.lane.b32.xlu1 %v14886_v12, %s13322_s19  ;;  %s13337_s19 = smov 117  }
 0x918   :  { %3092 = vrot.lane.b32.xlu0 %v14886_v12, %s13312_s10  ;;  %3116 = vrot.lane.b32.xlu1 %v14888_v13, %s13289_s18 }
 0x91c   :  { %3142 = vrot.lane.b32.xlu0 %v14888_v13, %s13324_s25  ;;  %3105 = vrot.lane.b32.xlu1 %v14886_v12, %s13323_s24  ;;  %s13338_s24 = smov 118  }
 0x920   :  { %3118 = vrot.lane.b32.xlu0 %v14886_v12, %s13289_s18  ;;  %3129 = vrot.lane.b32.xlu1 %v14888_v13, %s13291_s22 }
 0x924   :  { %3131 = vrot.lane.b32.xlu0 %v14886_v12, %s13291_s22  ;;  %3127 = vrot.lane.b32.xlu1 %v14884_v41, %s13291_s22 }
 0x928   :  { %3140 = vrot.lane.b32.xlu0 %v14884_v41, %s13324_s25  ;;  %3155 = vrot.lane.b32.xlu1 %v14888_v13, %s13325_s28 }
 0x92c   :  { %3157 = vrot.lane.b32.xlu0 %v14886_v12, %s13325_s28  ;;  %3144 = vrot.lane.b32.xlu1 %v14886_v12, %s13324_s25  ;;  %s16725_s25 = sld [smem:[#allocation43_spill]] }
 0x930   :  { %3168 = vrot.lane.b32.xlu0 %v14888_v13, %s13326_s1  ;;  %3153 = vrot.lane.b32.xlu1 %v14884_v41, %s13325_s28 }
 0x934   :  { %3166 = vrot.lane.b32.xlu0 %v14884_v41, %s13326_s1  ;;  %3170 = vrot.lane.b32.xlu1 %v14886_v12, %s13326_s1  ;;  %s16728_s1 = sld [smem:[#allocation36_spill]] }
 0x938   :  { %3190 = vperm.xlu0 %12389, %v3182_v30   ;;  %3185 = vperm.xlu1 %12400, %v3181_v32  }
 0x97a   :  { %v3089_v58 = vpop.permute.xlu0 %3088  ;;  %v3076_v52 = vpop.permute.xlu1 %3075 }
 0x97e   :  { %v3115_v62 = vpop.permute.xlu0 %3114  ;;  %v3102_v51 = vpop.permute.xlu1 %3101 }
 0x982   :  { %v3078_v15 = vpop.permute.xlu0 %3077  ;;  %v3091_v3 = vpop.permute.xlu1 %3090 }
 0x983   :  { %v3081_v22 = vsel %vm2780_vm0, %v3076_v52, %v3078_v15  ;;  %v3094_v6 = vsel %vm2740_vm11, %v3089_v58, %v3091_v3 }
 0x984   :  { %3205 = vmatprep.subr.bf16.mxu0 %v3081_v22 }
 0x985   :  { %10228 = vmatpush1.bf16.msk.msra.mxu0 %vm10227_vm9, %v3076_v52  ;;  %vm10231_vm9 = vmneg %vm2803_vm6 }
 0x986   :  { %v3104_v23 = vpop.permute.xlu0 %3103  ;;  %3207 = vmatprep.subr.bf16.mxu0 %v3094_v6  ;;  %v3080_v14 = vpop.permute.xlu1 %3079 }
 0x987   :  { %v3082_v40 = vsel %vm2780_vm0, %v3078_v15, %v3080_v14  ;;  %v3107_v46 = vsel %vm2803_vm6, %v3102_v51, %v3104_v23  ;;  %vm3806_vm0 = vcmask 80896  }
 0x988   :  { %3249 = vmatpush1.bf16.msra.mxu1 %v3082_v40 }
 0x989   :  { %10230 = vmatpush1.bf16.msk.msra.mxu0 %vm10229_vm3, %v3089_v58  ;;  %3250 = vmatprep.subr.bf16.mxu1 %v13295_v8  ;;  %vm14954_vm3 = vmneg %vm503_vm1 }
 0x98a   :  { %v3093_v34 = vpop.permute.xlu0 %3092  ;;  %3209 = vmatprep.subr.bf16.mxu0 %v3107_v46  ;;  %v3117_v37 = vpop.permute.xlu1 %3116 }
 0x98b   :  { %v3095_v16 = vsel %vm2740_vm11, %v3091_v3, %v3093_v34  ;;  %v3120_v59 = vsel %vm503_vm1, %v3115_v62, %v3117_v37  ;;  %v12631_v34 = vld [vmem:[%s16711_s3] sm:$0xff]   ;;  %s13343_s3 = smov 5  }
 0x98c   :  { %3251 = vmatpush1.bf16.msra.mxu1 %v3095_v16 }
 0x98d   :  { %10232 = vmatpush1.bf16.msk.msra.mxu0 %vm10231_vm9, %v3102_v51  ;;  %3252 = vmatprep.subr.bf16.mxu1 %v13295_v8  ;;  %vm3818_vm9 = vcmask 408576  }
 0x98e   :  { %v3143_v11 = vpop.permute.xlu0 %3142  ;;  %3211 = vmatprep.subr.bf16.mxu0 %v3120_v59  ;;  %v3106_v57 = vpop.permute.xlu1 %3105 }
 0x98f   :  { %v3108_v1 = vsel %vm2803_vm6, %v3104_v23, %v3106_v57  ;;  %v14994_v57 = vand.u32 %v12631_v34, %v14585_v45 }
 0x990   :  { %3253 = vmatpush1.bf16.msra.mxu1 %v3108_v1 }
 0x991   :  { %10234 = vmatpush1.bf16.msk.msra.mxu0 %vm14954_vm3, %v3115_v62  ;;  %3254 = vmatprep.subr.bf16.mxu1 %v13295_v8 }
 0x992   :  { %v3119_v25 = vpop.permute.xlu0 %3118  ;;  %3213 = vmatprep.subr.bf16.mxu0 %v14888_v13  ;;  %v3130_v17 = vpop.permute.xlu1 %3129 }
 0x993   :  { %v3121_v24 = vsel %vm503_vm1, %v3117_v37, %v3119_v25 }
 0x994   :  { %3255 = vmatpush1.bf16.msra.mxu1 %v3121_v24 }
 0x995   :  { %3214 = vmatpush1.bf16.msra.mxu0 %v14884_v41  ;;  %3256 = vmatprep.subr.bf16.mxu1 %v13295_v8 }
 0x996   :  { %v3132_v2 = vpop.permute.xlu0 %3131  ;;  %v3128_v47 = vpop.permute.xlu1 %3127 }
 0x997   :  { %v3133_v38 = vsel %vm533_vm5, %v3128_v47, %v3130_v17  ;;  %v3134_v5 = vsel %vm533_vm5, %v3130_v17, %v3132_v2  ;;  %v3138_v29 = vsel %vm572_vm13, %v3132_v2, 0  ;;  %vm16712_vm13 = vcmask 31744  }
 0x998   :  { %3215 = vmatprep.subr.bf16.mxu0 %v3134_v5  ;;  %3257 = vmatpush1.bf16.msra.mxu1 %v14886_v12 }
 0x999   :  { %3216 = vmatpush1.bf16.msra.mxu0 %v3133_v38  ;;  %3258 = vmatprep.subr.bf16.mxu1 %v13295_v8 }
 0x99a   :  { %v3141_v50 = vpop.permute.xlu0 %3140  ;;  %v3156_v55 = vpop.permute.xlu1 %3155 }
 0x99b   :  { %v3146_v9 = vsel %vm2835_vm14, %v3141_v50, %v3143_v11 }
 0x99c   :  { %3259 = vmatpush1.bf16.msra.mxu1 %v3138_v29 }
 0x99d   :  { %3260 = vmatprep.subr.bf16.mxu1 %v13295_v8 }
 0x99e   :  { %v3158_v36 = vpop.permute.xlu0 %3157  ;;  %v3145_v10 = vpop.permute.xlu1 %3144 }
 0x99f   :  { %v3147_v28 = vsel %vm2835_vm14, %v3143_v11, %v3145_v10  ;;  %v3151_v35 = vsel %vm2838_vm2, %v3145_v10, 0  ;;  %v3160_v60 = vsel %vm2847_vm8, %v3156_v55, %v3158_v36  ;;  %v3164_v39 = vsel %vm2540_vm7, %v3158_v36, 0 }
 0x9a0   :  { %3217 = vmatprep.subr.bf16.mxu0 %v3147_v28  ;;  %3261 = vmatpush1.bf16.msra.mxu1 %v3151_v35  ;;  %vm3815_vm14 = vcmask 326656   ;;  %vm16713_vm2 = vcmask 162816  }
 0x9a1   :  { %3218 = vmatpush1.bf16.msra.mxu0 %v3146_v9  ;;  %3262 = vmatprep.subr.bf16.mxu1 %v13295_v8 }
 0x9a2   :  { %v3169_v42 = vpop.permute.xlu0 %3168  ;;  %3219 = vmatprep.subr.bf16.mxu0 %v3160_v60  ;;  %v3154_v44 = vpop.permute.xlu1 %3153 }
 0x9a3   :  { %v3159_v33 = vsel %vm2847_vm8, %v3154_v44, %v3156_v55 }
 0x9a4   :  { %3263 = vmatpush1.bf16.msra.mxu1 %v3164_v39 }
 0x9a5   :  { %3220 = vmatpush1.bf16.msra.mxu0 %v3159_v33  ;;  %3264 = vmatprep.subr.bf16.mxu1 %v13295_v8 }
 0x9a6   :  { %v3167_v0 = vpop.permute.xlu0 %3166  ;;  %v3171_v54 = vpop.permute.xlu1 %3170 }
 0x9a7   :  { %v3172_v27 = vsel %vm2859_vm4, %v3167_v0, %v3169_v42  ;;  %v3173_v53 = vsel %vm2859_vm4, %v3169_v42, %v3171_v54  ;;  %v3177_v19 = vsel %vm2862_vm15, %v3171_v54, 0  ;;  %vm16714_vm4 = vmmov %vm16713_vm2 }
 0x9a8   :  { %3221 = vmatprep.subr.bf16.mxu0 %v3173_v53  ;;  %3265 = vmatpush1.bf16.msra.mxu1 %v3177_v19 }
 0x9a9   :  { %3222 = vmatpush1.bf16.msra.mxu0 %v3172_v27  ;;  %11857 = vmatprep.subr.bf16.mxu1 %v13296_v21 }
 0x9aa   :  { %11851 = vmatprep.subr.bf16.mxu0 %v13296_v21 }
 0x9ab   :  { %3281 = vmatmul.mubr.bf16.vlgmr.msra.gmra.mrb[56].mxu1 %v12630_v49 }
 0x9ac   :  { %3238 = vmatmul.mubr.bf16.vlgmr.msra.gmra.mrb[56].mxu0 %v12630_v49  ;;  %11859 = vmatprep.mubr.msk.bf16.mxu1 %vm13297_vm10, %v13296_v21 }
 0x9ad   :  { %11853 = vmatprep.mubr.msk.bf16.mxu0 %vm13297_vm10, %v13296_v21  ;;  %11852 = vmatpush3.bf16.msra.mxu0 %v14994_v57 }
 0x9ae   :  { %11858 = vmatpush3.bf16.msra.mxu1 %v14994_v57  ;;  %11863 = vmatprep.subr.bf16.mxu0 %v13296_v21 }
 0x9af   :  { %11869 = vmatprep.subr.bf16.mxu1 %v13296_v21 }
 0x9b7   :  { %v3191_v43 = vpop.permute.xlu0 %3190  ;;  %v3186_v18 = vpop.permute.xlu1 %3185 }
 0xa7e   :  { %v3282_v48 = vpop.f32.mrb[56].mxu1 }
 0xa7f   :  { %v3239_v31 = vpop.f32.mrb[56].mxu0  ;;  %v3284_v63 = vpop.f32.mrb[57].mxu1  ;;  %v3283_v26 = vadd.f32 %v3282_v48, %v3186_v18 }
 0xa80   :  { %v3240_v7 = vadd.f32 %v3239_v31, %v3186_v18  ;;  %v3241_v61 = vpop.f32.mrb[57].mxu0  ;;  %v3285_v41 = vpop.f32.mrb[58].mxu1 }
 0xa81   :  { %v3242_v12 = vadd.f32 %v3241_v61, %v3186_v18  ;;  %v3243_v13 = vpop.f32.mrb[58].mxu0  ;;  %v3287_v56 = vpop.f32.mrb[59].mxu1  ;;  %v3286_v62 = vadd.f32 %v3285_v41, %v3191_v43  ;;  %v3291_v15 = vmax.f32 %v3283_v26, 0.0 }
 0xa82   :  { %v3289_v30 = vmax.f32 %v3240_v7, 0.0  ;;  %v3244_v32 = vadd.f32 %v3243_v13, %v3191_v43  ;;  %v3245_v58 = vpop.f32.mrb[59].mxu0 }
 0xa83   :  { %v3290_v52 = vmax.f32 %v3242_v12, 0.0  ;;  %v3246_v51 = vadd.f32 %v3245_v58, %v3191_v43  ;;  %v3294_v14 = vmax.f32 %v3286_v62, 0.0 }
 0xa84   :  { %v3292_v3 = vmax.f32 %v3244_v32, 0.0 }
 0xa85   :  { %v12401_v22 = vpack.i.bf16 %v3290_v52, %v3289_v30  ;;  %v3293_v6 = vmax.f32 %v3246_v51, 0.0 }
 0xa86   :  { %v12406_v23 = vpack.i.bf16 %v3292_v3, %v3291_v15 }
 0xa87   :  { %12402 = vrot.lane.b32.xlu1 %v12401_v22, %s13291_s22  ;;  %v12411_v40 = vpack.i.bf16 %v3294_v14, %v3293_v6 }
 0xa88   :  { %12407 = vrot.lane.b32.xlu0 %v12406_v23, %s13291_s22 }
 0xa8b   :  { %12412 = vrot.lane.b32.xlu1 %v12411_v40, %s13291_s22 }
 0xaf9   :  { %v12403_v46 = vpop.permute.xlu1 %12402 }
 0xafa   :  { %v12405_v37 = vunpack.i.h.bf16 %v12403_v46  ;;  %v12404_v16 = vunpack.i.l.bf16 %v12403_v46  ;;  %v12408_v59 = vpop.permute.xlu0 %12407 }
 0xafb   :  { %v12409_v11 = vunpack.i.l.bf16 %v12408_v59  ;;  %v12410_v2 = vunpack.i.h.bf16 %v12408_v59 }
 0xafc   :  { %v3313_v1 = vsel %vm533_vm5, %v12404_v16, %v12405_v37 }
 0xafd   :  { %v3323_v25 = vmax.f32 %v3289_v30, %v3313_v1  ;;  %v3314_v17 = vsel %vm533_vm5, %v12405_v37, %v12409_v11  ;;  %v12413_v24 = vpop.permute.xlu1 %12412  ;;  %v3325_v28 = vmax.f32 %v3291_v15, %v12409_v11 }
 0xafe   :  { %v3324_v47 = vmax.f32 %v3290_v52, %v3314_v17  ;;  %v12415_v38 = vunpack.i.h.bf16 %v12413_v24  ;;  %v12414_v5 = vunpack.i.l.bf16 %v12413_v24 }
 0xb00   :  { %v3328_v45 = vmax.f32 %v3294_v14, %v12415_v38  ;;  %v3315_v50 = vsel %vm533_vm5, %v12410_v2, %v12414_v5  ;;  %v3316_v55 = vsel %vm533_vm5, %v12414_v5, %v12415_v38  ;;  %v12416_v29 = vpack.i.bf16 %v3324_v47, %v3323_v25 }
 0xb01   :  { %v3326_v36 = vmax.f32 %v3292_v3, %v3315_v50  ;;  %v3327_v10 = vmax.f32 %v3293_v6, %v3316_v55  ;;  %vm3374_vm5 = vcmask 121856  }
 0xb02   :  { %12417 = vrot.lane.b32.xlu0 %v12416_v29, %s13325_s28  ;;  %v12426_v9 = vpack.i.bf16 %v3328_v45, %v3325_v28 }
 0xb03   :  { %v12421_v35 = vpack.i.bf16 %v3327_v10, %v3326_v36 }
 0xb05   :  { %12422 = vrot.lane.b32.xlu1 %v12421_v35, %s13325_s28 }
 0xb06   :  { %12427 = vrot.lane.b32.xlu0 %v12426_v9, %s13325_s28  ;;  %s16727_s28 = sld [smem:[#allocation45_spill]] }
 0xb74   :  { %v12418_v60 = vpop.permute.xlu0 %12417 }
 0xb75   :  { %v12420_v42 = vunpack.i.h.bf16 %v12418_v60  ;;  %v12419_v44 = vunpack.i.l.bf16 %v12418_v60 }
 0xb77   :  { %v12423_v33 = vpop.permute.xlu1 %12422  ;;  %v3348_v39 = vsel %vm2847_vm8, %v12419_v44, %v12420_v42 }
 0xb78   :  { %v12425_v0 = vunpack.i.h.bf16 %v12423_v33  ;;  %v12424_v54 = vunpack.i.l.bf16 %v12423_v33  ;;  %v12428_v27 = vpop.permute.xlu0 %12427  ;;  %v3358_v43 = vmax.f32 %v3323_v25, %v3348_v39 }
 0xb79   :  { %v12430_v53 = vunpack.i.h.bf16 %v12428_v27  ;;  %v12429_v19 = vunpack.i.l.bf16 %v12428_v27 }
 0xb7a   :  { %v3350_v49 = vsel %vm2847_vm8, %v12424_v54, %v12425_v0 }
 0xb7b   :  { %v3361_v18 = vmax.f32 %v3326_v36, %v3350_v49  ;;  %v3351_v48 = vsel %vm2847_vm8, %v12425_v0, %v12430_v53  ;;  %v3349_v31 = vsel %vm2847_vm8, %v12420_v42, %v12429_v19  ;;  %v3363_v41 = vmax.f32 %v3328_v45, %v12430_v53 }
 0xb7c   :  { %v3362_v63 = vmax.f32 %v3327_v10, %v3351_v48  ;;  %v3359_v26 = vmax.f32 %v3324_v47, %v3349_v31  ;;  %v3360_v12 = vmax.f32 %v3325_v28, %v12429_v19  ;;  %vm3812_vm8 = vcmask 244736  }
 0xb7d   :  { %v3364_v7 = vpack.c.bf16 %v3361_v18, %v3358_v43 }
 0xb7e   :  { %v3365_v61 = vpack.c.bf16 %v3362_v63, %v3359_v26  ;;  %v3366_v13 = vpack.c.bf16 %v3363_v41, %v3360_v12 }
 0xb7f   :  { %3469 = vrot.lane.b32.xlu0 %v3364_v7, %s13327_s4  ;;  %3423 = vrot.lane.b32.xlu1 %v3364_v7, %s13328_s13  ;;  %s13344_s4 = smov 122   ;;  %s13345_s13 = smov 121  }
 0xb80   :  { %11854 = vmatmul.mubr.msk.bf16.vlgmr.msra.gmra.mrb[60].mxu0 %vm3374_vm5, %v3364_v7 }
 0xb81   :  { %11864 = vmatpush3.bf16.msra.mxu0 %v14994_v57  ;;  %11865 = vmatprep.mubr.msk.bf16.mxu0 %vm13297_vm10, %v13296_v21 }
 0xb82   :  { %11875 = vmatprep.subr.bf16.mxu0 %v13296_v21 }
 0xb83   :  { %3562 = vrot.lane.b32.xlu0 %v3365_v61, %s13302_s14  ;;  %3515 = vrot.lane.b32.xlu1 %v3364_v7, %s13309_s11  ;;  %s13331_s14 = smov 10  }
 0xb87   :  { %3654 = vrot.lane.b32.xlu0 %v3365_v61, %s13329_s15  ;;  %3608 = vrot.lane.b32.xlu1 %v3365_v61, %s13330_s16  ;;  %s16739_s16 = sld [smem:[#allocation49_spill]] }
 0xb8b   :  { %3703 = vrot.lane.b32.xlu0 %v3366_v13, %s13279_s21  ;;  %3701 = vrot.lane.b32.xlu1 %v3365_v61, %s13279_s21 }
 0xbf1   :  { %v3470_v56 = vpop.permute.xlu0 %3469  ;;  %v3424_v30 = vpop.permute.xlu1 %3423 }
 0xbf2   :  { %11860 = vmatmul.mubr.msk.bf16.vlgmr.msra.gmra.mrb[60].mxu1 %vm3374_vm5, %v3424_v30  ;;  %11866 = vmatmul.mubr.msk.bf16.vlgmr.msra.gmra.mrb[64].mxu0 %vm3374_vm5, %v3470_v56 }
 0xbf3   :  { %11870 = vmatpush3.bf16.msra.mxu1 %v14994_v57  ;;  %11876 = vmatpush3.bf16.msra.mxu0 %v14994_v57 }
 0xbf4   :  { %11871 = vmatprep.mubr.msk.bf16.mxu1 %vm13297_vm10, %v13296_v21  ;;  %11877 = vmatprep.mubr.msk.bf16.mxu0 %vm13297_vm10, %v13296_v21 }
 0xbf5   :  { %11881 = vmatprep.subr.bf16.mxu1 %v13296_v21  ;;  %11887 = vmatprep.subr.bf16.mxu0 %v13296_v21  ;;  %v3563_v32 = vpop.permute.xlu0 %3562  ;;  %v3516_v58 = vpop.permute.xlu1 %3515 }
 0xbf9   :  { %v3655_v52 = vpop.permute.xlu0 %3654  ;;  %v3609_v62 = vpop.permute.xlu1 %3608 }
 0xbfa   :  { %11872 = vmatmul.mubr.msk.bf16.vlgmr.msra.gmra.mrb[64].mxu1 %vm3374_vm5, %v3516_v58  ;;  %11878 = vmatmul.mubr.msk.bf16.vlgmr.msra.gmra.mrb[68].mxu0 %vm3374_vm5, %v3563_v32 }
 0xbfb   :  { %11882 = vmatpush3.bf16.msra.mxu1 %v14994_v57  ;;  %11888 = vmatpush3.bf16.msra.mxu0 %v14994_v57 }
 0xbfc   :  { %11883 = vmatprep.mubr.msk.bf16.mxu1 %vm13297_vm10, %v13296_v21  ;;  %11889 = vmatprep.mubr.msk.bf16.mxu0 %vm13297_vm10, %v13296_v21 }
 0xbfd   :  { %11893 = vmatprep.subr.bf16.mxu1 %v13296_v21  ;;  %3925 = vmatprep.subr.bf16.mxu0 %v13295_v8  ;;  %v3704_v51 = vpop.permute.xlu0 %3703  ;;  %v3702_v15 = vpop.permute.xlu1 %3701 }
 0xbfe   :  { %v3705_v3 = vsel %vm16712_vm13, %v3702_v15, %v3704_v51  ;;  %vm3821_vm13 = vcmask 490496  }
 0xc02   :  { %11884 = vmatmul.mubr.msk.bf16.vlgmr.msra.gmra.mrb[68].mxu1 %vm3374_vm5, %v3609_v62  ;;  %11890 = vmatmul.mubr.msk.bf16.vlgmr.msra.gmra.mrb[72].mxu0 %vm3374_vm5, %v3655_v52 }
 0xc03   :  { %11894 = vmatpush3.bf16.msra.mxu1 %v14994_v57  ;;  %11895 = vmatprep.mubr.msk.bf16.mxu1 %vm13297_vm10, %v13296_v21 }
 0xc0a   :  { %11896 = vmatmul.mubr.msk.bf16.vlgmr.msra.gmra.mrb[72].mxu1 %vm3374_vm5, %v3705_v3 }
 0xc53   :  { %v3415_v22 = vpop.f32.mrb[60].mxu0 }
 0xc54   :  { %v11855_v6 = vpop.f32.mrb[61].mxu0 }
 0xc55   :  { %v3418_v23 = vpop.f32.mrb[62].mxu0 }
 0xc56   :  { %v11856_v14 = vpop.f32.mrb[63].mxu0 }
 0xcc5   :  { %v3462_v40 = vpop.f32.mrb[60].mxu1  ;;  %v3508_v46 = vpop.f32.mrb[64].mxu0 }
 0xcc6   :  { %v11861_v34 = vpop.f32.mrb[61].mxu1  ;;  %v11867_v37 = vpop.f32.mrb[65].mxu0 }
 0xcc7   :  { %v3465_v16 = vpop.f32.mrb[62].mxu1  ;;  %v3511_v59 = vpop.f32.mrb[66].mxu0 }
 0xcc8   :  { %v12431_v11 = vpack.i.bf16 %v3465_v16, %v3462_v40  ;;  %v12436_v57 = vpack.i.bf16 %v3511_v59, %v3508_v46  ;;  %v11862_v1 = vpop.f32.mrb[63].mxu1  ;;  %v11868_v25 = vpop.f32.mrb[67].mxu0 }
 0xcca   :  { %12432 = vrot.lane.b32.xlu1 %v12431_v11, %s13331_s14  ;;  %12437 = vrot.lane.b32.xlu0 %v12436_v57, %s13309_s11  ;;  %s13333_s11 = smov 50  }
 0xccd   :  { %v3554_v17 = vpop.f32.mrb[64].mxu1  ;;  %v3601_v24 = vpop.f32.mrb[68].mxu0 }
 0xcce   :  { %v11873_v2 = vpop.f32.mrb[65].mxu1  ;;  %v11879_v47 = vpop.f32.mrb[69].mxu0 }
 0xccf   :  { %v3557_v38 = vpop.f32.mrb[66].mxu1  ;;  %v3604_v5 = vpop.f32.mrb[70].mxu0 }
 0xcd0   :  { %v12441_v45 = vpack.i.bf16 %v3557_v38, %v3554_v17  ;;  %v12446_v50 = vpack.i.bf16 %v3604_v5, %v3601_v24  ;;  %v11874_v55 = vpop.f32.mrb[67].mxu1  ;;  %v11880_v29 = vpop.f32.mrb[71].mxu0 }
 0xcd2   :  { %12442 = vrot.lane.b32.xlu1 %v12441_v45, %s13332_s9  ;;  %12447 = vrot.lane.b32.xlu0 %v12446_v50, %s13329_s15  ;;  %s16738_s15 = sld [smem:[#allocation48_spill]]  ;;  %s16741_s9 = sld [smem:[#allocation51_spill]] }
 0xcd5   :  { %v3647_v36 = vpop.f32.mrb[68].mxu1  ;;  %v3693_v10 = vpop.f32.mrb[72].mxu0 }
 0xcd6   :  { %v11885_v28 = vpop.f32.mrb[69].mxu1  ;;  %v11891_v35 = vpop.f32.mrb[73].mxu0 }
 0xcd7   :  { %v3650_v9 = vpop.f32.mrb[70].mxu1  ;;  %v3696_v60 = vpop.f32.mrb[74].mxu0 }
 0xcd8   :  { %v12451_v42 = vpack.i.bf16 %v3650_v9, %v3647_v36  ;;  %v12456_v44 = vpack.i.bf16 %v3696_v60, %v3693_v10  ;;  %v11886_v33 = vpop.f32.mrb[71].mxu1  ;;  %v11892_v39 = vpop.f32.mrb[75].mxu0  ;;  %v12659_v36 = vld [vmem:[#allocation16 + $0x1c] ss:$12 sps:$4 sm:$0xff]  }
 0xcda   :  { %12452 = vrot.lane.b32.xlu1 %v12451_v42, %s13333_s11  ;;  %12457 = vrot.lane.b32.xlu0 %v12456_v44, %s13300_s20  ;;  %s16717_s20 = sld [smem:[#allocation42_spill]]  ;;  %s16742_s11 = sld [smem:[#allocation52_spill]] }
 0xcdd   :  { %v3743_v0 = vpop.f32.mrb[72].mxu1 }
 0xcde   :  { %v11897_v54 = vpop.f32.mrb[73].mxu1 }
 0xcdf   :  { %v3746_v27 = vpop.f32.mrb[74].mxu1 }
 0xce0   :  { %v12461_v53 = vpack.i.bf16 %v3746_v27, %v3743_v0  ;;  %v11898_v19 = vpop.f32.mrb[75].mxu1  ;;  %v3878_v24 = vld [vmem:[%s16717_s20 + $0x8] sm:$0xff]  ;;  %v3877_v2 = vld [vmem:[%s16717_s20] sm:$0xff]  ;;  %v3880_v47 = vld [vmem:[%s16717_s20 + $0x18] sm:$0xff] }
 0xce1   :  { %v3879_v38 = vld [vmem:[%s16717_s20 + $0x10] sm:$0xff]  ;;  %s16743_s20 = sld [smem:[#allocation53_spill]] }
 0xce2   :  { %12462 = vrot.lane.b32.xlu1 %v12461_v53, %s13318_s26  ;;  %s16718_s26 = sld [smem:[#allocation41_spill]] }
 0xce8   :  { %v12632_v5 = vld [vmem:[%s16718_s26 + $0x4] ss:$8 sps:$4 sm:$0xff]   ;;  %v12634_v54 = vld [vmem:[%s16718_s26] ss:$8 sps:$4 sm:$0xff]   ;;  %v12635_v27 = vld [vmem:[%s16718_s26 + $0x14] ss:$8 sps:$4 sm:$0xff]  }
 0xce9   :  { %10258 = vmatprep.mubr.msk.bf16.mxu0 %vm2753_vm12, %v12632_v5  ;;  %v12637_v53 = vld [vmem:[%s16718_s26 + $0x10] ss:$8 sps:$4 sm:$0xff]   ;;  %s13346_s26 = smov 116  }
 0xd3c   :  { %v12433_v49 = vpop.permute.xlu1 %12432  ;;  %v12438_v48 = vpop.permute.xlu0 %12437 }
 0xd3d   :  { %v12435_v43 = vunpack.i.h.bf16 %v12433_v49  ;;  %v12434_v18 = vunpack.i.l.bf16 %v12433_v49  ;;  %v12440_v63 = vunpack.i.h.bf16 %v12438_v48  ;;  %v12439_v26 = vunpack.i.l.bf16 %v12438_v48 }
 0xd3f   :  { %v3807_v7 = vsel %vm3806_vm0, %v3415_v22, %v12434_v18  ;;  %v3808_v61 = vsel %vm3806_vm0, %v3418_v23, %v12435_v43 }
 0xd40   :  { %v3811_v30 = vsel %vm16713_vm2, %v3808_v61, %v12440_v63  ;;  %v3810_v32 = vsel %vm16714_vm4, %v3807_v7, %v12439_v26  ;;  %vm16715_vm2 = vcmask 572416  }
 0xd41   :  { %vm16716_vm4 = vmmov %vm16715_vm2 }
 0xd44   :  { %v12443_v31 = vpop.permute.xlu1 %12442  ;;  %v12448_v13 = vpop.permute.xlu0 %12447 }
 0xd45   :  { %v12445_v41 = vunpack.i.h.bf16 %v12443_v31  ;;  %v12444_v12 = vunpack.i.l.bf16 %v12443_v31  ;;  %v12450_v58 = vunpack.i.h.bf16 %v12448_v13  ;;  %v12449_v52 = vunpack.i.l.bf16 %v12448_v13 }
 0xd47   :  { %v3813_v62 = vsel %vm3812_vm8, %v3810_v32, %v12444_v12  ;;  %v3814_v51 = vsel %vm3812_vm8, %v3811_v30, %v12445_v41  ;;  %vm15074_vm8 = vmneg %vm2862_vm15 }
 0xd48   :  { %v3817_v22 = vsel %vm3815_vm14, %v3814_v51, %v12450_v58  ;;  %v3816_v23 = vsel %vm3815_vm14, %v3813_v62, %v12449_v52  ;;  %vm15082_vm14 = vmneg %vm3806_vm0  ;;  %vm3851_vm0 = vcmask 629760  }
 0xd4c   :  { %v12453_v56 = vpop.permute.xlu1 %12452  ;;  %v12458_v6 = vpop.permute.xlu0 %12457 }
 0xd4d   :  { %v12455_v15 = vunpack.i.h.bf16 %v12453_v56  ;;  %v12454_v3 = vunpack.i.l.bf16 %v12453_v56  ;;  %v12460_v14 = vunpack.i.h.bf16 %v12458_v6  ;;  %v12459_v40 = vunpack.i.l.bf16 %v12458_v6 }
 0xd4f   :  { %v3819_v46 = vsel %vm3818_vm9, %v3816_v23, %v12454_v3  ;;  %v3820_v34 = vsel %vm3818_vm9, %v3817_v22, %v12455_v15  ;;  %vm3840_vm9 = vcmask 72704  }
 0xd50   :  { %v3823_v11 = vsel %vm3821_vm13, %v3820_v34, %v12460_v14  ;;  %v3822_v57 = vsel %vm3821_vm13, %v3819_v46, %v12459_v40  ;;  %vm15089_vm15 = vmneg %vm3840_vm9  ;;  %vm3857_vm13 = vcmask 564224   ;;  %v12640_v40 = vld [vmem:[#allocation13 + $0x4] ss:$12 sps:$4 sm:$0xff]   ;;  %vm4135_vm9 = vcmask 261120  }
 0xd51   :  { %4174 = vmatprep.mubr.bf16.mxu1 %v12640_v40  ;;  %v4081_v46 = vld [vmem:[%s16725_s25] sm:$0xff]  ;;  %v4083_v34 = vld [vmem:[%s16725_s25 + $0x10] sm:$0xff] }
 0xd54   :  { %v12463_v37 = vpop.permute.xlu1 %12462 }
 0xd55   :  { %v12465_v16 = vunpack.i.h.bf16 %v12463_v37  ;;  %v12464_v59 = vunpack.i.l.bf16 %v12463_v37  ;;  %v4082_v37 = vld [vmem:[%s16725_s25 + $0x8] sm:$0xff] }
 0xd57   :  { %v3824_v1 = vsel %vm16715_vm2, %v3822_v57, %v12464_v59  ;;  %v3825_v25 = vsel %vm16716_vm4, %v3823_v11, %v12465_v16  ;;  %vm3863_vm2 = vcmask 556032   ;;  %vm3869_vm4 = vcmask 547840   ;;  %v4084_v16 = vld [vmem:[%s16725_s25 + $0x18] sm:$0xff]  ;;  %s16760_s25 = sld [smem:[#allocation56_spill]] }
 0xd58   :  { %v3826_v17 = vpack.c.bf16 %v3825_v25, %v3824_v1 }
 0xd5a   :  { %3833 = vrot.lane.b32.xlu1 %v3826_v17, %s13331_s14  ;;  %3828 = vrot.lane.b32.xlu0 %v3826_v17, %s13334_s23 }
 0xd5e   :  { %3844 = vrot.lane.b32.xlu1 %v3826_v17, %s13289_s18  ;;  %3838 = vrot.lane.b32.xlu0 %v3826_v17, %s13335_s8 }
 0xd62   :  { %3855 = vrot.lane.b32.xlu1 %v3826_v17, %s13336_s5  ;;  %3849 = vrot.lane.b32.xlu0 %v3826_v17, %s13291_s22 }
 0xd66   :  { %3867 = vrot.lane.b32.xlu1 %v3826_v17, %s13337_s19  ;;  %3861 = vrot.lane.b32.xlu0 %v3826_v17, %s13338_s24 }
 0xd6a   :  { %3888 = vperm.xlu1 %12400, %v3878_v24   ;;  %3883 = vperm.xlu0 %12389, %v3877_v2  }
 0xd6e   :  { %3898 = vperm.xlu1 %12400, %v3880_v47   ;;  %3893 = vperm.xlu0 %12389, %v3879_v38  }
 0xdcc   :  { %v3829_v50 = vpop.permute.xlu0 %3828  ;;  %v3834_v29 = vpop.permute.xlu1 %3833 }
 0xdcd   :  { %10251 = vmatpush1.bf16.msk.msra.mxu0 %vm15074_vm8, %v3829_v50 }
 0xdce   :  { %3927 = vmatprep.subr.bf16.mxu0 %v13295_v8 }
 0xdd0   :  { %v3839_v10 = vpop.permute.xlu0 %3838  ;;  %v3845_v28 = vpop.permute.xlu1 %3844 }
 0xdd1   :  { %10253 = vmatpush1.bf16.msk.msra.mxu0 %vm15082_vm14, %v3834_v29 }
 0xdd2   :  { %3929 = vmatprep.subr.bf16.mxu0 %v13295_v8 }
 0xdd4   :  { %v3850_v35 = vpop.permute.xlu0 %3849  ;;  %v3856_v60 = vpop.permute.xlu1 %3855 }
 0xdd5   :  { %10255 = vmatpush1.bf16.msk.msra.mxu0 %vm15089_vm15, %v3839_v10  ;;  %v3853_v9 = vsel %vm3851_vm0, %v3850_v35, 0  ;;  %v3859_v42 = vsel %vm3857_vm13, %v3856_v60, 0 }
 0xdd6   :  { %3931 = vmatprep.subr.bf16.mxu0 %v13295_v8 }
 0xdd8   :  { %v3862_v44 = vpop.permute.xlu0 %3861  ;;  %v3868_v39 = vpop.permute.xlu1 %3867 }
 0xdd9   :  { %10257 = vmatpush1.bf16.msk.msra.mxu0 %vm14954_vm3, %v3845_v28  ;;  %v3865_v33 = vsel %vm3863_vm2, %v3862_v44, 0  ;;  %v3871_v0 = vsel %vm3869_vm4, %v3868_v39, 0  ;;  %v12638_v28 = vld [vmem:[#allocation13] ss:$12 sps:$4 sm:$0xff]   ;;  %v12644_v39 = vld [vmem:[#allocation13 + $0x8] ss:$12 sps:$4 sm:$0xff]  }
 0xdda   :  { %3933 = vmatprep.subr.bf16.mxu0 %v13295_v8 }
 0xddd   :  { %3934 = vmatpush1.bf16.msra.mxu0 %v3826_v17 }
 0xdde   :  { %3935 = vmatprep.subr.bf16.mxu0 %v13295_v8 }
 0xde1   :  { %3936 = vmatpush1.bf16.msra.mxu0 %v3853_v9  ;;  %v12641_v9 = vld [vmem:[#allocation13 + $0x1c] ss:$12 sps:$4 sm:$0xff]  }
 0xde2   :  { %3937 = vmatprep.subr.bf16.mxu0 %v13295_v8 }
 0xde5   :  { %3938 = vmatpush1.bf16.msra.mxu0 %v3859_v42 }
 0xde6   :  { %3939 = vmatprep.subr.bf16.mxu0 %v13295_v8 }
 0xde9   :  { %3940 = vmatpush1.bf16.msra.mxu0 %v3865_v33  ;;  %v3884_v19 = vpop.permute.xlu0 %3883  ;;  %v3889_v48 = vpop.permute.xlu1 %3888  ;;  %v12643_v33 = vld [vmem:[#allocation13 + $0x18] ss:$12 sps:$4 sm:$0xff]  }
 0xdea   :  { %3941 = vmatprep.subr.bf16.mxu0 %v13295_v8  ;;  %v15111_v8 = vld [vmem:[#allocation2] ss:$0 sm:$0xff] }
 0xded   :  { %3942 = vmatpush1.bf16.msra.mxu0 %v3871_v0  ;;  %v3894_v13 = vpop.permute.xlu0 %3893  ;;  %v3899_v52 = vpop.permute.xlu1 %3898  ;;  %v12645_v0 = vld [vmem:[#allocation13 + $0x20] ss:$12 sps:$4 sm:$0xff]  }
 0xdf0   :  { %3958 = vmatmul.mubr.bf16.vlgmr.msra.gmra.mrb[76].mxu0 %v12634_v54 }
 0xdf1   :  { %10259 = vmatprep.mubr.msk.bf16.mxu0 %vm2753_vm12, %v12635_v27 }
 0xdf8   :  { %3966 = vmatmul.mubr.bf16.gmra.mrb[80].mxu0 %v12637_v53 }
 0xec3   :  { %v3959_v49 = vpop.f32.mrb[76].mxu0 }
 0xec4   :  { %v3960_v43 = vadd.f32 %v3959_v49, %v3884_v19  ;;  %v3961_v18 = vpop.f32.mrb[77].mxu0 }
 0xec5   :  { %v3962_v31 = vpop.f32.mrb[78].mxu0 }
 0xec6   :  { %v3974_v63 = vmax.f32 %v3960_v43, 0.0  ;;  %v3963_v26 = vadd.f32 %v3962_v31, %v3889_v48  ;;  %v3964_v7 = vpop.f32.mrb[79].mxu0 }
 0xec8   :  { %v3975_v61 = vmax.f32 %v3963_v26, 0.0  ;;  %v3985_v41 = vmul.f32 %v15111_v8, %v3974_v63 }
 0xeca   :  { %v3986_v12 = vmul.f32 %v15111_v8, %v3975_v61 }
 0xecb   :  { %v3967_v56 = vpop.f32.mrb[80].mxu0 }
 0xecc   :  { %v3989_v30 = vpack.c.bf16 %v3986_v12, %v3985_v41  ;;  %v3968_v32 = vadd.f32 %v3967_v56, %v3894_v13  ;;  %v3969_v58 = vpop.f32.mrb[81].mxu0 }
 0xecd   :  { %v3970_v62 = vpop.f32.mrb[82].mxu0 }
 0xece   :  { %v3976_v51 = vmax.f32 %v3968_v32, 0.0  ;;  %v3971_v15 = vadd.f32 %v3970_v62, %v3899_v52  ;;  %v3972_v3 = vpop.f32.mrb[83].mxu0  ;;  %3993 = vrot.lane.b32.xlu0 %v3989_v30, %s13334_s23  ;;  %10878 = vmatprep.subr.bf16.mxu1 %v3989_v30 }
 0xed0   :  { %v3977_v6 = vmax.f32 %v3971_v15, 0.0  ;;  %v3987_v22 = vmul.f32 %v15111_v8, %v3976_v51 }
 0xed2   :  { %v3988_v23 = vmul.f32 %v15111_v8, %v3977_v6  ;;  %4033 = vrot.lane.b32.xlu0 %v3989_v30, %s13291_s22 }
 0xed4   :  { %v3990_v14 = vpack.c.bf16 %v3988_v23, %v3987_v22 }
 0xed6   :  { %3995 = vrot.lane.b32.xlu1 %v3990_v14, %s13334_s23  ;;  %4035 = vrot.lane.b32.xlu0 %v3990_v14, %s13291_s22 }
 0xeda   :  { %4003 = vrot.lane.b32.xlu1 %v3989_v30, %s13331_s14  ;;  %4043 = vrot.lane.b32.xlu0 %v3989_v30, %s13336_s5 }
 0xede   :  { %4005 = vrot.lane.b32.xlu1 %v3990_v14, %s13331_s14  ;;  %4045 = vrot.lane.b32.xlu0 %v3990_v14, %s13336_s5 }
 0xee2   :  { %4013 = vrot.lane.b32.xlu1 %v3989_v30, %s13335_s8  ;;  %4053 = vrot.lane.b32.xlu0 %v3989_v30, %s13338_s24 }
 0xee6   :  { %4015 = vrot.lane.b32.xlu1 %v3990_v14, %s13335_s8  ;;  %4055 = vrot.lane.b32.xlu0 %v3990_v14, %s13338_s24 }
 0xeea   :  { %4023 = vrot.lane.b32.xlu1 %v3989_v30, %s13289_s18  ;;  %4063 = vrot.lane.b32.xlu0 %v3989_v30, %s13337_s19 }
 0xeee   :  { %4025 = vrot.lane.b32.xlu1 %v3990_v14, %s13289_s18  ;;  %4087 = vperm.xlu0 %12389, %v4081_v46  }
 0xef2   :  { %4065 = vrot.lane.b32.xlu1 %v3990_v14, %s13337_s19  ;;  %4097 = vperm.xlu0 %12389, %v4083_v34  }
 0xef6   :  { %4092 = vperm.xlu1 %12400, %v4082_v37  }
 0xefa   :  { %4102 = vperm.xlu1 %12400, %v4084_v16  }
 0xf40   :  { %v3994_v59 = vpop.permute.xlu0 %3993 }
 0xf41   :  { %10879 = vmatpush3.bf16.msk.msra.mxu1 %vm15074_vm8, %v3994_v59 }
 0xf42   :  { %10880 = vmatprep.subr.bf16.mxu1 %v3990_v14 }
 0xf44   :  { %v4034_v11 = vpop.permute.xlu0 %4033 }
 0xf48   :  { %v3996_v57 = vpop.permute.xlu1 %3995  ;;  %v4036_v1 = vpop.permute.xlu0 %4035 }
 0xf49   :  { %10881 = vmatpush3.bf16.msk.msra.mxu1 %vm15074_vm8, %v3996_v57 }
 0xf4a   :  { %12143 = vmatprep.subr.msk.bf16.mxu1 %vm3851_vm0, %v4034_v11 }
 0xf4c   :  { %v4004_v25 = vpop.permute.xlu1 %4003  ;;  %v4044_v17 = vpop.permute.xlu0 %4043 }
 0xf4d   :  { %10883 = vmatpush3.bf16.msk.msra.mxu1 %vm15082_vm14, %v4004_v25  ;;  %v12648_v25 = vld [vmem:[#allocation14 + $0x4] ss:$12 sps:$4 sm:$0xff]  }
 0xf4e   :  { %12144 = vmatprep.subr.msk.bf16.mxu1 %vm3851_vm0, %v4036_v1  ;;  %4432 = vmatprep.mubr.bf16.mxu0 %v12648_v25 }
 0xf50   :  { %v4006_v24 = vpop.permute.xlu1 %4005  ;;  %v4046_v2 = vpop.permute.xlu0 %4045 }
 0xf51   :  { %10885 = vmatpush3.bf16.msk.msra.mxu1 %vm15082_vm14, %v4006_v24  ;;  %v4341_v24 = vld [vmem:[%s16726_s12 + $0x8] sm:$0xff] }
 0xf52   :  { %12145 = vmatprep.subr.msk.bf16.mxu1 %vm3857_vm13, %v4044_v17  ;;  %v12649_v17 = vld [vmem:[#allocation14 + $0x8] ss:$12 sps:$4 sm:$0xff]  }
 0xf54   :  { %v4014_v47 = vpop.permute.xlu1 %4013  ;;  %v4054_v38 = vpop.permute.xlu0 %4053 }
 0xf55   :  { %10887 = vmatpush3.bf16.msk.msra.mxu1 %vm15089_vm15, %v4014_v47  ;;  %v4343_v47 = vld [vmem:[%s16726_s12 + $0x18] sm:$0xff] }
 0xf56   :  { %12146 = vmatprep.subr.msk.bf16.mxu1 %vm3857_vm13, %v4046_v2  ;;  %v4340_v2 = vld [vmem:[%s16726_s12] sm:$0xff] }
 0xf58   :  { %v4016_v5 = vpop.permute.xlu1 %4015  ;;  %v4056_v50 = vpop.permute.xlu0 %4055 }
 0xf59   :  { %10889 = vmatpush3.bf16.msk.msra.mxu1 %vm15089_vm15, %v4016_v5 }
 0xf5a   :  { %12147 = vmatprep.subr.msk.bf16.mxu1 %vm3863_vm2, %v4054_v38  ;;  %v4342_v38 = vld [vmem:[%s16726_s12 + $0x10] sm:$0xff]  ;;  %s16761_s12 = sld [smem:[#allocation57_spill]] }
 0xf5c   :  { %v4024_v29 = vpop.permute.xlu1 %4023  ;;  %v4064_v35 = vpop.permute.xlu0 %4063 }
 0xf5d   :  { %10891 = vmatpush3.bf16.msk.msra.mxu1 %vm14954_vm3, %v4024_v29  ;;  %v4068_v42 = vsel %vm3869_vm4, %v4064_v35, 0 }
 0xf5e   :  { %12148 = vmatprep.subr.msk.bf16.mxu1 %vm3863_vm2, %v4056_v50 }
 0xf60   :  { %v4026_v10 = vpop.permute.xlu1 %4025 }
 0xf61   :  { %10893 = vmatpush3.bf16.msk.msra.mxu1 %vm14954_vm3, %v4026_v10 }
 0xf62   :  { %12149 = vmatprep.subr.msk.bf16.mxu1 %vm3869_vm4, %v4064_v35 }
 0xf64   :  { %v4066_v60 = vpop.permute.xlu1 %4065  ;;  %4175 = vmatmul.mubr.bf16.vlgmr.msra.gmra.mrb[76].mxu1 %v12638_v28 }
 0xf65   :  { %11900 = vmatpush3.bf16.msra.mxu1 %v4068_v42  ;;  %4182 = vmatprep.mubr.bf16.mxu1 %v12641_v9  ;;  %v4071_v44 = vsel %vm3869_vm4, %v4066_v60, 0 }
 0xf66   :  { %12150 = vmatprep.subr.msk.bf16.mxu1 %vm3869_vm4, %v4066_v60 }
 0xf69   :  { %11902 = vmatpush3.bf16.msra.mxu1 %v4071_v44 }
 0xf6c   :  { %4183 = vmatmul.mubr.bf16.gmra.mrb[80].mxu1 %v12643_v33 }
 0xf6d   :  { %11903 = vmatprep.mubr.msk.bf16.mxu1 %vm4135_vm9, %v12644_v39  ;;  %v4088_v18 = vpop.permute.xlu0 %4087 }
 0xf71   :  { %v4098_v12 = vpop.permute.xlu0 %4097 }
 0xf74   :  { %11904 = vmatmul.mubr.msk.bf16.vlgmr.msra.gmra.mrb[84].mxu1 %vm4135_vm9, %v12645_v0 }
 0xf75   :  { %v4093_v63 = vpop.permute.xlu1 %4092  ;;  %11911 = vmatprep.mubr.msk.bf16.mxu1 %vm4135_vm9, %v12649_v17 }
 0xf79   :  { %v4103_v56 = vpop.permute.xlu1 %4102 }
0x1037   :  { %v10894_v54 = vpop.f32.mrb[76].mxu1 }
0x1038   :  { %v10895_v27 = vpop.f32.mrb[77].mxu1 }
0x1039   :  { %v10896_v53 = vadd.f32 %v10895_v27, %v10894_v54  ;;  %v10897_v19 = vpop.f32.mrb[78].mxu1 }
0x103a   :  { %v10898_v49 = vpop.f32.mrb[79].mxu1 }
0x103b   :  { %v10899_v43 = vadd.f32 %v10898_v49, %v10897_v19  ;;  %v4177_v32 = vadd.f32 %v10896_v53, %v4088_v18  ;;  %v12646_v53 = vld [vmem:[#allocation14] ss:$12 sps:$4 sm:$0xff]   ;;  %v12651_v49 = vld [vmem:[#allocation14 + $0x1c] ss:$12 sps:$4 sm:$0xff]  }
0x103d   :  { %v4180_v3 = vadd.f32 %v10899_v43, %v4093_v63 }
0x103f   :  { %v10900_v48 = vpop.f32.mrb[80].mxu1 }
0x1040   :  { %v10901_v31 = vpop.f32.mrb[81].mxu1 }
0x1041   :  { %v10902_v26 = vadd.f32 %v10901_v31, %v10900_v48  ;;  %v10903_v7 = vpop.f32.mrb[82].mxu1  ;;  %v12650_v48 = vld [vmem:[#allocation14 + $0x20] ss:$12 sps:$4 sm:$0xff]   ;;  %v12653_v31 = vld [vmem:[#allocation14 + $0x18] ss:$12 sps:$4 sm:$0xff]  }
0x1042   :  { %v10904_v61 = vpop.f32.mrb[83].mxu1 }
0x1043   :  { %v10905_v41 = vadd.f32 %v10904_v61, %v10903_v7  ;;  %v4185_v13 = vadd.f32 %v10902_v26, %v4098_v12 }
0x1045   :  { %v4188_v62 = vadd.f32 %v10905_v41, %v4103_v56 }
0x1047   :  { %v11905_v30 = vpop.f32.mrb[84].mxu1 }
0x1048   :  { %v4234_v58 = vadd.f32 %v11905_v30, %v4185_v13  ;;  %v4225_v52 = vpop.f32.mrb[85].mxu1 }
0x1049   :  { %v4226_v51 = vadd.f32 %v4225_v52, %v4177_v32  ;;  %v11906_v15 = vpop.f32.mrb[86].mxu1 }
0x104a   :  { %v4242_v6 = vmax.f32 %v4234_v58, 0.0  ;;  %v4237_v22 = vadd.f32 %v11906_v15, %v4188_v62  ;;  %v4228_v23 = vpop.f32.mrb[87].mxu1 }
0x104b   :  { %v4240_v14 = vmax.f32 %v4226_v51, 0.0  ;;  %v4229_v40 = vadd.f32 %v4228_v23, %v4180_v3 }
0x104c   :  { %v4243_v46 = vmax.f32 %v4237_v22, 0.0  ;;  %v4246_v37 = vmul.f32 %v15111_v8, %v4242_v6 }
0x104d   :  { %v4241_v34 = vmax.f32 %v4229_v40, 0.0  ;;  %v4244_v59 = vmul.f32 %v15111_v8, %v4240_v14 }
0x104e   :  { %v4247_v16 = vmul.f32 %v15111_v8, %v4243_v46 }
0x104f   :  { %v4245_v11 = vmul.f32 %v15111_v8, %v4241_v34 }
0x1050   :  { %v4249_v57 = vpack.c.bf16 %v4247_v16, %v4246_v37 }
0x1051   :  { %v4248_v1 = vpack.c.bf16 %v4245_v11, %v4244_v59 }
0x1052   :  { %4254 = vrot.lane.b32.xlu1 %v4249_v57, %s13334_s23 }
0x1053   :  { %4252 = vrot.lane.b32.xlu0 %v4248_v1, %s13334_s23  ;;  %10910 = vmatprep.subr.bf16.mxu0 %v4248_v1 }
0x1056   :  { %4262 = vrot.lane.b32.xlu1 %v4248_v1, %s13331_s14 }
0x1057   :  { %4292 = vrot.lane.b32.xlu0 %v4248_v1, %s13291_s22 }
0x105a   :  { %4264 = vrot.lane.b32.xlu1 %v4249_v57, %s13331_s14 }
0x105b   :  { %4294 = vrot.lane.b32.xlu0 %v4249_v57, %s13291_s22 }
0x105e   :  { %4272 = vrot.lane.b32.xlu1 %v4248_v1, %s13335_s8 }
0x105f   :  { %4302 = vrot.lane.b32.xlu0 %v4248_v1, %s13336_s5 }
0x1062   :  { %4274 = vrot.lane.b32.xlu1 %v4249_v57, %s13335_s8 }
0x1063   :  { %4304 = vrot.lane.b32.xlu0 %v4249_v57, %s13336_s5 }
0x1066   :  { %4282 = vrot.lane.b32.xlu1 %v4248_v1, %s13289_s18 }
0x1067   :  { %4312 = vrot.lane.b32.xlu0 %v4248_v1, %s13338_s24 }
0x106a   :  { %4284 = vrot.lane.b32.xlu1 %v4249_v57, %s13289_s18 }
0x106b   :  { %4314 = vrot.lane.b32.xlu0 %v4249_v57, %s13338_s24 }
0x106e   :  { %4324 = vrot.lane.b32.xlu1 %v4249_v57, %s13337_s19 }
0x106f   :  { %4322 = vrot.lane.b32.xlu0 %v4248_v1, %s13337_s19 }
0x1072   :  { %4351 = vperm.xlu1 %12400, %v4341_v24  }
0x1073   :  { %4346 = vperm.xlu0 %12389, %v4340_v2  }
0x1076   :  { %4361 = vperm.xlu1 %12400, %v4343_v47  }
0x1077   :  { %4356 = vperm.xlu0 %12389, %v4342_v38  }
0x10c4   :  { %v4255_v5 = vpop.permute.xlu1 %4254 }
0x10c5   :  { %v4253_v50 = vpop.permute.xlu0 %4252 }
0x10c6   :  { %10911 = vmatpush3.bf16.msk.msra.mxu0 %vm15074_vm8, %v4253_v50 }
0x10c7   :  { %10912 = vmatprep.subr.bf16.mxu0 %v4249_v57 }
0x10c8   :  { %v4263_v29 = vpop.permute.xlu1 %4262 }
0x10c9   :  { %v4293_v10 = vpop.permute.xlu0 %4292 }
0x10ca   :  { %10913 = vmatpush3.bf16.msk.msra.mxu0 %vm15074_vm8, %v4255_v5 }
0x10cb   :  { %12151 = vmatprep.subr.msk.bf16.mxu0 %vm3851_vm0, %v4293_v10  ;;  %v12656_v10 = vld [vmem:[#allocation16 + $0x4] ss:$12 sps:$4 sm:$0xff]  }
0x10cc   :  { %v4265_v28 = vpop.permute.xlu1 %4264 }
0x10cd   :  { %v4295_v35 = vpop.permute.xlu0 %4294 }
0x10ce   :  { %10915 = vmatpush3.bf16.msk.msra.mxu0 %vm15082_vm14, %v4263_v29 }
0x10cf   :  { %12152 = vmatprep.subr.msk.bf16.mxu0 %vm3851_vm0, %v4295_v35  ;;  %v4600_v35 = vld [vmem:[%s16727_s28 + $0x10] sm:$0xff] }
0x10d0   :  { %v4273_v9 = vpop.permute.xlu1 %4272 }
0x10d1   :  { %v4303_v60 = vpop.permute.xlu0 %4302 }
0x10d2   :  { %10917 = vmatpush3.bf16.msk.msra.mxu0 %vm15082_vm14, %v4265_v28  ;;  %v4598_v28 = vld [vmem:[%s16727_s28] sm:$0xff] }
0x10d3   :  { %12153 = vmatprep.subr.msk.bf16.mxu0 %vm3857_vm13, %v4303_v60  ;;  %v4601_v60 = vld [vmem:[%s16727_s28 + $0x18] sm:$0xff] }
0x10d4   :  { %v4275_v42 = vpop.permute.xlu1 %4274 }
0x10d5   :  { %v4305_v44 = vpop.permute.xlu0 %4304 }
0x10d6   :  { %10919 = vmatpush3.bf16.msk.msra.mxu0 %vm15089_vm15, %v4273_v9  ;;  %v4599_v9 = vld [vmem:[%s16727_s28 + $0x8] sm:$0xff]  ;;  %s16762_s28 = sld [smem:[#allocation58_spill]] }
0x10d7   :  { %12154 = vmatprep.subr.msk.bf16.mxu0 %vm3857_vm13, %v4305_v44 }
0x10d8   :  { %v4283_v33 = vpop.permute.xlu1 %4282 }
0x10d9   :  { %v4313_v39 = vpop.permute.xlu0 %4312 }
0x10da   :  { %10921 = vmatpush3.bf16.msk.msra.mxu0 %vm15089_vm15, %v4275_v42 }
0x10db   :  { %12155 = vmatprep.subr.msk.bf16.mxu0 %vm3863_vm2, %v4313_v39 }
0x10dc   :  { %v4285_v0 = vpop.permute.xlu1 %4284 }
0x10dd   :  { %v4315_v54 = vpop.permute.xlu0 %4314 }
0x10de   :  { %10923 = vmatpush3.bf16.msk.msra.mxu0 %vm14954_vm3, %v4283_v33 }
0x10df   :  { %12156 = vmatprep.subr.msk.bf16.mxu0 %vm3863_vm2, %v4315_v54 }
0x10e0   :  { %v4325_v43 = vpop.permute.xlu1 %4324 }
0x10e1   :  { %v4323_v27 = vpop.permute.xlu0 %4322  ;;  %v4330_v18 = vsel %vm3869_vm4, %v4325_v43, 0 }
0x10e2   :  { %10925 = vmatpush3.bf16.msk.msra.mxu0 %vm14954_vm3, %v4285_v0  ;;  %12157 = vmatprep.subr.msk.bf16.mxu1 %vm3869_vm4, %v4323_v27  ;;  %v4327_v19 = vsel %vm3869_vm4, %v4323_v27, 0 }
0x10e3   :  { %11908 = vmatpush3.bf16.msra.mxu1 %v4327_v19 }
0x10e4   :  { %12158 = vmatprep.subr.msk.bf16.mxu1 %vm3869_vm4, %v4325_v43 }
0x10e5   :  { %4433 = vmatmul.mubr.bf16.vlgmr.msra.gmra.mrb[84].mxu0 %v12646_v53 }
0x10e6   :  { %4440 = vmatprep.mubr.bf16.mxu0 %v12651_v49 }
0x10e7   :  { %11910 = vmatpush3.bf16.msra.mxu1 %v4330_v18 }
0x10ea   :  { %11912 = vmatmul.mubr.msk.bf16.vlgmr.msra.gmra.mrb[88].mxu1 %vm4135_vm9, %v12650_v48 }
0x10eb   :  { %4690 = vmatprep.mubr.bf16.mxu1 %v12656_v10 }
0x10ed   :  { %4441 = vmatmul.mubr.bf16.gmra.mrb[88].mxu0 %v12653_v31 }
0x10f1   :  { %v4352_v30 = vpop.permute.xlu1 %4351 }
0x10f2   :  { %v4347_v41 = vpop.permute.xlu0 %4346 }
0x10f5   :  { %v4362_v11 = vpop.permute.xlu1 %4361 }
0x10f6   :  { %v4357_v46 = vpop.permute.xlu0 %4356 }
0x11b8   :  { %v10926_v63 = vpop.f32.mrb[84].mxu0 }
0x11b9   :  { %v10927_v26 = vpop.f32.mrb[85].mxu0 }
0x11ba   :  { %v10928_v7 = vadd.f32 %v10927_v26, %v10926_v63  ;;  %v10929_v61 = vpop.f32.mrb[86].mxu0  ;;  %v12654_v63 = vld [vmem:[#allocation16] ss:$12 sps:$4 sm:$0xff]  }
0x11bb   :  { %v10930_v12 = vpop.f32.mrb[87].mxu0 }
0x11bc   :  { %v10931_v13 = vadd.f32 %v10930_v12, %v10929_v61  ;;  %v4435_v56 = vadd.f32 %v10928_v7, %v4347_v41  ;;  %v12658_v61 = vld [vmem:[#allocation16 + $0x20] ss:$12 sps:$4 sm:$0xff]   ;;  %v12661_v41 = vld [vmem:[#allocation16 + $0x18] ss:$12 sps:$4 sm:$0xff]  }
0x11bd   :  { %v11913_v32 = vpop.f32.mrb[88].mxu1 }
0x11be   :  { %v4483_v58 = vpop.f32.mrb[89].mxu1  ;;  %v4438_v52 = vadd.f32 %v10931_v13, %v4352_v30 }
0x11bf   :  { %v4484_v62 = vadd.f32 %v4483_v58, %v4435_v56  ;;  %v11914_v51 = vpop.f32.mrb[90].mxu1 }
0x11c0   :  { %v10932_v15 = vpop.f32.mrb[88].mxu0  ;;  %v4486_v3 = vpop.f32.mrb[91].mxu1 }
0x11c1   :  { %v4498_v6 = vmax.f32 %v4484_v62, 0.0  ;;  %v4487_v22 = vadd.f32 %v4486_v3, %v4438_v52  ;;  %v10933_v23 = vpop.f32.mrb[89].mxu0 }
0x11c2   :  { %v10934_v14 = vadd.f32 %v10933_v23, %v10932_v15  ;;  %v10935_v40 = vpop.f32.mrb[90].mxu0 }
0x11c3   :  { %v4499_v34 = vmax.f32 %v4487_v22, 0.0  ;;  %v10936_v37 = vpop.f32.mrb[91].mxu0  ;;  %v4502_v57 = vmul.f32 %v15111_v8, %v4498_v6 }
0x11c4   :  { %v4443_v16 = vadd.f32 %v10934_v14, %v4357_v46  ;;  %v10937_v59 = vadd.f32 %v10936_v37, %v10935_v40 }
0x11c5   :  { %v4503_v1 = vmul.f32 %v15111_v8, %v4499_v34 }
0x11c6   :  { %v4492_v25 = vadd.f32 %v11913_v32, %v4443_v16  ;;  %v4446_v17 = vadd.f32 %v10937_v59, %v4362_v11 }
0x11c7   :  { %v4506_v24 = vpack.c.bf16 %v4503_v1, %v4502_v57 }
0x11c8   :  { %v4500_v2 = vmax.f32 %v4492_v25, 0.0  ;;  %v4495_v47 = vadd.f32 %v11914_v51, %v4446_v17 }
0x11c9   :  { %4510 = vrot.lane.b32.xlu0 %v4506_v24, %s13334_s23  ;;  %10942 = vmatprep.subr.bf16.mxu1 %v4506_v24 }
0x11ca   :  { %v4501_v38 = vmax.f32 %v4495_v47, 0.0  ;;  %v4504_v5 = vmul.f32 %v15111_v8, %v4500_v2 }
0x11cc   :  { %v4505_v50 = vmul.f32 %v15111_v8, %v4501_v38  ;;  %v12657_v8 = vld [vmem:[#allocation16 + $0x8] ss:$12 sps:$4 sm:$0xff]  }
0x11cd   :  { %4550 = vrot.lane.b32.xlu0 %v4506_v24, %s13291_s22  ;;  %11919 = vmatprep.mubr.msk.bf16.mxu0 %vm4135_vm9, %v12657_v8 }
0x11ce   :  { %v4507_v29 = vpack.c.bf16 %v4505_v50, %v4504_v5 }
0x11d0   :  { %4512 = vrot.lane.b32.xlu1 %v4507_v29, %s13334_s23  ;;  %s16744_s23 = sld [smem:[#allocation37_spill]] }
0x11d1   :  { %4552 = vrot.lane.b32.xlu0 %v4507_v29, %s13291_s22 }
0x11d4   :  { %4520 = vrot.lane.b32.xlu1 %v4506_v24, %s13331_s14 }
0x11d5   :  { %4560 = vrot.lane.b32.xlu0 %v4506_v24, %s13336_s5 }
0x11d8   :  { %4522 = vrot.lane.b32.xlu1 %v4507_v29, %s13331_s14  ;;  %s16740_s14 = sld [smem:[#allocation50_spill]] }
0x11d9   :  { %4562 = vrot.lane.b32.xlu0 %v4507_v29, %s13336_s5  ;;  %s16751_s5 = sld [smem:[#allocation54_spill]] }
0x11dc   :  { %4530 = vrot.lane.b32.xlu1 %v4506_v24, %s13335_s8 }
0x11dd   :  { %4570 = vrot.lane.b32.xlu0 %v4506_v24, %s13338_s24 }
0x11e0   :  { %4532 = vrot.lane.b32.xlu1 %v4507_v29, %s13335_s8  ;;  %s13347_s8 = smov 3  }
0x11e1   :  { %4572 = vrot.lane.b32.xlu0 %v4507_v29, %s13338_s24 }
0x11e4   :  { %4540 = vrot.lane.b32.xlu1 %v4506_v24, %s13289_s18 }
0x11e5   :  { %4580 = vrot.lane.b32.xlu0 %v4506_v24, %s13337_s19 }
0x11e8   :  { %4542 = vrot.lane.b32.xlu1 %v4507_v29, %s13289_s18 }
0x11e9   :  { %4604 = vperm.xlu0 %12389, %v4598_v28  }
0x11ec   :  { %4582 = vrot.lane.b32.xlu1 %v4507_v29, %s13337_s19  ;;  %s13348_s19 = smov 125  }
0x11ed   :  { %4614 = vperm.xlu0 %12389, %v4600_v35  }
0x11f0   :  { %4609 = vperm.xlu1 %12400, %v4599_v9  }
0x11f4   :  { %4619 = vperm.xlu1 %12400, %v4601_v60   ;;  %v4802_v60 = vld [vmem:[%s16728_s1] sm:$0xf]  ;;  %s16763_s1 = sld [smem:[#allocation59_spill]] }
0x123b   :  { %v4511_v42 = vpop.permute.xlu0 %4510 }
0x123c   :  { %10943 = vmatpush3.bf16.msk.msra.mxu1 %vm15074_vm8, %v4511_v42 }
0x123d   :  { %10944 = vmatprep.subr.bf16.mxu1 %v4507_v29 }
0x123f   :  { %v4551_v44 = vpop.permute.xlu0 %4550 }
0x1242   :  { %v4513_v33 = vpop.permute.xlu1 %4512 }
0x1243   :  { %v4553_v39 = vpop.permute.xlu0 %4552  ;;  %10945 = vmatpush3.bf16.msk.msra.mxu1 %vm15074_vm8, %v4513_v33  ;;  %vm4810_vm8 = vcmask 1042432  }
0x1244   :  { %12159 = vmatprep.subr.msk.bf16.mxu1 %vm3851_vm0, %v4551_v44  ;;  %v4811_v28 = vsel %vm4810_vm8, 4294967295, %v13298_v4  ;;  %vm16745_vm8 = vcmask 31744  }
0x1246   :  { %v4521_v0 = vpop.permute.xlu1 %4520 }
0x1247   :  { %v4561_v54 = vpop.permute.xlu0 %4560  ;;  %10947 = vmatpush3.bf16.msk.msra.mxu1 %vm15082_vm14, %v4521_v0 }
0x1248   :  { %12160 = vmatprep.subr.msk.bf16.mxu1 %vm3851_vm0, %v4553_v39  ;;  %vm5092_vm0 = vcmask 48128  }
0x124a   :  { %v4523_v27 = vpop.permute.xlu1 %4522 }
0x124b   :  { %v4563_v53 = vpop.permute.xlu0 %4562  ;;  %10949 = vmatpush3.bf16.msk.msra.mxu1 %vm15082_vm14, %v4523_v27  ;;  %vm16729_vm14 = vcmask 1043456  }
0x124c   :  { %12161 = vmatprep.subr.msk.bf16.mxu1 %vm3857_vm13, %v4561_v54  ;;  %v4812_v42 = vsel %vm16729_vm14, %v4811_v28, 0  ;;  %vm16746_vm14 = vmmov %vm16745_vm8 }
0x124d   :  { %v4814_v44 = vand.u32 %v4812_v42, %v4802_v60 }
0x124e   :  { %v4531_v19 = vpop.permute.xlu1 %4530 }
0x124f   :  { %v4571_v49 = vpop.permute.xlu0 %4570  ;;  %10951 = vmatpush3.bf16.msk.msra.mxu1 %vm15089_vm15, %v4531_v19 }
0x1250   :  { %12162 = vmatprep.subr.msk.bf16.mxu1 %vm3857_vm13, %v4563_v53  ;;  %vm15343_vm13 = vmneg %vm5092_vm0 }
0x1252   :  { %v4533_v45 = vpop.permute.xlu1 %4532 }
0x1253   :  { %v4573_v43 = vpop.permute.xlu0 %4572  ;;  %10953 = vmatpush3.bf16.msk.msra.mxu1 %vm15089_vm15, %v4533_v45  ;;  %vm4803_vm15 = vcmask 56320  }
0x1254   :  { %12163 = vmatprep.subr.msk.bf16.mxu1 %vm3863_vm2, %v4571_v49 }
0x1256   :  { %v4541_v18 = vpop.permute.xlu1 %4540 }
0x1257   :  { %v4581_v48 = vpop.permute.xlu0 %4580  ;;  %10955 = vmatpush3.bf16.msk.msra.mxu1 %vm14954_vm3, %v4541_v18 }
0x1258   :  { %12164 = vmatprep.subr.msk.bf16.mxu1 %vm3863_vm2, %v4573_v43  ;;  %12165 = vmatprep.subr.msk.bf16.mxu0 %vm3869_vm4, %v4581_v48  ;;  %v4585_v55 = vsel %vm3869_vm4, %v4581_v48, 0  ;;  %vm5133_vm2 = vcmask 39936  }
0x1259   :  { %11916 = vmatpush3.bf16.msra.mxu0 %v4585_v55 }
0x125a   :  { %v4543_v31 = vpop.permute.xlu1 %4542 }
0x125b   :  { %10957 = vmatpush3.bf16.msk.msra.mxu1 %vm14954_vm3, %v4543_v31 }
0x125e   :  { %v4583_v26 = vpop.permute.xlu1 %4582  ;;  %4691 = vmatmul.mubr.bf16.vlgmr.msra.gmra.mrb[92].mxu1 %v12654_v63 }
0x125f   :  { %12166 = vmatprep.subr.msk.bf16.mxu0 %vm3869_vm4, %v4583_v26  ;;  %v4588_v7 = vsel %vm3869_vm4, %v4583_v26, 0  ;;  %4698 = vmatprep.mubr.bf16.mxu1 %v12659_v36  ;;  %vm15355_vm4 = vmneg %vm5133_vm2 }
0x1260   :  { %11918 = vmatpush3.bf16.msra.mxu0 %v4588_v7 }
0x1261   :  { %11923 = vmatprep.subr.bf16.mxu0 %v4814_v44 }
0x1263   :  { %11920 = vmatmul.mubr.msk.bf16.vlgmr.msra.gmra.mrb[92].mxu0 %vm4135_vm9, %v12658_v61 }
0x1264   :  { %11924 = vmatpush3.bf16.msra.mxu0 %v4814_v44 }
0x1265   :  { %11929 = vmatprep.subr.bf16.mxu0 %v4814_v44 }
0x1266   :  { %4699 = vmatmul.mubr.bf16.gmra.mrb[96].mxu1 %v12661_v41 }
0x1268   :  { %v4605_v32 = vpop.permute.xlu0 %4604 }
0x126c   :  { %v4615_v59 = vpop.permute.xlu0 %4614 }
0x126f   :  { %v4610_v51 = vpop.permute.xlu1 %4609 }
0x1273   :  { %v4620_v24 = vpop.permute.xlu1 %4619 }
0x1331   :  { %v10958_v12 = vpop.f32.mrb[92].mxu1 }
0x1332   :  { %v10959_v13 = vpop.f32.mrb[93].mxu1 }
0x1333   :  { %v10960_v56 = vadd.f32 %v10959_v13, %v10958_v12  ;;  %v10961_v30 = vpop.f32.mrb[94].mxu1 }
0x1334   :  { %v10962_v58 = vpop.f32.mrb[95].mxu1 }
0x1335   :  { %v10963_v52 = vadd.f32 %v10962_v58, %v10961_v30  ;;  %v4693_v62 = vadd.f32 %v10960_v56, %v4605_v32 }
0x1336   :  { %v11921_v15 = vpop.f32.mrb[92].mxu0 }
0x1337   :  { %v4741_v3 = vpop.f32.mrb[93].mxu0  ;;  %v4696_v6 = vadd.f32 %v10963_v52, %v4610_v51 }
0x1338   :  { %v4742_v22 = vadd.f32 %v4741_v3, %v4693_v62  ;;  %v11922_v23 = vpop.f32.mrb[94].mxu0 }
0x1339   :  { %v10964_v14 = vpop.f32.mrb[96].mxu1  ;;  %v4744_v40 = vpop.f32.mrb[95].mxu0 }
0x133a   :  { %v4745_v46 = vadd.f32 %v4744_v40, %v4696_v6  ;;  %v10965_v34 = vpop.f32.mrb[97].mxu1  ;;  %v4756_v11 = vmax.f32 %v4742_v22, 0.0 }
0x133b   :  { %v10966_v37 = vadd.f32 %v10965_v34, %v10964_v14  ;;  %v10967_v16 = vpop.f32.mrb[98].mxu1 }
0x133c   :  { %v4757_v57 = vmax.f32 %v4745_v46, 0.0  ;;  %v10968_v1 = vpop.f32.mrb[99].mxu1 }
0x133d   :  { %v4701_v25 = vadd.f32 %v10966_v37, %v4615_v59  ;;  %v10969_v17 = vadd.f32 %v10968_v1, %v10967_v16 }
0x133e   :  { %v12466_v2 = vpack.i.bf16 %v4757_v57, %v4756_v11 }
0x133f   :  { %v4750_v47 = vadd.f32 %v11921_v15, %v4701_v25  ;;  %v4704_v38 = vadd.f32 %v10969_v17, %v4620_v24 }
0x1340   :  { %12467 = vrot.lane.b32.xlu0 %v12466_v2, %s13291_s22 }
0x1341   :  { %v4753_v5 = vadd.f32 %v11922_v23, %v4704_v38  ;;  %v4758_v50 = vmax.f32 %v4750_v47, 0.0 }
0x1343   :  { %v4759_v29 = vmax.f32 %v4753_v5, 0.0 }
0x1345   :  { %v12471_v10 = vpack.i.bf16 %v4759_v29, %v4758_v50 }
0x1347   :  { %12472 = vrot.lane.b32.xlu1 %v12471_v10, %s13291_s22 }
0x13b2   :  { %v12468_v8 = vpop.permute.xlu0 %12467 }
0x13b3   :  { %v12470_v35 = vunpack.i.h.bf16 %v12468_v8  ;;  %v12469_v9 = vunpack.i.l.bf16 %v12468_v8 }
0x13b5   :  { %v4777_v33 = vmax.f32 %v4757_v57, %v12470_v35  ;;  %v4776_v39 = vmax.f32 %v4756_v11, %v12469_v9 }
0x13b7   :  { %v12476_v0 = vpack.i.bf16 %v4777_v33, %v4776_v39 }
0x13b9   :  { %v12473_v54 = vpop.permute.xlu1 %12472  ;;  %12477 = vrot.lane.b32.xlu0 %v12476_v0, %s13338_s24 }
0x13ba   :  { %v12475_v27 = vunpack.i.h.bf16 %v12473_v54  ;;  %v12474_v53 = vunpack.i.l.bf16 %v12473_v54 }
0x13bc   :  { %v4779_v19 = vmax.f32 %v4759_v29, %v12475_v27  ;;  %v4778_v49 = vmax.f32 %v4758_v50, %v12474_v53 }
0x13be   :  { %v12481_v45 = vpack.i.bf16 %v4779_v19, %v4778_v49 }
0x13c0   :  { %12482 = vrot.lane.b32.xlu1 %v12481_v45, %s13338_s24  ;;  %s16754_s24 = sld [smem:[#allocation55_spill]] }
0x142b   :  { %v12478_v43 = vpop.permute.xlu0 %12477 }
0x142c   :  { %v12480_v18 = vunpack.i.h.bf16 %v12478_v43  ;;  %v12479_v48 = vunpack.i.l.bf16 %v12478_v43 }
0x142e   :  { %v4797_v55 = vmax.f32 %v4777_v33, %v12480_v18  ;;  %v4796_v31 = vmax.f32 %v4776_v39, %v12479_v48 }
0x1430   :  { %v4800_v63 = vpack.c.bf16 %v4797_v55, %v4796_v31 }
0x1432   :  { %v12483_v36 = vpop.permute.xlu1 %12482  ;;  %4867 = vrot.lane.b32.xlu0 %v4800_v63, %s13316_s17  ;;  %11925 = vmatprep.mubr.msk.bf16.mxu0 %vm4803_vm15, %v4800_v63 }
0x1433   :  { %v12485_v26 = vunpack.i.h.bf16 %v12483_v36  ;;  %v12484_v7 = vunpack.i.l.bf16 %v12483_v36 }
0x1435   :  { %v4799_v61 = vmax.f32 %v4779_v19, %v12485_v26  ;;  %v4798_v41 = vmax.f32 %v4778_v49, %v12484_v7 }
0x1436   :  { %4926 = vrot.lane.b32.xlu0 %v4800_v63, %s13308_s0 }
0x1437   :  { %v4801_v12 = vpack.c.bf16 %v4799_v61, %v4798_v41 }
0x1439   :  { %4869 = vrot.lane.b32.xlu1 %v4801_v12, %s13316_s17  ;;  %11926 = vmatmul.mubr.msk.bf16.vlgmr.msra.gmra.mrb[96].mxu0 %vm4803_vm15, %v4801_v12  ;;  %s13342_s17 = smov 123  }
0x143a   :  { %4985 = vrot.lane.b32.xlu0 %v4800_v63, %s13339_s2  ;;  %11930 = vmatpush3.bf16.msra.mxu0 %v4814_v44 }
0x143b   :  { %11935 = vmatprep.subr.bf16.mxu0 %v4814_v44 }
0x143d   :  { %4928 = vrot.lane.b32.xlu1 %v4801_v12, %s13308_s0  ;;  %s13340_s0 = smov 6  }
0x1441   :  { %4987 = vrot.lane.b32.xlu1 %v4801_v12, %s13339_s2  ;;  %s16764_s2 = sld [smem:[#allocation60_spill]] }
0x14a4   :  { %v4868_v13 = vpop.permute.xlu0 %4867 }
0x14a5   :  { %11931 = vmatprep.mubr.msk.bf16.mxu0 %vm4803_vm15, %v4868_v13 }
0x14a8   :  { %v4927_v30 = vpop.permute.xlu0 %4926 }
0x14ab   :  { %v4870_v56 = vpop.permute.xlu1 %4869 }
0x14ac   :  { %11932 = vmatmul.mubr.msk.bf16.vlgmr.msra.gmra.mrb[100].mxu0 %vm4803_vm15, %v4870_v56  ;;  %v4986_v58 = vpop.permute.xlu0 %4985  ;;  %v5207_v56 = vld [vmem:[%s16731_s7] sm:$0xff] }
0x14ad   :  { %11937 = vmatprep.mubr.msk.bf16.mxu0 %vm4803_vm15, %v4927_v30  ;;  %11936 = vmatpush3.bf16.msra.mxu0 %v4814_v44  ;;  %v5209_v30 = vld [vmem:[%s16731_s7 + $0x10] sm:$0xff] }
0x14ae   :  { %11941 = vmatprep.subr.bf16.mxu0 %v4814_v44 }
0x14af   :  { %v4929_v32 = vpop.permute.xlu1 %4928 }
0x14b3   :  { %v4988_v52 = vpop.permute.xlu1 %4987 }
0x14b4   :  { %11938 = vmatmul.mubr.msk.bf16.vlgmr.msra.gmra.mrb[104].mxu0 %vm4803_vm15, %v4929_v32  ;;  %v5208_v32 = vld [vmem:[%s16731_s7 + $0x8] sm:$0xff] }
0x14b5   :  { %11943 = vmatprep.mubr.msk.bf16.mxu0 %vm4803_vm15, %v4986_v58  ;;  %11942 = vmatpush3.bf16.msra.mxu0 %v4814_v44  ;;  %v5211_v58 = vld [vmem:[%s16731_s7 + $0x20] sm:$0xff] }
0x14bc   :  { %11944 = vmatmul.mubr.msk.bf16.vlgmr.msra.gmra.mrb[108].mxu0 %vm4803_vm15, %v4988_v52  ;;  %v5210_v52 = vld [vmem:[%s16731_s7 + $0x18] sm:$0xff] }
0x150c   :  { %v11927_v62 = vpop.f32.mrb[96].mxu0 }
0x150d   :  { %v4850_v51 = vpop.f32.mrb[97].mxu0 }
0x150e   :  { %v11928_v15 = vpop.f32.mrb[98].mxu0 }
0x150f   :  { %v4853_v3 = vpop.f32.mrb[99].mxu0 }
0x157f   :  { %v11933_v6 = vpop.f32.mrb[100].mxu0 }
0x1580   :  { %v4911_v22 = vpop.f32.mrb[101].mxu0 }
0x1581   :  { %v11934_v23 = vpop.f32.mrb[102].mxu0 }
0x1582   :  { %v12496_v14 = vpack.i.bf16 %v11934_v23, %v11933_v6  ;;  %v4914_v40 = vpop.f32.mrb[103].mxu0 }
0x1583   :  { %v12486_v46 = vpack.i.bf16 %v4914_v40, %v4911_v22 }
0x1585   :  { %12487 = vrot.lane.b32.xlu0 %v12486_v46, %s13340_s0 }
0x1587   :  { %v11939_v34 = vpop.f32.mrb[104].mxu0 }
0x1588   :  { %v4970_v37 = vpop.f32.mrb[105].mxu0 }
0x1589   :  { %v11940_v16 = vpop.f32.mrb[106].mxu0 }
0x158a   :  { %v12506_v59 = vpack.i.bf16 %v11940_v16, %v11939_v34  ;;  %v4973_v11 = vpop.f32.mrb[107].mxu0 }
0x158b   :  { %v12491_v57 = vpack.i.bf16 %v4973_v11, %v4970_v37 }
0x158d   :  { %12492 = vrot.lane.b32.xlu1 %v12491_v57, %s13275_s27 }
0x158f   :  { %v11945_v1 = vpop.f32.mrb[108].mxu0 }
0x1590   :  { %v5029_v25 = vpop.f32.mrb[109].mxu0 }
0x1591   :  { %12497 = vrot.lane.b32.xlu1 %v12496_v14, %s13340_s0  ;;  %v11946_v17 = vpop.f32.mrb[110].mxu0  ;;  %v12739_v14 = vld [vmem:[%s16742_s11 + $0x28] ss:$20 sps:$4 sm:$0xff]  }
0x1592   :  { %v12511_v24 = vpack.i.bf16 %v11946_v17, %v11945_v1  ;;  %v5032_v2 = vpop.f32.mrb[111].mxu0 }
0x1593   :  { %v12501_v47 = vpack.i.bf16 %v5032_v2, %v5029_v25 }
0x1595   :  { %12512 = vrot.lane.b32.xlu1 %v12511_v24, %s13312_s10  ;;  %12502 = vrot.lane.b32.xlu0 %v12501_v47, %s13312_s10  ;;  %s16730_s10 = sld [smem:[#allocation46_spill]] }
0x1599   :  { %12507 = vrot.lane.b32.xlu0 %v12506_v59, %s13275_s27  ;;  %s13341_s27 = smov 7  }
0x159b   :  { %v12664_v12 = vld [vmem:[%s16730_s10 + $0x4] ss:$12 sps:$4 sm:$0xff]   ;;  %v12665_v13 = vld [vmem:[%s16730_s10 + $0x8] ss:$12 sps:$4 sm:$0xff]  }
0x159c   :  { %5359 = vmatprep.mubr.bf16.mxu1 %v12664_v12  ;;  %11951 = vmatprep.mubr.msk.bf16.mxu0 %vm4135_vm9, %v12665_v13 }
0x15f7   :  { %v12488_v5 = vpop.permute.xlu0 %12487 }
0x15f8   :  { %v12490_v50 = vunpack.i.h.bf16 %v12488_v5  ;;  %v12489_v29 = vunpack.i.l.bf16 %v12488_v5  ;;  %v12667_v5 = vld [vmem:[%s16730_s10 + $0x1c] ss:$12 sps:$4 sm:$0xff]  }
0x15fa   :  { %v5094_v9 = vsel %vm5092_vm0, %v4853_v3, %v12490_v50  ;;  %v5093_v60 = vsel %vm5092_vm0, %v4850_v51, %v12489_v29  ;;  %v5212_v51 = vld [vmem:[%s16731_s7 + $0x28] sm:$0xff] }
0x15ff   :  { %v12493_v38 = vpop.permute.xlu1 %12492 }
0x1600   :  { %v12495_v8 = vunpack.i.h.bf16 %v12493_v38  ;;  %v12494_v28 = vunpack.i.l.bf16 %v12493_v38  ;;  %v12662_v38 = vld [vmem:[%s16730_s10] ss:$12 sps:$4 sm:$0xff]  }
0x1602   :  { %v5098_v33 = vsel %vm2540_vm7, %v5094_v9, %v12495_v8  ;;  %v5097_v39 = vsel %vm2540_vm7, %v5093_v60, %v12494_v28  ;;  %v12673_v8 = vld [vmem:[%s16730_s10 + $0x38] ss:$12 sps:$4 sm:$0xff]   ;;  %v12674_v9 = vld [vmem:[%s16730_s10 + $0x50] ss:$12 sps:$4 sm:$0xff]  }
0x1603   :  { %v12498_v10 = vpop.permute.xlu1 %12497  ;;  %v12669_v28 = vld [vmem:[%s16730_s10 + $0x18] ss:$12 sps:$4 sm:$0xff]   ;;  %v12672_v60 = vld [vmem:[%s16730_s10 + $0x30] ss:$12 sps:$4 sm:$0xff]  }
0x1604   :  { %v12500_v0 = vunpack.i.h.bf16 %v12498_v10  ;;  %v12499_v54 = vunpack.i.l.bf16 %v12498_v10  ;;  %v12666_v10 = vld [vmem:[%s16730_s10 + $0x20] ss:$12 sps:$4 sm:$0xff]  }
0x1606   :  { %v5096_v48 = vsel %vm5092_vm0, %v11928_v15, %v12500_v0  ;;  %v5095_v55 = vsel %vm5092_vm0, %v11927_v62, %v12499_v54  ;;  %v5213_v62 = vld [vmem:[%s16731_s7 + $0x30] sm:$0xff]  ;;  %v5214_v15 = vld [vmem:[%s16731_s7 + $0x38] sm:$0xff]  ;;  %vm16748_vm0 = vmmov %vm16745_vm8 }
0x1607   :  { %v12503_v35 = vpop.permute.xlu0 %12502  ;;  %v12513_v27 = vpop.permute.xlu1 %12512 }
0x1608   :  { %v12505_v42 = vunpack.i.h.bf16 %v12503_v35  ;;  %v12504_v44 = vunpack.i.l.bf16 %v12503_v35  ;;  %v12515_v31 = vunpack.i.h.bf16 %v12513_v27  ;;  %v12514_v63 = vunpack.i.l.bf16 %v12513_v27  ;;  %v12670_v35 = vld [vmem:[%s16730_s10 + $0x34] ss:$12 sps:$4 sm:$0xff]  }
0x160a   :  { %v5102_v53 = vsel %vm2740_vm11, %v5098_v33, %v12505_v42  ;;  %v5101_v19 = vsel %vm2740_vm11, %v5097_v39, %v12504_v44  ;;  %v12675_v42 = vld [vmem:[%s16730_s10 + $0x4c] ss:$12 sps:$4 sm:$0xff]   ;;  %v12677_v44 = vld [vmem:[%s16730_s10 + $0x48] ss:$12 sps:$4 sm:$0xff]  }
0x160b   :  { %v5105_v49 = vpack.c.bf16 %v5102_v53, %v5101_v19  ;;  %v12508_v45 = vpop.permute.xlu0 %12507 }
0x160c   :  { %v12510_v43 = vunpack.i.h.bf16 %v12508_v45  ;;  %v12509_v18 = vunpack.i.l.bf16 %v12508_v45 }
0x160d   :  { %5109 = vrot.lane.b32.xlu0 %v5105_v49, %s13341_s27  ;;  %10986 = vmatprep.subr.bf16.mxu1 %v5105_v49 }
0x160e   :  { %v5100_v36 = vsel %vm2540_vm7, %v5096_v48, %v12510_v43  ;;  %v5099_v26 = vsel %vm2540_vm7, %v5095_v55, %v12509_v18  ;;  %vm15334_vm7 = vmneg %vm4803_vm15 }
0x160f   :  { %v5104_v7 = vsel %vm2740_vm11, %v5100_v36, %v12515_v31  ;;  %v5103_v61 = vsel %vm2740_vm11, %v5099_v26, %v12514_v63  ;;  %vm5154_vm11 = vcmask 171008   ;;  %vm16747_vm15 = vmmov %vm16745_vm8 }
0x1610   :  { %v5106_v41 = vpack.c.bf16 %v5104_v7, %v5103_v61 }
0x1611   :  { %5150 = vrot.lane.b32.xlu0 %v5105_v49, %s13291_s22 }
0x1612   :  { %5111 = vrot.lane.b32.xlu1 %v5106_v41, %s13341_s27 }
0x1615   :  { %5152 = vrot.lane.b32.xlu0 %v5106_v41, %s13291_s22 }
0x1616   :  { %5119 = vrot.lane.b32.xlu1 %v5105_v49, %s13340_s0 }
0x1619   :  { %5161 = vrot.lane.b32.xlu0 %v5105_v49, %s13342_s17 }
0x161a   :  { %5121 = vrot.lane.b32.xlu1 %v5106_v41, %s13340_s0 }
0x161d   :  { %5163 = vrot.lane.b32.xlu0 %v5106_v41, %s13342_s17 }
0x161e   :  { %5129 = vrot.lane.b32.xlu1 %v5105_v49, %s13343_s3 }
0x1621   :  { %5171 = vrot.lane.b32.xlu0 %v5105_v49, %s13344_s4 }
0x1622   :  { %5131 = vrot.lane.b32.xlu1 %v5106_v41, %s13343_s3 }
0x1625   :  { %5173 = vrot.lane.b32.xlu0 %v5106_v41, %s13344_s4 }
0x1626   :  { %5140 = vrot.lane.b32.xlu1 %v5105_v49, %s13289_s18 }
0x1629   :  { %5181 = vrot.lane.b32.xlu0 %v5105_v49, %s13345_s13 }
0x162a   :  { %5142 = vrot.lane.b32.xlu1 %v5106_v41, %s13289_s18 }
0x162d   :  { %5217 = vperm.xlu0 %12389, %v5207_v56  }
0x162e   :  { %5183 = vrot.lane.b32.xlu1 %v5106_v41, %s13345_s13 }
0x1631   :  { %5227 = vperm.xlu0 %12389, %v5209_v30  }
0x1632   :  { %5222 = vperm.xlu1 %12400, %v5208_v32  }
0x1635   :  { %5237 = vperm.xlu0 %12389, %v5211_v58  }
0x1636   :  { %5232 = vperm.xlu1 %12400, %v5210_v52  }
0x1639   :  { %5247 = vperm.xlu0 %12389, %v5213_v62  }
0x163a   :  { %5242 = vperm.xlu1 %12400, %v5212_v51  }
0x163e   :  { %5252 = vperm.xlu1 %12400, %v5214_v15  }
0x167f   :  { %v5110_v6 = vpop.permute.xlu0 %5109 }
0x1680   :  { %10987 = vmatpush3.bf16.msk.msra.mxu1 %vm15334_vm7, %v5110_v6 }
0x1681   :  { %10988 = vmatprep.subr.bf16.mxu1 %v5106_v41  ;;  %v15387_v41 = vld [vmem:[#allocation5] ss:$0 sm:$0xff] }
0x1683   :  { %v5151_v22 = vpop.permute.xlu0 %5150 }
0x1684   :  { %v5112_v23 = vpop.permute.xlu1 %5111 }
0x1685   :  { %10989 = vmatpush3.bf16.msk.msra.mxu1 %vm15334_vm7, %v5112_v23 }
0x1686   :  { %12167 = vmatprep.subr.msk.bf16.mxu1 %vm5154_vm11, %v5151_v22 }
0x1687   :  { %v5153_v40 = vpop.permute.xlu0 %5152 }
0x1688   :  { %v5120_v46 = vpop.permute.xlu1 %5119 }
0x1689   :  { %10991 = vmatpush3.bf16.msk.msra.mxu1 %vm15343_vm13, %v5120_v46 }
0x168a   :  { %12168 = vmatprep.subr.msk.bf16.mxu1 %vm5154_vm11, %v5153_v40 }
0x168b   :  { %v5162_v34 = vpop.permute.xlu0 %5161 }
0x168c   :  { %v5122_v37 = vpop.permute.xlu1 %5121 }
0x168d   :  { %10993 = vmatpush3.bf16.msk.msra.mxu1 %vm15343_vm13, %v5122_v37 }
0x168e   :  { %12169 = vmatprep.subr.msk.bf16.mxu1 %vm2803_vm6, %v5162_v34 }
0x168f   :  { %v5164_v59 = vpop.permute.xlu0 %5163 }
0x1690   :  { %v5130_v11 = vpop.permute.xlu1 %5129 }
0x1691   :  { %10995 = vmatpush3.bf16.msk.msra.mxu1 %vm15355_vm4, %v5130_v11 }
0x1692   :  { %12170 = vmatprep.subr.msk.bf16.mxu1 %vm2803_vm6, %v5164_v59 }
0x1693   :  { %v5172_v57 = vpop.permute.xlu0 %5171 }
0x1694   :  { %v5132_v1 = vpop.permute.xlu1 %5131 }
0x1695   :  { %10997 = vmatpush3.bf16.msk.msra.mxu1 %vm15355_vm4, %v5132_v1 }
0x1696   :  { %12171 = vmatprep.subr.msk.bf16.mxu1 %vm2753_vm12, %v5172_v57 }
0x1697   :  { %v5174_v25 = vpop.permute.xlu0 %5173 }
0x1698   :  { %v5141_v17 = vpop.permute.xlu1 %5140 }
0x1699   :  { %10999 = vmatpush3.bf16.msk.msra.mxu1 %vm14954_vm3, %v5141_v17 }
0x169a   :  { %12172 = vmatprep.subr.msk.bf16.mxu1 %vm2753_vm12, %v5174_v25 }
0x169b   :  { %v5182_v24 = vpop.permute.xlu0 %5181 }
0x169c   :  { %v5143_v2 = vpop.permute.xlu1 %5142  ;;  %12173 = vmatprep.subr.msk.bf16.mxu0 %vm3374_vm5, %v5182_v24  ;;  %v5186_v47 = vsel %vm3374_vm5, %v5182_v24, 0 }
0x169d   :  { %11001 = vmatpush3.bf16.msk.msra.mxu1 %vm14954_vm3, %v5143_v2  ;;  %11948 = vmatpush3.bf16.msra.mxu0 %v5186_v47 }
0x16a0   :  { %v5184_v50 = vpop.permute.xlu1 %5183  ;;  %5360 = vmatmul.mubr.bf16.vlgmr.msra.gmra.mrb[100].mxu1 %v12662_v38 }
0x16a1   :  { %12174 = vmatprep.subr.msk.bf16.mxu0 %vm3374_vm5, %v5184_v50  ;;  %v5189_v29 = vsel %vm3374_vm5, %v5184_v50, 0  ;;  %5367 = vmatprep.mubr.bf16.mxu1 %v12667_v5 }
0x16a2   :  { %11950 = vmatpush3.bf16.msra.mxu0 %v5189_v29 }
0x16a5   :  { %11952 = vmatmul.mubr.msk.bf16.vlgmr.msra.gmra.mrb[112].mxu0 %vm4135_vm9, %v12666_v10 }
0x16a6   :  { %11955 = vmatprep.mubr.msk.bf16.mxu0 %vm4135_vm9, %v12673_v8 }
0x16a8   :  { %5368 = vmatmul.mubr.bf16.gmra.mrb[104].mxu1 %v12669_v28 }
0x16a9   :  { %5375 = vmatprep.mubr.bf16.mxu1 %v12670_v35 }
0x16ac   :  { %v5218_v27 = vpop.permute.xlu0 %5217 }
0x16ad   :  { %11956 = vmatmul.mubr.msk.bf16.gmra.mrb[116].mxu0 %vm4135_vm9, %v12674_v9  ;;  %vm5820_vm9 = vcmask 523264  }
0x16b0   :  { %5376 = vmatmul.mubr.bf16.gmra.mrb[108].mxu1 %v12672_v60  ;;  %v5228_v56 = vpop.permute.xlu0 %5227 }
0x16b1   :  { %5383 = vmatprep.mubr.bf16.mxu1 %v12675_v42  ;;  %v5223_v45 = vpop.permute.xlu1 %5222 }
0x16b4   :  { %v5238_v2 = vpop.permute.xlu0 %5237 }
0x16b5   :  { %v5233_v62 = vpop.permute.xlu1 %5232 }
0x16b8   :  { %5384 = vmatmul.mubr.bf16.gmra.mrb[112].mxu1 %v12677_v44 }
0x16b9   :  { %v5243_v10 = vpop.permute.xlu1 %5242 }
0x1773   :  { %v11002_v33 = vpop.f32.mrb[100].mxu1 }
0x1774   :  { %v11003_v39 = vpop.f32.mrb[101].mxu1 }
0x1775   :  { %v11004_v0 = vadd.f32 %v11003_v39, %v11002_v33  ;;  %v11005_v54 = vpop.f32.mrb[102].mxu1 }
0x1776   :  { %v11006_v53 = vpop.f32.mrb[103].mxu1 }
0x1777   :  { %v11007_v19 = vadd.f32 %v11006_v53, %v11005_v54  ;;  %v5362_v49 = vadd.f32 %v11004_v0, %v5218_v27  ;;  %v5248_v54 = vpop.permute.xlu0 %5247 }
0x1778   :  { %v11953_v43 = vpop.f32.mrb[112].mxu0 }
0x1779   :  { %v5426_v18 = vpop.f32.mrb[113].mxu0  ;;  %v5365_v48 = vadd.f32 %v11007_v19, %v5223_v45 }
0x177a   :  { %v5427_v55 = vadd.f32 %v5426_v18, %v5362_v49  ;;  %v11954_v31 = vpop.f32.mrb[114].mxu0 }
0x177b   :  { %v11008_v63 = vpop.f32.mrb[104].mxu1  ;;  %v5429_v36 = vpop.f32.mrb[115].mxu0 }
0x177c   :  { %v5457_v26 = vmax.f32 %v5427_v55, 0.0  ;;  %v5430_v7 = vadd.f32 %v5429_v36, %v5365_v48  ;;  %v11009_v61 = vpop.f32.mrb[105].mxu1 }
0x177d   :  { %v11010_v12 = vadd.f32 %v11009_v61, %v11008_v63  ;;  %v11011_v13 = vpop.f32.mrb[106].mxu1 }
0x177e   :  { %v5458_v30 = vmax.f32 %v5430_v7, 0.0  ;;  %v11012_v32 = vpop.f32.mrb[107].mxu1  ;;  %v5472_v51 = vmul.f32 %v15387_v41, %v5457_v26 }
0x177f   :  { %v5370_v58 = vadd.f32 %v11010_v12, %v5228_v56  ;;  %v11013_v52 = vadd.f32 %v11012_v32, %v11011_v13  ;;  %v12680_v12 = vld [vmem:[%s16738_s15 + $0x4] ss:$20 sps:$4 sm:$0xff]   ;;  %v12686_v13 = vld [vmem:[%s16738_s15 + $0xc] ss:$20 sps:$4 sm:$0xff]  }
0x1780   :  { %v5473_v15 = vmul.f32 %v15387_v41, %v5458_v30  ;;  %v11957_v6 = vpop.f32.mrb[116].mxu0  ;;  %5865 = vmatprep.mubr.bf16.mxu0 %v12680_v12  ;;  %5930 = vmatprep.mubr.bf16.mxu1 %v12686_v13  ;;  %v5673_v56 = vld [vmem:[%s16739_s16 + $0x8] sm:$0xff]  ;;  %v5672_v30 = vld [vmem:[%s16739_s16] sm:$0xff]  ;;  %v5675_v32 = vld [vmem:[%s16739_s16 + $0x18] sm:$0xff] }
0x1781   :  { %v5435_v22 = vadd.f32 %v11953_v43, %v5370_v58  ;;  %v5373_v23 = vadd.f32 %v11013_v52, %v5233_v62  ;;  %v5442_v40 = vpop.f32.mrb[117].mxu0  ;;  %v5253_v43 = vpop.permute.xlu1 %5252  ;;  %v5674_v58 = vld [vmem:[%s16739_s16 + $0x10] sm:$0xff]  ;;  %v5677_v52 = vld [vmem:[%s16739_s16 + $0x28] sm:$0xff]  ;;  %v5676_v62 = vld [vmem:[%s16739_s16 + $0x20] sm:$0xff] }
0x1782   :  { %v15391_v46 = vpack.c.bf16 %v5473_v15, %v5472_v51  ;;  %v11958_v34 = vpop.f32.mrb[118].mxu0  ;;  %v5679_v51 = vld [vmem:[%s16739_s16 + $0x38] sm:$0xff]  ;;  %v5678_v15 = vld [vmem:[%s16739_s16 + $0x30] sm:$0xff] }
0x1783   :  { %v5459_v37 = vmax.f32 %v5435_v22, 0.0  ;;  %v5438_v59 = vadd.f32 %v11954_v31, %v5373_v23  ;;  %v11014_v11 = vpop.f32.mrb[108].mxu1  ;;  %v5445_v57 = vpop.f32.mrb[119].mxu0  ;;  %v12698_v12 = vld [vmem:[%s16738_s15 + $0x10] ss:$20 sps:$4 sm:$0xff]  }
0x1784   :  { %v11015_v1 = vpop.f32.mrb[109].mxu1  ;;  %5488 = vrot.lane.b32.xlu1 %v15391_v46, %s13341_s27  ;;  %5528 = vrot.lane.b32.xlu0 %v15391_v46, %s13343_s3 }
0x1785   :  { %v5460_v25 = vmax.f32 %v5438_v59, 0.0  ;;  %v11016_v17 = vadd.f32 %v11015_v1, %v11014_v11  ;;  %v11017_v24 = vpop.f32.mrb[110].mxu1  ;;  %v5474_v38 = vmul.f32 %v15387_v41, %v5459_v37 }
0x1786   :  { %v11018_v47 = vpop.f32.mrb[111].mxu1 }
0x1787   :  { %v5475_v5 = vmul.f32 %v15387_v41, %v5460_v25  ;;  %v11019_v50 = vadd.f32 %v11018_v47, %v11017_v24  ;;  %v5378_v29 = vadd.f32 %v11016_v17, %v5238_v2 }
0x1788   :  { %5588 = vrot.lane.b32.xlu1 %v15391_v46, %s13342_s17  ;;  %5548 = vrot.lane.b32.xlu0 %v15391_v46, %s13289_s18 }
0x1789   :  { %v15403_v8 = vpack.c.bf16 %v5475_v5, %v5474_v38  ;;  %v5443_v28 = vadd.f32 %v5442_v40, %v5378_v29  ;;  %v5381_v35 = vadd.f32 %v11019_v50, %v5243_v10  ;;  %v12678_v10 = vld [vmem:[%s16738_s15] ss:$20 sps:$4 sm:$0xff]  }
0x178b   :  { %v5461_v9 = vmax.f32 %v5443_v28, 0.0  ;;  %v5446_v60 = vadd.f32 %v5445_v57, %v5381_v35  ;;  %v11020_v42 = vpop.f32.mrb[112].mxu1 }
0x178c   :  { %v11021_v44 = vpop.f32.mrb[113].mxu1  ;;  %5490 = vrot.lane.b32.xlu1 %v15403_v8, %s13341_s27  ;;  %5508 = vrot.lane.b32.xlu0 %v15391_v46, %s13340_s0 }
0x178d   :  { %v5462_v33 = vmax.f32 %v5446_v60, 0.0  ;;  %v11022_v39 = vadd.f32 %v11021_v44, %v11020_v42  ;;  %v11023_v0 = vpop.f32.mrb[114].mxu1  ;;  %v5476_v53 = vmul.f32 %v15387_v41, %v5461_v9 }
0x178e   :  { %v11024_v27 = vpop.f32.mrb[115].mxu1 }
0x178f   :  { %v5477_v19 = vmul.f32 %v15387_v41, %v5462_v33  ;;  %v5386_v49 = vadd.f32 %v11022_v39, %v5248_v54  ;;  %v11025_v45 = vadd.f32 %v11024_v27, %v11023_v0  ;;  %v12683_v33 = vld [vmem:[%s16738_s15 + $0x28] ss:$20 sps:$4 sm:$0xff]  }
0x1790   :  { %5550 = vrot.lane.b32.xlu1 %v15403_v8, %s13289_s18  ;;  %5530 = vrot.lane.b32.xlu0 %v15403_v8, %s13343_s3  ;;  %v12687_v39 = vld [vmem:[%s16738_s15 + $0x54] ss:$20 sps:$4 sm:$0xff]  }
0x1791   :  { %v15415_v18 = vpack.c.bf16 %v5477_v19, %v5476_v53  ;;  %v5451_v48 = vadd.f32 %v11957_v6, %v5386_v49  ;;  %v5389_v55 = vadd.f32 %v11025_v45, %v5253_v43  ;;  %v12684_v45 = vld [vmem:[%s16738_s15 + $0x8] ss:$20 sps:$4 sm:$0xff]   ;;  %v12689_v43 = vld [vmem:[%s16738_s15 + $0x50] ss:$20 sps:$4 sm:$0xff]  }
0x1793   :  { %v5463_v31 = vmax.f32 %v5451_v48, 0.0  ;;  %v5454_v63 = vadd.f32 %v11958_v34, %v5389_v55  ;;  %v12692_v48 = vld [vmem:[%s16738_s15 + $0x34] ss:$20 sps:$4 sm:$0xff]  }
0x1794   :  { %5492 = vrot.lane.b32.xlu1 %v15415_v18, %s13341_s27  ;;  %5532 = vrot.lane.b32.xlu0 %v15415_v18, %s13343_s3 }
0x1795   :  { %v5464_v36 = vmax.f32 %v5454_v63, 0.0  ;;  %v5478_v26 = vmul.f32 %v15387_v41, %v5463_v31 }
0x1797   :  { %v5479_v7 = vmul.f32 %v15387_v41, %v5464_v36  ;;  %v12694_v36 = vld [vmem:[%s16738_s15 + $0x78] ss:$20 sps:$4 sm:$0xff]  }
0x1799   :  { %v15423_v61 = vpack.c.bf16 %v5479_v7, %v5478_v26  ;;  %v12695_v26 = vld [vmem:[%s16738_s15 + $0x30] ss:$20 sps:$4 sm:$0xff]  }
0x179b   :  { %5494 = vrot.lane.b32.xlu1 %v15423_v61, %s13341_s27  ;;  %5534 = vrot.lane.b32.xlu0 %v15423_v61, %s13343_s3 }
0x179f   :  { %5510 = vrot.lane.b32.xlu1 %v15403_v8, %s13340_s0  ;;  %5590 = vrot.lane.b32.xlu0 %v15403_v8, %s13342_s17 }
0x17a3   :  { %5592 = vrot.lane.b32.xlu1 %v15415_v18, %s13342_s17  ;;  %5552 = vrot.lane.b32.xlu0 %v15415_v18, %s13289_s18 }
0x17a7   :  { %5554 = vrot.lane.b32.xlu1 %v15423_v61, %s13289_s18  ;;  %5512 = vrot.lane.b32.xlu0 %v15415_v18, %s13340_s0 }
0x17ab   :  { %5514 = vrot.lane.b32.xlu1 %v15423_v61, %s13340_s0  ;;  %5594 = vrot.lane.b32.xlu0 %v15423_v61, %s13342_s17 }
0x17af   :  { %5608 = vrot.lane.b32.xlu1 %v15391_v46, %s13344_s4  ;;  %5568 = vrot.lane.b32.xlu0 %v15391_v46, %s13291_s22 }
0x17b3   :  { %5610 = vrot.lane.b32.xlu1 %v15403_v8, %s13344_s4  ;;  %5570 = vrot.lane.b32.xlu0 %v15403_v8, %s13291_s22 }
0x17b7   :  { %5612 = vrot.lane.b32.xlu1 %v15415_v18, %s13344_s4  ;;  %5572 = vrot.lane.b32.xlu0 %v15415_v18, %s13291_s22 }
0x17bb   :  { %5614 = vrot.lane.b32.xlu1 %v15423_v61, %s13344_s4  ;;  %5574 = vrot.lane.b32.xlu0 %v15423_v61, %s13291_s22 }
0x17bf   :  { %5630 = vrot.lane.b32.xlu1 %v15403_v8, %s13345_s13  ;;  %5628 = vrot.lane.b32.xlu0 %v15391_v46, %s13345_s13 }
0x17c3   :  { %5634 = vrot.lane.b32.xlu1 %v15423_v61, %s13345_s13  ;;  %5632 = vrot.lane.b32.xlu0 %v15415_v18, %s13345_s13 }
0x17c7   :  { %5687 = vperm.xlu1 %12400, %v5673_v56   ;;  %5682 = vperm.xlu0 %12389, %v5672_v30  }
0x17cb   :  { %5697 = vperm.xlu1 %12400, %v5675_v32   ;;  %5692 = vperm.xlu0 %12389, %v5674_v58   ;;  %v12699_v32 = vld [vmem:[%s16738_s15 + $0x58] ss:$20 sps:$4 sm:$0xff]  }
0x17cf   :  { %5707 = vperm.xlu1 %12400, %v5677_v52   ;;  %5702 = vperm.xlu0 %12389, %v5676_v62   ;;  %v12700_v52 = vld [vmem:[%s16738_s15 + $0x38] ss:$20 sps:$4 sm:$0xff]  }
0x17d0   :  { %v12701_v62 = vld [vmem:[%s16738_s15 + $0x84] ss:$20 sps:$4 sm:$0xff]  }
0x17d3   :  { %5717 = vperm.xlu1 %12400, %v5679_v51   ;;  %5712 = vperm.xlu0 %12389, %v5678_v15   ;;  %v12703_v51 = vld [vmem:[%s16738_s15 + $0x60] ss:$20 sps:$4 sm:$0xff]  }
0x17d4   :  { %v12704_v15 = vld [vmem:[%s16738_s15 + $0x80] ss:$20 sps:$4 sm:$0xff]  }
0x17f6   :  { %v5489_v6 = vpop.permute.xlu1 %5488  ;;  %v5529_v22 = vpop.permute.xlu0 %5528 }
0x17f7   :  { %11032 = vmatprep.subr.msk.bf16.mxu0 %vm15355_vm4, %v5529_v22 }
0x17f8   :  { %11033 = vmatpush3.bf16.msk.msra.mxu0 %vm15334_vm7, %v5489_v6  ;;  %v12705_v6 = vld [vmem:[%s16738_s15 + $0x88] ss:$20 sps:$4 sm:$0xff]  }
0x17fa   :  { %v5589_v23 = vpop.permute.xlu1 %5588  ;;  %v5549_v40 = vpop.permute.xlu0 %5548 }
0x17fb   :  { %12175 = vmatprep.subr.msk.bf16.mxu1 %vm2803_vm6, %v5589_v23 }
0x17fc   :  { %11073 = vmatpush3.bf16.msra.mxu1 %v15391_v46 }
0x17fe   :  { %v5491_v34 = vpop.permute.xlu1 %5490  ;;  %v5509_v37 = vpop.permute.xlu0 %5508 }
0x1802   :  { %v5551_v59 = vpop.permute.xlu1 %5550  ;;  %v5531_v11 = vpop.permute.xlu0 %5530 }
0x1803   :  { %11034 = vmatprep.subr.msk.bf16.mxu0 %vm15355_vm4, %v5531_v11 }
0x1804   :  { %11035 = vmatpush3.bf16.msk.msra.mxu0 %vm15334_vm7, %v5491_v34 }
0x1806   :  { %v5493_v57 = vpop.permute.xlu1 %5492  ;;  %v5533_v1 = vpop.permute.xlu0 %5532 }
0x1807   :  { %11036 = vmatprep.subr.msk.bf16.mxu0 %vm15355_vm4, %v5533_v1 }
0x1808   :  { %11037 = vmatpush3.bf16.msk.msra.mxu0 %vm15334_vm7, %v5493_v57 }
0x180d   :  { %v5495_v25 = vpop.permute.xlu1 %5494  ;;  %v5535_v46 = vpop.permute.xlu0 %5534 }
0x180e   :  { %11038 = vmatprep.subr.msk.bf16.mxu0 %vm15355_vm4, %v5535_v46 }
0x180f   :  { %11039 = vmatpush3.bf16.msk.msra.mxu0 %vm15334_vm7, %v5495_v25 }
0x1810   :  { %11040 = vmatprep.subr.msk.bf16.mxu0 %vm14954_vm3, %v5549_v40 }
0x1811   :  { %v5511_v17 = vpop.permute.xlu1 %5510  ;;  %v5591_v24 = vpop.permute.xlu0 %5590 }
0x1812   :  { %12176 = vmatprep.subr.msk.bf16.mxu1 %vm2803_vm6, %v5591_v24 }
0x1813   :  { %11041 = vmatpush3.bf16.msk.msra.mxu0 %vm15343_vm13, %v5509_v37  ;;  %11075 = vmatpush3.bf16.msra.mxu1 %v15403_v8  ;;  %v12681_v8 = vld [vmem:[%s16738_s15 + $0x2c] ss:$20 sps:$4 sm:$0xff]  }
0x1814   :  { %11042 = vmatprep.subr.msk.bf16.mxu0 %vm14954_vm3, %v5551_v59 }
0x1815   :  { %v5593_v2 = vpop.permute.xlu1 %5592  ;;  %v5553_v47 = vpop.permute.xlu0 %5552 }
0x1816   :  { %12177 = vmatprep.subr.msk.bf16.mxu1 %vm2803_vm6, %v5593_v2 }
0x1817   :  { %11043 = vmatpush3.bf16.msk.msra.mxu0 %vm15343_vm13, %v5511_v17  ;;  %11077 = vmatpush3.bf16.msra.mxu1 %v15415_v18  ;;  %v12690_v18 = vld [vmem:[%s16738_s15 + $0x7c] ss:$20 sps:$4 sm:$0xff]  }
0x1818   :  { %11044 = vmatprep.subr.msk.bf16.mxu0 %vm14954_vm3, %v5553_v47 }
0x1819   :  { %v5555_v38 = vpop.permute.xlu1 %5554  ;;  %v5513_v5 = vpop.permute.xlu0 %5512 }
0x181b   :  { %11045 = vmatpush3.bf16.msk.msra.mxu0 %vm15343_vm13, %v5513_v5 }
0x181c   :  { %11046 = vmatprep.subr.msk.bf16.mxu0 %vm14954_vm3, %v5555_v38 }
0x181d   :  { %v5515_v50 = vpop.permute.xlu1 %5514  ;;  %v5595_v29 = vpop.permute.xlu0 %5594 }
0x181e   :  { %12178 = vmatprep.subr.msk.bf16.mxu1 %vm2803_vm6, %v5595_v29 }
0x181f   :  { %11047 = vmatpush3.bf16.msk.msra.mxu0 %vm15343_vm13, %v5515_v50  ;;  %11079 = vmatpush3.bf16.msra.mxu1 %v15423_v61  ;;  %v12696_v61 = vld [vmem:[%s16738_s15 + $0x5c] ss:$20 sps:$4 sm:$0xff]  }
0x1821   :  { %v5609_v28 = vpop.permute.xlu1 %5608  ;;  %v5569_v35 = vpop.permute.xlu0 %5568 }
0x1822   :  { %v5577_v9 = vsel %vm5154_vm11, %v5569_v35, 0  ;;  %5866 = vmatmul.mubr.bf16.vlgmr.msra.gmra.mrb[120].mxu0 %v12678_v10  ;;  %12179 = vmatprep.subr.msk.bf16.mxu1 %vm2753_vm12, %v5609_v28 }
0x1823   :  { %11081 = vmatpush3.bf16.msra.mxu1 %v5577_v9  ;;  %5873 = vmatprep.mubr.bf16.mxu0 %v12681_v8 }
0x1825   :  { %v5611_v60 = vpop.permute.xlu1 %5610  ;;  %v5571_v42 = vpop.permute.xlu0 %5570 }
0x1826   :  { %v5580_v44 = vsel %vm5154_vm11, %v5571_v42, 0  ;;  %12180 = vmatprep.subr.msk.bf16.mxu1 %vm2753_vm12, %v5611_v60 }
0x1827   :  { %11083 = vmatpush3.bf16.msra.mxu1 %v5580_v44 }
0x1829   :  { %v5613_v0 = vpop.permute.xlu1 %5612  ;;  %v5573_v54 = vpop.permute.xlu0 %5572 }
0x182a   :  { %v5583_v27 = vsel %vm5154_vm11, %v5573_v54, 0  ;;  %5874 = vmatmul.mubr.bf16.gmra.mrb[124].mxu0 %v12683_v33  ;;  %12181 = vmatprep.subr.msk.bf16.mxu1 %vm2753_vm12, %v5613_v0 }
0x182b   :  { %11085 = vmatpush3.bf16.msra.mxu1 %v5583_v27  ;;  %5881 = vmatprep.mubr.bf16.mxu0 %v12687_v39 }
0x182d   :  { %v5615_v53 = vpop.permute.xlu1 %5614  ;;  %v5575_v19 = vpop.permute.xlu0 %5574 }
0x182e   :  { %v5586_v49 = vsel %vm5154_vm11, %v5575_v19, 0  ;;  %12182 = vmatprep.subr.msk.bf16.mxu1 %vm2753_vm12, %v5615_v53 }
0x182f   :  { %11087 = vmatpush3.bf16.msra.mxu1 %v5586_v49 }
0x1831   :  { %v5629_v55 = vpop.permute.xlu0 %5628  ;;  %v5631_v63 = vpop.permute.xlu1 %5630 }
0x1832   :  { %5882 = vmatmul.mubr.bf16.gmra.mrb[128].mxu0 %v12689_v43  ;;  %5931 = vmatmul.mubr.bf16.vlgmr.msra.gmra.mrb[116].mxu1 %v12684_v45  ;;  %v5637_v31 = vsel %vm3374_vm5, %v5629_v55, 0  ;;  %v5640_v7 = vsel %vm3374_vm5, %v5631_v63, 0 }
0x1833   :  { %12183 = vmatprep.subr.msk.bf16.mxu0 %vm3374_vm5, %v5629_v55  ;;  %5889 = vmatprep.mubr.bf16.mxu0 %v12690_v18 }
0x1834   :  { %11960 = vmatpush3.bf16.msra.mxu0 %v5637_v31  ;;  %5938 = vmatprep.mubr.bf16.mxu1 %v12692_v48 }
0x1835   :  { %12184 = vmatprep.subr.msk.bf16.mxu0 %vm3374_vm5, %v5631_v63  ;;  %v5633_v13 = vpop.permute.xlu0 %5632  ;;  %v5635_v30 = vpop.permute.xlu1 %5634 }
0x1836   :  { %v5643_v56 = vsel %vm3374_vm5, %v5633_v13, 0  ;;  %v5646_v58 = vsel %vm3374_vm5, %v5635_v30, 0 }
0x1838   :  { %11962 = vmatpush3.bf16.msra.mxu0 %v5640_v7 }
0x1839   :  { %12185 = vmatprep.subr.msk.bf16.mxu0 %vm3374_vm5, %v5633_v13 }
0x183a   :  { %5890 = vmatmul.mubr.bf16.gmra.mrb[132].mxu0 %v12694_v36  ;;  %5939 = vmatmul.mubr.bf16.gmra.mrb[120].mxu1 %v12695_v26 }
0x183b   :  { %5946 = vmatprep.mubr.bf16.mxu1 %v12696_v61  ;;  %11967 = vmatprep.mubr.msk.bf16.mxu0 %vm5820_vm9, %v12698_v12 }
0x183c   :  { %11964 = vmatpush3.bf16.msra.mxu0 %v5643_v56 }
0x183d   :  { %12186 = vmatprep.subr.msk.bf16.mxu0 %vm3374_vm5, %v5635_v30 }
0x1840   :  { %11966 = vmatpush3.bf16.msra.mxu0 %v5646_v58 }
0x1842   :  { %5947 = vmatmul.mubr.bf16.gmra.mrb[124].mxu1 %v12699_v32 }
0x1843   :  { %11968 = vmatmul.mubr.msk.bf16.vlgmr.msra.gmra.mrb[136].mxu0 %vm5820_vm9, %v12700_v52  ;;  %5954 = vmatprep.mubr.bf16.mxu1 %v12701_v62 }
0x1844   :  { %11971 = vmatprep.mubr.msk.bf16.mxu0 %vm5820_vm9, %v12703_v51 }
0x1846   :  { %v5688_v24 = vpop.permute.xlu1 %5687  ;;  %v5683_v2 = vpop.permute.xlu0 %5682 }
0x184a   :  { %5955 = vmatmul.mubr.bf16.gmra.mrb[128].mxu1 %v12704_v15  ;;  %v5698_v54 = vpop.permute.xlu1 %5697  ;;  %v5693_v27 = vpop.permute.xlu0 %5692 }
0x184b   :  { %11972 = vmatmul.mubr.msk.bf16.gmra.mrb[140].mxu0 %vm5820_vm9, %v12705_v6 }
0x184e   :  { %v5708_v56 = vpop.permute.xlu1 %5707  ;;  %v5703_v30 = vpop.permute.xlu0 %5702 }
0x18f5   :  { %v11048_v22 = vpop.f32.mrb[120].mxu0 }
0x18f6   :  { %v11049_v23 = vpop.f32.mrb[121].mxu0 }
0x18f7   :  { %v11050_v40 = vadd.f32 %v11049_v23, %v11048_v22  ;;  %v11051_v34 = vpop.f32.mrb[122].mxu0 }
0x18f8   :  { %v11052_v37 = vpop.f32.mrb[123].mxu0 }
0x18f9   :  { %v11053_v59 = vadd.f32 %v11052_v37, %v11051_v34  ;;  %v5868_v29 = vadd.f32 %v11050_v40, %v5683_v2 }
0x18fb   :  { %v5871_v42 = vadd.f32 %v11053_v59, %v5688_v24 }
0x18fd   :  { %v11054_v11 = vpop.f32.mrb[124].mxu0 }
0x18fe   :  { %v11055_v57 = vpop.f32.mrb[125].mxu0 }
0x18ff   :  { %v11056_v1 = vadd.f32 %v11055_v57, %v11054_v11  ;;  %v11057_v25 = vpop.f32.mrb[126].mxu0 }
0x1900   :  { %v11058_v46 = vpop.f32.mrb[127].mxu0 }
0x1901   :  { %v11059_v17 = vadd.f32 %v11058_v46, %v11057_v25  ;;  %v5876_v43 = vadd.f32 %v11056_v1, %v5693_v27 }
0x1903   :  { %v5879_v26 = vadd.f32 %v11059_v17, %v5698_v54 }
0x1905   :  { %v11060_v47 = vpop.f32.mrb[128].mxu0  ;;  %v11088_v38 = vpop.f32.mrb[116].mxu1 }
0x1906   :  { %v11061_v5 = vpop.f32.mrb[129].mxu0  ;;  %v11089_v50 = vpop.f32.mrb[117].mxu1 }
0x1907   :  { %v11062_v10 = vadd.f32 %v11061_v5, %v11060_v47  ;;  %v11090_v8 = vadd.f32 %v11089_v50, %v11088_v38  ;;  %v11063_v28 = vpop.f32.mrb[130].mxu0  ;;  %v11091_v35 = vpop.f32.mrb[118].mxu1 }
0x1908   :  { %v11064_v9 = vpop.f32.mrb[131].mxu0  ;;  %v11092_v60 = vpop.f32.mrb[119].mxu1 }
0x1909   :  { %v11065_v44 = vadd.f32 %v11064_v9, %v11063_v28  ;;  %v11093_v33 = vadd.f32 %v11092_v60, %v11091_v35  ;;  %v5933_v39 = vadd.f32 %v11090_v8, %v5868_v29  ;;  %v5884_v62 = vadd.f32 %v11062_v10, %v5703_v30  ;;  %v5718_v47 = vpop.permute.xlu1 %5717  ;;  %v5713_v5 = vpop.permute.xlu0 %5712 }
0x190b   :  { %v5936_v0 = vadd.f32 %v11093_v33, %v5871_v42  ;;  %v5887_v23 = vadd.f32 %v11065_v44, %v5708_v56 }
0x190d   :  { %v11066_v53 = vpop.f32.mrb[132].mxu0  ;;  %v11094_v19 = vpop.f32.mrb[120].mxu1 }
0x190e   :  { %v11067_v49 = vpop.f32.mrb[133].mxu0  ;;  %v11095_v45 = vpop.f32.mrb[121].mxu1 }
0x190f   :  { %v11068_v18 = vadd.f32 %v11067_v49, %v11066_v53  ;;  %v11096_v48 = vadd.f32 %v11095_v45, %v11094_v19  ;;  %v11069_v55 = vpop.f32.mrb[134].mxu0  ;;  %v11097_v31 = vpop.f32.mrb[122].mxu1 }
0x1910   :  { %v11070_v63 = vpop.f32.mrb[135].mxu0  ;;  %v11098_v36 = vpop.f32.mrb[123].mxu1 }
0x1911   :  { %v11071_v7 = vadd.f32 %v11070_v63, %v11069_v55  ;;  %v11099_v61 = vadd.f32 %v11098_v36, %v11097_v31  ;;  %v5941_v12 = vadd.f32 %v11096_v48, %v5876_v43  ;;  %v5892_v60 = vadd.f32 %v11068_v18, %v5713_v5 }
0x1913   :  { %v5944_v13 = vadd.f32 %v11099_v61, %v5879_v26  ;;  %v5895_v19 = vadd.f32 %v11071_v7, %v5718_v47 }
0x1915   :  { %v11100_v32 = vpop.f32.mrb[124].mxu1 }
0x1916   :  { %v11969_v58 = vpop.f32.mrb[136].mxu0  ;;  %v11101_v52 = vpop.f32.mrb[125].mxu1 }
0x1917   :  { %v6006_v51 = vadd.f32 %v11969_v58, %v5941_v12  ;;  %v11102_v15 = vadd.f32 %v11101_v52, %v11100_v32  ;;  %v5997_v6 = vpop.f32.mrb[137].mxu0  ;;  %v11103_v22 = vpop.f32.mrb[126].mxu1  ;;  %v12714_v58 = vld [vmem:[%s16740_s14 + $0xc] ss:$20 sps:$4 sm:$0xff]  }
0x1918   :  { %v5998_v40 = vadd.f32 %v5997_v6, %v5933_v39  ;;  %v11970_v34 = vpop.f32.mrb[138].mxu0  ;;  %v11104_v37 = vpop.f32.mrb[127].mxu1  ;;  %6493 = vmatprep.mubr.bf16.mxu0 %v12714_v58  ;;  %v6237_v52 = vld [vmem:[%s16741_s9 + $0x8] sm:$0xff] }
0x1919   :  { %v6030_v59 = vmax.f32 %v6006_v51, 0.0  ;;  %v6009_v11 = vadd.f32 %v11970_v34, %v5944_v13  ;;  %v11105_v57 = vadd.f32 %v11104_v37, %v11103_v22  ;;  %v6000_v1 = vpop.f32.mrb[139].mxu0  ;;  %v5949_v25 = vadd.f32 %v11102_v15, %v5884_v62  ;;  %v6236_v62 = vld [vmem:[%s16741_s9] sm:$0xff]  ;;  %v6239_v51 = vld [vmem:[%s16741_s9 + $0x18] sm:$0xff]  ;;  %v6238_v15 = vld [vmem:[%s16741_s9 + $0x10] sm:$0xff] }
0x191a   :  { %v6028_v46 = vmax.f32 %v5998_v40, 0.0  ;;  %v6001_v17 = vadd.f32 %v6000_v1, %v5936_v0  ;;  %v6241_v6 = vld [vmem:[%s16741_s9 + $0x28] sm:$0xff]  ;;  %v6240_v22 = vld [vmem:[%s16741_s9 + $0x20] sm:$0xff]  ;;  %v6242_v40 = vld [vmem:[%s16741_s9 + $0x30] sm:$0xff] }
0x191b   :  { %v6031_v24 = vmax.f32 %v6009_v11, 0.0  ;;  %v5952_v2 = vadd.f32 %v11105_v57, %v5887_v23  ;;  %v6038_v50 = vmul.f32 %v15387_v41, %v6030_v59  ;;  %v6243_v23 = vld [vmem:[%s16741_s9 + $0x38] sm:$0xff] }
0x191c   :  { %v6029_v38 = vmax.f32 %v6001_v17, 0.0  ;;  %v6036_v8 = vmul.f32 %v15387_v41, %v6028_v46 }
0x191d   :  { %v6039_v29 = vmul.f32 %v15387_v41, %v6031_v24  ;;  %v11106_v10 = vpop.f32.mrb[128].mxu1 }
0x191e   :  { %v6037_v28 = vmul.f32 %v15387_v41, %v6029_v38  ;;  %v11973_v35 = vpop.f32.mrb[140].mxu0  ;;  %v11107_v9 = vpop.f32.mrb[129].mxu1 }
0x191f   :  { %v15561_v42 = vpack.c.bf16 %v6039_v29, %v6038_v50  ;;  %v11108_v44 = vadd.f32 %v11107_v9, %v11106_v10  ;;  %v6013_v33 = vpop.f32.mrb[141].mxu0  ;;  %v11109_v39 = vpop.f32.mrb[130].mxu1  ;;  %v12706_v9 = vld [vmem:[%s16740_s14] ss:$20 sps:$4 sm:$0xff]  }
0x1920   :  { %v15563_v0 = vpack.c.bf16 %v6037_v28, %v6036_v8  ;;  %v6014_v54 = vadd.f32 %v6013_v33, %v5949_v25  ;;  %v11974_v27 = vpop.f32.mrb[142].mxu0  ;;  %v11110_v53 = vpop.f32.mrb[131].mxu1 }
0x1921   :  { %v5957_v49 = vadd.f32 %v11108_v44, %v5892_v60  ;;  %v11111_v45 = vadd.f32 %v11110_v53, %v11109_v39  ;;  %v6016_v43 = vpop.f32.mrb[143].mxu0  ;;  %6054 = vrot.lane.b32.xlu1 %v15561_v42, %s13341_s27  ;;  %6094 = vrot.lane.b32.xlu0 %v15561_v42, %s13343_s3  ;;  %v12709_v60 = vld [vmem:[%s16740_s14 + $0x2c] ss:$20 sps:$4 sm:$0xff]   ;;  %v12715_v53 = vld [vmem:[%s16740_s14 + $0x54] ss:$20 sps:$4 sm:$0xff]  }
0x1922   :  { %v6032_v18 = vmax.f32 %v6014_v54, 0.0  ;;  %v6017_v48 = vadd.f32 %v6016_v43, %v5952_v2 }
0x1923   :  { %v6022_v55 = vadd.f32 %v11973_v35, %v5957_v49  ;;  %v5960_v31 = vadd.f32 %v11111_v45, %v5895_v19 }
0x1924   :  { %v6033_v63 = vmax.f32 %v6017_v48, 0.0  ;;  %v6040_v7 = vmul.f32 %v15387_v41, %v6032_v18 }
0x1925   :  { %v6034_v36 = vmax.f32 %v6022_v55, 0.0  ;;  %v6025_v26 = vadd.f32 %v11974_v27, %v5960_v31  ;;  %6052 = vrot.lane.b32.xlu1 %v15563_v0, %s13341_s27  ;;  %6092 = vrot.lane.b32.xlu0 %v15563_v0, %s13343_s3  ;;  %v12711_v27 = vld [vmem:[%s16740_s14 + $0x28] ss:$20 sps:$4 sm:$0xff]   ;;  %v12717_v31 = vld [vmem:[%s16740_s14 + $0x50] ss:$20 sps:$4 sm:$0xff]  }
0x1926   :  { %v6041_v61 = vmul.f32 %v15387_v41, %v6033_v63  ;;  %v12712_v55 = vld [vmem:[%s16740_s14 + $0x8] ss:$20 sps:$4 sm:$0xff]  }
0x1927   :  { %v6035_v12 = vmax.f32 %v6025_v26, 0.0  ;;  %v6042_v56 = vmul.f32 %v15387_v41, %v6034_v36  ;;  %v12718_v63 = vld [vmem:[%s16740_s14 + $0x7c] ss:$20 sps:$4 sm:$0xff]   ;;  %v12720_v36 = vld [vmem:[%s16740_s14 + $0x34] ss:$20 sps:$4 sm:$0xff]  }
0x1928   :  { %v15575_v13 = vpack.c.bf16 %v6041_v61, %v6040_v7 }
0x1929   :  { %v6043_v30 = vmul.f32 %v15387_v41, %v6035_v12  ;;  %6152 = vrot.lane.b32.xlu1 %v15563_v0, %s13342_s17  ;;  %6112 = vrot.lane.b32.xlu0 %v15563_v0, %s13289_s18  ;;  %v12708_v41 = vld [vmem:[%s16740_s14 + $0x4] ss:$20 sps:$4 sm:$0xff]  }
0x192a   :  { %6428 = vmatprep.mubr.bf16.mxu1 %v12708_v41  ;;  %v12722_v12 = vld [vmem:[%s16740_s14 + $0x78] ss:$20 sps:$4 sm:$0xff]  }
0x192b   :  { %v15583_v32 = vpack.c.bf16 %v6043_v30, %v6042_v56  ;;  %v12724_v30 = vld [vmem:[%s16740_s14 + $0x5c] ss:$20 sps:$4 sm:$0xff]  }
0x192d   :  { %6058 = vrot.lane.b32.xlu1 %v15583_v32, %s13341_s27  ;;  %6098 = vrot.lane.b32.xlu0 %v15583_v32, %s13343_s3 }
0x1931   :  { %6056 = vrot.lane.b32.xlu1 %v15575_v13, %s13341_s27  ;;  %6096 = vrot.lane.b32.xlu0 %v15575_v13, %s13343_s3 }
0x1935   :  { %6114 = vrot.lane.b32.xlu1 %v15561_v42, %s13289_s18  ;;  %6072 = vrot.lane.b32.xlu0 %v15563_v0, %s13340_s0 }
0x1939   :  { %6074 = vrot.lane.b32.xlu1 %v15561_v42, %s13340_s0  ;;  %6154 = vrot.lane.b32.xlu0 %v15561_v42, %s13342_s17 }
0x193d   :  { %6118 = vrot.lane.b32.xlu1 %v15583_v32, %s13289_s18  ;;  %6116 = vrot.lane.b32.xlu0 %v15575_v13, %s13289_s18 }
0x1941   :  { %6156 = vrot.lane.b32.xlu1 %v15575_v13, %s13342_s17  ;;  %6076 = vrot.lane.b32.xlu0 %v15575_v13, %s13340_s0 }
0x1945   :  { %6078 = vrot.lane.b32.xlu1 %v15583_v32, %s13340_s0  ;;  %6158 = vrot.lane.b32.xlu0 %v15583_v32, %s13342_s17 }
0x1949   :  { %6172 = vrot.lane.b32.xlu1 %v15563_v0, %s13344_s4  ;;  %6132 = vrot.lane.b32.xlu0 %v15563_v0, %s13291_s22 }
0x194d   :  { %6174 = vrot.lane.b32.xlu1 %v15561_v42, %s13344_s4  ;;  %6134 = vrot.lane.b32.xlu0 %v15561_v42, %s13291_s22 }
0x1951   :  { %6176 = vrot.lane.b32.xlu1 %v15575_v13, %s13344_s4  ;;  %6136 = vrot.lane.b32.xlu0 %v15575_v13, %s13291_s22 }
0x1955   :  { %6178 = vrot.lane.b32.xlu1 %v15583_v32, %s13344_s4  ;;  %6138 = vrot.lane.b32.xlu0 %v15583_v32, %s13291_s22 }
0x1959   :  { %6194 = vrot.lane.b32.xlu1 %v15561_v42, %s13345_s13  ;;  %6192 = vrot.lane.b32.xlu0 %v15563_v0, %s13345_s13 }
0x195d   :  { %6198 = vrot.lane.b32.xlu1 %v15583_v32, %s13345_s13  ;;  %6196 = vrot.lane.b32.xlu0 %v15575_v13, %s13345_s13 }
0x1961   :  { %6251 = vperm.xlu1 %12400, %v6237_v52   ;;  %6246 = vperm.xlu0 %12389, %v6236_v62   ;;  %v12727_v62 = vld [vmem:[%s16740_s14 + $0x58] ss:$20 sps:$4 sm:$0xff]  }
0x1965   :  { %6261 = vperm.xlu1 %12400, %v6239_v51   ;;  %6256 = vperm.xlu0 %12389, %v6238_v15   ;;  %v12728_v15 = vld [vmem:[%s16740_s14 + $0x38] ss:$20 sps:$4 sm:$0xff]  }
0x1969   :  { %6271 = vperm.xlu1 %12400, %v6241_v6   ;;  %6266 = vperm.xlu0 %12389, %v6240_v22   ;;  %v12729_v6 = vld [vmem:[%s16740_s14 + $0x84] ss:$20 sps:$4 sm:$0xff]   ;;  %v12731_v22 = vld [vmem:[%s16740_s14 + $0x60] ss:$20 sps:$4 sm:$0xff]  }
0x196d   :  { %6281 = vperm.xlu1 %12400, %v6243_v23   ;;  %6276 = vperm.xlu0 %12389, %v6242_v40   ;;  %v12732_v23 = vld [vmem:[%s16740_s14 + $0x80] ss:$20 sps:$4 sm:$0xff]   ;;  %v12733_v40 = vld [vmem:[%s16740_s14 + $0x88] ss:$20 sps:$4 sm:$0xff]  }
0x1993   :  { %v6055_v34 = vpop.permute.xlu1 %6054  ;;  %v6095_v37 = vpop.permute.xlu0 %6094 }
0x1997   :  { %v6053_v59 = vpop.permute.xlu1 %6052  ;;  %v6093_v11 = vpop.permute.xlu0 %6092 }
0x1998   :  { %11120 = vmatprep.subr.msk.bf16.mxu1 %vm15355_vm4, %v6093_v11 }
0x1999   :  { %11121 = vmatpush3.bf16.msk.msra.mxu1 %vm15334_vm7, %v6053_v59 }
0x199a   :  { %11122 = vmatprep.subr.msk.bf16.mxu1 %vm15355_vm4, %v6095_v37 }
0x199b   :  { %v6153_v57 = vpop.permute.xlu1 %6152  ;;  %v6113_v1 = vpop.permute.xlu0 %6112 }
0x199c   :  { %12187 = vmatprep.subr.msk.bf16.mxu0 %vm2803_vm6, %v6153_v57 }
0x199d   :  { %11123 = vmatpush3.bf16.msk.msra.mxu1 %vm15334_vm7, %v6055_v34  ;;  %11161 = vmatpush3.bf16.msra.mxu0 %v15563_v0 }
0x199f   :  { %v6059_v25 = vpop.permute.xlu1 %6058  ;;  %v6099_v46 = vpop.permute.xlu0 %6098 }
0x19a3   :  { %v6057_v17 = vpop.permute.xlu1 %6056  ;;  %v6097_v24 = vpop.permute.xlu0 %6096 }
0x19a4   :  { %11124 = vmatprep.subr.msk.bf16.mxu1 %vm15355_vm4, %v6097_v24 }
0x19a5   :  { %11125 = vmatpush3.bf16.msk.msra.mxu1 %vm15334_vm7, %v6057_v17 }
0x19a6   :  { %11126 = vmatprep.subr.msk.bf16.mxu1 %vm15355_vm4, %v6099_v46 }
0x19a7   :  { %v6115_v2 = vpop.permute.xlu1 %6114  ;;  %v6073_v47 = vpop.permute.xlu0 %6072 }
0x19a9   :  { %11127 = vmatpush3.bf16.msk.msra.mxu1 %vm15334_vm7, %v6059_v25 }
0x19aa   :  { %11128 = vmatprep.subr.msk.bf16.mxu1 %vm14954_vm3, %v6113_v1 }
0x19ab   :  { %v6075_v38 = vpop.permute.xlu1 %6074  ;;  %v6155_v5 = vpop.permute.xlu0 %6154 }
0x19ac   :  { %12188 = vmatprep.subr.msk.bf16.mxu0 %vm2803_vm6, %v6155_v5 }
0x19ad   :  { %11129 = vmatpush3.bf16.msk.msra.mxu1 %vm15343_vm13, %v6073_v47  ;;  %11163 = vmatpush3.bf16.msra.mxu0 %v15561_v42 }
0x19ae   :  { %11130 = vmatprep.subr.msk.bf16.mxu1 %vm14954_vm3, %v6115_v2 }
0x19af   :  { %v6119_v50 = vpop.permute.xlu1 %6118  ;;  %v6117_v29 = vpop.permute.xlu0 %6116 }
0x19b1   :  { %11131 = vmatpush3.bf16.msk.msra.mxu1 %vm15343_vm13, %v6075_v38 }
0x19b2   :  { %11132 = vmatprep.subr.msk.bf16.mxu1 %vm14954_vm3, %v6117_v29 }
0x19b3   :  { %v6157_v10 = vpop.permute.xlu1 %6156  ;;  %v6077_v8 = vpop.permute.xlu0 %6076 }
0x19b4   :  { %12189 = vmatprep.subr.msk.bf16.mxu0 %vm2803_vm6, %v6157_v10 }
0x19b5   :  { %11133 = vmatpush3.bf16.msk.msra.mxu1 %vm15343_vm13, %v6077_v8  ;;  %11165 = vmatpush3.bf16.msra.mxu0 %v15575_v13  ;;  %v12723_v13 = vld [vmem:[%s16740_s14 + $0x30] ss:$20 sps:$4 sm:$0xff]  }
0x19b6   :  { %11134 = vmatprep.subr.msk.bf16.mxu1 %vm14954_vm3, %v6119_v50 }
0x19b7   :  { %v6079_v28 = vpop.permute.xlu1 %6078  ;;  %v6159_v35 = vpop.permute.xlu0 %6158 }
0x19b8   :  { %12190 = vmatprep.subr.msk.bf16.mxu0 %vm2803_vm6, %v6159_v35 }
0x19b9   :  { %11135 = vmatpush3.bf16.msk.msra.mxu1 %vm15343_vm13, %v6079_v28  ;;  %11167 = vmatpush3.bf16.msra.mxu0 %v15583_v32  ;;  %v12726_v32 = vld [vmem:[%s16740_s14 + $0x10] ss:$20 sps:$4 sm:$0xff]  }
0x19bb   :  { %v6173_v42 = vpop.permute.xlu1 %6172  ;;  %v6133_v44 = vpop.permute.xlu0 %6132 }
0x19bc   :  { %v6141_v33 = vsel %vm5154_vm11, %v6133_v44, 0  ;;  %6429 = vmatmul.mubr.bf16.vlgmr.msra.gmra.mrb[132].mxu1 %v12706_v9  ;;  %12191 = vmatprep.subr.msk.bf16.mxu0 %vm2753_vm12, %v6173_v42 }
0x19bd   :  { %11169 = vmatpush3.bf16.msra.mxu0 %v6141_v33  ;;  %6436 = vmatprep.mubr.bf16.mxu1 %v12709_v60 }
0x19bf   :  { %v6175_v39 = vpop.permute.xlu1 %6174  ;;  %v6135_v0 = vpop.permute.xlu0 %6134 }
0x19c0   :  { %v6144_v54 = vsel %vm5154_vm11, %v6135_v0, 0  ;;  %12192 = vmatprep.subr.msk.bf16.mxu0 %vm2753_vm12, %v6175_v39 }
0x19c1   :  { %11171 = vmatpush3.bf16.msra.mxu0 %v6144_v54 }
0x19c3   :  { %v6177_v19 = vpop.permute.xlu1 %6176  ;;  %v6137_v49 = vpop.permute.xlu0 %6136 }
0x19c4   :  { %v6147_v45 = vsel %vm5154_vm11, %v6137_v49, 0  ;;  %6437 = vmatmul.mubr.bf16.gmra.mrb[136].mxu1 %v12711_v27  ;;  %12193 = vmatprep.subr.msk.bf16.mxu0 %vm2753_vm12, %v6177_v19 }
0x19c5   :  { %11173 = vmatpush3.bf16.msra.mxu0 %v6147_v45  ;;  %6444 = vmatprep.mubr.bf16.mxu1 %v12715_v53 }
0x19c7   :  { %v6179_v43 = vpop.permute.xlu1 %6178  ;;  %v6139_v18 = vpop.permute.xlu0 %6138 }
0x19c8   :  { %v6150_v48 = vsel %vm5154_vm11, %v6139_v18, 0  ;;  %12194 = vmatprep.subr.msk.bf16.mxu0 %vm2753_vm12, %v6179_v43 }
0x19c9   :  { %11175 = vmatpush3.bf16.msra.mxu0 %v6150_v48 }
0x19cb   :  { %v6193_v26 = vpop.permute.xlu0 %6192  ;;  %v6195_v61 = vpop.permute.xlu1 %6194 }
0x19cc   :  { %6445 = vmatmul.mubr.bf16.gmra.mrb[140].mxu1 %v12717_v31  ;;  %6494 = vmatmul.mubr.bf16.vlgmr.msra.gmra.mrb[144].mxu0 %v12712_v55  ;;  %v6201_v7 = vsel %vm3374_vm5, %v6193_v26, 0  ;;  %v6204_v56 = vsel %vm3374_vm5, %v6195_v61, 0 }
0x19cd   :  { %12195 = vmatprep.subr.msk.bf16.mxu1 %vm3374_vm5, %v6193_v26  ;;  %6452 = vmatprep.mubr.bf16.mxu1 %v12718_v63 }
0x19ce   :  { %11976 = vmatpush3.bf16.msra.mxu1 %v6201_v7  ;;  %6501 = vmatprep.mubr.bf16.mxu0 %v12720_v36 }
0x19cf   :  { %12196 = vmatprep.subr.msk.bf16.mxu1 %vm3374_vm5, %v6195_v61  ;;  %v6197_v41 = vpop.permute.xlu0 %6196  ;;  %v6199_v52 = vpop.permute.xlu1 %6198 }
0x19d0   :  { %v6207_v58 = vsel %vm3374_vm5, %v6197_v41, 0  ;;  %v6210_v51 = vsel %vm3374_vm5, %v6199_v52, 0 }
0x19d2   :  { %11978 = vmatpush3.bf16.msra.mxu1 %v6204_v56 }
0x19d3   :  { %12197 = vmatprep.subr.msk.bf16.mxu1 %vm3374_vm5, %v6197_v41 }
0x19d4   :  { %6453 = vmatmul.mubr.bf16.gmra.mrb[144].mxu1 %v12722_v12  ;;  %6502 = vmatmul.mubr.bf16.gmra.mrb[148].mxu0 %v12723_v13 }
0x19d5   :  { %6509 = vmatprep.mubr.bf16.mxu0 %v12724_v30  ;;  %11983 = vmatprep.mubr.msk.bf16.mxu1 %vm5820_vm9, %v12726_v32 }
0x19d6   :  { %11980 = vmatpush3.bf16.msra.mxu1 %v6207_v58 }
0x19d7   :  { %12198 = vmatprep.subr.msk.bf16.mxu1 %vm3374_vm5, %v6199_v52 }
0x19da   :  { %11982 = vmatpush3.bf16.msra.mxu1 %v6210_v51 }
0x19dc   :  { %6510 = vmatmul.mubr.bf16.gmra.mrb[152].mxu0 %v12727_v62 }
0x19dd   :  { %11984 = vmatmul.mubr.msk.bf16.vlgmr.msra.gmra.mrb[148].mxu1 %vm5820_vm9, %v12728_v15  ;;  %6517 = vmatprep.mubr.bf16.mxu0 %v12729_v6 }
0x19de   :  { %11987 = vmatprep.mubr.msk.bf16.mxu1 %vm5820_vm9, %v12731_v22 }
0x19e0   :  { %v6252_v38 = vpop.permute.xlu1 %6251  ;;  %v6247_v5 = vpop.permute.xlu0 %6246 }
0x19e4   :  { %6518 = vmatmul.mubr.bf16.gmra.mrb[156].mxu0 %v12732_v23  ;;  %v6262_v19 = vpop.permute.xlu1 %6261  ;;  %v6257_v49 = vpop.permute.xlu0 %6256 }
0x19e5   :  { %11988 = vmatmul.mubr.msk.bf16.gmra.mrb[152].mxu1 %vm5820_vm9, %v12733_v40 }
0x19e8   :  { %v6272_v41 = vpop.permute.xlu1 %6271  ;;  %v6267_v58 = vpop.permute.xlu0 %6266 }
0x1a8f   :  { %v11136_v34 = vpop.f32.mrb[132].mxu1 }
0x1a90   :  { %v11137_v37 = vpop.f32.mrb[133].mxu1 }
0x1a91   :  { %v11138_v59 = vadd.f32 %v11137_v37, %v11136_v34  ;;  %v11139_v11 = vpop.f32.mrb[134].mxu1 }
0x1a92   :  { %v11140_v57 = vpop.f32.mrb[135].mxu1 }
0x1a93   :  { %v11141_v1 = vadd.f32 %v11140_v57, %v11139_v11  ;;  %v6431_v28 = vadd.f32 %v11138_v59, %v6247_v5  ;;  %v6282_v5 = vpop.permute.xlu1 %6281 }
0x1a95   :  { %v6434_v39 = vadd.f32 %v11141_v1, %v6252_v38 }
0x1a97   :  { %v11142_v25 = vpop.f32.mrb[136].mxu1 }
0x1a98   :  { %v11143_v46 = vpop.f32.mrb[137].mxu1 }
0x1a99   :  { %v11144_v17 = vadd.f32 %v11143_v46, %v11142_v25  ;;  %v11145_v24 = vpop.f32.mrb[138].mxu1 }
0x1a9a   :  { %v11146_v2 = vpop.f32.mrb[139].mxu1 }
0x1a9b   :  { %v11147_v47 = vadd.f32 %v11146_v2, %v11145_v24  ;;  %v6439_v55 = vadd.f32 %v11144_v17, %v6257_v49 }
0x1a9d   :  { %v6442_v12 = vadd.f32 %v11147_v47, %v6262_v19 }
0x1a9f   :  { %v11148_v50 = vpop.f32.mrb[140].mxu1  ;;  %v11176_v29 = vpop.f32.mrb[144].mxu0 }
0x1aa0   :  { %v11149_v10 = vpop.f32.mrb[141].mxu1  ;;  %v11177_v8 = vpop.f32.mrb[145].mxu0 }
0x1aa1   :  { %v11150_v35 = vadd.f32 %v11149_v10, %v11148_v50  ;;  %v11178_v9 = vadd.f32 %v11177_v8, %v11176_v29  ;;  %v11151_v60 = vpop.f32.mrb[142].mxu1  ;;  %v11179_v42 = vpop.f32.mrb[146].mxu0  ;;  %v12894_v10 = vld [vmem:[#allocation5] ss:$0 sm:$0xff] }
0x1aa2   :  { %v11152_v44 = vpop.f32.mrb[143].mxu1  ;;  %v11180_v33 = vpop.f32.mrb[147].mxu0 }
0x1aa3   :  { %v11153_v0 = vadd.f32 %v11152_v44, %v11151_v60  ;;  %v11181_v54 = vadd.f32 %v11180_v33, %v11179_v42  ;;  %v6496_v27 = vadd.f32 %v11178_v9, %v6431_v28  ;;  %v6447_v15 = vadd.f32 %v11150_v35, %v6267_v58  ;;  %v6277_v29 = vpop.permute.xlu0 %6276 }
0x1aa5   :  { %v6499_v53 = vadd.f32 %v11181_v54, %v6434_v39  ;;  %v6450_v34 = vadd.f32 %v11153_v0, %v6272_v41 }
0x1aa7   :  { %v11154_v45 = vpop.f32.mrb[144].mxu1  ;;  %v11182_v43 = vpop.f32.mrb[148].mxu0 }
0x1aa8   :  { %v11155_v18 = vpop.f32.mrb[145].mxu1  ;;  %v11183_v48 = vpop.f32.mrb[149].mxu0 }
0x1aa9   :  { %v11156_v31 = vadd.f32 %v11155_v18, %v11154_v45  ;;  %v11184_v63 = vadd.f32 %v11183_v48, %v11182_v43  ;;  %v11157_v36 = vpop.f32.mrb[146].mxu1  ;;  %v11185_v26 = vpop.f32.mrb[150].mxu0 }
0x1aaa   :  { %v11158_v7 = vpop.f32.mrb[147].mxu1  ;;  %v11186_v61 = vpop.f32.mrb[151].mxu0 }
0x1aab   :  { %v11159_v13 = vadd.f32 %v11158_v7, %v11157_v36  ;;  %v11187_v56 = vadd.f32 %v11186_v61, %v11185_v26  ;;  %v6504_v30 = vadd.f32 %v11184_v63, %v6439_v55  ;;  %v6455_v33 = vadd.f32 %v11156_v31, %v6277_v29 }
0x1aad   :  { %v6507_v32 = vadd.f32 %v11187_v56, %v6442_v12  ;;  %v6458_v43 = vadd.f32 %v11159_v13, %v6282_v5 }
0x1aaf   :  { %v11188_v52 = vpop.f32.mrb[152].mxu0 }
0x1ab0   :  { %v11985_v62 = vpop.f32.mrb[148].mxu1  ;;  %v11189_v51 = vpop.f32.mrb[153].mxu0 }
0x1ab1   :  { %v6569_v6 = vadd.f32 %v11985_v62, %v6504_v30  ;;  %v11190_v22 = vadd.f32 %v11189_v51, %v11188_v52  ;;  %v6560_v23 = vpop.f32.mrb[149].mxu1  ;;  %v11191_v40 = vpop.f32.mrb[154].mxu0  ;;  %v12736_v62 = vld [vmem:[%s16742_s11 + $0x4] ss:$20 sps:$4 sm:$0xff]   ;;  %v12742_v51 = vld [vmem:[%s16742_s11 + $0xc] ss:$20 sps:$4 sm:$0xff]  }
0x1ab2   :  { %v6561_v37 = vadd.f32 %v6560_v23, %v6496_v27  ;;  %v11986_v59 = vpop.f32.mrb[150].mxu1  ;;  %v11192_v11 = vpop.f32.mrb[155].mxu0  ;;  %6991 = vmatprep.mubr.bf16.mxu0 %v12736_v62  ;;  %7056 = vmatprep.mubr.bf16.mxu1 %v12742_v51  ;;  %v6801_v23 = vld [vmem:[%s16743_s20 + $0x10] sm:$0xff] }
0x1ab3   :  { %v6593_v57 = vmax.f32 %v6569_v6, 0.0  ;;  %v6572_v1 = vadd.f32 %v11986_v59, %v6507_v32  ;;  %v11193_v25 = vadd.f32 %v11192_v11, %v11191_v40  ;;  %v6563_v46 = vpop.f32.mrb[151].mxu1  ;;  %v6512_v17 = vadd.f32 %v11190_v22, %v6447_v15  ;;  %v6800_v15 = vld [vmem:[%s16743_s20 + $0x8] sm:$0xff]  ;;  %v6799_v6 = vld [vmem:[%s16743_s20] sm:$0xff]  ;;  %v6802_v22 = vld [vmem:[%s16743_s20 + $0x18] sm:$0xff] }
0x1ab4   :  { %v6591_v24 = vmax.f32 %v6561_v37, 0.0  ;;  %v6564_v2 = vadd.f32 %v6563_v46, %v6499_v53  ;;  %v6804_v40 = vld [vmem:[%s16743_s20 + $0x28] sm:$0xff]  ;;  %v6806_v37 = vld [vmem:[%s16743_s20 + $0x38] sm:$0xff]  ;;  %v6805_v59 = vld [vmem:[%s16743_s20 + $0x30] sm:$0xff] }
0x1ab5   :  { %v6594_v47 = vmax.f32 %v6572_v1, 0.0  ;;  %v6515_v38 = vadd.f32 %v11193_v25, %v6450_v34  ;;  %v6601_v8 = vmul.f32 %v12894_v10, %v6593_v57  ;;  %v6803_v34 = vld [vmem:[%s16743_s20 + $0x20] sm:$0xff] }
0x1ab6   :  { %v6592_v50 = vmax.f32 %v6564_v2, 0.0  ;;  %v6599_v9 = vmul.f32 %v12894_v10, %v6591_v24 }
0x1ab7   :  { %v6602_v28 = vmul.f32 %v12894_v10, %v6594_v47  ;;  %v11194_v35 = vpop.f32.mrb[156].mxu0 }
0x1ab8   :  { %v6600_v60 = vmul.f32 %v12894_v10, %v6592_v50  ;;  %v11989_v42 = vpop.f32.mrb[152].mxu1  ;;  %v11195_v44 = vpop.f32.mrb[157].mxu0 }
0x1ab9   :  { %v15725_v39 = vpack.c.bf16 %v6602_v28, %v6601_v8  ;;  %v11196_v0 = vadd.f32 %v11195_v44, %v11194_v35  ;;  %v6576_v54 = vpop.f32.mrb[153].mxu1  ;;  %v11197_v27 = vpop.f32.mrb[158].mxu0 }
0x1aba   :  { %v15727_v53 = vpack.c.bf16 %v6600_v60, %v6599_v9  ;;  %v6577_v19 = vadd.f32 %v6576_v54, %v6512_v17  ;;  %v11990_v49 = vpop.f32.mrb[154].mxu1  ;;  %v11198_v45 = vpop.f32.mrb[159].mxu0 }
0x1abb   :  { %v6520_v18 = vadd.f32 %v11196_v0, %v6455_v33  ;;  %v11199_v48 = vadd.f32 %v11198_v45, %v11197_v27  ;;  %v6579_v55 = vpop.f32.mrb[155].mxu1  ;;  %6617 = vrot.lane.b32.xlu1 %v15725_v39, %s13341_s27  ;;  %6657 = vrot.lane.b32.xlu0 %v15725_v39, %s13343_s3  ;;  %v12734_v33 = vld [vmem:[%s16742_s11] ss:$20 sps:$4 sm:$0xff]  }
0x1abc   :  { %v6595_v31 = vmax.f32 %v6577_v19, 0.0  ;;  %v6580_v63 = vadd.f32 %v6579_v55, %v6515_v38  ;;  %v12737_v0 = vld [vmem:[%s16742_s11 + $0x2c] ss:$20 sps:$4 sm:$0xff]  }
0x1abd   :  { %v6585_v36 = vadd.f32 %v11989_v42, %v6520_v18  ;;  %v6523_v26 = vadd.f32 %v11199_v48, %v6458_v43  ;;  %v12743_v43 = vld [vmem:[%s16742_s11 + $0x54] ss:$20 sps:$4 sm:$0xff]  }
0x1abe   :  { %v6596_v7 = vmax.f32 %v6580_v63, 0.0  ;;  %v6603_v13 = vmul.f32 %v12894_v10, %v6595_v31  ;;  %v12740_v31 = vld [vmem:[%s16742_s11 + $0x8] ss:$20 sps:$4 sm:$0xff]  }
0x1abf   :  { %v6597_v61 = vmax.f32 %v6585_v36, 0.0  ;;  %v6588_v12 = vadd.f32 %v11990_v49, %v6523_v26  ;;  %6615 = vrot.lane.b32.xlu1 %v15727_v53, %s13341_s27  ;;  %6655 = vrot.lane.b32.xlu0 %v15727_v53, %s13343_s3  ;;  %v12746_v63 = vld [vmem:[%s16742_s11 + $0x34] ss:$20 sps:$4 sm:$0xff]   ;;  %v12745_v26 = vld [vmem:[%s16742_s11 + $0x50] ss:$20 sps:$4 sm:$0xff]  }
0x1ac0   :  { %v6604_v56 = vmul.f32 %v12894_v10, %v6596_v7 }
0x1ac1   :  { %v6598_v30 = vmax.f32 %v6588_v12, 0.0  ;;  %v6605_v41 = vmul.f32 %v12894_v10, %v6597_v61  ;;  %v12749_v61 = vld [vmem:[%s16742_s11 + $0x7c] ss:$20 sps:$4 sm:$0xff]  }
0x1ac2   :  { %v15737_v32 = vpack.c.bf16 %v6604_v56, %v6603_v13  ;;  %v12748_v56 = vld [vmem:[%s16742_s11 + $0x30] ss:$20 sps:$4 sm:$0xff]  }
0x1ac3   :  { %v6606_v58 = vmul.f32 %v12894_v10, %v6598_v30  ;;  %6675 = vrot.lane.b32.xlu1 %v15727_v53, %s13289_s18  ;;  %6715 = vrot.lane.b32.xlu0 %v15727_v53, %s13342_s17 }
0x1ac5   :  { %v15743_v52 = vpack.c.bf16 %v6606_v58, %v6605_v41  ;;  %v12751_v41 = vld [vmem:[%s16742_s11 + $0x78] ss:$20 sps:$4 sm:$0xff]  }
0x1ac7   :  { %6621 = vrot.lane.b32.xlu1 %v15743_v52, %s13341_s27  ;;  %6661 = vrot.lane.b32.xlu0 %v15743_v52, %s13343_s3 }
0x1acb   :  { %6717 = vrot.lane.b32.xlu1 %v15725_v39, %s13342_s17  ;;  %6659 = vrot.lane.b32.xlu0 %v15737_v32, %s13343_s3 }
0x1acf   :  { %6619 = vrot.lane.b32.xlu1 %v15737_v32, %s13341_s27  ;;  %6635 = vrot.lane.b32.xlu0 %v15727_v53, %s13340_s0 }
0x1ad3   :  { %6637 = vrot.lane.b32.xlu1 %v15725_v39, %s13340_s0  ;;  %6677 = vrot.lane.b32.xlu0 %v15725_v39, %s13289_s18 }
0x1ad7   :  { %6721 = vrot.lane.b32.xlu1 %v15743_v52, %s13342_s17  ;;  %6681 = vrot.lane.b32.xlu0 %v15743_v52, %s13289_s18 }
0x1adb   :  { %6679 = vrot.lane.b32.xlu1 %v15737_v32, %s13289_s18  ;;  %6719 = vrot.lane.b32.xlu0 %v15737_v32, %s13342_s17 }
0x1adf   :  { %6641 = vrot.lane.b32.xlu1 %v15743_v52, %s13340_s0  ;;  %6639 = vrot.lane.b32.xlu0 %v15737_v32, %s13340_s0  ;;  %s16765_s0 = sld [smem:[#allocation61_spill]] }
0x1ae3   :  { %6735 = vrot.lane.b32.xlu1 %v15727_v53, %s13344_s4  ;;  %6695 = vrot.lane.b32.xlu0 %v15727_v53, %s13291_s22 }
0x1ae7   :  { %6737 = vrot.lane.b32.xlu1 %v15725_v39, %s13344_s4  ;;  %6697 = vrot.lane.b32.xlu0 %v15725_v39, %s13291_s22 }
0x1aeb   :  { %6739 = vrot.lane.b32.xlu1 %v15737_v32, %s13344_s4  ;;  %6699 = vrot.lane.b32.xlu0 %v15737_v32, %s13291_s22 }
0x1aef   :  { %6741 = vrot.lane.b32.xlu1 %v15743_v52, %s13344_s4  ;;  %6701 = vrot.lane.b32.xlu0 %v15743_v52, %s13291_s22 }
0x1af3   :  { %6757 = vrot.lane.b32.xlu1 %v15725_v39, %s13345_s13  ;;  %6755 = vrot.lane.b32.xlu0 %v15727_v53, %s13345_s13 }
0x1af7   :  { %6761 = vrot.lane.b32.xlu1 %v15743_v52, %s13345_s13  ;;  %6759 = vrot.lane.b32.xlu0 %v15737_v32, %s13345_s13 }
0x1afb   :  { %6814 = vperm.xlu1 %12400, %v6800_v15   ;;  %6809 = vperm.xlu0 %12389, %v6799_v6   ;;  %v12754_v15 = vld [vmem:[%s16742_s11 + $0x58] ss:$20 sps:$4 sm:$0xff]  }
0x1afc   :  { %v12757_v6 = vld [vmem:[%s16742_s11 + $0x84] ss:$20 sps:$4 sm:$0xff]  }
0x1aff   :  { %6824 = vperm.xlu1 %12400, %v6802_v22   ;;  %6819 = vperm.xlu0 %12389, %v6801_v23   ;;  %v12756_v22 = vld [vmem:[%s16742_s11 + $0x38] ss:$20 sps:$4 sm:$0xff]   ;;  %v12760_v23 = vld [vmem:[%s16742_s11 + $0x60] ss:$20 sps:$4 sm:$0xff]  }
0x1b03   :  { %6834 = vperm.xlu1 %12400, %v6804_v40   ;;  %6829 = vperm.xlu0 %12389, %v6803_v34   ;;  %v12759_v40 = vld [vmem:[%s16742_s11 + $0x80] ss:$20 sps:$4 sm:$0xff]   ;;  %v12761_v34 = vld [vmem:[%s16742_s11 + $0x88] ss:$20 sps:$4 sm:$0xff]  }
0x1b07   :  { %6844 = vperm.xlu1 %12400, %v6806_v37   ;;  %6839 = vperm.xlu0 %12389, %v6805_v59  }
0x1b2d   :  { %v6618_v11 = vpop.permute.xlu1 %6617  ;;  %v6658_v57 = vpop.permute.xlu0 %6657 }
0x1b31   :  { %v6616_v1 = vpop.permute.xlu1 %6615  ;;  %v6656_v25 = vpop.permute.xlu0 %6655 }
0x1b32   :  { %11208 = vmatprep.subr.msk.bf16.mxu0 %vm15355_vm4, %v6656_v25 }
0x1b33   :  { %11209 = vmatpush3.bf16.msk.msra.mxu0 %vm15334_vm7, %v6616_v1 }
0x1b34   :  { %11210 = vmatprep.subr.msk.bf16.mxu0 %vm15355_vm4, %v6658_v57 }
0x1b35   :  { %v6676_v46 = vpop.permute.xlu1 %6675  ;;  %v6716_v17 = vpop.permute.xlu0 %6715 }
0x1b36   :  { %12199 = vmatprep.subr.msk.bf16.mxu1 %vm2803_vm6, %v6716_v17 }
0x1b37   :  { %11211 = vmatpush3.bf16.msk.msra.mxu0 %vm15334_vm7, %v6618_v11  ;;  %11249 = vmatpush3.bf16.msra.mxu1 %v15727_v53 }
0x1b39   :  { %v6622_v24 = vpop.permute.xlu1 %6621  ;;  %v6662_v2 = vpop.permute.xlu0 %6661 }
0x1b3d   :  { %v6718_v47 = vpop.permute.xlu1 %6717  ;;  %v6660_v38 = vpop.permute.xlu0 %6659 }
0x1b3e   :  { %11212 = vmatprep.subr.msk.bf16.mxu0 %vm15355_vm4, %v6660_v38  ;;  %12200 = vmatprep.subr.msk.bf16.mxu1 %vm2803_vm6, %v6718_v47 }
0x1b3f   :  { %11251 = vmatpush3.bf16.msra.mxu1 %v15725_v39 }
0x1b41   :  { %v6620_v5 = vpop.permute.xlu1 %6619  ;;  %v6636_v50 = vpop.permute.xlu0 %6635 }
0x1b42   :  { %11213 = vmatpush3.bf16.msk.msra.mxu0 %vm15334_vm7, %v6620_v5 }
0x1b43   :  { %11214 = vmatprep.subr.msk.bf16.mxu0 %vm15355_vm4, %v6662_v2 }
0x1b45   :  { %v6638_v29 = vpop.permute.xlu1 %6637  ;;  %v6678_v10 = vpop.permute.xlu0 %6677 }
0x1b46   :  { %11215 = vmatpush3.bf16.msk.msra.mxu0 %vm15334_vm7, %v6622_v24  ;;  %vm16749_vm7 = vmmov %vm16748_vm0 }
0x1b47   :  { %11216 = vmatprep.subr.msk.bf16.mxu0 %vm14954_vm3, %v6676_v46 }
0x1b49   :  { %v6722_v8 = vpop.permute.xlu1 %6721  ;;  %v6682_v28 = vpop.permute.xlu0 %6681 }
0x1b4a   :  { %11217 = vmatpush3.bf16.msk.msra.mxu0 %vm15343_vm13, %v6636_v50 }
0x1b4b   :  { %11218 = vmatprep.subr.msk.bf16.mxu0 %vm14954_vm3, %v6678_v10 }
0x1b4d   :  { %v6680_v35 = vpop.permute.xlu1 %6679  ;;  %v6720_v9 = vpop.permute.xlu0 %6719 }
0x1b4e   :  { %11219 = vmatpush3.bf16.msk.msra.mxu0 %vm15343_vm13, %v6638_v29  ;;  %12201 = vmatprep.subr.msk.bf16.mxu1 %vm2803_vm6, %v6720_v9 }
0x1b4f   :  { %11220 = vmatprep.subr.msk.bf16.mxu0 %vm14954_vm3, %v6680_v35  ;;  %11253 = vmatpush3.bf16.msra.mxu1 %v15737_v32  ;;  %v12752_v32 = vld [vmem:[%s16742_s11 + $0x5c] ss:$20 sps:$4 sm:$0xff]  }
0x1b50   :  { %12202 = vmatprep.subr.msk.bf16.mxu1 %vm2803_vm6, %v6722_v8  ;;  %vm7261_vm6 = vcmask 1041408  }
0x1b51   :  { %v6642_v3 = vpop.permute.xlu1 %6641  ;;  %v6640_v60 = vpop.permute.xlu0 %6639 }
0x1b52   :  { %11221 = vmatpush3.bf16.msk.msra.mxu0 %vm15343_vm13, %v6640_v60 }
0x1b53   :  { %11222 = vmatprep.subr.msk.bf16.mxu0 %vm14954_vm3, %v6682_v28  ;;  %11255 = vmatpush3.bf16.msra.mxu1 %v15743_v52  ;;  %v12755_v52 = vld [vmem:[%s16742_s11 + $0x10] ss:$20 sps:$4 sm:$0xff]  }
0x1b55   :  { %v6736_v42 = vpop.permute.xlu1 %6735  ;;  %v6696_v44 = vpop.permute.xlu0 %6695 }
0x1b56   :  { %v6704_v39 = vsel %vm5154_vm11, %v6696_v44, 0  ;;  %11223 = vmatpush3.bf16.msk.msra.mxu0 %vm15343_vm13, %v6642_v3  ;;  %12203 = vmatprep.subr.msk.bf16.mxu1 %vm2753_vm12, %v6736_v42  ;;  %vm16752_vm13 = vmmov %vm16748_vm0 }
0x1b57   :  { %11257 = vmatpush3.bf16.msra.mxu1 %v6704_v39 }
0x1b59   :  { %v6738_v54 = vpop.permute.xlu1 %6737  ;;  %6992 = vmatmul.mubr.bf16.vlgmr.msra.gmra.mrb[160].mxu0 %v12734_v33  ;;  %v6698_v27 = vpop.permute.xlu0 %6697 }
0x1b5a   :  { %v6707_v53 = vsel %vm5154_vm11, %v6698_v27, 0  ;;  %12204 = vmatprep.subr.msk.bf16.mxu1 %vm2753_vm12, %v6738_v54  ;;  %6999 = vmatprep.mubr.bf16.mxu0 %v12737_v0 }
0x1b5b   :  { %11259 = vmatpush3.bf16.msra.mxu1 %v6707_v53 }
0x1b5d   :  { %v6740_v19 = vpop.permute.xlu1 %6739  ;;  %v6700_v49 = vpop.permute.xlu0 %6699 }
0x1b5e   :  { %v6710_v45 = vsel %vm5154_vm11, %v6700_v49, 0  ;;  %12205 = vmatprep.subr.msk.bf16.mxu1 %vm2753_vm12, %v6740_v19 }
0x1b5f   :  { %11261 = vmatpush3.bf16.msra.mxu1 %v6710_v45 }
0x1b61   :  { %v6742_v18 = vpop.permute.xlu1 %6741  ;;  %7000 = vmatmul.mubr.bf16.gmra.mrb[164].mxu0 %v12739_v14  ;;  %v6702_v48 = vpop.permute.xlu0 %6701 }
0x1b62   :  { %v6713_v55 = vsel %vm5154_vm11, %v6702_v48, 0  ;;  %12206 = vmatprep.subr.msk.bf16.mxu1 %vm2753_vm12, %v6742_v18  ;;  %7007 = vmatprep.mubr.bf16.mxu0 %v12743_v43  ;;  %vm7260_vm12 = vcmask 1040384   ;;  %vm16750_vm11 = vmmov %vm16748_vm0 }
0x1b63   :  { %11263 = vmatpush3.bf16.msra.mxu1 %v6713_v55 }
0x1b65   :  { %v6756_v36 = vpop.permute.xlu0 %6755  ;;  %v6758_v12 = vpop.permute.xlu1 %6757 }
0x1b66   :  { %7057 = vmatmul.mubr.bf16.vlgmr.msra.gmra.mrb[156].mxu1 %v12740_v31  ;;  %12207 = vmatprep.subr.msk.bf16.mxu0 %vm3374_vm5, %v6756_v36  ;;  %v6764_v7 = vsel %vm3374_vm5, %v6756_v36, 0  ;;  %v6767_v13 = vsel %vm3374_vm5, %v6758_v12, 0 }
0x1b67   :  { %11992 = vmatpush3.bf16.msra.mxu0 %v6764_v7  ;;  %7064 = vmatprep.mubr.bf16.mxu1 %v12746_v63 }
0x1b68   :  { %12208 = vmatprep.subr.msk.bf16.mxu0 %vm3374_vm5, %v6758_v12 }
0x1b69   :  { %7008 = vmatmul.mubr.bf16.gmra.mrb[168].mxu0 %v12745_v26  ;;  %v6760_v30 = vpop.permute.xlu0 %6759  ;;  %v6762_v62 = vpop.permute.xlu1 %6761 }
0x1b6a   :  { %7015 = vmatprep.mubr.bf16.mxu0 %v12749_v61  ;;  %v6770_v58 = vsel %vm3374_vm5, %v6760_v30, 0  ;;  %v6773_v51 = vsel %vm3374_vm5, %v6762_v62, 0 }
0x1b6b   :  { %11994 = vmatpush3.bf16.msra.mxu0 %v6767_v13 }
0x1b6c   :  { %12209 = vmatprep.subr.msk.bf16.mxu0 %vm3374_vm5, %v6760_v30 }
0x1b6e   :  { %7065 = vmatmul.mubr.bf16.gmra.mrb[160].mxu1 %v12748_v56 }
0x1b6f   :  { %11996 = vmatpush3.bf16.msra.mxu0 %v6770_v58  ;;  %7072 = vmatprep.mubr.bf16.mxu1 %v12752_v32 }
0x1b70   :  { %12210 = vmatprep.subr.msk.bf16.mxu0 %vm3374_vm5, %v6762_v62  ;;  %vm7247_vm5 = vcmask 23552  }
0x1b71   :  { %7016 = vmatmul.mubr.bf16.gmra.mrb[172].mxu0 %v12751_v41 }
0x1b72   :  { %11999 = vmatprep.mubr.msk.bf16.mxu0 %vm5820_vm9, %v12755_v52 }
0x1b73   :  { %11998 = vmatpush3.bf16.msra.mxu0 %v6773_v51 }
0x1b76   :  { %7073 = vmatmul.mubr.bf16.gmra.mrb[164].mxu1 %v12754_v15 }
0x1b77   :  { %7080 = vmatprep.mubr.bf16.mxu1 %v12757_v6 }
0x1b79   :  { %12000 = vmatmul.mubr.msk.bf16.vlgmr.msra.gmra.mrb[176].mxu0 %vm5820_vm9, %v12756_v22 }
0x1b7a   :  { %12003 = vmatprep.mubr.msk.bf16.mxu0 %vm5820_vm9, %v12760_v23  ;;  %v6810_v50 = vpop.permute.xlu0 %6809  ;;  %v6815_v10 = vpop.permute.xlu1 %6814 }
0x1b7e   :  { %7081 = vmatmul.mubr.bf16.gmra.mrb[168].mxu1 %v12759_v40  ;;  %v6820_v49 = vpop.permute.xlu0 %6819  ;;  %v6825_v45 = vpop.permute.xlu1 %6824 }
0x1b81   :  { %12004 = vmatmul.mubr.msk.bf16.gmra.mrb[180].mxu0 %vm5820_vm9, %v12761_v34 }
0x1b82   :  { %v6830_v41 = vpop.permute.xlu0 %6829  ;;  %v6835_v52 = vpop.permute.xlu1 %6834 }
0x1c2c   :  { %v11224_v37 = vpop.f32.mrb[160].mxu0 }
0x1c2d   :  { %v11225_v59 = vpop.f32.mrb[161].mxu0 }
0x1c2e   :  { %v11226_v11 = vadd.f32 %v11225_v59, %v11224_v37  ;;  %v11227_v57 = vpop.f32.mrb[162].mxu0 }
0x1c2f   :  { %v11228_v1 = vpop.f32.mrb[163].mxu0 }
0x1c30   :  { %v11229_v25 = vadd.f32 %v11228_v1, %v11227_v57  ;;  %v6994_v8 = vadd.f32 %v11226_v11, %v6810_v50 }
0x1c32   :  { %v6997_v60 = vadd.f32 %v11229_v25, %v6815_v10  ;;  %v6845_v10 = vpop.permute.xlu1 %6844 }
0x1c34   :  { %v11230_v46 = vpop.f32.mrb[164].mxu0 }
0x1c35   :  { %v11231_v17 = vpop.f32.mrb[165].mxu0 }
0x1c36   :  { %v11232_v24 = vadd.f32 %v11231_v17, %v11230_v46  ;;  %v11233_v2 = vpop.f32.mrb[166].mxu0 }
0x1c37   :  { %v11234_v47 = vpop.f32.mrb[167].mxu0 }
0x1c38   :  { %v11235_v38 = vadd.f32 %v11234_v47, %v11233_v2  ;;  %v7002_v43 = vadd.f32 %v11232_v24, %v6820_v49 }
0x1c39   :  { %v11264_v5 = vpop.f32.mrb[156].mxu1 }
0x1c3a   :  { %v11265_v29 = vpop.f32.mrb[157].mxu1  ;;  %v7005_v63 = vadd.f32 %v11235_v38, %v6825_v45  ;;  %v6840_v38 = vpop.permute.xlu0 %6839 }
0x1c3b   :  { %v11266_v28 = vadd.f32 %v11265_v29, %v11264_v5  ;;  %v11267_v35 = vpop.f32.mrb[158].mxu1 }
0x1c3c   :  { %v11236_v9 = vpop.f32.mrb[168].mxu0  ;;  %v11268_v3 = vpop.f32.mrb[159].mxu1 }
0x1c3d   :  { %v11269_v42 = vadd.f32 %v11268_v3, %v11267_v35  ;;  %v11237_v44 = vpop.f32.mrb[169].mxu0  ;;  %v7059_v33 = vadd.f32 %v11266_v28, %v6994_v8 }
0x1c3e   :  { %v11238_v39 = vadd.f32 %v11237_v44, %v11236_v9  ;;  %v11239_v0 = vpop.f32.mrb[170].mxu0 }
0x1c3f   :  { %v11240_v54 = vpop.f32.mrb[171].mxu0  ;;  %v7062_v27 = vadd.f32 %v11269_v42, %v6997_v60 }
0x1c40   :  { %v11241_v53 = vadd.f32 %v11240_v54, %v11239_v0  ;;  %v7010_v62 = vadd.f32 %v11238_v39, %v6830_v41 }
0x1c41   :  { %v11270_v19 = vpop.f32.mrb[160].mxu1 }
0x1c42   :  { %v11271_v14 = vpop.f32.mrb[161].mxu1  ;;  %v7013_v23 = vadd.f32 %v11241_v53, %v6835_v52 }
0x1c43   :  { %v11272_v18 = vadd.f32 %v11271_v14, %v11270_v19  ;;  %v11273_v48 = vpop.f32.mrb[162].mxu1 }
0x1c44   :  { %v11242_v55 = vpop.f32.mrb[172].mxu0  ;;  %v11274_v31 = vpop.f32.mrb[163].mxu1 }
0x1c45   :  { %v11275_v36 = vadd.f32 %v11274_v31, %v11273_v48  ;;  %v11243_v26 = vpop.f32.mrb[173].mxu0  ;;  %v7067_v7 = vadd.f32 %v11272_v18, %v7002_v43 }
0x1c46   :  { %v11244_v61 = vadd.f32 %v11243_v26, %v11242_v55  ;;  %v11245_v12 = vpop.f32.mrb[174].mxu0  ;;  %v7246_v26 = vld [vmem:[%s16744_s23] sm:$0x3] }
0x1c47   :  { %v11246_v13 = vpop.f32.mrb[175].mxu0  ;;  %v7070_v56 = vadd.f32 %v11275_v36, %v7005_v63  ;;  %v7262_v36 = vsel %vm7260_vm12, 4294967295, %v13298_v4  ;;  %vm16753_vm12 = vmmov %vm16748_vm0 }
0x1c48   :  { %v11247_v30 = vadd.f32 %v11246_v13, %v11245_v12  ;;  %v7018_v8 = vadd.f32 %v11244_v61, %v6840_v38 }
0x1c49   :  { %v11276_v32 = vpop.f32.mrb[164].mxu1 }
0x1c4a   :  { %v11277_v58 = vpop.f32.mrb[165].mxu1  ;;  %v7021_v44 = vadd.f32 %v11247_v30, %v6845_v10 }
0x1c4b   :  { %v11278_v51 = vadd.f32 %v11277_v58, %v11276_v32  ;;  %v11279_v15 = vpop.f32.mrb[166].mxu1 }
0x1c4c   :  { %v11280_v6 = vpop.f32.mrb[167].mxu1  ;;  %v12001_v22 = vpop.f32.mrb[176].mxu0 }
0x1c4d   :  { %v11281_v40 = vadd.f32 %v11280_v6, %v11279_v15  ;;  %v15885_v34 = vadd.f32 %v12001_v22, %v7067_v7  ;;  %v7123_v37 = vpop.f32.mrb[177].mxu0  ;;  %v7075_v59 = vadd.f32 %v11278_v51, %v7010_v62  ;;  %v7263_v7 = vsel %vm7261_vm6, %v7262_v36, 0  ;;  %vm16001_vm6 = vmneg %vm7247_vm5 }
0x1c4e   :  { %v7124_v11 = vadd.f32 %v7123_v37, %v7059_v33  ;;  %v12002_v57 = vpop.f32.mrb[178].mxu0  ;;  %v7265_v61 = vand.u32 %v7263_v7, %v7246_v26 }
0x1c4f   :  { %v7135_v1 = vadd.f32 %v12002_v57, %v7070_v56  ;;  %v7126_v25 = vpop.f32.mrb[179].mxu0  ;;  %v7078_v46 = vadd.f32 %v11281_v40, %v7013_v23  ;;  %v7156_v24 = vmax.f32 %v15885_v34, 0.0 }
0x1c50   :  { %v7127_v17 = vadd.f32 %v7126_v25, %v7062_v27  ;;  %v7154_v5 = vmax.f32 %v7124_v11, 0.0  ;;  %12007 = vmatprep.subr.bf16.mxu0 %v7265_v61  ;;  %12017 = vmatprep.subr.bf16.mxu1 %v7265_v61 }
0x1c51   :  { %v7157_v2 = vmax.f32 %v7135_v1, 0.0  ;;  %v11282_v47 = vpop.f32.mrb[168].mxu1  ;;  %12008 = vmatpush3.bf16.msra.mxu0 %v7265_v61  ;;  %12018 = vmatpush3.bf16.msra.mxu1 %v7265_v61 }
0x1c52   :  { %v7155_v50 = vmax.f32 %v7127_v17, 0.0  ;;  %v11283_v29 = vpop.f32.mrb[169].mxu1 }
0x1c53   :  { %v12521_v28 = vpack.i.bf16 %v7157_v2, %v7156_v24  ;;  %v11284_v35 = vadd.f32 %v11283_v29, %v11282_v47  ;;  %v11285_v9 = vpop.f32.mrb[170].mxu1 }
0x1c54   :  { %v12516_v3 = vpack.i.bf16 %v7155_v50, %v7154_v5  ;;  %v11286_v60 = vpop.f32.mrb[171].mxu1  ;;  %v12005_v42 = vpop.f32.mrb[180].mxu0 }
0x1c55   :  { %v11287_v33 = vadd.f32 %v11286_v60, %v11285_v9  ;;  %v7083_v39 = vadd.f32 %v11284_v35, %v7018_v8  ;;  %v7139_v0 = vpop.f32.mrb[181].mxu0  ;;  %12522 = vrot.lane.b32.xlu1 %v12521_v28, %s13291_s22 }
0x1c56   :  { %v7140_v54 = vadd.f32 %v7139_v0, %v7075_v59  ;;  %v12006_v27 = vpop.f32.mrb[182].mxu0  ;;  %12517 = vrot.lane.b32.xlu0 %v12516_v3, %s13291_s22 }
0x1c57   :  { %v7148_v53 = vadd.f32 %v12005_v42, %v7083_v39  ;;  %v7086_v19 = vadd.f32 %v11287_v33, %v7021_v44  ;;  %v7142_v49 = vpop.f32.mrb[183].mxu0 }
0x1c58   :  { %v7143_v14 = vadd.f32 %v7142_v49, %v7078_v46  ;;  %v7158_v43 = vmax.f32 %v7140_v54, 0.0 }
0x1c59   :  { %v7151_v45 = vadd.f32 %v12006_v27, %v7086_v19  ;;  %v7160_v48 = vmax.f32 %v7148_v53, 0.0 }
0x1c5a   :  { %v7159_v18 = vmax.f32 %v7143_v14, 0.0 }
0x1c5b   :  { %v7161_v55 = vmax.f32 %v7151_v45, 0.0 }
0x1c5c   :  { %v12526_v31 = vpack.i.bf16 %v7159_v18, %v7158_v43 }
0x1c5d   :  { %v12531_v63 = vpack.i.bf16 %v7161_v55, %v7160_v48 }
0x1c5e   :  { %12527 = vrot.lane.b32.xlu0 %v12526_v31, %s13291_s22 }
0x1c5f   :  { %12532 = vrot.lane.b32.xlu1 %v12531_v63, %s13291_s22 }
0x1cc7   :  { %v12523_v12 = vpop.permute.xlu1 %12522 }
0x1cc8   :  { %v12525_v13 = vunpack.i.h.bf16 %v12523_v12  ;;  %v12524_v56 = vunpack.i.l.bf16 %v12523_v12  ;;  %v12518_v30 = vpop.permute.xlu0 %12517 }
0x1cc9   :  { %v12520_v32 = vunpack.i.h.bf16 %v12518_v30  ;;  %v12519_v41 = vunpack.i.l.bf16 %v12518_v30 }
0x1cca   :  { %v7197_v58 = vmax.f32 %v7157_v2, %v12525_v13  ;;  %v7196_v52 = vmax.f32 %v7156_v24, %v12524_v56 }
0x1ccb   :  { %v7195_v62 = vmax.f32 %v7155_v50, %v12520_v32  ;;  %v7194_v51 = vmax.f32 %v7154_v5, %v12519_v41 }
0x1ccc   :  { %v12541_v15 = vpack.i.bf16 %v7197_v58, %v7196_v52 }
0x1ccd   :  { %v12536_v6 = vpack.i.bf16 %v7195_v62, %v7194_v51 }
0x1cce   :  { %12542 = vrot.lane.b32.xlu1 %v12541_v15, %s13344_s4 }
0x1ccf   :  { %12537 = vrot.lane.b32.xlu0 %v12536_v6, %s13344_s4 }
0x1cd0   :  { %v12528_v4 = vpop.permute.xlu0 %12527 }
0x1cd1   :  { %v12530_v22 = vunpack.i.h.bf16 %v12528_v4  ;;  %v12529_v23 = vunpack.i.l.bf16 %v12528_v4  ;;  %v12533_v40 = vpop.permute.xlu1 %12532 }
0x1cd2   :  { %v12535_v34 = vunpack.i.h.bf16 %v12533_v40  ;;  %v12534_v37 = vunpack.i.l.bf16 %v12533_v40 }
0x1cd3   :  { %v7199_v59 = vmax.f32 %v7159_v18, %v12530_v22  ;;  %v7198_v11 = vmax.f32 %v7158_v43, %v12529_v23 }
0x1cd4   :  { %v7201_v57 = vmax.f32 %v7161_v55, %v12535_v34  ;;  %v7200_v1 = vmax.f32 %v7160_v48, %v12534_v37 }
0x1cd5   :  { %v12546_v25 = vpack.i.bf16 %v7199_v59, %v7198_v11 }
0x1cd6   :  { %v12551_v46 = vpack.i.bf16 %v7201_v57, %v7200_v1 }
0x1cd7   :  { %12547 = vrot.lane.b32.xlu0 %v12546_v25, %s13344_s4 }
0x1cd8   :  { %12552 = vrot.lane.b32.xlu1 %v12551_v46, %s13344_s4 }
0x1d40   :  { %v12543_v17 = vpop.permute.xlu1 %12542 }
0x1d41   :  { %v12545_v24 = vunpack.i.h.bf16 %v12543_v17  ;;  %v12544_v2 = vunpack.i.l.bf16 %v12543_v17  ;;  %v12538_v47 = vpop.permute.xlu0 %12537 }
0x1d42   :  { %v12540_v38 = vunpack.i.h.bf16 %v12538_v47  ;;  %v12539_v5 = vunpack.i.l.bf16 %v12538_v47 }
0x1d43   :  { %v7237_v50 = vmax.f32 %v7197_v58, %v12545_v24  ;;  %v7236_v29 = vmax.f32 %v7196_v52, %v12544_v2 }
0x1d44   :  { %v7235_v10 = vmax.f32 %v7195_v62, %v12540_v38  ;;  %v7234_v8 = vmax.f32 %v7194_v51, %v12539_v5 }
0x1d45   :  { %v7243_v28 = vpack.c.bf16 %v7237_v50, %v7236_v29 }
0x1d46   :  { %v7242_v35 = vpack.c.bf16 %v7235_v10, %v7234_v8 }
0x1d47   :  { %7338 = vrot.lane.b32.xlu1 %v7243_v28, %s13346_s26 }
0x1d48   :  { %7336 = vrot.lane.b32.xlu0 %v7242_v35, %s13346_s26  ;;  %12009 = vmatprep.mubr.msk.bf16.mxu0 %vm7247_vm5, %v7242_v35  ;;  %v12764_v35 = vld [vmem:[%s16751_s5 + $0x4] ss:$20 sps:$4 sm:$0xff]  }
0x1d49   :  { %v12548_v9 = vpop.permute.xlu0 %12547  ;;  %12010 = vmatmul.mubr.msk.bf16.vlgmr.msra.gmra.mrb[184].mxu0 %vm7247_vm5, %v7243_v28 }
0x1d4a   :  { %v12550_v3 = vunpack.i.h.bf16 %v12548_v9  ;;  %v12549_v60 = vunpack.i.l.bf16 %v12548_v9  ;;  %v12553_v42 = vpop.permute.xlu1 %12552  ;;  %v12770_v9 = vld [vmem:[%s16751_s5 + $0xc] ss:$20 sps:$4 sm:$0xff]  }
0x1d4b   :  { %v12555_v44 = vunpack.i.h.bf16 %v12553_v42  ;;  %v12554_v33 = vunpack.i.l.bf16 %v12553_v42  ;;  %v7658_v42 = vld [vmem:[%s16754_s24 + $0x18] sm:$0xff] }
0x1d4c   :  { %v7239_v39 = vmax.f32 %v7199_v59, %v12550_v3  ;;  %v7238_v0 = vmax.f32 %v7198_v11, %v12549_v60  ;;  %v7656_v3 = vld [vmem:[%s16754_s24 + $0x8] sm:$0xff]  ;;  %v7655_v60 = vld [vmem:[%s16754_s24] sm:$0xff] }
0x1d4d   :  { %v7241_v54 = vmax.f32 %v7201_v57, %v12555_v44  ;;  %v7240_v27 = vmax.f32 %v7200_v1, %v12554_v33  ;;  %v7657_v44 = vld [vmem:[%s16754_s24 + $0x10] sm:$0xff]  ;;  %v7660_v33 = vld [vmem:[%s16754_s24 + $0x28] sm:$0xff] }
0x1d4e   :  { %v7244_v53 = vpack.c.bf16 %v7239_v39, %v7238_v0  ;;  %v7659_v39 = vld [vmem:[%s16754_s24 + $0x20] sm:$0xff]  ;;  %v7662_v0 = vld [vmem:[%s16754_s24 + $0x38] sm:$0xff] }
0x1d4f   :  { %v7245_v19 = vpack.c.bf16 %v7241_v54, %v7240_v27  ;;  %v7661_v54 = vld [vmem:[%s16754_s24 + $0x30] sm:$0xff] }
0x1d50   :  { %7340 = vrot.lane.b32.xlu0 %v7244_v53, %s13346_s26  ;;  %12013 = vmatprep.mubr.msk.bf16.mxu0 %vm7247_vm5, %v7244_v53 }
0x1d51   :  { %7342 = vrot.lane.b32.xlu1 %v7245_v19, %s13346_s26  ;;  %12014 = vmatmul.mubr.msk.bf16.gmra.mrb[188].mxu0 %vm7247_vm5, %v7245_v19 }
0x1d52   :  { %7847 = vmatprep.mubr.bf16.mxu0 %v12764_v35 }
0x1db9   :  { %v7339_v14 = vpop.permute.xlu1 %7338 }
0x1dba   :  { %v7337_v49 = vpop.permute.xlu0 %7336 }
0x1dbb   :  { %12019 = vmatprep.mubr.msk.bf16.mxu1 %vm7247_vm5, %v7337_v49 }
0x1dbc   :  { %12020 = vmatmul.mubr.msk.bf16.vlgmr.msra.gmra.mrb[172].mxu1 %vm7247_vm5, %v7339_v14 }
0x1dc2   :  { %v7341_v45 = vpop.permute.xlu0 %7340 }
0x1dc3   :  { %v7343_v43 = vpop.permute.xlu1 %7342  ;;  %12023 = vmatprep.mubr.msk.bf16.mxu1 %vm7247_vm5, %v7341_v45 }
0x1dc4   :  { %12024 = vmatmul.mubr.msk.bf16.gmra.mrb[176].mxu1 %vm7247_vm5, %v7343_v43 }
0x1dc5   :  { %7912 = vmatprep.mubr.bf16.mxu1 %v12770_v9 }
0x1e1c   :  { %v12011_v18 = vpop.f32.mrb[184].mxu0 }
0x1e1d   :  { %v7301_v48 = vpop.f32.mrb[185].mxu0 }
0x1e1e   :  { %v12012_v55 = vpop.f32.mrb[186].mxu0 }
0x1e1f   :  { %v7304_v31 = vpop.f32.mrb[187].mxu0 }
0x1e24   :  { %v12015_v63 = vpop.f32.mrb[188].mxu0 }
0x1e25   :  { %v7317_v36 = vpop.f32.mrb[189].mxu0 }
0x1e26   :  { %v12016_v26 = vpop.f32.mrb[190].mxu0 }
0x1e27   :  { %v7320_v7 = vpop.f32.mrb[191].mxu0 }
0x1e8f   :  { %v12021_v61 = vpop.f32.mrb[172].mxu1 }
0x1e90   :  { %v7390_v12 = vpop.f32.mrb[173].mxu1 }
0x1e91   :  { %v12022_v13 = vpop.f32.mrb[174].mxu1 }
0x1e92   :  { %v12561_v56 = vpack.i.bf16 %v12022_v13, %v12021_v61  ;;  %v7393_v30 = vpop.f32.mrb[175].mxu1 }
0x1e93   :  { %v12556_v32 = vpack.i.bf16 %v7393_v30, %v7390_v12 }
0x1e94   :  { %12562 = vrot.lane.b32.xlu1 %v12561_v56, %s13279_s21 }
0x1e95   :  { %12557 = vrot.lane.b32.xlu0 %v12556_v32, %s13279_s21 }
0x1e97   :  { %v12025_v41 = vpop.f32.mrb[176].mxu1 }
0x1e98   :  { %v7406_v58 = vpop.f32.mrb[177].mxu1 }
0x1e99   :  { %v12026_v52 = vpop.f32.mrb[178].mxu1 }
0x1e9a   :  { %v12571_v62 = vpack.i.bf16 %v12026_v52, %v12025_v41  ;;  %v7409_v51 = vpop.f32.mrb[179].mxu1  ;;  %v12765_v52 = vld [vmem:[%s16751_s5 + $0x2c] ss:$20 sps:$4 sm:$0xff]  }
0x1e9b   :  { %v12566_v15 = vpack.i.bf16 %v7409_v51, %v7406_v58  ;;  %v12762_v58 = vld [vmem:[%s16751_s5] ss:$20 sps:$4 sm:$0xff]  }
0x1e9c   :  { %12572 = vrot.lane.b32.xlu1 %v12571_v62, %s13279_s21 }
0x1e9d   :  { %12567 = vrot.lane.b32.xlu0 %v12566_v15, %s13279_s21 }
0x1f06   :  { %v12563_v6 = vpop.permute.xlu1 %12562 }
0x1f07   :  { %v12565_v4 = vunpack.i.h.bf16 %v12563_v6  ;;  %v12564_v22 = vunpack.i.l.bf16 %v12563_v6  ;;  %v12558_v23 = vpop.permute.xlu0 %12557 }
0x1f08   :  { %v12560_v40 = vunpack.i.h.bf16 %v12558_v23  ;;  %v12559_v34 = vunpack.i.l.bf16 %v12558_v23  ;;  %v12767_v23 = vld [vmem:[%s16751_s5 + $0x28] ss:$20 sps:$4 sm:$0xff]  }
0x1f09   :  { %v7456_v37 = vsel %vm16745_vm8, %v12011_v18, %v12564_v22  ;;  %v7457_v59 = vsel %vm16746_vm14, %v12012_v55, %v12565_v4  ;;  %vm16757_vm8 = vmmov %vm16748_vm0 }
0x1f0a   :  { %v15912_v11 = vpack.c.bf16 %v7457_v59, %v7456_v37  ;;  %v7454_v57 = vsel %vm16747_vm15, %v7301_v48, %v12559_v34  ;;  %v7455_v1 = vsel %vm16748_vm0, %v7304_v31, %v12560_v40  ;;  %vm16024_vm14 = vmneg %vm16757_vm8  ;;  %vm7598_vm15 = vcmask 15360   ;;  %v12771_v40 = vld [vmem:[%s16751_s5 + $0x54] ss:$20 sps:$4 sm:$0xff]  }
0x1f0b   :  { %v15916_v25 = vpack.c.bf16 %v7455_v1, %v7454_v57 }
0x1f0c   :  { %7472 = vrot.lane.b32.xlu1 %v15912_v11, %s13343_s3  ;;  %7512 = vrot.lane.b32.xlu0 %v15912_v11, %s13347_s8 }
0x1f0e   :  { %v12573_v46 = vpop.permute.xlu1 %12572 }
0x1f0f   :  { %v12575_v17 = vunpack.i.h.bf16 %v12573_v46  ;;  %v12574_v24 = vunpack.i.l.bf16 %v12573_v46  ;;  %v12568_v2 = vpop.permute.xlu0 %12567  ;;  %v12773_v46 = vld [vmem:[%s16751_s5 + $0x50] ss:$20 sps:$4 sm:$0xff]  }
0x1f10   :  { %v12570_v47 = vunpack.i.h.bf16 %v12568_v2  ;;  %v12569_v38 = vunpack.i.l.bf16 %v12568_v2  ;;  %7470 = vrot.lane.b32.xlu1 %v15916_v25, %s13343_s3  ;;  %7510 = vrot.lane.b32.xlu0 %v15916_v25, %s13347_s8 }
0x1f11   :  { %v7460_v5 = vsel %vm16749_vm7, %v12015_v63, %v12574_v24  ;;  %v7461_v50 = vsel %vm16750_vm11, %v12016_v26, %v12575_v17  ;;  %v12774_v17 = vld [vmem:[%s16751_s5 + $0x7c] ss:$20 sps:$4 sm:$0xff]   ;;  %v12776_v24 = vld [vmem:[%s16751_s5 + $0x34] ss:$20 sps:$4 sm:$0xff]  }
0x1f12   :  { %v15928_v29 = vpack.c.bf16 %v7461_v50, %v7460_v5  ;;  %v7458_v10 = vsel %vm16752_vm13, %v7317_v36, %v12569_v38  ;;  %v7459_v8 = vsel %vm16753_vm12, %v7320_v7, %v12570_v47  ;;  %v12778_v5 = vld [vmem:[%s16751_s5 + $0x78] ss:$20 sps:$4 sm:$0xff]   ;;  %v12779_v50 = vld [vmem:[%s16751_s5 + $0x30] ss:$20 sps:$4 sm:$0xff]   ;;  %v12851_v26 = vld [vmem:[%s16764_s2 + $0x28] ss:$20 sps:$4 sm:$0xff]  }
0x1f13   :  { %v15932_v28 = vpack.c.bf16 %v7459_v8, %v7458_v10  ;;  %v12780_v10 = vld [vmem:[%s16751_s5 + $0x5c] ss:$20 sps:$4 sm:$0xff]  }
0x1f14   :  { %7570 = vrot.lane.b32.xlu1 %v15916_v25, %s13348_s19  ;;  %7530 = vrot.lane.b32.xlu0 %v15916_v25, %s13289_s18  ;;  %v12782_v8 = vld [vmem:[%s16751_s5 + $0x10] ss:$20 sps:$4 sm:$0xff]  }
0x1f18   :  { %7476 = vrot.lane.b32.xlu1 %v15928_v29, %s13343_s3  ;;  %7516 = vrot.lane.b32.xlu0 %v15928_v29, %s13347_s8 }
0x1f1c   :  { %7474 = vrot.lane.b32.xlu1 %v15932_v28, %s13343_s3  ;;  %7514 = vrot.lane.b32.xlu0 %v15932_v28, %s13347_s8 }
0x1f20   :  { %7532 = vrot.lane.b32.xlu1 %v15912_v11, %s13289_s18  ;;  %7490 = vrot.lane.b32.xlu0 %v15916_v25, %s13279_s21 }
0x1f24   :  { %7492 = vrot.lane.b32.xlu1 %v15912_v11, %s13279_s21  ;;  %7572 = vrot.lane.b32.xlu0 %v15912_v11, %s13348_s19 }
0x1f28   :  { %7536 = vrot.lane.b32.xlu1 %v15928_v29, %s13289_s18  ;;  %7534 = vrot.lane.b32.xlu0 %v15932_v28, %s13289_s18 }
0x1f2c   :  { %7574 = vrot.lane.b32.xlu1 %v15932_v28, %s13348_s19  ;;  %7494 = vrot.lane.b32.xlu0 %v15932_v28, %s13279_s21 }
0x1f30   :  { %7496 = vrot.lane.b32.xlu1 %v15928_v29, %s13279_s21  ;;  %7576 = vrot.lane.b32.xlu0 %v15928_v29, %s13348_s19 }
0x1f34   :  { %7590 = vrot.lane.b32.xlu1 %v15916_v25, %s13320_s30  ;;  %7550 = vrot.lane.b32.xlu0 %v15916_v25, %s13291_s22 }
0x1f38   :  { %7592 = vrot.lane.b32.xlu1 %v15912_v11, %s13320_s30  ;;  %7552 = vrot.lane.b32.xlu0 %v15912_v11, %s13291_s22 }
0x1f3c   :  { %7594 = vrot.lane.b32.xlu1 %v15932_v28, %s13320_s30  ;;  %7554 = vrot.lane.b32.xlu0 %v15932_v28, %s13291_s22 }
0x1f40   :  { %7596 = vrot.lane.b32.xlu1 %v15928_v29, %s13320_s30  ;;  %7556 = vrot.lane.b32.xlu0 %v15928_v29, %s13291_s22 }
0x1f44   :  { %7613 = vrot.lane.b32.xlu1 %v15912_v11, %s13342_s17  ;;  %7611 = vrot.lane.b32.xlu0 %v15916_v25, %s13342_s17 }
0x1f48   :  { %7617 = vrot.lane.b32.xlu1 %v15928_v29, %s13342_s17  ;;  %7615 = vrot.lane.b32.xlu0 %v15932_v28, %s13342_s17 }
0x1f4c   :  { %7670 = vperm.xlu1 %12400, %v7656_v3   ;;  %7665 = vperm.xlu0 %12389, %v7655_v60   ;;  %v12783_v3 = vld [vmem:[%s16751_s5 + $0x58] ss:$20 sps:$4 sm:$0xff]  }
0x1f50   :  { %7680 = vperm.xlu1 %12400, %v7658_v42   ;;  %7675 = vperm.xlu0 %12389, %v7657_v44   ;;  %v12784_v42 = vld [vmem:[%s16751_s5 + $0x38] ss:$20 sps:$4 sm:$0xff]  }
0x1f51   :  { %v12785_v44 = vld [vmem:[%s16751_s5 + $0x84] ss:$20 sps:$4 sm:$0xff]  }
0x1f54   :  { %7690 = vperm.xlu1 %12400, %v7660_v33   ;;  %7685 = vperm.xlu0 %12389, %v7659_v39   ;;  %v12787_v33 = vld [vmem:[%s16751_s5 + $0x60] ss:$20 sps:$4 sm:$0xff]  }
0x1f55   :  { %v12788_v39 = vld [vmem:[%s16751_s5 + $0x80] ss:$20 sps:$4 sm:$0xff]  }
0x1f58   :  { %7700 = vperm.xlu1 %12400, %v7662_v0   ;;  %7695 = vperm.xlu0 %12389, %v7661_v54   ;;  %v12789_v0 = vld [vmem:[%s16751_s5 + $0x88] ss:$20 sps:$4 sm:$0xff]  }
0x1f7e   :  { %v7473_v27 = vpop.permute.xlu1 %7472  ;;  %v7513_v53 = vpop.permute.xlu0 %7512 }
0x1f82   :  { %v7471_v49 = vpop.permute.xlu1 %7470  ;;  %v7511_v14 = vpop.permute.xlu0 %7510 }
0x1f83   :  { %11306 = vmatprep.subr.msk.bf16.mxu0 %vm16001_vm6, %v7511_v14 }
0x1f84   :  { %11307 = vmatpush3.bf16.msk.msra.mxu0 %vm15355_vm4, %v7471_v49 }
0x1f85   :  { %11308 = vmatprep.subr.msk.bf16.mxu0 %vm16001_vm6, %v7513_v53 }
0x1f86   :  { %v7571_v45 = vpop.permute.xlu1 %7570  ;;  %v7531_v43 = vpop.permute.xlu0 %7530 }
0x1f87   :  { %12211 = vmatprep.subr.msk.bf16.mxu1 %vm7247_vm5, %v7571_v45 }
0x1f88   :  { %11309 = vmatpush3.bf16.msk.msra.mxu0 %vm15355_vm4, %v7473_v27  ;;  %11347 = vmatpush3.bf16.msra.mxu1 %v15916_v25  ;;  %v12768_v25 = vld [vmem:[%s16751_s5 + $0x8] ss:$20 sps:$4 sm:$0xff]  }
0x1f8a   :  { %v7477_v18 = vpop.permute.xlu1 %7476  ;;  %v7517_v48 = vpop.permute.xlu0 %7516 }
0x1f8e   :  { %v7475_v55 = vpop.permute.xlu1 %7474  ;;  %v7515_v31 = vpop.permute.xlu0 %7514 }
0x1f8f   :  { %11310 = vmatprep.subr.msk.bf16.mxu0 %vm16001_vm6, %v7515_v31 }
0x1f90   :  { %11311 = vmatpush3.bf16.msk.msra.mxu0 %vm15355_vm4, %v7475_v55 }
0x1f91   :  { %11312 = vmatprep.subr.msk.bf16.mxu0 %vm16001_vm6, %v7517_v48 }
0x1f92   :  { %v7533_v63 = vpop.permute.xlu1 %7532  ;;  %v7491_v36 = vpop.permute.xlu0 %7490 }
0x1f94   :  { %11313 = vmatpush3.bf16.msk.msra.mxu0 %vm15355_vm4, %v7477_v18 }
0x1f95   :  { %11314 = vmatprep.subr.msk.bf16.mxu0 %vm14954_vm3, %v7531_v43 }
0x1f96   :  { %v7493_v7 = vpop.permute.xlu1 %7492  ;;  %v7573_v61 = vpop.permute.xlu0 %7572 }
0x1f97   :  { %12212 = vmatprep.subr.msk.bf16.mxu1 %vm7247_vm5, %v7573_v61 }
0x1f98   :  { %11315 = vmatpush3.bf16.msk.msra.mxu0 %vm16024_vm14, %v7491_v36  ;;  %11349 = vmatpush3.bf16.msra.mxu1 %v15912_v11 }
0x1f99   :  { %11316 = vmatprep.subr.msk.bf16.mxu0 %vm14954_vm3, %v7533_v63 }
0x1f9a   :  { %v7537_v12 = vpop.permute.xlu1 %7536  ;;  %v7535_v13 = vpop.permute.xlu0 %7534 }
0x1f9c   :  { %11317 = vmatpush3.bf16.msk.msra.mxu0 %vm16024_vm14, %v7493_v7 }
0x1f9d   :  { %11318 = vmatprep.subr.msk.bf16.mxu0 %vm14954_vm3, %v7535_v13 }
0x1f9e   :  { %v7575_v56 = vpop.permute.xlu1 %7574  ;;  %v7495_v30 = vpop.permute.xlu0 %7494 }
0x1f9f   :  { %12213 = vmatprep.subr.msk.bf16.mxu1 %vm7247_vm5, %v7575_v56 }
0x1fa0   :  { %11319 = vmatpush3.bf16.msk.msra.mxu0 %vm16024_vm14, %v7495_v30  ;;  %11351 = vmatpush3.bf16.msra.mxu1 %v15932_v28 }
0x1fa1   :  { %11320 = vmatprep.subr.msk.bf16.mxu0 %vm14954_vm3, %v7537_v12 }
0x1fa2   :  { %v7497_v32 = vpop.permute.xlu1 %7496  ;;  %v7577_v41 = vpop.permute.xlu0 %7576 }
0x1fa3   :  { %12214 = vmatprep.subr.msk.bf16.mxu1 %vm7247_vm5, %v7577_v41 }
0x1fa4   :  { %11321 = vmatpush3.bf16.msk.msra.mxu0 %vm16024_vm14, %v7497_v32  ;;  %11353 = vmatpush3.bf16.msra.mxu1 %v15928_v29 }
0x1fa6   :  { %v7591_v62 = vpop.permute.xlu1 %7590  ;;  %v7551_v51 = vpop.permute.xlu0 %7550 }
0x1fa7   :  { %v7559_v15 = vsel %vm5133_vm2, %v7551_v51, 0  ;;  %7848 = vmatmul.mubr.bf16.vlgmr.msra.gmra.mrb[192].mxu0 %v12762_v58  ;;  %12215 = vmatprep.subr.msk.bf16.mxu1 %vm7598_vm15, %v7591_v62 }
0x1fa8   :  { %11355 = vmatpush3.bf16.msra.mxu1 %v7559_v15  ;;  %7855 = vmatprep.mubr.bf16.mxu0 %v12765_v52 }
0x1faa   :  { %v7593_v6 = vpop.permute.xlu1 %7592  ;;  %v7553_v4 = vpop.permute.xlu0 %7552 }
0x1fab   :  { %v7562_v22 = vsel %vm5133_vm2, %v7553_v4, 0  ;;  %12216 = vmatprep.subr.msk.bf16.mxu1 %vm7598_vm15, %v7593_v6 }
0x1fac   :  { %11357 = vmatpush3.bf16.msra.mxu1 %v7562_v22 }
0x1fae   :  { %v7595_v34 = vpop.permute.xlu1 %7594  ;;  %v7555_v37 = vpop.permute.xlu0 %7554 }
0x1faf   :  { %v7565_v59 = vsel %vm5133_vm2, %v7555_v37, 0  ;;  %7856 = vmatmul.mubr.bf16.gmra.mrb[196].mxu0 %v12767_v23  ;;  %12217 = vmatprep.subr.msk.bf16.mxu1 %vm7598_vm15, %v7595_v34 }
0x1fb0   :  { %11359 = vmatpush3.bf16.msra.mxu1 %v7565_v59  ;;  %7863 = vmatprep.mubr.bf16.mxu0 %v12771_v40 }
0x1fb2   :  { %v7597_v11 = vpop.permute.xlu1 %7596  ;;  %v7557_v57 = vpop.permute.xlu0 %7556 }
0x1fb3   :  { %v7568_v1 = vsel %vm5133_vm2, %v7557_v57, 0  ;;  %12218 = vmatprep.subr.msk.bf16.mxu1 %vm7598_vm15, %v7597_v11 }
0x1fb4   :  { %11361 = vmatpush3.bf16.msra.mxu1 %v7568_v1 }
0x1fb6   :  { %v7612_v2 = vpop.permute.xlu0 %7611  ;;  %v7614_v38 = vpop.permute.xlu1 %7613 }
0x1fb7   :  { %7864 = vmatmul.mubr.bf16.gmra.mrb[200].mxu0 %v12773_v46  ;;  %7913 = vmatmul.mubr.bf16.vlgmr.msra.gmra.mrb[180].mxu1 %v12768_v25  ;;  %v7620_v47 = vsel %vm503_vm1, %v7612_v2, 0  ;;  %v7623_v29 = vsel %vm503_vm1, %v7614_v38, 0 }
0x1fb8   :  { %12219 = vmatprep.subr.msk.bf16.mxu0 %vm503_vm1, %v7612_v2  ;;  %7871 = vmatprep.mubr.bf16.mxu0 %v12774_v17 }
0x1fb9   :  { %12028 = vmatpush3.bf16.msra.mxu0 %v7620_v47  ;;  %7920 = vmatprep.mubr.bf16.mxu1 %v12776_v24 }
0x1fba   :  { %12220 = vmatprep.subr.msk.bf16.mxu0 %vm503_vm1, %v7614_v38  ;;  %v7616_v28 = vpop.permute.xlu0 %7615  ;;  %v7618_v9 = vpop.permute.xlu1 %7617 }
0x1fbb   :  { %v7626_v35 = vsel %vm503_vm1, %v7616_v28, 0  ;;  %v7629_v60 = vsel %vm503_vm1, %v7618_v9, 0 }
0x1fbd   :  { %12030 = vmatpush3.bf16.msra.mxu0 %v7623_v29 }
0x1fbe   :  { %12221 = vmatprep.subr.msk.bf16.mxu0 %vm503_vm1, %v7616_v28 }
0x1fbf   :  { %7872 = vmatmul.mubr.bf16.gmra.mrb[204].mxu0 %v12778_v5  ;;  %7921 = vmatmul.mubr.bf16.gmra.mrb[184].mxu1 %v12779_v50 }
0x1fc0   :  { %7928 = vmatprep.mubr.bf16.mxu1 %v12780_v10  ;;  %12035 = vmatprep.mubr.msk.bf16.mxu0 %vm5820_vm9, %v12782_v8 }
0x1fc1   :  { %12032 = vmatpush3.bf16.msra.mxu0 %v7626_v35 }
0x1fc2   :  { %12222 = vmatprep.subr.msk.bf16.mxu0 %vm503_vm1, %v7618_v9 }
0x1fc5   :  { %12034 = vmatpush3.bf16.msra.mxu0 %v7629_v60 }
0x1fc7   :  { %7929 = vmatmul.mubr.bf16.gmra.mrb[188].mxu1 %v12783_v3 }
0x1fc8   :  { %12036 = vmatmul.mubr.msk.bf16.vlgmr.msra.gmra.mrb[208].mxu0 %vm5820_vm9, %v12784_v42  ;;  %7936 = vmatprep.mubr.bf16.mxu1 %v12785_v44 }
0x1fc9   :  { %12039 = vmatprep.mubr.msk.bf16.mxu0 %vm5820_vm9, %v12787_v33 }
0x1fcb   :  { %v7671_v36 = vpop.permute.xlu1 %7670  ;;  %v7666_v7 = vpop.permute.xlu0 %7665 }
0x1fcf   :  { %7937 = vmatmul.mubr.bf16.gmra.mrb[192].mxu1 %v12788_v39  ;;  %v7681_v40 = vpop.permute.xlu1 %7680  ;;  %v7676_v34 = vpop.permute.xlu0 %7675 }
0x1fd0   :  { %12040 = vmatmul.mubr.msk.bf16.gmra.mrb[212].mxu0 %vm5820_vm9, %v12789_v0 }
0x1fd3   :  { %v7691_v8 = vpop.permute.xlu1 %7690  ;;  %v7686_v28 = vpop.permute.xlu0 %7685 }
0x207a   :  { %v11322_v54 = vpop.f32.mrb[192].mxu0 }
0x207b   :  { %v11323_v27 = vpop.f32.mrb[193].mxu0 }
0x207c   :  { %v11324_v53 = vadd.f32 %v11323_v27, %v11322_v54  ;;  %v11325_v49 = vpop.f32.mrb[194].mxu0 }
0x207d   :  { %v11326_v14 = vpop.f32.mrb[195].mxu0 }
0x207e   :  { %v11327_v45 = vadd.f32 %v11326_v14, %v11325_v49  ;;  %v7850_v30 = vadd.f32 %v11324_v53, %v7666_v7  ;;  %v7701_v7 = vpop.permute.xlu1 %7700 }
0x2080   :  { %v7853_v15 = vadd.f32 %v11327_v45, %v7671_v36 }
0x2082   :  { %v11328_v43 = vpop.f32.mrb[196].mxu0 }
0x2083   :  { %v11329_v18 = vpop.f32.mrb[197].mxu0 }
0x2084   :  { %v11330_v48 = vadd.f32 %v11329_v18, %v11328_v43  ;;  %v11331_v55 = vpop.f32.mrb[198].mxu0 }
0x2085   :  { %v11332_v31 = vpop.f32.mrb[199].mxu0 }
0x2086   :  { %v11333_v63 = vadd.f32 %v11332_v31, %v11331_v55  ;;  %v7858_v1 = vadd.f32 %v11330_v48, %v7676_v34  ;;  %v16088_v48 = vld [vmem:[#allocation7] ss:$0 sm:$0xff] }
0x2088   :  { %v7861_v38 = vadd.f32 %v11333_v63, %v7681_v40 }
0x208a   :  { %v11334_v61 = vpop.f32.mrb[200].mxu0  ;;  %v11362_v12 = vpop.f32.mrb[180].mxu1 }
0x208b   :  { %v11335_v13 = vpop.f32.mrb[201].mxu0  ;;  %v11363_v56 = vpop.f32.mrb[181].mxu1 }
0x208c   :  { %v11336_v32 = vadd.f32 %v11335_v13, %v11334_v61  ;;  %v11364_v41 = vadd.f32 %v11363_v56, %v11362_v12  ;;  %v11337_v58 = vpop.f32.mrb[202].mxu0  ;;  %v11365_v52 = vpop.f32.mrb[182].mxu1 }
0x208d   :  { %v11338_v62 = vpop.f32.mrb[203].mxu0  ;;  %v11366_v51 = vpop.f32.mrb[183].mxu1 }
0x208e   :  { %v11339_v6 = vadd.f32 %v11338_v62, %v11337_v58  ;;  %v11367_v4 = vadd.f32 %v11366_v51, %v11365_v52  ;;  %v7915_v22 = vadd.f32 %v11364_v41, %v7850_v30  ;;  %v7866_v60 = vadd.f32 %v11336_v32, %v7686_v28  ;;  %v7696_v12 = vpop.permute.xlu0 %7695 }
0x2090   :  { %v7918_v23 = vadd.f32 %v11367_v4, %v7853_v15  ;;  %v7869_v0 = vadd.f32 %v11339_v6, %v7691_v8 }
0x2092   :  { %v11340_v37 = vpop.f32.mrb[204].mxu0  ;;  %v11368_v59 = vpop.f32.mrb[184].mxu1 }
0x2093   :  { %v11341_v11 = vpop.f32.mrb[205].mxu0  ;;  %v11369_v57 = vpop.f32.mrb[185].mxu1 }
0x2094   :  { %v11342_v25 = vadd.f32 %v11341_v11, %v11340_v37  ;;  %v11370_v46 = vadd.f32 %v11369_v57, %v11368_v59  ;;  %v11343_v17 = vpop.f32.mrb[206].mxu0  ;;  %v11371_v24 = vpop.f32.mrb[186].mxu1 }
0x2095   :  { %v11344_v2 = vpop.f32.mrb[207].mxu0  ;;  %v11372_v47 = vpop.f32.mrb[187].mxu1 }
0x2096   :  { %v11345_v5 = vadd.f32 %v11344_v2, %v11343_v17  ;;  %v11373_v50 = vadd.f32 %v11372_v47, %v11371_v24  ;;  %v7923_v29 = vadd.f32 %v11370_v46, %v7858_v1  ;;  %v7874_v62 = vadd.f32 %v11342_v25, %v7696_v12 }
0x2098   :  { %v7926_v10 = vadd.f32 %v11373_v50, %v7861_v38  ;;  %v7877_v37 = vadd.f32 %v11345_v5, %v7701_v7 }
0x209a   :  { %v11374_v35 = vpop.f32.mrb[188].mxu1 }
0x209b   :  { %v12037_v9 = vpop.f32.mrb[208].mxu0  ;;  %v11375_v3 = vpop.f32.mrb[189].mxu1 }
0x209c   :  { %v7988_v42 = vadd.f32 %v12037_v9, %v7923_v29  ;;  %v11376_v44 = vadd.f32 %v11375_v3, %v11374_v35  ;;  %v7979_v33 = vpop.f32.mrb[209].mxu0  ;;  %v11377_v39 = vpop.f32.mrb[190].mxu1  ;;  %v12792_v35 = vld [vmem:[%s16760_s25 + $0x4] ss:$20 sps:$4 sm:$0xff]   ;;  %v12798_v9 = vld [vmem:[%s16760_s25 + $0xc] ss:$20 sps:$4 sm:$0xff]  }
0x209d   :  { %v7980_v54 = vadd.f32 %v7979_v33, %v7915_v22  ;;  %v12038_v27 = vpop.f32.mrb[210].mxu0  ;;  %v11378_v53 = vpop.f32.mrb[191].mxu1  ;;  %8417 = vmatprep.mubr.bf16.mxu1 %v12792_v35  ;;  %8482 = vmatprep.mubr.bf16.mxu0 %v12798_v9  ;;  %v8226_v3 = vld [vmem:[%s16761_s12 + $0x8] sm:$0xff] }
0x209e   :  { %v8012_v49 = vmax.f32 %v7988_v42, 0.0  ;;  %v7991_v14 = vadd.f32 %v12038_v27, %v7926_v10  ;;  %v11379_v45 = vadd.f32 %v11378_v53, %v11377_v39  ;;  %v7982_v43 = vpop.f32.mrb[211].mxu0  ;;  %v7931_v18 = vadd.f32 %v11376_v44, %v7866_v60  ;;  %v8225_v60 = vld [vmem:[%s16761_s12] sm:$0xff]  ;;  %v8228_v42 = vld [vmem:[%s16761_s12 + $0x18] sm:$0xff]  ;;  %v8227_v44 = vld [vmem:[%s16761_s12 + $0x10] sm:$0xff] }
0x209f   :  { %v8010_v55 = vmax.f32 %v7980_v54, 0.0  ;;  %v7983_v31 = vadd.f32 %v7982_v43, %v7918_v23  ;;  %v8230_v33 = vld [vmem:[%s16761_s12 + $0x28] sm:$0xff]  ;;  %v8229_v39 = vld [vmem:[%s16761_s12 + $0x20] sm:$0xff]  ;;  %v8231_v54 = vld [vmem:[%s16761_s12 + $0x30] sm:$0xff] }
0x20a0   :  { %v8013_v63 = vmax.f32 %v7991_v14, 0.0  ;;  %v7934_v36 = vadd.f32 %v11379_v45, %v7869_v0  ;;  %v8027_v13 = vmul.f32 %v16088_v48, %v8012_v49  ;;  %v8232_v0 = vld [vmem:[%s16761_s12 + $0x38] sm:$0xff] }
0x20a1   :  { %v8011_v61 = vmax.f32 %v7983_v31, 0.0  ;;  %v8025_v32 = vmul.f32 %v16088_v48, %v8010_v55 }
0x20a2   :  { %v8028_v56 = vmul.f32 %v16088_v48, %v8013_v63  ;;  %v11380_v30 = vpop.f32.mrb[192].mxu1 }
0x20a3   :  { %v8026_v41 = vmul.f32 %v16088_v48, %v8011_v61  ;;  %v12041_v58 = vpop.f32.mrb[212].mxu0  ;;  %v11381_v52 = vpop.f32.mrb[193].mxu1 }
0x20a4   :  { %v16094_v51 = vpack.c.bf16 %v8028_v56, %v8027_v13  ;;  %v11382_v15 = vadd.f32 %v11381_v52, %v11380_v30  ;;  %v7995_v6 = vpop.f32.mrb[213].mxu0  ;;  %v11383_v4 = vpop.f32.mrb[194].mxu1  ;;  %v12790_v52 = vld [vmem:[%s16760_s25] ss:$20 sps:$4 sm:$0xff]  }
0x20a5   :  { %v16096_v22 = vpack.c.bf16 %v8026_v41, %v8025_v32  ;;  %v7996_v23 = vadd.f32 %v7995_v6, %v7931_v18  ;;  %v12042_v40 = vpop.f32.mrb[214].mxu0  ;;  %v11384_v34 = vpop.f32.mrb[195].mxu1 }
0x20a6   :  { %v7939_v59 = vadd.f32 %v11382_v15, %v7874_v62  ;;  %v11385_v11 = vadd.f32 %v11384_v34, %v11383_v4  ;;  %v7998_v57 = vpop.f32.mrb[215].mxu0  ;;  %8043 = vrot.lane.b32.xlu1 %v16094_v51, %s13343_s3  ;;  %8083 = vrot.lane.b32.xlu0 %v16094_v51, %s13347_s8  ;;  %v12793_v62 = vld [vmem:[%s16760_s25 + $0x2c] ss:$20 sps:$4 sm:$0xff]   ;;  %v12799_v34 = vld [vmem:[%s16760_s25 + $0x54] ss:$20 sps:$4 sm:$0xff]  }
0x20a7   :  { %v8014_v1 = vmax.f32 %v7996_v23, 0.0  ;;  %v7999_v25 = vadd.f32 %v7998_v57, %v7934_v36 }
0x20a8   :  { %v8004_v46 = vadd.f32 %v12041_v58, %v7939_v59  ;;  %v7942_v17 = vadd.f32 %v11385_v11, %v7877_v37 }
0x20a9   :  { %v8015_v24 = vmax.f32 %v7999_v25, 0.0  ;;  %v8029_v38 = vmul.f32 %v16088_v48, %v8014_v1 }
0x20aa   :  { %v8016_v2 = vmax.f32 %v8004_v46, 0.0  ;;  %v8007_v47 = vadd.f32 %v12042_v40, %v7942_v17  ;;  %8041 = vrot.lane.b32.xlu1 %v16096_v22, %s13343_s3  ;;  %8081 = vrot.lane.b32.xlu0 %v16096_v22, %s13347_s8  ;;  %v12795_v40 = vld [vmem:[%s16760_s25 + $0x28] ss:$20 sps:$4 sm:$0xff]   ;;  %v12801_v17 = vld [vmem:[%s16760_s25 + $0x50] ss:$20 sps:$4 sm:$0xff]  }
0x20ab   :  { %v8030_v5 = vmul.f32 %v16088_v48, %v8015_v24  ;;  %v12796_v46 = vld [vmem:[%s16760_s25 + $0x8] ss:$20 sps:$4 sm:$0xff]  }
0x20ac   :  { %v8017_v50 = vmax.f32 %v8007_v47, 0.0  ;;  %v8031_v10 = vmul.f32 %v16088_v48, %v8016_v2  ;;  %v12802_v24 = vld [vmem:[%s16760_s25 + $0x7c] ss:$20 sps:$4 sm:$0xff]   ;;  %v12804_v2 = vld [vmem:[%s16760_s25 + $0x34] ss:$20 sps:$4 sm:$0xff]  }
0x20ad   :  { %v16108_v29 = vpack.c.bf16 %v8030_v5, %v8029_v38 }
0x20ae   :  { %v8032_v8 = vmul.f32 %v16088_v48, %v8017_v50  ;;  %8141 = vrot.lane.b32.xlu1 %v16096_v22, %s13348_s19  ;;  %8101 = vrot.lane.b32.xlu0 %v16096_v22, %s13289_s18  ;;  %v12806_v50 = vld [vmem:[%s16760_s25 + $0x78] ss:$20 sps:$4 sm:$0xff]  }
0x20b0   :  { %v16116_v28 = vpack.c.bf16 %v8032_v8, %v8031_v10  ;;  %v12808_v8 = vld [vmem:[%s16760_s25 + $0x5c] ss:$20 sps:$4 sm:$0xff]  }
0x20b2   :  { %8047 = vrot.lane.b32.xlu1 %v16116_v28, %s13343_s3  ;;  %8087 = vrot.lane.b32.xlu0 %v16116_v28, %s13347_s8 }
0x20b6   :  { %8045 = vrot.lane.b32.xlu1 %v16108_v29, %s13343_s3  ;;  %8085 = vrot.lane.b32.xlu0 %v16108_v29, %s13347_s8 }
0x20ba   :  { %8103 = vrot.lane.b32.xlu1 %v16094_v51, %s13289_s18  ;;  %8061 = vrot.lane.b32.xlu0 %v16096_v22, %s13279_s21 }
0x20be   :  { %8063 = vrot.lane.b32.xlu1 %v16094_v51, %s13279_s21  ;;  %8143 = vrot.lane.b32.xlu0 %v16094_v51, %s13348_s19 }
0x20c2   :  { %8107 = vrot.lane.b32.xlu1 %v16116_v28, %s13289_s18  ;;  %8105 = vrot.lane.b32.xlu0 %v16108_v29, %s13289_s18 }
0x20c6   :  { %8145 = vrot.lane.b32.xlu1 %v16108_v29, %s13348_s19  ;;  %8065 = vrot.lane.b32.xlu0 %v16108_v29, %s13279_s21 }
0x20ca   :  { %8067 = vrot.lane.b32.xlu1 %v16116_v28, %s13279_s21  ;;  %8147 = vrot.lane.b32.xlu0 %v16116_v28, %s13348_s19 }
0x20ce   :  { %8161 = vrot.lane.b32.xlu1 %v16096_v22, %s13320_s30  ;;  %8121 = vrot.lane.b32.xlu0 %v16096_v22, %s13291_s22 }
0x20d2   :  { %8163 = vrot.lane.b32.xlu1 %v16094_v51, %s13320_s30  ;;  %8123 = vrot.lane.b32.xlu0 %v16094_v51, %s13291_s22 }
0x20d6   :  { %8165 = vrot.lane.b32.xlu1 %v16108_v29, %s13320_s30  ;;  %8125 = vrot.lane.b32.xlu0 %v16108_v29, %s13291_s22 }
0x20da   :  { %8167 = vrot.lane.b32.xlu1 %v16116_v28, %s13320_s30  ;;  %8127 = vrot.lane.b32.xlu0 %v16116_v28, %s13291_s22 }
0x20de   :  { %8183 = vrot.lane.b32.xlu1 %v16094_v51, %s13342_s17  ;;  %8181 = vrot.lane.b32.xlu0 %v16096_v22, %s13342_s17 }
0x20e2   :  { %8187 = vrot.lane.b32.xlu1 %v16116_v28, %s13342_s17  ;;  %8185 = vrot.lane.b32.xlu0 %v16108_v29, %s13342_s17 }
0x20e6   :  { %8240 = vperm.xlu1 %12400, %v8226_v3   ;;  %8235 = vperm.xlu0 %12389, %v8225_v60   ;;  %v12811_v60 = vld [vmem:[%s16760_s25 + $0x58] ss:$20 sps:$4 sm:$0xff]  }
0x20ea   :  { %8250 = vperm.xlu1 %12400, %v8228_v42   ;;  %8245 = vperm.xlu0 %12389, %v8227_v44   ;;  %v12812_v44 = vld [vmem:[%s16760_s25 + $0x38] ss:$20 sps:$4 sm:$0xff]  }
0x20ee   :  { %8260 = vperm.xlu1 %12400, %v8230_v33   ;;  %8255 = vperm.xlu0 %12389, %v8229_v39   ;;  %v12813_v33 = vld [vmem:[%s16760_s25 + $0x84] ss:$20 sps:$4 sm:$0xff]   ;;  %v12815_v39 = vld [vmem:[%s16760_s25 + $0x60] ss:$20 sps:$4 sm:$0xff]  }
0x20f2   :  { %8270 = vperm.xlu1 %12400, %v8232_v0   ;;  %8265 = vperm.xlu0 %12389, %v8231_v54   ;;  %v12816_v0 = vld [vmem:[%s16760_s25 + $0x80] ss:$20 sps:$4 sm:$0xff]   ;;  %v12817_v54 = vld [vmem:[%s16760_s25 + $0x88] ss:$20 sps:$4 sm:$0xff]  }
0x2118   :  { %v8044_v27 = vpop.permute.xlu1 %8043  ;;  %v8084_v53 = vpop.permute.xlu0 %8083 }
0x211c   :  { %v8042_v49 = vpop.permute.xlu1 %8041  ;;  %v8082_v14 = vpop.permute.xlu0 %8081 }
0x211d   :  { %11394 = vmatprep.subr.msk.bf16.mxu1 %vm16001_vm6, %v8082_v14 }
0x211e   :  { %11395 = vmatpush3.bf16.msk.msra.mxu1 %vm15355_vm4, %v8042_v49 }
0x211f   :  { %11396 = vmatprep.subr.msk.bf16.mxu1 %vm16001_vm6, %v8084_v53 }
0x2120   :  { %v8142_v45 = vpop.permute.xlu1 %8141  ;;  %v8102_v43 = vpop.permute.xlu0 %8101 }
0x2121   :  { %12223 = vmatprep.subr.msk.bf16.mxu0 %vm7247_vm5, %v8142_v45 }
0x2122   :  { %11397 = vmatpush3.bf16.msk.msra.mxu1 %vm15355_vm4, %v8044_v27  ;;  %11435 = vmatpush3.bf16.msra.mxu0 %v16096_v22 }
0x2124   :  { %v8048_v18 = vpop.permute.xlu1 %8047  ;;  %v8088_v55 = vpop.permute.xlu0 %8087 }
0x2128   :  { %v8046_v31 = vpop.permute.xlu1 %8045  ;;  %v8086_v63 = vpop.permute.xlu0 %8085 }
0x2129   :  { %11398 = vmatprep.subr.msk.bf16.mxu1 %vm16001_vm6, %v8086_v63 }
0x212a   :  { %11399 = vmatpush3.bf16.msk.msra.mxu1 %vm15355_vm4, %v8046_v31 }
0x212b   :  { %11400 = vmatprep.subr.msk.bf16.mxu1 %vm16001_vm6, %v8088_v55 }
0x212c   :  { %v8104_v36 = vpop.permute.xlu1 %8103  ;;  %v8062_v7 = vpop.permute.xlu0 %8061 }
0x212e   :  { %11401 = vmatpush3.bf16.msk.msra.mxu1 %vm15355_vm4, %v8048_v18 }
0x212f   :  { %11402 = vmatprep.subr.msk.bf16.mxu1 %vm14954_vm3, %v8102_v43 }
0x2130   :  { %v8064_v61 = vpop.permute.xlu1 %8063  ;;  %v8144_v12 = vpop.permute.xlu0 %8143 }
0x2131   :  { %12224 = vmatprep.subr.msk.bf16.mxu0 %vm7247_vm5, %v8144_v12 }
0x2132   :  { %11403 = vmatpush3.bf16.msk.msra.mxu1 %vm16024_vm14, %v8062_v7  ;;  %11437 = vmatpush3.bf16.msra.mxu0 %v16094_v51 }
0x2133   :  { %11404 = vmatprep.subr.msk.bf16.mxu1 %vm14954_vm3, %v8104_v36 }
0x2134   :  { %v8108_v13 = vpop.permute.xlu1 %8107  ;;  %v8106_v56 = vpop.permute.xlu0 %8105 }
0x2136   :  { %11405 = vmatpush3.bf16.msk.msra.mxu1 %vm16024_vm14, %v8064_v61 }
0x2137   :  { %11406 = vmatprep.subr.msk.bf16.mxu1 %vm14954_vm3, %v8106_v56 }
0x2138   :  { %v8146_v30 = vpop.permute.xlu1 %8145  ;;  %v8066_v32 = vpop.permute.xlu0 %8065 }
0x2139   :  { %12225 = vmatprep.subr.msk.bf16.mxu0 %vm7247_vm5, %v8146_v30 }
0x213a   :  { %11407 = vmatpush3.bf16.msk.msra.mxu1 %vm16024_vm14, %v8066_v32  ;;  %11439 = vmatpush3.bf16.msra.mxu0 %v16108_v29  ;;  %v12807_v29 = vld [vmem:[%s16760_s25 + $0x30] ss:$20 sps:$4 sm:$0xff]  }
0x213b   :  { %11408 = vmatprep.subr.msk.bf16.mxu1 %vm14954_vm3, %v8108_v13 }
0x213c   :  { %v8068_v41 = vpop.permute.xlu1 %8067  ;;  %v8148_v58 = vpop.permute.xlu0 %8147 }
0x213d   :  { %12226 = vmatprep.subr.msk.bf16.mxu0 %vm7247_vm5, %v8148_v58 }
0x213e   :  { %11409 = vmatpush3.bf16.msk.msra.mxu1 %vm16024_vm14, %v8068_v41  ;;  %11441 = vmatpush3.bf16.msra.mxu0 %v16116_v28  ;;  %v12810_v28 = vld [vmem:[%s16760_s25 + $0x10] ss:$20 sps:$4 sm:$0xff]  }
0x2140   :  { %v8162_v51 = vpop.permute.xlu1 %8161  ;;  %v8122_v15 = vpop.permute.xlu0 %8121 }
0x2141   :  { %v8130_v6 = vsel %vm5133_vm2, %v8122_v15, 0  ;;  %8418 = vmatmul.mubr.bf16.vlgmr.msra.gmra.mrb[196].mxu1 %v12790_v52  ;;  %12227 = vmatprep.subr.msk.bf16.mxu0 %vm7598_vm15, %v8162_v51 }
0x2142   :  { %11443 = vmatpush3.bf16.msra.mxu0 %v8130_v6  ;;  %8425 = vmatprep.mubr.bf16.mxu1 %v12793_v62 }
0x2144   :  { %v8164_v4 = vpop.permute.xlu1 %8163  ;;  %v8124_v22 = vpop.permute.xlu0 %8123 }
0x2145   :  { %v8133_v23 = vsel %vm5133_vm2, %v8124_v22, 0  ;;  %12228 = vmatprep.subr.msk.bf16.mxu0 %vm7598_vm15, %v8164_v4 }
0x2146   :  { %11445 = vmatpush3.bf16.msra.mxu0 %v8133_v23 }
0x2148   :  { %v8166_v37 = vpop.permute.xlu1 %8165  ;;  %v8126_v59 = vpop.permute.xlu0 %8125 }
0x2149   :  { %v8136_v11 = vsel %vm5133_vm2, %v8126_v59, 0  ;;  %8426 = vmatmul.mubr.bf16.gmra.mrb[200].mxu1 %v12795_v40  ;;  %12229 = vmatprep.subr.msk.bf16.mxu0 %vm7598_vm15, %v8166_v37 }
0x214a   :  { %11447 = vmatpush3.bf16.msra.mxu0 %v8136_v11  ;;  %8433 = vmatprep.mubr.bf16.mxu1 %v12799_v34 }
0x214c   :  { %v8168_v57 = vpop.permute.xlu1 %8167  ;;  %v8128_v1 = vpop.permute.xlu0 %8127 }
0x214d   :  { %v8139_v25 = vsel %vm5133_vm2, %v8128_v1, 0  ;;  %12230 = vmatprep.subr.msk.bf16.mxu0 %vm7598_vm15, %v8168_v57 }
0x214e   :  { %11449 = vmatpush3.bf16.msra.mxu0 %v8139_v25 }
0x2150   :  { %v8182_v47 = vpop.permute.xlu0 %8181  ;;  %v8184_v5 = vpop.permute.xlu1 %8183 }
0x2151   :  { %8434 = vmatmul.mubr.bf16.gmra.mrb[204].mxu1 %v12801_v17  ;;  %8483 = vmatmul.mubr.bf16.vlgmr.msra.gmra.mrb[216].mxu0 %v12796_v46  ;;  %v8190_v38 = vsel %vm503_vm1, %v8182_v47, 0  ;;  %v8193_v10 = vsel %vm503_vm1, %v8184_v5, 0 }
0x2152   :  { %12231 = vmatprep.subr.msk.bf16.mxu1 %vm503_vm1, %v8182_v47  ;;  %8441 = vmatprep.mubr.bf16.mxu1 %v12802_v24 }
0x2153   :  { %12044 = vmatpush3.bf16.msra.mxu1 %v8190_v38  ;;  %8490 = vmatprep.mubr.bf16.mxu0 %v12804_v2 }
0x2154   :  { %12232 = vmatprep.subr.msk.bf16.mxu1 %vm503_vm1, %v8184_v5  ;;  %v8186_v35 = vpop.permute.xlu0 %8185  ;;  %v8188_v3 = vpop.permute.xlu1 %8187 }
0x2155   :  { %v8196_v9 = vsel %vm503_vm1, %v8186_v35, 0  ;;  %v8199_v42 = vsel %vm503_vm1, %v8188_v3, 0 }
0x2157   :  { %12046 = vmatpush3.bf16.msra.mxu1 %v8193_v10 }
0x2158   :  { %12233 = vmatprep.subr.msk.bf16.mxu1 %vm503_vm1, %v8186_v35 }
0x2159   :  { %8442 = vmatmul.mubr.bf16.gmra.mrb[208].mxu1 %v12806_v50  ;;  %8491 = vmatmul.mubr.bf16.gmra.mrb[220].mxu0 %v12807_v29 }
0x215a   :  { %8498 = vmatprep.mubr.bf16.mxu0 %v12808_v8  ;;  %12051 = vmatprep.mubr.msk.bf16.mxu1 %vm5820_vm9, %v12810_v28 }
0x215b   :  { %12048 = vmatpush3.bf16.msra.mxu1 %v8196_v9 }
0x215c   :  { %12234 = vmatprep.subr.msk.bf16.mxu1 %vm503_vm1, %v8188_v3 }
0x215f   :  { %12050 = vmatpush3.bf16.msra.mxu1 %v8199_v42 }
0x2161   :  { %8499 = vmatmul.mubr.bf16.gmra.mrb[224].mxu0 %v12811_v60 }
0x2162   :  { %12052 = vmatmul.mubr.msk.bf16.vlgmr.msra.gmra.mrb[212].mxu1 %vm5820_vm9, %v12812_v44  ;;  %8506 = vmatprep.mubr.bf16.mxu0 %v12813_v33 }
0x2163   :  { %12055 = vmatprep.mubr.msk.bf16.mxu1 %vm5820_vm9, %v12815_v39 }
0x2165   :  { %v8241_v61 = vpop.permute.xlu1 %8240  ;;  %v8236_v12 = vpop.permute.xlu0 %8235 }
0x2169   :  { %8507 = vmatmul.mubr.bf16.gmra.mrb[228].mxu0 %v12816_v0  ;;  %v8251_v37 = vpop.permute.xlu1 %8250  ;;  %v8246_v59 = vpop.permute.xlu0 %8245 }
0x216a   :  { %12056 = vmatmul.mubr.msk.bf16.gmra.mrb[216].mxu1 %vm5820_vm9, %v12817_v54 }
0x216d   :  { %v8261_v35 = vpop.permute.xlu1 %8260  ;;  %v8256_v9 = vpop.permute.xlu0 %8255 }
0x2214   :  { %v11410_v27 = vpop.f32.mrb[196].mxu1 }
0x2215   :  { %v11411_v53 = vpop.f32.mrb[197].mxu1 }
0x2216   :  { %v11412_v49 = vadd.f32 %v11411_v53, %v11410_v27  ;;  %v11413_v14 = vpop.f32.mrb[198].mxu1 }
0x2217   :  { %v11414_v45 = vpop.f32.mrb[199].mxu1 }
0x2218   :  { %v11415_v43 = vadd.f32 %v11414_v45, %v11413_v14  ;;  %v8420_v41 = vadd.f32 %v11412_v49, %v8236_v12  ;;  %v8271_v12 = vpop.permute.xlu1 %8270 }
0x221a   :  { %v8423_v4 = vadd.f32 %v11415_v43, %v8241_v61 }
0x221c   :  { %v11416_v18 = vpop.f32.mrb[200].mxu1 }
0x221d   :  { %v11417_v55 = vpop.f32.mrb[201].mxu1 }
0x221e   :  { %v11418_v31 = vadd.f32 %v11417_v55, %v11416_v18  ;;  %v11419_v63 = vpop.f32.mrb[202].mxu1 }
0x221f   :  { %v11420_v36 = vpop.f32.mrb[203].mxu1 }
0x2220   :  { %v11421_v7 = vadd.f32 %v11420_v36, %v11419_v63  ;;  %v8428_v46 = vadd.f32 %v11418_v31, %v8246_v59 }
0x2222   :  { %v8431_v50 = vadd.f32 %v11421_v7, %v8251_v37 }
0x2224   :  { %v11422_v13 = vpop.f32.mrb[204].mxu1  ;;  %v11450_v56 = vpop.f32.mrb[216].mxu0 }
0x2225   :  { %v11423_v30 = vpop.f32.mrb[205].mxu1  ;;  %v11451_v32 = vpop.f32.mrb[217].mxu0 }
0x2226   :  { %v11424_v58 = vadd.f32 %v11423_v30, %v11422_v13  ;;  %v11452_v52 = vadd.f32 %v11451_v32, %v11450_v56  ;;  %v11425_v62 = vpop.f32.mrb[206].mxu1  ;;  %v11453_v51 = vpop.f32.mrb[218].mxu0 }
0x2227   :  { %v11426_v15 = vpop.f32.mrb[207].mxu1  ;;  %v11454_v6 = vpop.f32.mrb[219].mxu0 }
0x2228   :  { %v11427_v22 = vadd.f32 %v11426_v15, %v11425_v62  ;;  %v11455_v23 = vadd.f32 %v11454_v6, %v11453_v51  ;;  %v8485_v40 = vadd.f32 %v11452_v52, %v8420_v41  ;;  %v8436_v44 = vadd.f32 %v11424_v58, %v8256_v9  ;;  %v8266_v56 = vpop.permute.xlu0 %8265 }
0x222a   :  { %v8488_v34 = vadd.f32 %v11455_v23, %v8423_v4  ;;  %v8439_v27 = vadd.f32 %v11427_v22, %v8261_v35 }
0x222c   :  { %v11428_v11 = vpop.f32.mrb[208].mxu1  ;;  %v11456_v57 = vpop.f32.mrb[220].mxu0 }
0x222d   :  { %v11429_v1 = vpop.f32.mrb[209].mxu1  ;;  %v11457_v25 = vpop.f32.mrb[221].mxu0 }
0x222e   :  { %v11430_v17 = vadd.f32 %v11429_v1, %v11428_v11  ;;  %v11458_v24 = vadd.f32 %v11457_v25, %v11456_v57  ;;  %v11431_v2 = vpop.f32.mrb[210].mxu1  ;;  %v11459_v47 = vpop.f32.mrb[222].mxu0 }
0x222f   :  { %v11432_v38 = vpop.f32.mrb[211].mxu1  ;;  %v11460_v5 = vpop.f32.mrb[223].mxu0 }
0x2230   :  { %v11433_v29 = vadd.f32 %v11432_v38, %v11431_v2  ;;  %v11461_v10 = vadd.f32 %v11460_v5, %v11459_v47  ;;  %v8493_v8 = vadd.f32 %v11458_v24, %v8428_v46  ;;  %v8444_v15 = vadd.f32 %v11430_v17, %v8266_v56 }
0x2232   :  { %v8496_v28 = vadd.f32 %v11461_v10, %v8431_v50  ;;  %v8447_v11 = vadd.f32 %v11433_v29, %v8271_v12 }
0x2234   :  { %v11462_v3 = vpop.f32.mrb[224].mxu0 }
0x2235   :  { %v12053_v60 = vpop.f32.mrb[212].mxu1  ;;  %v11463_v42 = vpop.f32.mrb[225].mxu0 }
0x2236   :  { %v8558_v33 = vadd.f32 %v12053_v60, %v8493_v8  ;;  %v11464_v39 = vadd.f32 %v11463_v42, %v11462_v3  ;;  %v8549_v0 = vpop.f32.mrb[213].mxu1  ;;  %v11465_v54 = vpop.f32.mrb[226].mxu0  ;;  %v12826_v3 = vld [vmem:[%s16762_s28 + $0xc] ss:$20 sps:$4 sm:$0xff]  }
0x2237   :  { %v8550_v53 = vadd.f32 %v8549_v0, %v8485_v40  ;;  %v12054_v49 = vpop.f32.mrb[214].mxu1  ;;  %v11466_v14 = vpop.f32.mrb[227].mxu0  ;;  %9045 = vmatprep.mubr.bf16.mxu1 %v12826_v3  ;;  %v8789_v60 = vld [vmem:[%s16763_s1 + $0x8] sm:$0xff]  ;;  %v8788_v42 = vld [vmem:[%s16763_s1] sm:$0xff] }
0x2238   :  { %v8582_v45 = vmax.f32 %v8558_v33, 0.0  ;;  %v8561_v43 = vadd.f32 %v12054_v49, %v8496_v28  ;;  %v11467_v18 = vadd.f32 %v11466_v14, %v11465_v54  ;;  %v8552_v55 = vpop.f32.mrb[215].mxu1  ;;  %v8501_v31 = vadd.f32 %v11464_v39, %v8436_v44  ;;  %v8791_v44 = vld [vmem:[%s16763_s1 + $0x18] sm:$0xff]  ;;  %v8790_v33 = vld [vmem:[%s16763_s1 + $0x10] sm:$0xff]  ;;  %v8793_v39 = vld [vmem:[%s16763_s1 + $0x28] sm:$0xff] }
0x2239   :  { %v8580_v63 = vmax.f32 %v8550_v53, 0.0  ;;  %v8553_v36 = vadd.f32 %v8552_v55, %v8488_v34  ;;  %v8792_v0 = vld [vmem:[%s16763_s1 + $0x20] sm:$0xff]  ;;  %v8795_v54 = vld [vmem:[%s16763_s1 + $0x38] sm:$0xff] }
0x223a   :  { %v8583_v7 = vmax.f32 %v8561_v43, 0.0  ;;  %v8504_v61 = vadd.f32 %v11467_v18, %v8439_v27  ;;  %v8590_v30 = vmul.f32 %v16088_v48, %v8582_v45  ;;  %v8794_v27 = vld [vmem:[%s16763_s1 + $0x30] sm:$0xff] }
0x223b   :  { %v8581_v13 = vmax.f32 %v8553_v36, 0.0  ;;  %v8588_v58 = vmul.f32 %v16088_v48, %v8580_v63 }
0x223c   :  { %v8591_v32 = vmul.f32 %v16088_v48, %v8583_v7  ;;  %v11468_v41 = vpop.f32.mrb[228].mxu0 }
0x223d   :  { %v8589_v52 = vmul.f32 %v16088_v48, %v8581_v13  ;;  %v12057_v62 = vpop.f32.mrb[216].mxu1  ;;  %v11469_v51 = vpop.f32.mrb[229].mxu0 }
0x223e   :  { %v16262_v6 = vpack.c.bf16 %v8591_v32, %v8590_v30  ;;  %v11470_v4 = vadd.f32 %v11469_v51, %v11468_v41  ;;  %v8565_v22 = vpop.f32.mrb[217].mxu1  ;;  %v11471_v23 = vpop.f32.mrb[230].mxu0  ;;  %v12821_v51 = vld [vmem:[%s16762_s28 + $0x2c] ss:$20 sps:$4 sm:$0xff]  }
0x223f   :  { %v16264_v40 = vpack.c.bf16 %v8589_v52, %v8588_v58  ;;  %v8566_v34 = vadd.f32 %v8565_v22, %v8501_v31  ;;  %v12058_v37 = vpop.f32.mrb[218].mxu1  ;;  %v11472_v59 = vpop.f32.mrb[231].mxu0 }
0x2240   :  { %v8509_v57 = vadd.f32 %v11470_v4, %v8444_v15  ;;  %v11473_v1 = vadd.f32 %v11472_v59, %v11471_v23  ;;  %v8568_v25 = vpop.f32.mrb[219].mxu1  ;;  %8606 = vrot.lane.b32.xlu1 %v16262_v6, %s13343_s3  ;;  %8646 = vrot.lane.b32.xlu0 %v16262_v6, %s13347_s8 }
0x2241   :  { %v8584_v46 = vmax.f32 %v8566_v34, 0.0  ;;  %v8569_v17 = vadd.f32 %v8568_v25, %v8504_v61  ;;  %v12823_v34 = vld [vmem:[%s16762_s28 + $0x28] ss:$20 sps:$4 sm:$0xff]  }
0x2242   :  { %v8574_v24 = vadd.f32 %v12057_v62, %v8509_v57  ;;  %v8512_v2 = vadd.f32 %v11473_v1, %v8447_v11  ;;  %v12818_v62 = vld [vmem:[%s16762_s28] ss:$20 sps:$4 sm:$0xff]  }
0x2243   :  { %v8585_v47 = vmax.f32 %v8569_v17, 0.0  ;;  %v8592_v50 = vmul.f32 %v16088_v48, %v8584_v46  ;;  %v12824_v17 = vld [vmem:[%s16762_s28 + $0x8] ss:$20 sps:$4 sm:$0xff]  }
0x2244   :  { %v8586_v38 = vmax.f32 %v8574_v24, 0.0  ;;  %v8577_v5 = vadd.f32 %v12058_v37, %v8512_v2  ;;  %8604 = vrot.lane.b32.xlu1 %v16264_v40, %s13343_s3  ;;  %8644 = vrot.lane.b32.xlu0 %v16264_v40, %s13347_s8  ;;  %v12827_v37 = vld [vmem:[%s16762_s28 + $0x54] ss:$20 sps:$4 sm:$0xff]   ;;  %v12829_v24 = vld [vmem:[%s16762_s28 + $0x50] ss:$20 sps:$4 sm:$0xff]  }
0x2245   :  { %v8593_v29 = vmul.f32 %v16088_v48, %v8585_v47  ;;  %v12830_v2 = vld [vmem:[%s16762_s28 + $0x7c] ss:$20 sps:$4 sm:$0xff]   ;;  %v12832_v47 = vld [vmem:[%s16762_s28 + $0x34] ss:$20 sps:$4 sm:$0xff]  }
0x2246   :  { %v8587_v10 = vmax.f32 %v8577_v5, 0.0  ;;  %v8594_v28 = vmul.f32 %v16088_v48, %v8586_v38 }
0x2247   :  { %v16276_v8 = vpack.c.bf16 %v8593_v29, %v8592_v50  ;;  %v12834_v29 = vld [vmem:[%s16762_s28 + $0x78] ss:$20 sps:$4 sm:$0xff]  }
0x2248   :  { %v8595_v35 = vmul.f32 %v16088_v48, %v8587_v10  ;;  %8704 = vrot.lane.b32.xlu1 %v16264_v40, %s13348_s19  ;;  %8664 = vrot.lane.b32.xlu0 %v16264_v40, %s13289_s18  ;;  %v12820_v48 = vld [vmem:[%s16762_s28 + $0x4] ss:$20 sps:$4 sm:$0xff]  }
0x2249   :  { %8980 = vmatprep.mubr.bf16.mxu0 %v12820_v48  ;;  %v12835_v10 = vld [vmem:[%s16762_s28 + $0x30] ss:$20 sps:$4 sm:$0xff]  }
0x224a   :  { %v16284_v9 = vpack.c.bf16 %v8595_v35, %v8594_v28  ;;  %v12836_v28 = vld [vmem:[%s16762_s28 + $0x5c] ss:$20 sps:$4 sm:$0xff]  }
0x224b   :  { %v12838_v35 = vld [vmem:[%s16762_s28 + $0x10] ss:$20 sps:$4 sm:$0xff]  }
0x224c   :  { %8610 = vrot.lane.b32.xlu1 %v16284_v9, %s13343_s3  ;;  %8650 = vrot.lane.b32.xlu0 %v16284_v9, %s13347_s8 }
0x2250   :  { %8608 = vrot.lane.b32.xlu1 %v16276_v8, %s13343_s3  ;;  %8648 = vrot.lane.b32.xlu0 %v16276_v8, %s13347_s8 }
0x2254   :  { %8666 = vrot.lane.b32.xlu1 %v16262_v6, %s13289_s18  ;;  %8624 = vrot.lane.b32.xlu0 %v16264_v40, %s13279_s21 }
0x2258   :  { %8626 = vrot.lane.b32.xlu1 %v16262_v6, %s13279_s21  ;;  %8706 = vrot.lane.b32.xlu0 %v16262_v6, %s13348_s19 }
0x225c   :  { %8670 = vrot.lane.b32.xlu1 %v16284_v9, %s13289_s18  ;;  %8668 = vrot.lane.b32.xlu0 %v16276_v8, %s13289_s18 }
0x2260   :  { %8708 = vrot.lane.b32.xlu1 %v16276_v8, %s13348_s19  ;;  %8628 = vrot.lane.b32.xlu0 %v16276_v8, %s13279_s21 }
0x2264   :  { %8630 = vrot.lane.b32.xlu1 %v16284_v9, %s13279_s21  ;;  %8710 = vrot.lane.b32.xlu0 %v16284_v9, %s13348_s19 }
0x2268   :  { %8724 = vrot.lane.b32.xlu1 %v16264_v40, %s13320_s30  ;;  %8684 = vrot.lane.b32.xlu0 %v16264_v40, %s13291_s22 }
0x226c   :  { %8726 = vrot.lane.b32.xlu1 %v16262_v6, %s13320_s30  ;;  %8686 = vrot.lane.b32.xlu0 %v16262_v6, %s13291_s22 }
0x2270   :  { %8728 = vrot.lane.b32.xlu1 %v16276_v8, %s13320_s30  ;;  %8688 = vrot.lane.b32.xlu0 %v16276_v8, %s13291_s22 }
0x2274   :  { %8730 = vrot.lane.b32.xlu1 %v16284_v9, %s13320_s30  ;;  %8690 = vrot.lane.b32.xlu0 %v16284_v9, %s13291_s22 }
0x2278   :  { %8746 = vrot.lane.b32.xlu1 %v16262_v6, %s13342_s17  ;;  %8744 = vrot.lane.b32.xlu0 %v16264_v40, %s13342_s17 }
0x227c   :  { %8750 = vrot.lane.b32.xlu1 %v16284_v9, %s13342_s17  ;;  %8748 = vrot.lane.b32.xlu0 %v16276_v8, %s13342_s17 }
0x2280   :  { %8803 = vperm.xlu1 %12400, %v8789_v60   ;;  %8798 = vperm.xlu0 %12389, %v8788_v42   ;;  %v12839_v60 = vld [vmem:[%s16762_s28 + $0x58] ss:$20 sps:$4 sm:$0xff]  }
0x2284   :  { %8813 = vperm.xlu1 %12400, %v8791_v44   ;;  %8808 = vperm.xlu0 %12389, %v8790_v33   ;;  %v12840_v44 = vld [vmem:[%s16762_s28 + $0x38] ss:$20 sps:$4 sm:$0xff]  }
0x2285   :  { %v12841_v33 = vld [vmem:[%s16762_s28 + $0x84] ss:$20 sps:$4 sm:$0xff]  }
0x2288   :  { %8823 = vperm.xlu1 %12400, %v8793_v39   ;;  %8818 = vperm.xlu0 %12389, %v8792_v0   ;;  %v12843_v39 = vld [vmem:[%s16762_s28 + $0x60] ss:$20 sps:$4 sm:$0xff]  }
0x2289   :  { %v12844_v0 = vld [vmem:[%s16762_s28 + $0x80] ss:$20 sps:$4 sm:$0xff]  }
0x228c   :  { %8833 = vperm.xlu1 %12400, %v8795_v54   ;;  %8828 = vperm.xlu0 %12389, %v8794_v27   ;;  %v12845_v54 = vld [vmem:[%s16762_s28 + $0x88] ss:$20 sps:$4 sm:$0xff]  }
0x22b2   :  { %v8607_v53 = vpop.permute.xlu1 %8606  ;;  %v8647_v49 = vpop.permute.xlu0 %8646 }
0x22b6   :  { %v8605_v14 = vpop.permute.xlu1 %8604  ;;  %v8645_v45 = vpop.permute.xlu0 %8644 }
0x22b7   :  { %11482 = vmatprep.subr.msk.bf16.mxu0 %vm16001_vm6, %v8645_v45 }
0x22b8   :  { %11483 = vmatpush3.bf16.msk.msra.mxu0 %vm15355_vm4, %v8605_v14 }
0x22b9   :  { %11484 = vmatprep.subr.msk.bf16.mxu0 %vm16001_vm6, %v8647_v49 }
0x22ba   :  { %v8705_v43 = vpop.permute.xlu1 %8704  ;;  %v8665_v18 = vpop.permute.xlu0 %8664 }
0x22bb   :  { %12235 = vmatprep.subr.msk.bf16.mxu1 %vm7247_vm5, %v8705_v43 }
0x22bc   :  { %11485 = vmatpush3.bf16.msk.msra.mxu0 %vm15355_vm4, %v8607_v53  ;;  %11523 = vmatpush3.bf16.msra.mxu1 %v16264_v40 }
0x22be   :  { %v8611_v55 = vpop.permute.xlu1 %8610  ;;  %v8651_v31 = vpop.permute.xlu0 %8650 }
0x22c2   :  { %v8609_v63 = vpop.permute.xlu1 %8608  ;;  %v8649_v36 = vpop.permute.xlu0 %8648 }
0x22c3   :  { %11486 = vmatprep.subr.msk.bf16.mxu0 %vm16001_vm6, %v8649_v36 }
0x22c4   :  { %11487 = vmatpush3.bf16.msk.msra.mxu0 %vm15355_vm4, %v8609_v63 }
0x22c5   :  { %11488 = vmatprep.subr.msk.bf16.mxu0 %vm16001_vm6, %v8651_v31 }
0x22c6   :  { %v8667_v7 = vpop.permute.xlu1 %8666  ;;  %v8625_v61 = vpop.permute.xlu0 %8624 }
0x22c8   :  { %11489 = vmatpush3.bf16.msk.msra.mxu0 %vm15355_vm4, %v8611_v55 }
0x22c9   :  { %11490 = vmatprep.subr.msk.bf16.mxu0 %vm14954_vm3, %v8665_v18 }
0x22ca   :  { %v8627_v12 = vpop.permute.xlu1 %8626  ;;  %v8707_v13 = vpop.permute.xlu0 %8706 }
0x22cb   :  { %12236 = vmatprep.subr.msk.bf16.mxu1 %vm7247_vm5, %v8707_v13 }
0x22cc   :  { %11491 = vmatpush3.bf16.msk.msra.mxu0 %vm16024_vm14, %v8625_v61  ;;  %11525 = vmatpush3.bf16.msra.mxu1 %v16262_v6 }
0x22cd   :  { %11492 = vmatprep.subr.msk.bf16.mxu0 %vm14954_vm3, %v8667_v7 }
0x22ce   :  { %v8671_v56 = vpop.permute.xlu1 %8670  ;;  %v8669_v30 = vpop.permute.xlu0 %8668 }
0x22d0   :  { %11493 = vmatpush3.bf16.msk.msra.mxu0 %vm16024_vm14, %v8627_v12 }
0x22d1   :  { %11494 = vmatprep.subr.msk.bf16.mxu0 %vm14954_vm3, %v8669_v30 }
0x22d2   :  { %v8709_v32 = vpop.permute.xlu1 %8708  ;;  %v8629_v41 = vpop.permute.xlu0 %8628 }
0x22d3   :  { %12237 = vmatprep.subr.msk.bf16.mxu1 %vm7247_vm5, %v8709_v32 }
0x22d4   :  { %11495 = vmatpush3.bf16.msk.msra.mxu0 %vm16024_vm14, %v8629_v41  ;;  %11527 = vmatpush3.bf16.msra.mxu1 %v16276_v8 }
0x22d5   :  { %11496 = vmatprep.subr.msk.bf16.mxu0 %vm14954_vm3, %v8671_v56 }
0x22d6   :  { %v8631_v58 = vpop.permute.xlu1 %8630  ;;  %v8711_v52 = vpop.permute.xlu0 %8710 }
0x22d7   :  { %12238 = vmatprep.subr.msk.bf16.mxu1 %vm7247_vm5, %v8711_v52 }
0x22d8   :  { %11497 = vmatpush3.bf16.msk.msra.mxu0 %vm16024_vm14, %v8631_v58  ;;  %11529 = vmatpush3.bf16.msra.mxu1 %v16284_v9 }
0x22da   :  { %v8725_v15 = vpop.permute.xlu1 %8724  ;;  %v8685_v6 = vpop.permute.xlu0 %8684 }
0x22db   :  { %v8693_v4 = vsel %vm5133_vm2, %v8685_v6, 0  ;;  %8981 = vmatmul.mubr.bf16.vlgmr.msra.gmra.mrb[232].mxu0 %v12818_v62  ;;  %12239 = vmatprep.subr.msk.bf16.mxu1 %vm7598_vm15, %v8725_v15 }
0x22dc   :  { %11531 = vmatpush3.bf16.msra.mxu1 %v8693_v4  ;;  %8988 = vmatprep.mubr.bf16.mxu0 %v12821_v51 }
0x22de   :  { %v8727_v22 = vpop.permute.xlu1 %8726  ;;  %v8687_v23 = vpop.permute.xlu0 %8686 }
0x22df   :  { %v8696_v40 = vsel %vm5133_vm2, %v8687_v23, 0  ;;  %12240 = vmatprep.subr.msk.bf16.mxu1 %vm7598_vm15, %v8727_v22 }
0x22e0   :  { %11533 = vmatpush3.bf16.msra.mxu1 %v8696_v40 }
0x22e2   :  { %v8729_v59 = vpop.permute.xlu1 %8728  ;;  %v8689_v11 = vpop.permute.xlu0 %8688 }
0x22e3   :  { %v8699_v57 = vsel %vm5133_vm2, %v8689_v11, 0  ;;  %8989 = vmatmul.mubr.bf16.gmra.mrb[236].mxu0 %v12823_v34  ;;  %12241 = vmatprep.subr.msk.bf16.mxu1 %vm7598_vm15, %v8729_v59 }
0x22e4   :  { %11535 = vmatpush3.bf16.msra.mxu1 %v8699_v57  ;;  %8996 = vmatprep.mubr.bf16.mxu0 %v12827_v37 }
0x22e6   :  { %v8731_v1 = vpop.permute.xlu1 %8730  ;;  %v8691_v25 = vpop.permute.xlu0 %8690 }
0x22e7   :  { %v8702_v46 = vsel %vm5133_vm2, %v8691_v25, 0  ;;  %12242 = vmatprep.subr.msk.bf16.mxu1 %vm7598_vm15, %v8731_v1 }
0x22e8   :  { %11537 = vmatpush3.bf16.msra.mxu1 %v8702_v46 }
0x22ea   :  { %v8745_v38 = vpop.permute.xlu0 %8744  ;;  %v8747_v50 = vpop.permute.xlu1 %8746 }
0x22eb   :  { %v8753_v5 = vsel %vm503_vm1, %v8745_v38, 0  ;;  %8997 = vmatmul.mubr.bf16.gmra.mrb[240].mxu0 %v12829_v24  ;;  %9046 = vmatmul.mubr.bf16.vlgmr.msra.gmra.mrb[220].mxu1 %v12824_v17  ;;  %v8756_v8 = vsel %vm503_vm1, %v8747_v50, 0 }
0x22ec   :  { %12243 = vmatprep.subr.msk.bf16.mxu0 %vm503_vm1, %v8745_v38  ;;  %9004 = vmatprep.mubr.bf16.mxu0 %v12830_v2 }
0x22ed   :  { %12060 = vmatpush3.bf16.msra.mxu0 %v8753_v5  ;;  %9053 = vmatprep.mubr.bf16.mxu1 %v12832_v47 }
0x22ee   :  { %12244 = vmatprep.subr.msk.bf16.mxu0 %vm503_vm1, %v8747_v50  ;;  %v8749_v9 = vpop.permute.xlu0 %8748  ;;  %v8751_v3 = vpop.permute.xlu1 %8750 }
0x22ef   :  { %v8759_v48 = vsel %vm503_vm1, %v8749_v9, 0  ;;  %v8762_v42 = vsel %vm503_vm1, %v8751_v3, 0 }
0x22f1   :  { %12062 = vmatpush3.bf16.msra.mxu0 %v8756_v8 }
0x22f2   :  { %12245 = vmatprep.subr.msk.bf16.mxu0 %vm503_vm1, %v8749_v9 }
0x22f3   :  { %9005 = vmatmul.mubr.bf16.gmra.mrb[244].mxu0 %v12834_v29  ;;  %9054 = vmatmul.mubr.bf16.gmra.mrb[224].mxu1 %v12835_v10 }
0x22f4   :  { %9061 = vmatprep.mubr.bf16.mxu1 %v12836_v28  ;;  %12067 = vmatprep.mubr.msk.bf16.mxu0 %vm5820_vm9, %v12838_v35 }
0x22f5   :  { %12064 = vmatpush3.bf16.msra.mxu0 %v8759_v48 }
0x22f6   :  { %12246 = vmatprep.subr.msk.bf16.mxu0 %vm503_vm1, %v8751_v3 }
0x22f9   :  { %12066 = vmatpush3.bf16.msra.mxu0 %v8762_v42 }
0x22fb   :  { %9062 = vmatmul.mubr.bf16.gmra.mrb[228].mxu1 %v12839_v60 }
0x22fc   :  { %12068 = vmatmul.mubr.msk.bf16.vlgmr.msra.gmra.mrb[248].mxu0 %vm5820_vm9, %v12840_v44  ;;  %9069 = vmatprep.mubr.bf16.mxu1 %v12841_v33 }
0x22fd   :  { %12071 = vmatprep.mubr.msk.bf16.mxu0 %vm5820_vm9, %v12843_v39 }
0x22ff   :  { %v8804_v61 = vpop.permute.xlu1 %8803  ;;  %v8799_v12 = vpop.permute.xlu0 %8798 }
0x2303   :  { %9070 = vmatmul.mubr.bf16.gmra.mrb[232].mxu1 %v12844_v0  ;;  %v8814_v37 = vpop.permute.xlu1 %8813  ;;  %v8809_v59 = vpop.permute.xlu0 %8808 }
0x2304   :  { %12072 = vmatmul.mubr.msk.bf16.gmra.mrb[252].mxu0 %vm5820_vm9, %v12845_v54 }
0x2307   :  { %v8824_v35 = vpop.permute.xlu1 %8823  ;;  %v8819_v9 = vpop.permute.xlu0 %8818 }
0x23ae   :  { %v11498_v27 = vpop.f32.mrb[232].mxu0 }
0x23af   :  { %v11499_v53 = vpop.f32.mrb[233].mxu0 }
0x23b0   :  { %v11500_v49 = vadd.f32 %v11499_v53, %v11498_v27  ;;  %v11501_v14 = vpop.f32.mrb[234].mxu0 }
0x23b1   :  { %v11502_v45 = vpop.f32.mrb[235].mxu0 }
0x23b2   :  { %v11503_v43 = vadd.f32 %v11502_v45, %v11501_v14  ;;  %v8983_v41 = vadd.f32 %v11500_v49, %v8799_v12 }
0x23b4   :  { %v8986_v4 = vadd.f32 %v11503_v43, %v8804_v61  ;;  %v8834_v61 = vpop.permute.xlu1 %8833 }
0x23b6   :  { %v11504_v18 = vpop.f32.mrb[236].mxu0 }
0x23b7   :  { %v11505_v55 = vpop.f32.mrb[237].mxu0 }
0x23b8   :  { %v11506_v31 = vadd.f32 %v11505_v55, %v11504_v18  ;;  %v11507_v63 = vpop.f32.mrb[238].mxu0 }
0x23b9   :  { %v11508_v36 = vpop.f32.mrb[239].mxu0 }
0x23ba   :  { %v11509_v7 = vadd.f32 %v11508_v36, %v11507_v63  ;;  %v8991_v46 = vadd.f32 %v11506_v31, %v8809_v59 }
0x23bc   :  { %v8994_v50 = vadd.f32 %v11509_v7, %v8814_v37 }
0x23be   :  { %v11510_v13 = vpop.f32.mrb[240].mxu0  ;;  %v11538_v56 = vpop.f32.mrb[220].mxu1 }
0x23bf   :  { %v11511_v30 = vpop.f32.mrb[241].mxu0  ;;  %v11539_v32 = vpop.f32.mrb[221].mxu1 }
0x23c0   :  { %v11512_v58 = vadd.f32 %v11511_v30, %v11510_v13  ;;  %v11540_v52 = vadd.f32 %v11539_v32, %v11538_v56  ;;  %v11513_v62 = vpop.f32.mrb[242].mxu0  ;;  %v11541_v51 = vpop.f32.mrb[222].mxu1  ;;  %v12895_v56 = vld [vmem:[#allocation7] ss:$0 sm:$0xff] }
0x23c1   :  { %v11514_v15 = vpop.f32.mrb[243].mxu0  ;;  %v11542_v6 = vpop.f32.mrb[223].mxu1 }
0x23c2   :  { %v11515_v22 = vadd.f32 %v11514_v15, %v11513_v62  ;;  %v11543_v23 = vadd.f32 %v11542_v6, %v11541_v51  ;;  %v9048_v40 = vadd.f32 %v11540_v52, %v8983_v41  ;;  %v8999_v42 = vadd.f32 %v11512_v58, %v8819_v9  ;;  %v8829_v13 = vpop.permute.xlu0 %8828 }
0x23c4   :  { %v9051_v34 = vadd.f32 %v11543_v23, %v8986_v4  ;;  %v9002_v54 = vadd.f32 %v11515_v22, %v8824_v35 }
0x23c6   :  { %v11516_v11 = vpop.f32.mrb[244].mxu0  ;;  %v11544_v57 = vpop.f32.mrb[224].mxu1 }
0x23c7   :  { %v11517_v1 = vpop.f32.mrb[245].mxu0  ;;  %v11545_v25 = vpop.f32.mrb[225].mxu1 }
0x23c8   :  { %v11518_v17 = vadd.f32 %v11517_v1, %v11516_v11  ;;  %v11546_v24 = vadd.f32 %v11545_v25, %v11544_v57  ;;  %v11519_v2 = vpop.f32.mrb[246].mxu0  ;;  %v11547_v47 = vpop.f32.mrb[226].mxu1 }
0x23c9   :  { %v11520_v38 = vpop.f32.mrb[247].mxu0  ;;  %v11548_v5 = vpop.f32.mrb[227].mxu1 }
0x23ca   :  { %v11521_v29 = vadd.f32 %v11520_v38, %v11519_v2  ;;  %v11549_v10 = vadd.f32 %v11548_v5, %v11547_v47  ;;  %v9056_v8 = vadd.f32 %v11546_v24, %v8991_v46  ;;  %v9007_v15 = vadd.f32 %v11518_v17, %v8829_v13 }
0x23cc   :  { %v9059_v28 = vadd.f32 %v11549_v10, %v8994_v50  ;;  %v9010_v11 = vadd.f32 %v11521_v29, %v8834_v61 }
0x23ce   :  { %v11550_v48 = vpop.f32.mrb[228].mxu1 }
0x23cf   :  { %v12069_v3 = vpop.f32.mrb[248].mxu0  ;;  %v11551_v60 = vpop.f32.mrb[229].mxu1 }
0x23d0   :  { %v9121_v44 = vadd.f32 %v12069_v3, %v9056_v8  ;;  %v11552_v33 = vadd.f32 %v11551_v60, %v11550_v48  ;;  %v9112_v39 = vpop.f32.mrb[249].mxu0  ;;  %v11553_v0 = vpop.f32.mrb[230].mxu1  ;;  %v12848_v48 = vld [vmem:[%s16764_s2 + $0x4] ss:$20 sps:$4 sm:$0xff]   ;;  %v12854_v3 = vld [vmem:[%s16764_s2 + $0xc] ss:$20 sps:$4 sm:$0xff]  }
0x23d1   :  { %v9113_v27 = vadd.f32 %v9112_v39, %v9048_v40  ;;  %v12070_v53 = vpop.f32.mrb[250].mxu0  ;;  %v11554_v49 = vpop.f32.mrb[231].mxu1  ;;  %9543 = vmatprep.mubr.bf16.mxu1 %v12848_v48  ;;  %9608 = vmatprep.mubr.bf16.mxu0 %v12854_v3  ;;  %v9352_v60 = vld [vmem:[%s16765_s0 + $0x8] sm:$0xff]  ;;  %v12871_v3 = vld [vmem:[%s16764_s2 + $0x84] ss:$20 sps:$4 sm:$0xff]  }
0x23d2   :  { %v9145_v14 = vmax.f32 %v9121_v44, 0.0  ;;  %v9124_v45 = vadd.f32 %v12070_v53, %v9059_v28  ;;  %v11555_v43 = vadd.f32 %v11554_v49, %v11553_v0  ;;  %v9115_v18 = vpop.f32.mrb[251].mxu0  ;;  %v9064_v55 = vadd.f32 %v11552_v33, %v8999_v42  ;;  %v9351_v42 = vld [vmem:[%s16765_s0] sm:$0xff]  ;;  %v9354_v44 = vld [vmem:[%s16765_s0 + $0x18] sm:$0xff]  ;;  %v9353_v33 = vld [vmem:[%s16765_s0 + $0x10] sm:$0xff] }
0x23d3   :  { %v9143_v31 = vmax.f32 %v9113_v27, 0.0  ;;  %v9116_v63 = vadd.f32 %v9115_v18, %v9051_v34  ;;  %v9356_v39 = vld [vmem:[%s16765_s0 + $0x28] sm:$0xff]  ;;  %v9355_v0 = vld [vmem:[%s16765_s0 + $0x20] sm:$0xff]  ;;  %v9357_v27 = vld [vmem:[%s16765_s0 + $0x30] sm:$0xff] }
0x23d4   :  { %v9146_v36 = vmax.f32 %v9124_v45, 0.0  ;;  %v9067_v7 = vadd.f32 %v11555_v43, %v9002_v54  ;;  %v9153_v30 = vmul.f32 %v12895_v56, %v9145_v14  ;;  %v9358_v54 = vld [vmem:[%s16765_s0 + $0x38] sm:$0xff] }
0x23d5   :  { %v9144_v12 = vmax.f32 %v9116_v63, 0.0  ;;  %v9151_v58 = vmul.f32 %v12895_v56, %v9143_v31  ;;  %v12868_v48 = vld [vmem:[%s16764_s2 + $0x38] ss:$20 sps:$4 sm:$0xff]  }
0x23d6   :  { %v9154_v32 = vmul.f32 %v12895_v56, %v9146_v36  ;;  %v11556_v41 = vpop.f32.mrb[232].mxu1 }
0x23d7   :  { %v9152_v52 = vmul.f32 %v12895_v56, %v9144_v12  ;;  %v12073_v62 = vpop.f32.mrb[252].mxu0  ;;  %v11557_v51 = vpop.f32.mrb[233].mxu1 }
0x23d8   :  { %v16426_v6 = vpack.c.bf16 %v9154_v32, %v9153_v30  ;;  %v11558_v4 = vadd.f32 %v11557_v51, %v11556_v41  ;;  %v9128_v22 = vpop.f32.mrb[253].mxu0  ;;  %v11559_v23 = vpop.f32.mrb[234].mxu1 }
0x23d9   :  { %v16428_v40 = vpack.c.bf16 %v9152_v52, %v9151_v58  ;;  %v9129_v34 = vadd.f32 %v9128_v22, %v9064_v55  ;;  %v12074_v37 = vpop.f32.mrb[254].mxu0  ;;  %v11560_v59 = vpop.f32.mrb[235].mxu1  ;;  %v12846_v58 = vld [vmem:[%s16764_s2] ss:$20 sps:$4 sm:$0xff]  }
0x23da   :  { %v9072_v57 = vadd.f32 %v11558_v4, %v9007_v15  ;;  %v11561_v1 = vadd.f32 %v11560_v59, %v11559_v23  ;;  %v9131_v25 = vpop.f32.mrb[255].mxu0  ;;  %9169 = vrot.lane.b32.xlu1 %v16426_v6, %s13343_s3  ;;  %9209 = vrot.lane.b32.xlu0 %v16426_v6, %s13347_s8  ;;  %v12849_v52 = vld [vmem:[%s16764_s2 + $0x2c] ss:$20 sps:$4 sm:$0xff]   ;;  %v12855_v22 = vld [vmem:[%s16764_s2 + $0x54] ss:$20 sps:$4 sm:$0xff]  }
0x23db   :  { %v9147_v46 = vmax.f32 %v9129_v34, 0.0  ;;  %v9132_v17 = vadd.f32 %v9131_v25, %v9067_v7  ;;  %v12858_v25 = vld [vmem:[%s16764_s2 + $0x7c] ss:$20 sps:$4 sm:$0xff]  }
0x23dc   :  { %v9137_v24 = vadd.f32 %v12073_v62, %v9072_v57  ;;  %v9075_v2 = vadd.f32 %v11561_v1, %v9010_v11  ;;  %v12852_v57 = vld [vmem:[%s16764_s2 + $0x8] ss:$20 sps:$4 sm:$0xff]   ;;  %v12857_v1 = vld [vmem:[%s16764_s2 + $0x50] ss:$20 sps:$4 sm:$0xff]  }
0x23dd   :  { %v9148_v47 = vmax.f32 %v9132_v17, 0.0  ;;  %v9155_v50 = vmul.f32 %v12895_v56, %v9147_v46  ;;  %v12862_v46 = vld [vmem:[%s16764_s2 + $0x34] ss:$20 sps:$4 sm:$0xff]  }
0x23de   :  { %v9149_v38 = vmax.f32 %v9137_v24, 0.0  ;;  %v9140_v5 = vadd.f32 %v12074_v37, %v9075_v2  ;;  %9167 = vrot.lane.b32.xlu1 %v16428_v40, %s13343_s3  ;;  %9207 = vrot.lane.b32.xlu0 %v16428_v40, %s13347_s8 }
0x23df   :  { %v9156_v29 = vmul.f32 %v12895_v56, %v9148_v47  ;;  %v12860_v47 = vld [vmem:[%s16764_s2 + $0x30] ss:$20 sps:$4 sm:$0xff]  }
0x23e0   :  { %v9150_v10 = vmax.f32 %v9140_v5, 0.0  ;;  %v9157_v28 = vmul.f32 %v12895_v56, %v9149_v38  ;;  %v12863_v38 = vld [vmem:[%s16764_s2 + $0x78] ss:$20 sps:$4 sm:$0xff]  }
0x23e1   :  { %v16438_v8 = vpack.c.bf16 %v9156_v29, %v9155_v50  ;;  %v12866_v50 = vld [vmem:[%s16764_s2 + $0x5c] ss:$20 sps:$4 sm:$0xff]  }
0x23e2   :  { %v9158_v35 = vmul.f32 %v12895_v56, %v9150_v10  ;;  %9227 = vrot.lane.b32.xlu1 %v16428_v40, %s13289_s18  ;;  %9267 = vrot.lane.b32.xlu0 %v16428_v40, %s13348_s19  ;;  %v12867_v29 = vld [vmem:[%s16764_s2 + $0x10] ss:$20 sps:$4 sm:$0xff]  }
0x23e4   :  { %v16444_v9 = vpack.c.bf16 %v9158_v35, %v9157_v28  ;;  %v12864_v35 = vld [vmem:[%s16764_s2 + $0x58] ss:$20 sps:$4 sm:$0xff]  }
0x23e6   :  { %9173 = vrot.lane.b32.xlu1 %v16444_v9, %s13343_s3  ;;  %9213 = vrot.lane.b32.xlu0 %v16444_v9, %s13347_s8 }
0x23ea   :  { %9171 = vrot.lane.b32.xlu1 %v16438_v8, %s13343_s3  ;;  %9211 = vrot.lane.b32.xlu0 %v16438_v8, %s13347_s8 }
0x23ee   :  { %9269 = vrot.lane.b32.xlu1 %v16426_v6, %s13348_s19  ;;  %9187 = vrot.lane.b32.xlu0 %v16428_v40, %s13279_s21 }
0x23f2   :  { %9189 = vrot.lane.b32.xlu1 %v16426_v6, %s13279_s21  ;;  %9229 = vrot.lane.b32.xlu0 %v16426_v6, %s13289_s18 }
0x23f6   :  { %9273 = vrot.lane.b32.xlu1 %v16444_v9, %s13348_s19  ;;  %9271 = vrot.lane.b32.xlu0 %v16438_v8, %s13348_s19 }
0x23fa   :  { %9231 = vrot.lane.b32.xlu1 %v16438_v8, %s13289_s18  ;;  %9191 = vrot.lane.b32.xlu0 %v16438_v8, %s13279_s21 }
0x23fe   :  { %9193 = vrot.lane.b32.xlu1 %v16444_v9, %s13279_s21  ;;  %9233 = vrot.lane.b32.xlu0 %v16444_v9, %s13289_s18  ;;  %s16766_s21 = sld [smem:[#allocation62_spill]]  ;;  %s13349_s18 = smov [#allocation23]  }
0x2402   :  { %9287 = vrot.lane.b32.xlu1 %v16428_v40, %s13320_s30  ;;  %9247 = vrot.lane.b32.xlu0 %v16428_v40, %s13291_s22 }
0x2406   :  { %9289 = vrot.lane.b32.xlu1 %v16426_v6, %s13320_s30  ;;  %9249 = vrot.lane.b32.xlu0 %v16426_v6, %s13291_s22 }
0x240a   :  { %9291 = vrot.lane.b32.xlu1 %v16438_v8, %s13320_s30  ;;  %9251 = vrot.lane.b32.xlu0 %v16438_v8, %s13291_s22 }
0x240e   :  { %9293 = vrot.lane.b32.xlu1 %v16444_v9, %s13320_s30  ;;  %9253 = vrot.lane.b32.xlu0 %v16444_v9, %s13291_s22 }
0x2412   :  { %9309 = vrot.lane.b32.xlu1 %v16426_v6, %s13342_s17  ;;  %9307 = vrot.lane.b32.xlu0 %v16428_v40, %s13342_s17 }
0x2416   :  { %9313 = vrot.lane.b32.xlu1 %v16444_v9, %s13342_s17  ;;  %9311 = vrot.lane.b32.xlu0 %v16438_v8, %s13342_s17 }
0x241a   :  { %9366 = vperm.xlu1 %12400, %v9352_v60   ;;  %9361 = vperm.xlu0 %12389, %v9351_v42   ;;  %v12872_v60 = vld [vmem:[%s16764_s2 + $0x60] ss:$20 sps:$4 sm:$0xff]  }
0x241b   :  { %v12869_v42 = vld [vmem:[%s16764_s2 + $0x80] ss:$20 sps:$4 sm:$0xff]  }
0x241e   :  { %9376 = vperm.xlu1 %12400, %v9354_v44   ;;  %9371 = vperm.xlu0 %12389, %v9353_v33   ;;  %v12873_v44 = vld [vmem:[%s16764_s2 + $0x88] ss:$20 sps:$4 sm:$0xff]  }
0x2422   :  { %9386 = vperm.xlu1 %12400, %v9356_v39   ;;  %9381 = vperm.xlu0 %12389, %v9355_v0  }
0x2426   :  { %9396 = vperm.xlu1 %12400, %v9358_v54   ;;  %9391 = vperm.xlu0 %12389, %v9357_v27  }
0x244c   :  { %v9170_v53 = vpop.permute.xlu1 %9169  ;;  %v9210_v49 = vpop.permute.xlu0 %9209 }
0x2450   :  { %v9168_v14 = vpop.permute.xlu1 %9167  ;;  %v9208_v45 = vpop.permute.xlu0 %9207 }
0x2451   :  { %11570 = vmatprep.subr.msk.bf16.mxu1 %vm16001_vm6, %v9208_v45 }
0x2452   :  { %11571 = vmatpush3.bf16.msk.msra.mxu1 %vm15355_vm4, %v9168_v14 }
0x2453   :  { %11572 = vmatprep.subr.msk.bf16.mxu1 %vm16001_vm6, %v9210_v49 }
0x2454   :  { %v9228_v43 = vpop.permute.xlu1 %9227  ;;  %v9268_v18 = vpop.permute.xlu0 %9267 }
0x2455   :  { %12247 = vmatprep.subr.msk.bf16.mxu0 %vm7247_vm5, %v9268_v18 }
0x2456   :  { %11573 = vmatpush3.bf16.msk.msra.mxu1 %vm15355_vm4, %v9170_v53  ;;  %11611 = vmatpush3.bf16.msra.mxu0 %v16428_v40 }
0x2458   :  { %v9174_v55 = vpop.permute.xlu1 %9173  ;;  %v9214_v31 = vpop.permute.xlu0 %9213 }
0x245c   :  { %v9172_v63 = vpop.permute.xlu1 %9171  ;;  %v9212_v36 = vpop.permute.xlu0 %9211 }
0x245d   :  { %11574 = vmatprep.subr.msk.bf16.mxu1 %vm16001_vm6, %v9212_v36 }
0x245e   :  { %11575 = vmatpush3.bf16.msk.msra.mxu1 %vm15355_vm4, %v9172_v63 }
0x245f   :  { %11576 = vmatprep.subr.msk.bf16.mxu1 %vm16001_vm6, %v9214_v31 }
0x2460   :  { %v9270_v7 = vpop.permute.xlu1 %9269  ;;  %v9188_v61 = vpop.permute.xlu0 %9187 }
0x2461   :  { %12248 = vmatprep.subr.msk.bf16.mxu0 %vm7247_vm5, %v9270_v7 }
0x2462   :  { %11577 = vmatpush3.bf16.msk.msra.mxu1 %vm15355_vm4, %v9174_v55  ;;  %11613 = vmatpush3.bf16.msra.mxu0 %v16426_v6 }
0x2463   :  { %11578 = vmatprep.subr.msk.bf16.mxu1 %vm14954_vm3, %v9228_v43 }
0x2464   :  { %v9190_v12 = vpop.permute.xlu1 %9189  ;;  %v9230_v13 = vpop.permute.xlu0 %9229 }
0x2466   :  { %11579 = vmatpush3.bf16.msk.msra.mxu1 %vm16024_vm14, %v9188_v61 }
0x2467   :  { %11580 = vmatprep.subr.msk.bf16.mxu1 %vm14954_vm3, %v9230_v13 }
0x2468   :  { %v9274_v19 = vpop.permute.xlu1 %9273  ;;  %v9272_v56 = vpop.permute.xlu0 %9271 }
0x2469   :  { %12249 = vmatprep.subr.msk.bf16.mxu0 %vm7247_vm5, %v9272_v56 }
0x246a   :  { %11581 = vmatpush3.bf16.msk.msra.mxu1 %vm16024_vm14, %v9190_v12  ;;  %11615 = vmatpush3.bf16.msra.mxu0 %v16438_v8 }
0x246b   :  { %12250 = vmatprep.subr.msk.bf16.mxu0 %vm7247_vm5, %v9274_v19 }
0x246c   :  { %v9232_v16 = vpop.permute.xlu1 %9231  ;;  %v9192_v30 = vpop.permute.xlu0 %9191 }
0x246d   :  { %11582 = vmatprep.subr.msk.bf16.mxu1 %vm14954_vm3, %v9232_v16 }
0x246e   :  { %11583 = vmatpush3.bf16.msk.msra.mxu1 %vm16024_vm14, %v9192_v30  ;;  %11617 = vmatpush3.bf16.msra.mxu0 %v16444_v9 }
0x2470   :  { %v9194_v32 = vpop.permute.xlu1 %9193  ;;  %v9234_v41 = vpop.permute.xlu0 %9233 }
0x2471   :  { %11584 = vmatprep.subr.msk.bf16.mxu1 %vm14954_vm3, %v9234_v41 }
0x2472   :  { %11585 = vmatpush3.bf16.msk.msra.mxu1 %vm16024_vm14, %v9194_v32 }
0x2474   :  { %v9288_v62 = vpop.permute.xlu1 %9287  ;;  %v9248_v51 = vpop.permute.xlu0 %9247 }
0x2475   :  { %v9256_v15 = vsel %vm5133_vm2, %v9248_v51, 0  ;;  %9544 = vmatmul.mubr.bf16.vlgmr.msra.gmra.mrb[236].mxu1 %v12846_v58  ;;  %12251 = vmatprep.subr.msk.bf16.mxu0 %vm7598_vm15, %v9288_v62 }
0x2476   :  { %11619 = vmatpush3.bf16.msra.mxu0 %v9256_v15  ;;  %9551 = vmatprep.mubr.bf16.mxu1 %v12849_v52 }
0x2478   :  { %v9290_v6 = vpop.permute.xlu1 %9289  ;;  %v9250_v4 = vpop.permute.xlu0 %9249 }
0x2479   :  { %v9259_v20 = vsel %vm5133_vm2, %v9250_v4, 0  ;;  %12252 = vmatprep.subr.msk.bf16.mxu0 %vm7598_vm15, %v9290_v6 }
0x247a   :  { %11621 = vmatpush3.bf16.msra.mxu0 %v9259_v20 }
0x247c   :  { %v9292_v23 = vpop.permute.xlu1 %9291  ;;  %v9252_v40 = vpop.permute.xlu0 %9251 }
0x247d   :  { %v9262_v34 = vsel %vm5133_vm2, %v9252_v40, 0  ;;  %9552 = vmatmul.mubr.bf16.gmra.mrb[240].mxu1 %v12851_v26  ;;  %12253 = vmatprep.subr.msk.bf16.mxu0 %vm7598_vm15, %v9292_v23 }
0x247e   :  { %11623 = vmatpush3.bf16.msra.mxu0 %v9262_v34  ;;  %9559 = vmatprep.mubr.bf16.mxu1 %v12855_v22 }
0x2480   :  { %v9294_v37 = vpop.permute.xlu1 %9293  ;;  %v9254_v59 = vpop.permute.xlu0 %9253 }
0x2481   :  { %v9265_v11 = vsel %vm5133_vm2, %v9254_v59, 0  ;;  %12254 = vmatprep.subr.msk.bf16.mxu0 %vm7598_vm15, %v9294_v37 }
0x2482   :  { %11625 = vmatpush3.bf16.msra.mxu0 %v9265_v11 }
0x2483   :  { %12103 = vmatprep.subr.bf16.mxu0 %v13296_v21 }
0x2484   :  { %v9308_v17 = vpop.permute.xlu0 %9307  ;;  %v9310_v2 = vpop.permute.xlu1 %9309 }
0x2485   :  { %v9316_v24 = vsel %vm503_vm1, %v9308_v17, 0  ;;  %9560 = vmatmul.mubr.bf16.gmra.mrb[244].mxu1 %v12857_v1  ;;  %9609 = vmatmul.mubr.bf16.vlgmr.msra.gmra.mrb[0].mxu0 %v12852_v57  ;;  %v9319_v5 = vsel %vm503_vm1, %v9310_v2, 0 }
0x2486   :  { %12255 = vmatprep.subr.msk.bf16.mxu1 %vm503_vm1, %v9308_v17  ;;  %9567 = vmatprep.mubr.bf16.mxu1 %v12858_v25 }
0x2487   :  { %12076 = vmatpush3.bf16.msra.mxu1 %v9316_v24  ;;  %9616 = vmatprep.mubr.bf16.mxu0 %v12862_v46 }
0x2488   :  { %12256 = vmatprep.subr.msk.bf16.mxu1 %vm503_vm1, %v9310_v2  ;;  %v9312_v10 = vpop.permute.xlu0 %9311  ;;  %v9314_v28 = vpop.permute.xlu1 %9313 }
0x2489   :  { %v9322_v8 = vsel %vm503_vm1, %v9312_v10, 0  ;;  %v9325_v9 = vsel %vm503_vm1, %v9314_v28, 0 }
0x248b   :  { %12078 = vmatpush3.bf16.msra.mxu1 %v9319_v5 }
0x248c   :  { %12257 = vmatprep.subr.msk.bf16.mxu1 %vm503_vm1, %v9312_v10 }
0x248d   :  { %9568 = vmatmul.mubr.bf16.gmra.mrb[248].mxu1 %v12863_v38  ;;  %9617 = vmatmul.mubr.bf16.gmra.mrb[4].mxu0 %v12860_v47 }
0x248e   :  { %9624 = vmatprep.mubr.bf16.mxu0 %v12866_v50  ;;  %12083 = vmatprep.mubr.msk.bf16.mxu1 %vm5820_vm9, %v12867_v29 }
0x248f   :  { %12080 = vmatpush3.bf16.msra.mxu1 %v9322_v8 }
0x2490   :  { %12258 = vmatprep.subr.msk.bf16.mxu1 %vm503_vm1, %v9314_v28  ;;  %vm10104_vm1 = vcmask 73728  }
0x2493   :  { %12082 = vmatpush3.bf16.msra.mxu1 %v9325_v9 }
0x2494   :  { %12091 = vmatprep.subr.bf16.mxu1 %v13296_v21 }
0x2495   :  { %9625 = vmatmul.mubr.bf16.gmra.mrb[8].mxu0 %v12864_v35 }
0x2496   :  { %12084 = vmatmul.mubr.msk.bf16.vlgmr.msra.gmra.mrb[252].mxu1 %vm5820_vm9, %v12868_v48  ;;  %9632 = vmatprep.mubr.bf16.mxu0 %v12871_v3 }
0x2497   :  { %12087 = vmatprep.mubr.msk.bf16.mxu1 %vm5820_vm9, %v12872_v60 }
0x2499   :  { %v9367_v31 = vpop.permute.xlu1 %9366  ;;  %v9362_v63 = vpop.permute.xlu0 %9361 }
0x249d   :  { %9633 = vmatmul.mubr.bf16.gmra.mrb[12].mxu0 %v12869_v42  ;;  %v9377_v6 = vpop.permute.xlu1 %9376  ;;  %v9372_v4 = vpop.permute.xlu0 %9371 }
0x249e   :  { %12088 = vmatmul.mubr.msk.bf16.gmra.mrb[0].mxu1 %vm5820_vm9, %v12873_v44  ;;  %12119 = vmatprep.mubr.msk.bf16.mxu0 %vm13297_vm10, %v13296_v21 }
0x249f   :  { %12099 = vmatprep.mubr.msk.bf16.mxu1 %vm13297_vm10, %v13296_v21 }
0x24a1   :  { %v9387_v47 = vpop.permute.xlu1 %9386  ;;  %v9382_v38 = vpop.permute.xlu0 %9381 }
0x2548   :  { %v11586_v33 = vpop.f32.mrb[236].mxu1 }
0x2549   :  { %v11587_v39 = vpop.f32.mrb[237].mxu1 }
0x254a   :  { %v11588_v0 = vadd.f32 %v11587_v39, %v11586_v33  ;;  %v11589_v54 = vpop.f32.mrb[238].mxu1 }
0x254b   :  { %v11590_v27 = vpop.f32.mrb[239].mxu1 }
0x254c   :  { %v11591_v53 = vadd.f32 %v11590_v27, %v11589_v54  ;;  %v9546_v13 = vadd.f32 %v11588_v0, %v9362_v63 }
0x254e   :  { %v9549_v58 = vadd.f32 %v11591_v53, %v9367_v31 }
0x2550   :  { %v11592_v49 = vpop.f32.mrb[240].mxu1 }
0x2551   :  { %v11593_v14 = vpop.f32.mrb[241].mxu1 }
0x2552   :  { %v11594_v45 = vadd.f32 %v11593_v14, %v11592_v49  ;;  %v11595_v43 = vpop.f32.mrb[242].mxu1  ;;  %v9397_v14 = vpop.permute.xlu1 %9396 }
0x2553   :  { %v11596_v18 = vpop.f32.mrb[243].mxu1 }
0x2554   :  { %v11597_v55 = vadd.f32 %v11596_v18, %v11595_v43  ;;  %v9554_v40 = vadd.f32 %v11594_v45, %v9372_v4  ;;  %v9392_v18 = vpop.permute.xlu0 %9391 }
0x2556   :  { %v9557_v25 = vadd.f32 %v11597_v55, %v9377_v6 }
0x2558   :  { %v11598_v36 = vpop.f32.mrb[244].mxu1  ;;  %v11626_v7 = vpop.f32.mrb[0].mxu0 }
0x2559   :  { %v11599_v61 = vpop.f32.mrb[245].mxu1  ;;  %v11627_v12 = vpop.f32.mrb[1].mxu0 }
0x255a   :  { %v11600_v19 = vadd.f32 %v11599_v61, %v11598_v36  ;;  %v11628_v56 = vadd.f32 %v11627_v12, %v11626_v7  ;;  %v11601_v16 = vpop.f32.mrb[246].mxu1  ;;  %v11629_v30 = vpop.f32.mrb[2].mxu0 }
0x255b   :  { %v11602_v32 = vpop.f32.mrb[247].mxu1  ;;  %v11630_v41 = vpop.f32.mrb[3].mxu0 }
0x255c   :  { %v11603_v52 = vadd.f32 %v11602_v32, %v11601_v16  ;;  %v11631_v62 = vadd.f32 %v11630_v41, %v11629_v30  ;;  %v9611_v51 = vadd.f32 %v11628_v56, %v9546_v13  ;;  %v9562_v10 = vadd.f32 %v11600_v19, %v9382_v38 }
0x255e   :  { %v9614_v15 = vadd.f32 %v11631_v62, %v9549_v58  ;;  %v9565_v42 = vadd.f32 %v11603_v52, %v9387_v47 }
0x2560   :  { %v11604_v20 = vpop.f32.mrb[248].mxu1  ;;  %v11632_v26 = vpop.f32.mrb[4].mxu0 }
0x2561   :  { %v11605_v22 = vpop.f32.mrb[249].mxu1  ;;  %v11633_v23 = vpop.f32.mrb[5].mxu0 }
0x2562   :  { %v11606_v34 = vadd.f32 %v11605_v22, %v11604_v20  ;;  %v11634_v37 = vadd.f32 %v11633_v23, %v11632_v26  ;;  %v11607_v59 = vpop.f32.mrb[250].mxu1  ;;  %v11635_v11 = vpop.f32.mrb[6].mxu0 }
0x2563   :  { %v11608_v57 = vpop.f32.mrb[251].mxu1  ;;  %v11636_v1 = vpop.f32.mrb[7].mxu0 }
0x2564   :  { %v11609_v46 = vadd.f32 %v11608_v57, %v11607_v59  ;;  %v11637_v17 = vadd.f32 %v11636_v1, %v11635_v11  ;;  %v9619_v24 = vadd.f32 %v11634_v37, %v9554_v40  ;;  %v9570_v61 = vadd.f32 %v11606_v34, %v9392_v18 }
0x2566   :  { %v9622_v2 = vadd.f32 %v11637_v17, %v9557_v25  ;;  %v9573_v32 = vadd.f32 %v11609_v46, %v9397_v14 }
0x2568   :  { %v11638_v5 = vpop.f32.mrb[8].mxu0 }
0x2569   :  { %v12085_v50 = vpop.f32.mrb[252].mxu1  ;;  %v11639_v29 = vpop.f32.mrb[9].mxu0 }
0x256a   :  { %v9684_v8 = vadd.f32 %v12085_v50, %v9619_v24  ;;  %v11640_v28 = vadd.f32 %v11639_v29, %v11638_v5  ;;  %v9675_v35 = vpop.f32.mrb[253].mxu1  ;;  %v11641_v9 = vpop.f32.mrb[10].mxu0 }
0x256b   :  { %v9676_v48 = vadd.f32 %v9675_v35, %v9611_v51  ;;  %v12086_v3 = vpop.f32.mrb[254].mxu1  ;;  %v11642_v60 = vpop.f32.mrb[11].mxu0 }
0x256c   :  { %v9687_v44 = vadd.f32 %v12086_v3, %v9622_v2  ;;  %v11643_v33 = vadd.f32 %v11642_v60, %v11641_v9  ;;  %v9678_v39 = vpop.f32.mrb[255].mxu1  ;;  %v9627_v0 = vadd.f32 %v11640_v28, %v9562_v10  ;;  %v9708_v27 = vmax.f32 %v9684_v8, 0.0  ;;  %v12874_v9 = vld [vmem:[#allocation17] sm:$0xff]  }
0x256d   :  { %v9679_v54 = vadd.f32 %v9678_v39, %v9614_v15  ;;  %v9706_v45 = vmax.f32 %v9676_v48, 0.0  ;;  %12092 = vmatpush3.bf16.msra.mxu1 %v12874_v9  ;;  %v12877_v39 = vld [vmem:[#allocation17 + $0x18] sm:$0xff]  }
0x256e   :  { %v9709_v53 = vmax.f32 %v9687_v44, 0.0  ;;  %v9630_v49 = vadd.f32 %v11643_v33, %v9565_v42  ;;  %v12875_v42 = vld [vmem:[#allocation17 + $0x8] sm:$0xff]   ;;  %12093 = vmatprep.subr.bf16.mxu1 %v13296_v21  ;;  %v12876_v33 = vld [vmem:[#allocation17 + $0x10] sm:$0xff]  }
0x256f   :  { %v9707_v43 = vmax.f32 %v9679_v54, 0.0  ;;  %v12879_v54 = vld [vmem:[%s16766_s21 + $0x8] sm:$0xff]  }
0x2570   :  { %v12576_v55 = vpack.i.bf16 %v9709_v53, %v9708_v27  ;;  %v11644_v31 = vpop.f32.mrb[12].mxu0 }
0x2571   :  { %v12581_v63 = vpack.i.bf16 %v9707_v43, %v9706_v45  ;;  %v12089_v36 = vpop.f32.mrb[0].mxu1  ;;  %v11645_v7 = vpop.f32.mrb[13].mxu0  ;;  %12094 = vmatpush3.bf16.msra.mxu1 %v12875_v42 }
0x2572   :  { %v11646_v12 = vadd.f32 %v11645_v7, %v11644_v31  ;;  %v9691_v13 = vpop.f32.mrb[1].mxu1  ;;  %12577 = vrot.lane.b32.xlu1 %v12576_v55, %s13291_s22  ;;  %v11647_v19 = vpop.f32.mrb[14].mxu0  ;;  %12095 = vmatprep.subr.bf16.mxu1 %v13296_v21 }
0x2573   :  { %v9692_v56 = vadd.f32 %v9691_v13, %v9627_v0  ;;  %v12090_v16 = vpop.f32.mrb[2].mxu1  ;;  %12582 = vrot.lane.b32.xlu0 %v12581_v63, %s13291_s22  ;;  %v11648_v30 = vpop.f32.mrb[15].mxu0  ;;  %v12878_v0 = vld [vmem:[%s16766_s21] sm:$0xff]  }
0x2574   :  { %v9635_v41 = vadd.f32 %v11646_v12, %v9570_v61  ;;  %v11649_v58 = vadd.f32 %v11648_v30, %v11647_v19  ;;  %v9694_v52 = vpop.f32.mrb[3].mxu1  ;;  %12104 = vmatpush3.bf16.msra.mxu0 %v12878_v0 }
0x2575   :  { %v9695_v62 = vadd.f32 %v9694_v52, %v9630_v49  ;;  %v9710_v6 = vmax.f32 %v9692_v56, 0.0  ;;  %12096 = vmatpush3.bf16.msra.mxu1 %v12876_v33  ;;  %12105 = vmatprep.subr.bf16.mxu0 %v13296_v21  ;;  %v12882_v49 = vld [vmem:[%s16766_s21 + $0x20] sm:$0xff]  }
0x2576   :  { %v9700_v51 = vadd.f32 %v12089_v36, %v9635_v41  ;;  %v9638_v15 = vadd.f32 %v11649_v58, %v9573_v32  ;;  %12097 = vmatprep.subr.bf16.mxu1 %v13296_v21 }
0x2577   :  { %v9711_v4 = vmax.f32 %v9695_v62, 0.0 }
0x2578   :  { %v9703_v20 = vadd.f32 %v12090_v16, %v9638_v15  ;;  %v9712_v22 = vmax.f32 %v9700_v51, 0.0  ;;  %12106 = vmatpush3.bf16.msra.mxu0 %v12879_v54 }
0x2579   :  { %v12586_v26 = vpack.i.bf16 %v9711_v4, %v9710_v6  ;;  %12098 = vmatpush3.bf16.msra.mxu1 %v12877_v39  ;;  %12107 = vmatprep.subr.bf16.mxu0 %v13296_v21 }
0x257a   :  { %v9713_v23 = vmax.f32 %v9703_v20, 0.0  ;;  %12123 = vmatprep.subr.bf16.mxu1 %v13296_v21 }
0x257b   :  { %12587 = vrot.lane.b32.xlu0 %v12586_v26, %s13291_s22  ;;  %v12884_v26 = vld [vmem:[%s16766_s21 + $0x30] sm:$0xff]  }
0x257c   :  { %v12591_v40 = vpack.i.bf16 %v9713_v23, %v9712_v22 }
0x257e   :  { %12592 = vrot.lane.b32.xlu1 %v12591_v40, %s13291_s22  ;;  %v12887_v40 = vld [vmem:[%s13588_s6 + $0x8] sm:$0xff]   ;;  %s10112_s22 = sshll.u32 %s13349_s18, 4  ;;  %s10113_s22 = int_to_ptr.vmem [resolvable:$true] %s10112_s22 }
0x257f   :  { %p13187_p7 = scmp.lt.s32.totalorder %s10113_s22, %s10113_s22 }
0x25e4   :  { %v12578_v34 = vpop.permute.xlu1 %12577 }
0x25e5   :  { %v12580_v37 = vunpack.i.h.bf16 %v12578_v34  ;;  %v12579_v59 = vunpack.i.l.bf16 %v12578_v34  ;;  %v12583_v11 = vpop.permute.xlu0 %12582  ;;  %v12888_v34 = vld [vmem:[%s13588_s6 + $0x10] sm:$0xff]  }
0x25e6   :  { %v12585_v57 = vunpack.i.h.bf16 %v12583_v11  ;;  %v12584_v1 = vunpack.i.l.bf16 %v12583_v11  ;;  %v12891_v11 = vld [vmem:[%s13588_s6 + $0x28] sm:$0xff]  }
0x25e7   :  { %v9749_v25 = vmax.f32 %v9709_v53, %v12580_v37  ;;  %v9748_v46 = vmax.f32 %v9708_v27, %v12579_v59  ;;  %v12880_v27 = vld [vmem:[%s16766_s21 + $0x10] sm:$0xff]   ;;  %v12881_v53 = vld [vmem:[%s16766_s21 + $0x18] sm:$0xff]   ;;  %v12890_v59 = vld [vmem:[%s13588_s6 + $0x20] sm:$0xff]  }
0x25e8   :  { %v9747_v17 = vmax.f32 %v9707_v43, %v12585_v57  ;;  %v9746_v24 = vmax.f32 %v9706_v45, %v12584_v1  ;;  %12108 = vmatpush3.bf16.msra.mxu0 %v12880_v27  ;;  %v12883_v43 = vld [vmem:[%s16766_s21 + $0x28] sm:$0xff]   ;;  %v12889_v37 = vld [vmem:[%s13588_s6 + $0x18] sm:$0xff]   ;;  %v9806_v57 = vld [vmem:[#allocation19] sm:$0x1] }
0x25e9   :  { %v12596_v2 = vpack.i.bf16 %v9749_v25, %v9748_v46  ;;  %12109 = vmatprep.subr.bf16.mxu0 %v13296_v21 }
0x25ea   :  { %v12601_v47 = vpack.i.bf16 %v9747_v17, %v9746_v24 }
0x25eb   :  { %12597 = vrot.lane.b32.xlu1 %v12596_v2, %s13320_s30 }
0x25ec   :  { %12602 = vrot.lane.b32.xlu0 %v12601_v47, %s13320_s30  ;;  %12110 = vmatpush3.bf16.msra.mxu0 %v12881_v53 }
0x25ed   :  { %v12588_v38 = vpop.permute.xlu0 %12587  ;;  %12111 = vmatprep.subr.bf16.mxu0 %v13296_v21 }
0x25ee   :  { %v12590_v5 = vunpack.i.h.bf16 %v12588_v38  ;;  %v12589_v50 = vunpack.i.l.bf16 %v12588_v38  ;;  %v12892_v38 = vld [vmem:[%s13588_s6 + $0x30] sm:$0xff]  }
0x25f0   :  { %v9751_v29 = vmax.f32 %v9711_v4, %v12590_v5  ;;  %v9750_v10 = vmax.f32 %v9710_v6, %v12589_v50  ;;  %v12593_v8 = vpop.permute.xlu1 %12592  ;;  %12112 = vmatpush3.bf16.msra.mxu0 %v12882_v49  ;;  %v12893_v5 = vld [vmem:[%s13588_s6 + $0x38] sm:$0xff]   ;;  %v9908_v50 = vld [vmem:[#allocation20] sm:$0x1] }
0x25f1   :  { %v12595_v28 = vunpack.i.h.bf16 %v12593_v8  ;;  %v12594_v35 = vunpack.i.l.bf16 %v12593_v8  ;;  %12113 = vmatprep.subr.bf16.mxu0 %v13296_v21 }
0x25f2   :  { %v12606_v48 = vpack.i.bf16 %v9751_v29, %v9750_v10 }
0x25f3   :  { %v9753_v3 = vmax.f32 %v9713_v23, %v12595_v28  ;;  %v9752_v60 = vmax.f32 %v9712_v22, %v12594_v35  ;;  %v12885_v22 = vld [vmem:[%s16766_s21 + $0x38] sm:$0xff]   ;;  %v12886_v23 = vld [vmem:[%s13588_s6] sm:$0xff]   ;;  %s13182_s6 = scalar_lea.vmem %s10113_s22, 16 }
0x25f4   :  { %12607 = vrot.lane.b32.xlu0 %v12606_v48, %s13320_s30  ;;  %12114 = vmatpush3.bf16.msra.mxu0 %v12883_v43  ;;  %p13183_p6 = scmp.ne.s32.totalorder %s10113_s22, %s13182_s6 }
0x25f5   :  { %v12611_v44 = vpack.i.bf16 %v9753_v3, %v9752_v60  ;;  %12115 = vmatprep.subr.bf16.mxu0 %v13296_v21 }
0x25f7   :  { %12612 = vrot.lane.b32.xlu1 %v12611_v44, %s13320_s30  ;;  %s13186_s30 = scalar_lea.vmem %s10113_s22, 32 }
0x25f8   :  { %12116 = vmatpush3.bf16.msra.mxu0 %v12884_v26  ;;  %p13188_p8 = scmp.lt.s32.totalorder %s13186_s30, %s13182_s6 }
0x25f9   :  { %12117 = vmatprep.subr.bf16.mxu0 %v13296_v21 }
0x25fa   :  { %p13189_p9 = por %p13188_p8, %p13187_p7 }
0x25fc   :  { %12118 = vmatpush3.bf16.msra.mxu0 %v12885_v22  ;;  %p13190_p10 = pnand %p13189_p9, %p13183_p6 }
0x265d   :  { %v12598_v14 = vpop.permute.xlu1 %12597 }
0x265e   :  { %v12603_v45 = vpop.permute.xlu0 %12602  ;;  %v12600_v18 = vunpack.i.h.bf16 %v12598_v14  ;;  %v12599_v55 = vunpack.i.l.bf16 %v12598_v14 }
0x265f   :  { %v12605_v31 = vunpack.i.h.bf16 %v12603_v45  ;;  %v12604_v63 = vunpack.i.l.bf16 %v12603_v45 }
0x2660   :  { %v9789_v61 = vmax.f32 %v9749_v25, %v12600_v18  ;;  %v9788_v12 = vmax.f32 %v9748_v46, %v12599_v55 }
0x2661   :  { %v9787_v36 = vmax.f32 %v9747_v17, %v12605_v31  ;;  %v9786_v7 = vmax.f32 %v9746_v24, %v12604_v63 }
0x2662   :  { %v9795_v56 = vpack.c.bf16 %v9789_v61, %v9788_v12 }
0x2663   :  { %v9794_v13 = vpack.c.bf16 %v9787_v36, %v9786_v7 }
0x2665   :  { %9807 = vxpose.xlu0.c.b16.start [1/4] (short) (narrow) %v9794_v13, 16 }
0x2666   :  { %v12608_v19 = vpop.permute.xlu0 %12607 }
0x2667   :  { %v12610_v16 = vunpack.i.h.bf16 %v12608_v19  ;;  %v12609_v30 = vunpack.i.l.bf16 %v12608_v19 }
0x2669   :  { %v9791_v32 = vmax.f32 %v9751_v29, %v12610_v16  ;;  %v9790_v41 = vmax.f32 %v9750_v10, %v12609_v30  ;;  %9808 = vxpose.xlu0.c.b16.cont [2/4] (short) (narrow) %v9795_v56, 16  ;;  %v12613_v58 = vpop.permute.xlu1 %12612 }
0x266a   :  { %v12615_v52 = vunpack.i.h.bf16 %v12613_v58  ;;  %v12614_v62 = vunpack.i.l.bf16 %v12613_v58 }
0x266b   :  { %v9796_v51 = vpack.c.bf16 %v9791_v32, %v9790_v41 }
0x266c   :  { %v9793_v15 = vmax.f32 %v9753_v3, %v12615_v52  ;;  %v9792_v6 = vmax.f32 %v9752_v60, %v12614_v62  ;;  %v10015_v3 = vld [vmem:[#allocation22] sm:$0x1] }
0x266d   :  { %9809 = vxpose.xlu0.c.b16.cont [3/4] (short) (narrow) %v9796_v51, 16 }
0x266e   :  { %v9797_v4 = vpack.c.bf16 %v9793_v15, %v9792_v6 }
0x2671   :  { %9810 = vxpose.xlu0.c.b16.end [4/4] (short) (narrow) %v9797_v4, 16 }
0x26cb   :  { %v9815_v20 = vpop.trf.xlu0 }
0x26cc   :  { %12100 = vmatmul.mubr.msk.bf16.vlgmr.msra.gmra.mrb[4].mxu1 %vm5820_vm9, %v9815_v20 }
0x26cd   :  { %12139 = vmatprep.mubr.msk.bf16.mxu1 %vm13297_vm10, %v13296_v21  ;;  %12124 = vmatpush3.bf16.msra.mxu1 %v12886_v23 }
0x26ce   :  { %12125 = vmatprep.subr.bf16.mxu1 %v13296_v21 }
0x26d1   :  { %12126 = vmatpush3.bf16.msra.mxu1 %v12887_v40 }
0x26d2   :  { %12127 = vmatprep.subr.bf16.mxu1 %v13296_v21 }
0x26d5   :  { %12128 = vmatpush3.bf16.msra.mxu1 %v12888_v34 }
0x26d6   :  { %12129 = vmatprep.subr.bf16.mxu1 %v13296_v21 }
0x26d9   :  { %12130 = vmatpush3.bf16.msra.mxu1 %v12889_v37 }
0x26da   :  { %12131 = vmatprep.subr.bf16.mxu1 %v13296_v21 }
0x26dd   :  { %12132 = vmatpush3.bf16.msra.mxu1 %v12890_v59 }
0x26de   :  { %12133 = vmatprep.subr.bf16.mxu1 %v13296_v21 }
0x26e1   :  { %12134 = vmatpush3.bf16.msra.mxu1 %v12891_v11 }
0x26e2   :  { %12135 = vmatprep.subr.bf16.mxu1 %v13296_v21 }
0x26e5   :  { %12136 = vmatpush3.bf16.msra.mxu1 %v12892_v38 }
0x26e6   :  { %12137 = vmatprep.subr.bf16.mxu1 %v13296_v21 }
0x26e9   :  { %12138 = vmatpush3.bf16.msra.mxu1 %v12893_v5 }
0x279f   :  { %v9884_v1 = vpop.f32.mrb[4].mxu1 }
0x27a0   :  { %v9885_v25 = vadd.f32 %v9884_v1, %v9806_v57  ;;  %v12101_v46 = vpop.f32.mrb[5].mxu1 }
0x27a1   :  { %v9887_v17 = vpop.f32.mrb[6].mxu1 }
0x27a2   :  { %v9890_v24 = vmax.f32 %v9885_v25, 0.0  ;;  %v12102_v2 = vpop.f32.mrb[7].mxu1 }
0x27a4   :  { %v9891_v47 = vpack.c.bf16 %v9890_v24, %v9890_v24 }
0x27a6   :  { %12120 = vmatmul.mubr.bf16.vlgmr.msra.gmra.mrb[16].mxu0 %v9891_v47 }
0x2879   :  { %v9991_v29 = vpop.f32.mrb[16].mxu0 }
0x287a   :  { %v9992_v10 = vadd.f32 %v9991_v29, %v9908_v50  ;;  %v12121_v8 = vpop.f32.mrb[17].mxu0 }
0x287b   :  { %v9994_v28 = vpop.f32.mrb[18].mxu0 }
0x287c   :  { %v9997_v35 = vmax.f32 %v9992_v10, 0.0  ;;  %v12122_v9 = vpop.f32.mrb[19].mxu0 }
0x287e   :  { %v9998_v48 = vpack.c.bf16 %v9997_v35, %v9997_v35 }
0x2880   :  { %12140 = vmatmul.mubr.bf16.vlgmr.msra.gmra.mrb[8].mxu1 %v9998_v48 }
0x2953   :  { %v10098_v60 = vpop.f32.mrb[8].mxu1 }
0x2954   :  { %v10099_v42 = vadd.f32 %v10098_v60, %v10015_v3  ;;  %v12141_v44 = vpop.f32.mrb[9].mxu1 }
0x2955   :  { %v10101_v21 = vpop.f32.mrb[10].mxu1 }
0x2956   :  { %v12142_v33 = vpop.f32.mrb[11].mxu1  ;;  %10105 = vst.msk [vmem:[#allocation23] sm:$0x1] %vm10104_vm1, %v10099_v42 }
0x2957   :  { %13193 = shalt.err (!%p13190_p10)
}
0x2958   :  { %s13194_s27 = scalar_lea.hbm %s13598_s29, 16 }
0x2959   :  { %p13195_p11 = scmp.ne.s32.totalorder %s13598_s29, %s13194_s27  ;;  %p13198_p12 = scmp.lt.u32.totalorder %s13194_s27, %s13598_s29 }
0x295b   :  { %p13200_p13 = pnand %p13198_p12, %p13195_p11 }
0x295d   :  { %13203 = shalt.err (!%p13200_p13)
}
0x295e   :  { %10115 = dma.vmem_to_hbm [thread:$0]  %s10113_s22, 16, %s13598_s29, [#allocation4]  }
0x295f   :  { %13218 = dma.done.wait [#allocation4], 16  }
0x2960   :  { %13219 = vsyncadd [#allocation4], 4294967280 }
0x2961   :  { %10119 = vsyncpa [#allocation3], 1 }
0x2962   :  { %10120 = vsyncpa [#allocation6], 1 }
0x2963   :  { %10121 = vsyncpa [#allocation9], 1 }
0x2964   :  { %10122 = vsyncpa [#allocation12], 1 }
0x2965   :  { %10123 = vsyncpa [#allocation15], 1 }
0x2966   :  { %10124 = vsyncpa [#allocation18], 1 }
0x2967   :  { %10125 = vsyncpa [#allocation21], 1 }
0x2968   :  { %10126 = vsyncpa [#allocation4], 1 }

</bundles_post_ra>
